<compile_context>
chip_gen: v5e
topology: v5e:2x2
jax: 0.10.0
libtpu: 0.0.40
codegen_flags: <defaults>
</compile_context>

<pallas_src>
import functools

import jax
import jax.numpy as jnp
from jax import lax
from jax.experimental import pallas as pl
from jax.experimental.pallas import tpu as pltpu


def _resnet_kernel(x_ref, wi_ref, bi_ref, w1_ref, b1_ref, w2_ref, b2_ref,
                   w3_ref, b3_ref, wo_ref, bo_ref,
                   o_ref,
                   padi_ref, padm_ref, h_ref,
                   *, H, W, F, n_in, n_out, n_block):
    """One grid program = one image of the batch; full network fused in VMEM."""
    HW = H * W

    # Zero the padded scratches once; only their interiors are written below,
    # so the 1-pixel border stays zero (this IS the conv "same" padding).
    padi_ref[...] = jnp.zeros_like(padi_ref)
    padm_ref[...] = jnp.zeros_like(padm_ref)

    def im2col3x3(p_ref, cin):
        # p_ref: (1, H+2, W+2, cin) zero-padded activation in VMEM.
        # Returns (H*W, 9*cin) bf16; column order (dy, dx, cin) matches the
        # HWIO -> (9*cin, cout) weight flattening done in the wrapper.
        cols = []
        for dy in range(3):
            for dx in range(3):
                cols.append(p_ref[:, dy:dy + H, dx:dx + W, :].reshape(HW, cin))
        return jnp.concatenate(cols, axis=-1).astype(jnp.bfloat16)

    def mxu(a_bf16, w_ref):
        return jnp.dot(a_bf16, w_ref[...], preferred_element_type=jnp.float32)

    # ---- init_conv: Conv3x3(pad=1) + ReLU ----
    padi_ref[:, 1:H + 1, 1:W + 1, :] = x_ref[...]
    h = mxu(im2col3x3(padi_ref, n_in), wi_ref) + bi_ref[...]
    h_ref[...] = jnp.maximum(h, 0.0)

    # ---- residual blocks.  NOTE: PyTorch's nn.Sequential(*[ResnetBlock(n)] * n_block)
    # repeats the SAME module object, i.e. every block shares one set of weights;
    # that aliasing is reproduced here (one weight set, looped n_block times). ----
    def block(_, carry):
        h_cur = h_ref[...]                                          # (HW, F) f32
        # 1x1 conv + ReLU
        t = mxu(h_cur.astype(jnp.bfloat16), w1_ref) + b1_ref[...]
        t = jnp.maximum(t, 0.0)
        # 3x3 conv (pad=1) + ReLU as a single im2col matmul
        padm_ref[:, 1:H + 1, 1:W + 1, :] = t.reshape(1, H, W, F)
        t = mxu(im2col3x3(padm_ref, F), w2_ref) + b2_ref[...]
        t = jnp.maximum(t, 0.0)
        # 1x1 conv + residual (residual accumulation kept in f32)
        t = mxu(t.astype(jnp.bfloat16), w3_ref) + b3_ref[...]
        h_ref[...] = t + h_cur
        return carry

    lax.fori_loop(0, n_block, block, 0, unroll=True)

    # ---- out_conv: ReLU then Conv3x3(pad=1) ----
    hr = jnp.maximum(h_ref[...], 0.0)
    padm_ref[:, 1:H + 1, 1:W + 1, :] = hr.reshape(1, H, W, F)
    y = mxu(im2col3x3(padm_ref, F), wo_ref) + bo_ref[...]
    o_ref[...] = y.reshape(1, HW, n_out)


def simple_resnet_forward(x_nchw, params, n_block):
    n, n_in, H, W = x_nchw.shape
    F = params['blk_w1'].shape[-1]
    n_out = params['out_w'].shape[-1]
    x = jnp.transpose(x_nchw, (0, 2, 3, 1))                        # NCHW -> NHWC

    # One-time parameter packing (wrapper glue): HWIO -> (kh*kw*Cin, Cout)
    # im2col weights, cast to bf16 for the MXU; biases stay f32.
    wi = params['init_w'].reshape(9 * n_in, F).astype(jnp.bfloat16)
    w1 = params['blk_w1'].reshape(F, F).astype(jnp.bfloat16)
    w2 = params['blk_w2'].reshape(9 * F, F).astype(jnp.bfloat16)
    w3 = params['blk_w3'].reshape(F, F).astype(jnp.bfloat16)
    wo = params['out_w'].reshape(9 * F, n_out).astype(jnp.bfloat16)
    bi = params['init_b'].reshape(1, F).astype(jnp.float32)
    b1 = params['blk_b1'].reshape(1, F).astype(jnp.float32)
    b2 = params['blk_b2'].reshape(1, F).astype(jnp.float32)
    b3 = params['blk_b3'].reshape(1, F).astype(jnp.float32)
    bo = params['out_b'].reshape(1, n_out).astype(jnp.float32)

    weights = (wi, bi, w1, b1, w2, b2, w3, b3, wo, bo)

    kernel = functools.partial(_resnet_kernel, H=H, W=W, F=F,
                               n_in=n_in, n_out=n_out, n_block=n_block)

    def full_spec(arr):
        nd = arr.ndim
        return pl.BlockSpec(arr.shape, lambda i: (0,) * nd)

    flops = 2 * n * H * W * (9 * n_in * F
                             + n_block * (F * F + 9 * F * F + F * F)
                             + 9 * F * n_out)
    bytes_accessed = (x.size * 4 + n * H * W * n_out * 4
                      + sum(w.size * w.dtype.itemsize for w in weights))

    y = pl.pallas_call(
        kernel,
        out_shape=jax.ShapeDtypeStruct((n, H * W, n_out), jnp.float32),
        grid=(n,),
        in_specs=[pl.BlockSpec((1, H, W, n_in), lambda i: (i, 0, 0, 0))]
                 + [full_spec(w) for w in weights],
        out_specs=pl.BlockSpec((1, H * W, n_out), lambda i: (i, 0, 0)),
        scratch_shapes=[
            pltpu.VMEM((1, H + 2, W + 2, n_in), jnp.float32),     # padded input
            pltpu.VMEM((1, H + 2, W + 2, F), jnp.float32),        # padded activation
            pltpu.VMEM((H * W, F), jnp.float32),                  # resident `h`
        ],
        compiler_params=pltpu.CompilerParams(
            dimension_semantics=("parallel",),
            vmem_limit_bytes=16 * 1024 * 1024,
        ),
        cost_estimate=pl.CostEstimate(flops=int(flops), transcendentals=0,
                                      bytes_accessed=int(bytes_accessed)),
    )(x, *weights)

    y = y.reshape(n, H, W, n_out)
    return jnp.transpose(y, (0, 3, 1, 2))                          # back to NCHW


def init_params(key, n_filters, n_in, n_out):
    """Deterministic PyTorch-Conv2d-style uniform(-1/sqrt(fan_in), 1/sqrt(fan_in)) init."""
    def conv_init(k, kh, kw, cin, cout):
        kw_key, kb_key = jax.random.split(k)
        bound = 1.0 / float(jnp.sqrt(cin * kh * kw))
        w = jax.random.uniform(kw_key, (kh, kw, cin, cout), jnp.float32, -bound, bound)
        bb = jax.random.uniform(kb_key, (cout,), jnp.float32, -bound, bound)
        return w, bb

    keys = jax.random.split(key, 5)
    p = {}
    p['init_w'], p['init_b'] = conv_init(keys[0], 3, 3, n_in, n_filters)
    p['blk_w1'], p['blk_b1'] = conv_init(keys[1], 1, 1, n_filters, n_filters)
    p['blk_w2'], p['blk_b2'] = conv_init(keys[2], 3, 3, n_filters, n_filters)
    p['blk_w3'], p['blk_b3'] = conv_init(keys[3], 1, 1, n_filters, n_filters)
    p['out_w'], p['out_b'] = conv_init(keys[4], 3, 3, n_filters, n_out)
    return p


# ---- pure-JAX f32 reference (correctness check only) ----
def _ref_conv(x, w, b, pad):
    y = lax.conv_general_dilated(x, w, (1, 1), [(pad, pad), (pad, pad)],
                                 dimension_numbers=('NHWC', 'HWIO', 'NHWC'))
    return y + b.reshape(1, 1, 1, -1)


def ref_forward(x_nchw, params, n_block):
    x = jnp.transpose(x_nchw, (0, 2, 3, 1))
    h = jax.nn.relu(_ref_conv(x, params['init_w'], params['init_b'], 1))
    for _ in range(n_block):
        t = jax.nn.relu(_ref_conv(h, params['blk_w1'], params['blk_b1'], 0))
        t = jax.nn.relu(_ref_conv(t, params['blk_w2'], params['blk_b2'], 1))
        h = _ref_conv(t, params['blk_w3'], params['blk_b3'], 0) + h
    y = _ref_conv(jax.nn.relu(h), params['out_w'], params['out_b'], 1)
    return jnp.transpose(y, (0, 3, 1, 2))


if __name__ == "__main__":
    n_in, n_filters, n_block, n_out = 3, 32, 2, 6
    N, H, W = 2, 16, 16

    key = jax.random.PRNGKey(0)
    kx, kp = jax.random.split(key)
    x = jax.random.normal(kx, (N, n_in, H, W), jnp.float32)        # NCHW, like PyTorch
    params = init_params(kp, n_filters, n_in, n_out)

    fwd = jax.jit(functools.partial(simple_resnet_forward, n_block=n_block))
    out = jax.block_until_ready(fwd(x, params))

    ref = ref_forward(x, params, n_block)
    assert out.shape == (N, n_out, H, W), out.shape
    max_err = float(jnp.max(jnp.abs(out - ref)))
    # bf16 MXU inputs (f32 accumulation) -> relaxed tolerance vs the f32 reference.
    assert jnp.allclose(out, ref, atol=5e-2, rtol=5e-2), max_err

    print("KERNEL_OK")
</pallas_src>

<mosaic_0001>
module attributes {stable_mosaic.version = 11 : i64} {
  func.func @_resnet_kernel(%arg0: i32, %arg1: memref<1x16x16x3xf32, #tpu.memory_space<vmem>>, %arg2: memref<27x32xbf16, #tpu.memory_space<vmem>>, %arg3: memref<1x32xf32, #tpu.memory_space<vmem>>, %arg4: memref<32x32xbf16, #tpu.memory_space<vmem>>, %arg5: memref<1x32xf32, #tpu.memory_space<vmem>>, %arg6: memref<288x32xbf16, #tpu.memory_space<vmem>>, %arg7: memref<1x32xf32, #tpu.memory_space<vmem>>, %arg8: memref<32x32xbf16, #tpu.memory_space<vmem>>, %arg9: memref<1x32xf32, #tpu.memory_space<vmem>>, %arg10: memref<288x6xbf16, #tpu.memory_space<vmem>>, %arg11: memref<1x6xf32, #tpu.memory_space<vmem>>, %arg12: memref<1x256x6xf32, #tpu.memory_space<vmem>>, %arg13: memref<1x18x18x3xf32, #tpu.memory_space<vmem>>, %arg14: memref<1x18x18x32xf32, #tpu.memory_space<vmem>>, %arg15: memref<256x32xf32, #tpu.memory_space<vmem>>) attributes {dimension_semantics = [#tpu.dimension_semantics<parallel>], iteration_bounds = array<i64: 2>, scalar_prefetch = 0 : i64, scratch_operands = 3 : i64, tpu.core_type = #tpu.core_type<tc>, window_params = [{transform_indices = @transform_0, window_bounds = array<i64: 1, 16, 16, 3>}, {pipeline_mode = #tpu.pipeline_mode<synchronous>, transform_indices = @transform_1, window_bounds = array<i64: 27, 32>}, {pipeline_mode = #tpu.pipeline_mode<synchronous>, transform_indices = @transform_2, window_bounds = array<i64: 1, 32>}, {pipeline_mode = #tpu.pipeline_mode<synchronous>, transform_indices = @transform_3, window_bounds = array<i64: 32, 32>}, {pipeline_mode = #tpu.pipeline_mode<synchronous>, transform_indices = @transform_4, window_bounds = array<i64: 1, 32>}, {pipeline_mode = #tpu.pipeline_mode<synchronous>, transform_indices = @transform_5, window_bounds = array<i64: 288, 32>}, {pipeline_mode = #tpu.pipeline_mode<synchronous>, transform_indices = @transform_6, window_bounds = array<i64: 1, 32>}, {pipeline_mode = #tpu.pipeline_mode<synchronous>, transform_indices = @transform_7, window_bounds = array<i64: 32, 32>}, {pipeline_mode = #tpu.pipeline_mode<synchronous>, transform_indices = @transform_8, window_bounds = array<i64: 1, 32>}, {pipeline_mode = #tpu.pipeline_mode<synchronous>, transform_indices = @transform_9, window_bounds = array<i64: 288, 6>}, {pipeline_mode = #tpu.pipeline_mode<synchronous>, transform_indices = @transform_10, window_bounds = array<i64: 1, 6>}, {transform_indices = @transform_11, window_bounds = array<i64: 1, 256, 6>}]} {
    %cst = arith.constant 0.000000e+00 : f32
    %0 = vector.broadcast %cst : f32 to vector<1x18x18x3xf32>
    %c0 = arith.constant 0 : index
    %c0_0 = arith.constant 0 : index
    %c0_1 = arith.constant 0 : index
    %c0_2 = arith.constant 0 : index
    %1 = vector.load %arg13[%c0, %c0_0, %c0_1, %c0_2] : memref<1x18x18x3xf32, #tpu.memory_space<vmem>>, vector<1x18x18x3xf32>
    tpu.vector_store %arg13[%c0, %c0_0, %c0_1, %c0_2], %0 {strides = array<i32>} : memref<1x18x18x3xf32, #tpu.memory_space<vmem>>, vector<1x18x18x3xf32>,
    %cst_3 = arith.constant 0.000000e+00 : f32
    %2 = vector.broadcast %cst_3 : f32 to vector<1x18x18x32xf32>
    %c0_4 = arith.constant 0 : index
    %c0_5 = arith.constant 0 : index
    %c0_6 = arith.constant 0 : index
    %c0_7 = arith.constant 0 : index
    %3 = vector.load %arg14[%c0_4, %c0_5, %c0_6, %c0_7] : memref<1x18x18x32xf32, #tpu.memory_space<vmem>>, vector<1x18x18x32xf32>
    tpu.vector_store %arg14[%c0_4, %c0_5, %c0_6, %c0_7], %2 {strides = array<i32>} : memref<1x18x18x32xf32, #tpu.memory_space<vmem>>, vector<1x18x18x32xf32>,
    %c0_8 = arith.constant 0 : index
    %c0_9 = arith.constant 0 : index
    %c0_10 = arith.constant 0 : index
    %c0_11 = arith.constant 0 : index
    %4 = vector.load %arg1[%c0_8, %c0_9, %c0_10, %c0_11] : memref<1x16x16x3xf32, #tpu.memory_space<vmem>>, vector<1x16x16x3xf32>
    %c0_12 = arith.constant 0 : index
    %c1 = arith.constant 1 : index
    %c1_13 = arith.constant 1 : index
    %c0_14 = arith.constant 0 : index
    %5 = vector.load %arg13[%c0_12, %c1, %c1_13, %c0_14] : memref<1x18x18x3xf32, #tpu.memory_space<vmem>>, vector<1x16x16x3xf32>
    tpu.vector_store %arg13[%c0_12, %c1, %c1_13, %c0_14], %4 {strides = array<i32>} : memref<1x18x18x3xf32, #tpu.memory_space<vmem>>, vector<1x16x16x3xf32>,
    %c0_15 = arith.constant 0 : index
    %c0_16 = arith.constant 0 : index
    %c0_17 = arith.constant 0 : index
    %c0_18 = arith.constant 0 : index
    %6 = vector.load %arg13[%c0_15, %c0_16, %c0_17, %c0_18] : memref<1x18x18x3xf32, #tpu.memory_space<vmem>>, vector<1x16x16x3xf32>
    %7 = vector.shape_cast %6 : vector<1x16x16x3xf32> to vector<256x3xf32>
    %c0_19 = arith.constant 0 : index
    %c0_20 = arith.constant 0 : index
    %c1_21 = arith.constant 1 : index
    %c0_22 = arith.constant 0 : index
    %8 = vector.load %arg13[%c0_19, %c0_20, %c1_21, %c0_22] : memref<1x18x18x3xf32, #tpu.memory_space<vmem>>, vector<1x16x16x3xf32>
    %9 = vector.shape_cast %8 : vector<1x16x16x3xf32> to vector<256x3xf32>
    %c0_23 = arith.constant 0 : index
    %c0_24 = arith.constant 0 : index
    %c2 = arith.constant 2 : index
    %c0_25 = arith.constant 0 : index
    %10 = vector.load %arg13[%c0_23, %c0_24, %c2, %c0_25] : memref<1x18x18x3xf32, #tpu.memory_space<vmem>>, vector<1x16x16x3xf32>
    %11 = vector.shape_cast %10 : vector<1x16x16x3xf32> to vector<256x3xf32>
    %c0_26 = arith.constant 0 : index
    %c1_27 = arith.constant 1 : index
    %c0_28 = arith.constant 0 : index
    %c0_29 = arith.constant 0 : index
    %12 = vector.load %arg13[%c0_26, %c1_27, %c0_28, %c0_29] : memref<1x18x18x3xf32, #tpu.memory_space<vmem>>, vector<1x16x16x3xf32>
    %13 = vector.shape_cast %12 : vector<1x16x16x3xf32> to vector<256x3xf32>
    %c0_30 = arith.constant 0 : index
    %c1_31 = arith.constant 1 : index
    %c1_32 = arith.constant 1 : index
    %c0_33 = arith.constant 0 : index
    %14 = vector.load %arg13[%c0_30, %c1_31, %c1_32, %c0_33] : memref<1x18x18x3xf32, #tpu.memory_space<vmem>>, vector<1x16x16x3xf32>
    %15 = vector.shape_cast %14 : vector<1x16x16x3xf32> to vector<256x3xf32>
    %c0_34 = arith.constant 0 : index
    %c1_35 = arith.constant 1 : index
    %c2_36 = arith.constant 2 : index
    %c0_37 = arith.constant 0 : index
    %16 = vector.load %arg13[%c0_34, %c1_35, %c2_36, %c0_37] : memref<1x18x18x3xf32, #tpu.memory_space<vmem>>, vector<1x16x16x3xf32>
    %17 = vector.shape_cast %16 : vector<1x16x16x3xf32> to vector<256x3xf32>
    %c0_38 = arith.constant 0 : index
    %c2_39 = arith.constant 2 : index
    %c0_40 = arith.constant 0 : index
    %c0_41 = arith.constant 0 : index
    %18 = vector.load %arg13[%c0_38, %c2_39, %c0_40, %c0_41] : memref<1x18x18x3xf32, #tpu.memory_space<vmem>>, vector<1x16x16x3xf32>
    %19 = vector.shape_cast %18 : vector<1x16x16x3xf32> to vector<256x3xf32>
    %c0_42 = arith.constant 0 : index
    %c2_43 = arith.constant 2 : index
    %c1_44 = arith.constant 1 : index
    %c0_45 = arith.constant 0 : index
    %20 = vector.load %arg13[%c0_42, %c2_43, %c1_44, %c0_45] : memref<1x18x18x3xf32, #tpu.memory_space<vmem>>, vector<1x16x16x3xf32>
    %21 = vector.shape_cast %20 : vector<1x16x16x3xf32> to vector<256x3xf32>
    %c0_46 = arith.constant 0 : index
    %c2_47 = arith.constant 2 : index
    %c2_48 = arith.constant 2 : index
    %c0_49 = arith.constant 0 : index
    %22 = vector.load %arg13[%c0_46, %c2_47, %c2_48, %c0_49] : memref<1x18x18x3xf32, #tpu.memory_space<vmem>>, vector<1x16x16x3xf32>
    %23 = vector.shape_cast %22 : vector<1x16x16x3xf32> to vector<256x3xf32>
    %24 = tpu.concatenate %7, %9, %11, %13, %15, %17, %19, %21, %23 in 1 : vector<256x3xf32>, vector<256x3xf32>, vector<256x3xf32>, vector<256x3xf32>, vector<256x3xf32>, vector<256x3xf32>, vector<256x3xf32>, vector<256x3xf32>, vector<256x3xf32> -> vector<256x27xf32>
    %25 = arith.truncf %24 : vector<256x27xf32> to vector<256x27xbf16>
    %c0_50 = arith.constant 0 : index
    %c0_51 = arith.constant 0 : index
    %26 = vector.load %arg2[%c0_50, %c0_51] : memref<27x32xbf16, #tpu.memory_space<vmem>>, vector<27x32xbf16>
    %cst_52 = arith.constant dense<0.000000e+00> : vector<256x32xf32>
    %27 = tpu.matmul %25, %26, %cst_52 {dimension_numbers = #tpu.dot_dimension_numbers<[1], [0], [0], [1], [0, 0, 1, 1], [], []>} : vector<256x27xbf16>, vector<27x32xbf16>, vector<256x32xf32> -> vector<256x32xf32>
    %c0_53 = arith.constant 0 : index
    %c0_54 = arith.constant 0 : index
    %28 = vector.load %arg3[%c0_53, %c0_54] : memref<1x32xf32, #tpu.memory_space<vmem>>, vector<1x32xf32>
    %29 = vector.broadcast %28 : vector<1x32xf32> to vector<256x32xf32>
    %30 = arith.addf %27, %29 : vector<256x32xf32>
    %cst_55 = arith.constant 0.000000e+00 : f32
    %31 = vector.broadcast %cst_55 : f32 to vector<256x32xf32>
    %32 = arith.maximumf %30, %31 : vector<256x32xf32>
    %c0_56 = arith.constant 0 : index
    %c0_57 = arith.constant 0 : index
    %33 = vector.load %arg15[%c0_56, %c0_57] : memref<256x32xf32, #tpu.memory_space<vmem>>, vector<256x32xf32>
    tpu.vector_store %arg15[%c0_56, %c0_57], %32 {strides = array<i32>} : memref<256x32xf32, #tpu.memory_space<vmem>>, vector<256x32xf32>,
    %c0_i32 = arith.constant 0 : i32
    %c0_58 = arith.constant 0 : index
    %c0_59 = arith.constant 0 : index
    %34 = vector.load %arg15[%c0_58, %c0_59] : memref<256x32xf32, #tpu.memory_space<vmem>>, vector<256x32xf32>
    %35 = arith.truncf %34 : vector<256x32xf32> to vector<256x32xbf16>
    %c0_60 = arith.constant 0 : index
    %c0_61 = arith.constant 0 : index
    %36 = vector.load %arg4[%c0_60, %c0_61] : memref<32x32xbf16, #tpu.memory_space<vmem>>, vector<32x32xbf16>
    %cst_62 = arith.constant dense<0.000000e+00> : vector<256x32xf32>
    %37 = tpu.matmul %35, %36, %cst_62 {dimension_numbers = #tpu.dot_dimension_numbers<[1], [0], [0], [1], [0, 0, 1, 1], [], []>} : vector<256x32xbf16>, vector<32x32xbf16>, vector<256x32xf32> -> vector<256x32xf32>
    %c0_63 = arith.constant 0 : index
    %c0_64 = arith.constant 0 : index
    %38 = vector.load %arg5[%c0_63, %c0_64] : memref<1x32xf32, #tpu.memory_space<vmem>>, vector<1x32xf32>
    %39 = vector.broadcast %38 : vector<1x32xf32> to vector<256x32xf32>
    %40 = arith.addf %37, %39 : vector<256x32xf32>
    %cst_65 = arith.constant 0.000000e+00 : f32
    %41 = vector.broadcast %cst_65 : f32 to vector<256x32xf32>
    %42 = arith.maximumf %40, %41 : vector<256x32xf32>
    %43 = vector.shape_cast %42 : vector<256x32xf32> to vector<1x16x16x32xf32>
    %c0_66 = arith.constant 0 : index
    %c1_67 = arith.constant 1 : index
    %c1_68 = arith.constant 1 : index
    %c0_69 = arith.constant 0 : index
    %44 = vector.load %arg14[%c0_66, %c1_67, %c1_68, %c0_69] : memref<1x18x18x32xf32, #tpu.memory_space<vmem>>, vector<1x16x16x32xf32>
    tpu.vector_store %arg14[%c0_66, %c1_67, %c1_68, %c0_69], %43 {strides = array<i32>} : memref<1x18x18x32xf32, #tpu.memory_space<vmem>>, vector<1x16x16x32xf32>,
    %c0_70 = arith.constant 0 : index
    %c0_71 = arith.constant 0 : index
    %c0_72 = arith.constant 0 : index
    %c0_73 = arith.constant 0 : index
    %45 = vector.load %arg14[%c0_70, %c0_71, %c0_72, %c0_73] : memref<1x18x18x32xf32, #tpu.memory_space<vmem>>, vector<1x16x16x32xf32>
    %46 = vector.shape_cast %45 : vector<1x16x16x32xf32> to vector<256x32xf32>
    %c0_74 = arith.constant 0 : index
    %c0_75 = arith.constant 0 : index
    %c1_76 = arith.constant 1 : index
    %c0_77 = arith.constant 0 : index
    %47 = vector.load %arg14[%c0_74, %c0_75, %c1_76, %c0_77] : memref<1x18x18x32xf32, #tpu.memory_space<vmem>>, vector<1x16x16x32xf32>
    %48 = vector.shape_cast %47 : vector<1x16x16x32xf32> to vector<256x32xf32>
    %c0_78 = arith.constant 0 : index
    %c0_79 = arith.constant 0 : index
    %c2_80 = arith.constant 2 : index
    %c0_81 = arith.constant 0 : index
    %49 = vector.load %arg14[%c0_78, %c0_79, %c2_80, %c0_81] : memref<1x18x18x32xf32, #tpu.memory_space<vmem>>, vector<1x16x16x32xf32>
    %50 = vector.shape_cast %49 : vector<1x16x16x32xf32> to vector<256x32xf32>
    %c0_82 = arith.constant 0 : index
    %c1_83 = arith.constant 1 : index
    %c0_84 = arith.constant 0 : index
    %c0_85 = arith.constant 0 : index
    %51 = vector.load %arg14[%c0_82, %c1_83, %c0_84, %c0_85] : memref<1x18x18x32xf32, #tpu.memory_space<vmem>>, vector<1x16x16x32xf32>
    %52 = vector.shape_cast %51 : vector<1x16x16x32xf32> to vector<256x32xf32>
    %c0_86 = arith.constant 0 : index
    %c1_87 = arith.constant 1 : index
    %c1_88 = arith.constant 1 : index
    %c0_89 = arith.constant 0 : index
    %53 = vector.load %arg14[%c0_86, %c1_87, %c1_88, %c0_89] : memref<1x18x18x32xf32, #tpu.memory_space<vmem>>, vector<1x16x16x32xf32>
    %54 = vector.shape_cast %53 : vector<1x16x16x32xf32> to vector<256x32xf32>
    %c0_90 = arith.constant 0 : index
    %c1_91 = arith.constant 1 : index
    %c2_92 = arith.constant 2 : index
    %c0_93 = arith.constant 0 : index
    %55 = vector.load %arg14[%c0_90, %c1_91, %c2_92, %c0_93] : memref<1x18x18x32xf32, #tpu.memory_space<vmem>>, vector<1x16x16x32xf32>
    %56 = vector.shape_cast %55 : vector<1x16x16x32xf32> to vector<256x32xf32>
    %c0_94 = arith.constant 0 : index
    %c2_95 = arith.constant 2 : index
    %c0_96 = arith.constant 0 : index
    %c0_97 = arith.constant 0 : index
    %57 = vector.load %arg14[%c0_94, %c2_95, %c0_96, %c0_97] : memref<1x18x18x32xf32, #tpu.memory_space<vmem>>, vector<1x16x16x32xf32>
    %58 = vector.shape_cast %57 : vector<1x16x16x32xf32> to vector<256x32xf32>
    %c0_98 = arith.constant 0 : index
    %c2_99 = arith.constant 2 : index
    %c1_100 = arith.constant 1 : index
    %c0_101 = arith.constant 0 : index
    %59 = vector.load %arg14[%c0_98, %c2_99, %c1_100, %c0_101] : memref<1x18x18x32xf32, #tpu.memory_space<vmem>>, vector<1x16x16x32xf32>
    %60 = vector.shape_cast %59 : vector<1x16x16x32xf32> to vector<256x32xf32>
    %c0_102 = arith.constant 0 : index
    %c2_103 = arith.constant 2 : index
    %c2_104 = arith.constant 2 : index
    %c0_105 = arith.constant 0 : index
    %61 = vector.load %arg14[%c0_102, %c2_103, %c2_104, %c0_105] : memref<1x18x18x32xf32, #tpu.memory_space<vmem>>, vector<1x16x16x32xf32>
    %62 = vector.shape_cast %61 : vector<1x16x16x32xf32> to vector<256x32xf32>
    %63 = tpu.concatenate %46, %48, %50, %52, %54, %56, %58, %60, %62 in 1 : vector<256x32xf32>, vector<256x32xf32>, vector<256x32xf32>, vector<256x32xf32>, vector<256x32xf32>, vector<256x32xf32>, vector<256x32xf32>, vector<256x32xf32>, vector<256x32xf32> -> vector<256x288xf32>
    %64 = arith.truncf %63 : vector<256x288xf32> to vector<256x288xbf16>
    %c0_106 = arith.constant 0 : index
    %c0_107 = arith.constant 0 : index
    %65 = vector.load %arg6[%c0_106, %c0_107] : memref<288x32xbf16, #tpu.memory_space<vmem>>, vector<288x32xbf16>
    %cst_108 = arith.constant dense<0.000000e+00> : vector<256x32xf32>
    %66 = tpu.matmul %64, %65, %cst_108 {dimension_numbers = #tpu.dot_dimension_numbers<[1], [0], [0], [1], [0, 0, 1, 1], [], []>} : vector<256x288xbf16>, vector<288x32xbf16>, vector<256x32xf32> -> vector<256x32xf32>
    %c0_109 = arith.constant 0 : index
    %c0_110 = arith.constant 0 : index
    %67 = vector.load %arg7[%c0_109, %c0_110] : memref<1x32xf32, #tpu.memory_space<vmem>>, vector<1x32xf32>
    %68 = vector.broadcast %67 : vector<1x32xf32> to vector<256x32xf32>
    %69 = arith.addf %66, %68 : vector<256x32xf32>
    %cst_111 = arith.constant 0.000000e+00 : f32
    %70 = vector.broadcast %cst_111 : f32 to vector<256x32xf32>
    %71 = arith.maximumf %69, %70 : vector<256x32xf32>
    %72 = arith.truncf %71 : vector<256x32xf32> to vector<256x32xbf16>
    %c0_112 = arith.constant 0 : index
    %c0_113 = arith.constant 0 : index
    %73 = vector.load %arg8[%c0_112, %c0_113] : memref<32x32xbf16, #tpu.memory_space<vmem>>, vector<32x32xbf16>
    %cst_114 = arith.constant dense<0.000000e+00> : vector<256x32xf32>
    %74 = tpu.matmul %72, %73, %cst_114 {dimension_numbers = #tpu.dot_dimension_numbers<[1], [0], [0], [1], [0, 0, 1, 1], [], []>} : vector<256x32xbf16>, vector<32x32xbf16>, vector<256x32xf32> -> vector<256x32xf32>
    %c0_115 = arith.constant 0 : index
    %c0_116 = arith.constant 0 : index
    %75 = vector.load %arg9[%c0_115, %c0_116] : memref<1x32xf32, #tpu.memory_space<vmem>>, vector<1x32xf32>
    %76 = vector.broadcast %75 : vector<1x32xf32> to vector<256x32xf32>
    %77 = arith.addf %74, %76 : vector<256x32xf32>
    %78 = arith.addf %77, %34 : vector<256x32xf32>
    %c0_117 = arith.constant 0 : index
    %c0_118 = arith.constant 0 : index
    %79 = vector.load %arg15[%c0_117, %c0_118] : memref<256x32xf32, #tpu.memory_space<vmem>>, vector<256x32xf32>
    tpu.vector_store %arg15[%c0_117, %c0_118], %78 {strides = array<i32>} : memref<256x32xf32, #tpu.memory_space<vmem>>, vector<256x32xf32>,
    %c1_i32 = arith.constant 1 : i32
    %c0_119 = arith.constant 0 : index
    %c0_120 = arith.constant 0 : index
    %80 = vector.load %arg15[%c0_119, %c0_120] : memref<256x32xf32, #tpu.memory_space<vmem>>, vector<256x32xf32>
    %81 = arith.truncf %80 : vector<256x32xf32> to vector<256x32xbf16>
    %c0_121 = arith.constant 0 : index
    %c0_122 = arith.constant 0 : index
    %82 = vector.load %arg4[%c0_121, %c0_122] : memref<32x32xbf16, #tpu.memory_space<vmem>>, vector<32x32xbf16>
    %cst_123 = arith.constant dense<0.000000e+00> : vector<256x32xf32>
    %83 = tpu.matmul %81, %82, %cst_123 {dimension_numbers = #tpu.dot_dimension_numbers<[1], [0], [0], [1], [0, 0, 1, 1], [], []>} : vector<256x32xbf16>, vector<32x32xbf16>, vector<256x32xf32> -> vector<256x32xf32>
    %c0_124 = arith.constant 0 : index
    %c0_125 = arith.constant 0 : index
    %84 = vector.load %arg5[%c0_124, %c0_125] : memref<1x32xf32, #tpu.memory_space<vmem>>, vector<1x32xf32>
    %85 = vector.broadcast %84 : vector<1x32xf32> to vector<256x32xf32>
    %86 = arith.addf %83, %85 : vector<256x32xf32>
    %cst_126 = arith.constant 0.000000e+00 : f32
    %87 = vector.broadcast %cst_126 : f32 to vector<256x32xf32>
    %88 = arith.maximumf %86, %87 : vector<256x32xf32>
    %89 = vector.shape_cast %88 : vector<256x32xf32> to vector<1x16x16x32xf32>
    %c0_127 = arith.constant 0 : index
    %c1_128 = arith.constant 1 : index
    %c1_129 = arith.constant 1 : index
    %c0_130 = arith.constant 0 : index
    %90 = vector.load %arg14[%c0_127, %c1_128, %c1_129, %c0_130] : memref<1x18x18x32xf32, #tpu.memory_space<vmem>>, vector<1x16x16x32xf32>
    tpu.vector_store %arg14[%c0_127, %c1_128, %c1_129, %c0_130], %89 {strides = array<i32>} : memref<1x18x18x32xf32, #tpu.memory_space<vmem>>, vector<1x16x16x32xf32>,
    %c0_131 = arith.constant 0 : index
    %c0_132 = arith.constant 0 : index
    %c0_133 = arith.constant 0 : index
    %c0_134 = arith.constant 0 : index
    %91 = vector.load %arg14[%c0_131, %c0_132, %c0_133, %c0_134] : memref<1x18x18x32xf32, #tpu.memory_space<vmem>>, vector<1x16x16x32xf32>
    %92 = vector.shape_cast %91 : vector<1x16x16x32xf32> to vector<256x32xf32>
    %c0_135 = arith.constant 0 : index
    %c0_136 = arith.constant 0 : index
    %c1_137 = arith.constant 1 : index
    %c0_138 = arith.constant 0 : index
    %93 = vector.load %arg14[%c0_135, %c0_136, %c1_137, %c0_138] : memref<1x18x18x32xf32, #tpu.memory_space<vmem>>, vector<1x16x16x32xf32>
    %94 = vector.shape_cast %93 : vector<1x16x16x32xf32> to vector<256x32xf32>
    %c0_139 = arith.constant 0 : index
    %c0_140 = arith.constant 0 : index
    %c2_141 = arith.constant 2 : index
    %c0_142 = arith.constant 0 : index
    %95 = vector.load %arg14[%c0_139, %c0_140, %c2_141, %c0_142] : memref<1x18x18x32xf32, #tpu.memory_space<vmem>>, vector<1x16x16x32xf32>
    %96 = vector.shape_cast %95 : vector<1x16x16x32xf32> to vector<256x32xf32>
    %c0_143 = arith.constant 0 : index
    %c1_144 = arith.constant 1 : index
    %c0_145 = arith.constant 0 : index
    %c0_146 = arith.constant 0 : index
    %97 = vector.load %arg14[%c0_143, %c1_144, %c0_145, %c0_146] : memref<1x18x18x32xf32, #tpu.memory_space<vmem>>, vector<1x16x16x32xf32>
    %98 = vector.shape_cast %97 : vector<1x16x16x32xf32> to vector<256x32xf32>
    %c0_147 = arith.constant 0 : index
    %c1_148 = arith.constant 1 : index
    %c1_149 = arith.constant 1 : index
    %c0_150 = arith.constant 0 : index
    %99 = vector.load %arg14[%c0_147, %c1_148, %c1_149, %c0_150] : memref<1x18x18x32xf32, #tpu.memory_space<vmem>>, vector<1x16x16x32xf32>
    %100 = vector.shape_cast %99 : vector<1x16x16x32xf32> to vector<256x32xf32>
    %c0_151 = arith.constant 0 : index
    %c1_152 = arith.constant 1 : index
    %c2_153 = arith.constant 2 : index
    %c0_154 = arith.constant 0 : index
    %101 = vector.load %arg14[%c0_151, %c1_152, %c2_153, %c0_154] : memref<1x18x18x32xf32, #tpu.memory_space<vmem>>, vector<1x16x16x32xf32>
    %102 = vector.shape_cast %101 : vector<1x16x16x32xf32> to vector<256x32xf32>
    %c0_155 = arith.constant 0 : index
    %c2_156 = arith.constant 2 : index
    %c0_157 = arith.constant 0 : index
    %c0_158 = arith.constant 0 : index
    %103 = vector.load %arg14[%c0_155, %c2_156, %c0_157, %c0_158] : memref<1x18x18x32xf32, #tpu.memory_space<vmem>>, vector<1x16x16x32xf32>
    %104 = vector.shape_cast %103 : vector<1x16x16x32xf32> to vector<256x32xf32>
    %c0_159 = arith.constant 0 : index
    %c2_160 = arith.constant 2 : index
    %c1_161 = arith.constant 1 : index
    %c0_162 = arith.constant 0 : index
    %105 = vector.load %arg14[%c0_159, %c2_160, %c1_161, %c0_162] : memref<1x18x18x32xf32, #tpu.memory_space<vmem>>, vector<1x16x16x32xf32>
    %106 = vector.shape_cast %105 : vector<1x16x16x32xf32> to vector<256x32xf32>
    %c0_163 = arith.constant 0 : index
    %c2_164 = arith.constant 2 : index
    %c2_165 = arith.constant 2 : index
    %c0_166 = arith.constant 0 : index
    %107 = vector.load %arg14[%c0_163, %c2_164, %c2_165, %c0_166] : memref<1x18x18x32xf32, #tpu.memory_space<vmem>>, vector<1x16x16x32xf32>
    %108 = vector.shape_cast %107 : vector<1x16x16x32xf32> to vector<256x32xf32>
    %109 = tpu.concatenate %92, %94, %96, %98, %100, %102, %104, %106, %108 in 1 : vector<256x32xf32>, vector<256x32xf32>, vector<256x32xf32>, vector<256x32xf32>, vector<256x32xf32>, vector<256x32xf32>, vector<256x32xf32>, vector<256x32xf32>, vector<256x32xf32> -> vector<256x288xf32>
    %110 = arith.truncf %109 : vector<256x288xf32> to vector<256x288xbf16>
    %c0_167 = arith.constant 0 : index
    %c0_168 = arith.constant 0 : index
    %111 = vector.load %arg6[%c0_167, %c0_168] : memref<288x32xbf16, #tpu.memory_space<vmem>>, vector<288x32xbf16>
    %cst_169 = arith.constant dense<0.000000e+00> : vector<256x32xf32>
    %112 = tpu.matmul %110, %111, %cst_169 {dimension_numbers = #tpu.dot_dimension_numbers<[1], [0], [0], [1], [0, 0, 1, 1], [], []>} : vector<256x288xbf16>, vector<288x32xbf16>, vector<256x32xf32> -> vector<256x32xf32>
    %c0_170 = arith.constant 0 : index
    %c0_171 = arith.constant 0 : index
    %113 = vector.load %arg7[%c0_170, %c0_171] : memref<1x32xf32, #tpu.memory_space<vmem>>, vector<1x32xf32>
    %114 = vector.broadcast %113 : vector<1x32xf32> to vector<256x32xf32>
    %115 = arith.addf %112, %114 : vector<256x32xf32>
    %cst_172 = arith.constant 0.000000e+00 : f32
    %116 = vector.broadcast %cst_172 : f32 to vector<256x32xf32>
    %117 = arith.maximumf %115, %116 : vector<256x32xf32>
    %118 = arith.truncf %117 : vector<256x32xf32> to vector<256x32xbf16>
    %c0_173 = arith.constant 0 : index
    %c0_174 = arith.constant 0 : index
    %119 = vector.load %arg8[%c0_173, %c0_174] : memref<32x32xbf16, #tpu.memory_space<vmem>>, vector<32x32xbf16>
    %cst_175 = arith.constant dense<0.000000e+00> : vector<256x32xf32>
    %120 = tpu.matmul %118, %119, %cst_175 {dimension_numbers = #tpu.dot_dimension_numbers<[1], [0], [0], [1], [0, 0, 1, 1], [], []>} : vector<256x32xbf16>, vector<32x32xbf16>, vector<256x32xf32> -> vector<256x32xf32>
    %c0_176 = arith.constant 0 : index
    %c0_177 = arith.constant 0 : index
    %121 = vector.load %arg9[%c0_176, %c0_177] : memref<1x32xf32, #tpu.memory_space<vmem>>, vector<1x32xf32>
    %122 = vector.broadcast %121 : vector<1x32xf32> to vector<256x32xf32>
    %123 = arith.addf %120, %122 : vector<256x32xf32>
    %124 = arith.addf %123, %80 : vector<256x32xf32>
    %c0_178 = arith.constant 0 : index
    %c0_179 = arith.constant 0 : index
    %125 = vector.load %arg15[%c0_178, %c0_179] : memref<256x32xf32, #tpu.memory_space<vmem>>, vector<256x32xf32>
    tpu.vector_store %arg15[%c0_178, %c0_179], %124 {strides = array<i32>} : memref<256x32xf32, #tpu.memory_space<vmem>>, vector<256x32xf32>,
    %c0_180 = arith.constant 0 : index
    %c0_181 = arith.constant 0 : index
    %126 = vector.load %arg15[%c0_180, %c0_181] : memref<256x32xf32, #tpu.memory_space<vmem>>, vector<256x32xf32>
    %cst_182 = arith.constant 0.000000e+00 : f32
    %127 = vector.broadcast %cst_182 : f32 to vector<256x32xf32>
    %128 = arith.maximumf %126, %127 : vector<256x32xf32>
    %129 = vector.shape_cast %128 : vector<256x32xf32> to vector<1x16x16x32xf32>
    %c0_183 = arith.constant 0 : index
    %c1_184 = arith.constant 1 : index
    %c1_185 = arith.constant 1 : index
    %c0_186 = arith.constant 0 : index
    %130 = vector.load %arg14[%c0_183, %c1_184, %c1_185, %c0_186] : memref<1x18x18x32xf32, #tpu.memory_space<vmem>>, vector<1x16x16x32xf32>
    tpu.vector_store %arg14[%c0_183, %c1_184, %c1_185, %c0_186], %129 {strides = array<i32>} : memref<1x18x18x32xf32, #tpu.memory_space<vmem>>, vector<1x16x16x32xf32>,
    %c0_187 = arith.constant 0 : index
    %c0_188 = arith.constant 0 : index
    %c0_189 = arith.constant 0 : index
    %c0_190 = arith.constant 0 : index
    %131 = vector.load %arg14[%c0_187, %c0_188, %c0_189, %c0_190] : memref<1x18x18x32xf32, #tpu.memory_space<vmem>>, vector<1x16x16x32xf32>
    %132 = vector.shape_cast %131 : vector<1x16x16x32xf32> to vector<256x32xf32>
    %c0_191 = arith.constant 0 : index
    %c0_192 = arith.constant 0 : index
    %c1_193 = arith.constant 1 : index
    %c0_194 = arith.constant 0 : index
    %133 = vector.load %arg14[%c0_191, %c0_192, %c1_193, %c0_194] : memref<1x18x18x32xf32, #tpu.memory_space<vmem>>, vector<1x16x16x32xf32>
    %134 = vector.shape_cast %133 : vector<1x16x16x32xf32> to vector<256x32xf32>
    %c0_195 = arith.constant 0 : index
    %c0_196 = arith.constant 0 : index
    %c2_197 = arith.constant 2 : index
    %c0_198 = arith.constant 0 : index
    %135 = vector.load %arg14[%c0_195, %c0_196, %c2_197, %c0_198] : memref<1x18x18x32xf32, #tpu.memory_space<vmem>>, vector<1x16x16x32xf32>
    %136 = vector.shape_cast %135 : vector<1x16x16x32xf32> to vector<256x32xf32>
    %c0_199 = arith.constant 0 : index
    %c1_200 = arith.constant 1 : index
    %c0_201 = arith.constant 0 : index
    %c0_202 = arith.constant 0 : index
    %137 = vector.load %arg14[%c0_199, %c1_200, %c0_201, %c0_202] : memref<1x18x18x32xf32, #tpu.memory_space<vmem>>, vector<1x16x16x32xf32>
    %138 = vector.shape_cast %137 : vector<1x16x16x32xf32> to vector<256x32xf32>
    %c0_203 = arith.constant 0 : index
    %c1_204 = arith.constant 1 : index
    %c1_205 = arith.constant 1 : index
    %c0_206 = arith.constant 0 : index
    %139 = vector.load %arg14[%c0_203, %c1_204, %c1_205, %c0_206] : memref<1x18x18x32xf32, #tpu.memory_space<vmem>>, vector<1x16x16x32xf32>
    %140 = vector.shape_cast %139 : vector<1x16x16x32xf32> to vector<256x32xf32>
    %c0_207 = arith.constant 0 : index
    %c1_208 = arith.constant 1 : index
    %c2_209 = arith.constant 2 : index
    %c0_210 = arith.constant 0 : index
    %141 = vector.load %arg14[%c0_207, %c1_208, %c2_209, %c0_210] : memref<1x18x18x32xf32, #tpu.memory_space<vmem>>, vector<1x16x16x32xf32>
    %142 = vector.shape_cast %141 : vector<1x16x16x32xf32> to vector<256x32xf32>
    %c0_211 = arith.constant 0 : index
    %c2_212 = arith.constant 2 : index
    %c0_213 = arith.constant 0 : index
    %c0_214 = arith.constant 0 : index
    %143 = vector.load %arg14[%c0_211, %c2_212, %c0_213, %c0_214] : memref<1x18x18x32xf32, #tpu.memory_space<vmem>>, vector<1x16x16x32xf32>
    %144 = vector.shape_cast %143 : vector<1x16x16x32xf32> to vector<256x32xf32>
    %c0_215 = arith.constant 0 : index
    %c2_216 = arith.constant 2 : index
    %c1_217 = arith.constant 1 : index
    %c0_218 = arith.constant 0 : index
    %145 = vector.load %arg14[%c0_215, %c2_216, %c1_217, %c0_218] : memref<1x18x18x32xf32, #tpu.memory_space<vmem>>, vector<1x16x16x32xf32>
    %146 = vector.shape_cast %145 : vector<1x16x16x32xf32> to vector<256x32xf32>
    %c0_219 = arith.constant 0 : index
    %c2_220 = arith.constant 2 : index
    %c2_221 = arith.constant 2 : index
    %c0_222 = arith.constant 0 : index
    %147 = vector.load %arg14[%c0_219, %c2_220, %c2_221, %c0_222] : memref<1x18x18x32xf32, #tpu.memory_space<vmem>>, vector<1x16x16x32xf32>
    %148 = vector.shape_cast %147 : vector<1x16x16x32xf32> to vector<256x32xf32>
    %149 = tpu.concatenate %132, %134, %136, %138, %140, %142, %144, %146, %148 in 1 : vector<256x32xf32>, vector<256x32xf32>, vector<256x32xf32>, vector<256x32xf32>, vector<256x32xf32>, vector<256x32xf32>, vector<256x32xf32>, vector<256x32xf32>, vector<256x32xf32> -> vector<256x288xf32>
    %150 = arith.truncf %149 : vector<256x288xf32> to vector<256x288xbf16>
    %c0_223 = arith.constant 0 : index
    %c0_224 = arith.constant 0 : index
    %151 = vector.load %arg10[%c0_223, %c0_224] : memref<288x6xbf16, #tpu.memory_space<vmem>>, vector<288x6xbf16>
    %cst_225 = arith.constant dense<0.000000e+00> : vector<256x6xf32>
    %152 = tpu.matmul %150, %151, %cst_225 {dimension_numbers = #tpu.dot_dimension_numbers<[1], [0], [0], [1], [0, 0, 1, 1], [], []>} : vector<256x288xbf16>, vector<288x6xbf16>, vector<256x6xf32> -> vector<256x6xf32>
    %c0_226 = arith.constant 0 : index
    %c0_227 = arith.constant 0 : index
    %153 = vector.load %arg11[%c0_226, %c0_227] : memref<1x6xf32, #tpu.memory_space<vmem>>, vector<1x6xf32>
    %154 = vector.broadcast %153 : vector<1x6xf32> to vector<256x6xf32>
    %155 = arith.addf %152, %154 : vector<256x6xf32>
    %156 = vector.shape_cast %155 : vector<256x6xf32> to vector<1x256x6xf32>
    %c0_228 = arith.constant 0 : index
    %c0_229 = arith.constant 0 : index
    %c0_230 = arith.constant 0 : index
    %157 = vector.load %arg12[%c0_228, %c0_229, %c0_230] : memref<1x256x6xf32, #tpu.memory_space<vmem>>, vector<1x256x6xf32>
    tpu.vector_store %arg12[%c0_228, %c0_229, %c0_230], %156 {strides = array<i32>} : memref<1x256x6xf32, #tpu.memory_space<vmem>>, vector<1x256x6xf32>,
    return
  }
  func.func @transform_0(%arg0: i32) -> (i32, i32, i32, i32) {
    %c0_i32 = arith.constant 0 : i32
    %c0_i32_0 = arith.constant 0 : i32
    %c0_i32_1 = arith.constant 0 : i32
    %c0_i32_2 = arith.constant 0 : i32
    return %arg0, %c0_i32, %c0_i32_0, %c0_i32_1 : i32, i32, i32, i32
  }
  func.func @transform_1(%arg0: i32) -> (i32, i32) {
    %c0_i32 = arith.constant 0 : i32
    %c0_i32_0 = arith.constant 0 : i32
    %c0_i32_1 = arith.constant 0 : i32
    return %c0_i32, %c0_i32_0 : i32, i32
  }
  func.func @transform_2(%arg0: i32) -> (i32, i32) {
    %c0_i32 = arith.constant 0 : i32
    %c0_i32_0 = arith.constant 0 : i32
    %c0_i32_1 = arith.constant 0 : i32
    return %c0_i32, %c0_i32_0 : i32, i32
  }
  func.func @transform_3(%arg0: i32) -> (i32, i32) {
    %c0_i32 = arith.constant 0 : i32
    %c0_i32_0 = arith.constant 0 : i32
    %c0_i32_1 = arith.constant 0 : i32
    return %c0_i32, %c0_i32_0 : i32, i32
  }
  func.func @transform_4(%arg0: i32) -> (i32, i32) {
    %c0_i32 = arith.constant 0 : i32
    %c0_i32_0 = arith.constant 0 : i32
    %c0_i32_1 = arith.constant 0 : i32
    return %c0_i32, %c0_i32_0 : i32, i32
  }
  func.func @transform_5(%arg0: i32) -> (i32, i32) {
    %c0_i32 = arith.constant 0 : i32
    %c0_i32_0 = arith.constant 0 : i32
    %c0_i32_1 = arith.constant 0 : i32
    return %c0_i32, %c0_i32_0 : i32, i32
  }
  func.func @transform_6(%arg0: i32) -> (i32, i32) {
    %c0_i32 = arith.constant 0 : i32
    %c0_i32_0 = arith.constant 0 : i32
    %c0_i32_1 = arith.constant 0 : i32
    return %c0_i32, %c0_i32_0 : i32, i32
  }
  func.func @transform_7(%arg0: i32) -> (i32, i32) {
    %c0_i32 = arith.constant 0 : i32
    %c0_i32_0 = arith.constant 0 : i32
    %c0_i32_1 = arith.constant 0 : i32
    return %c0_i32, %c0_i32_0 : i32, i32
  }
  func.func @transform_8(%arg0: i32) -> (i32, i32) {
    %c0_i32 = arith.constant 0 : i32
    %c0_i32_0 = arith.constant 0 : i32
    %c0_i32_1 = arith.constant 0 : i32
    return %c0_i32, %c0_i32_0 : i32, i32
  }
  func.func @transform_9(%arg0: i32) -> (i32, i32) {
    %c0_i32 = arith.constant 0 : i32
    %c0_i32_0 = arith.constant 0 : i32
    %c0_i32_1 = arith.constant 0 : i32
    return %c0_i32, %c0_i32_0 : i32, i32
  }
  func.func @transform_10(%arg0: i32) -> (i32, i32) {
    %c0_i32 = arith.constant 0 : i32
    %c0_i32_0 = arith.constant 0 : i32
    %c0_i32_1 = arith.constant 0 : i32
    return %c0_i32, %c0_i32_0 : i32, i32
  }
  func.func @transform_11(%arg0: i32) -> (i32, i32, i32) {
    %c0_i32 = arith.constant 0 : i32
    %c0_i32_0 = arith.constant 0 : i32
    %c0_i32_1 = arith.constant 0 : i32
    return %arg0, %c0_i32, %c0_i32_0 : i32, i32, i32
  }
}

</mosaic_0001>

<bundles_post_ra>
// kernel: simple_resnet_forward.1
= control target key start
LH: loop header
LB: loop body
LE: loop exit
PB: predicated region body
PF: predicated region fallthrough
CT: control target
= control target key end

     0   :  { %s11659_s17 = smov 0   ;;  %s16463_s0 = inlined_call_operand.vmem [shape: f32[2,16,16,3], index: 0, kind: input, shape index: {}]   ;;  %s16464_s1 = inlined_call_operand.vmem [shape: bf16[27,32], index: 1, kind: input, shape index: {}]   ;;  %s16465_s2 = inlined_call_operand.vmem [shape: f32[1,32], index: 2, kind: input, shape index: {}]   ;;  %s16466_s3 = inlined_call_operand.vmem [shape: bf16[32,32], index: 3, kind: input, shape index: {}]   ;;  %s16467_s4 = inlined_call_operand.vmem [shape: f32[1,32], index: 4, kind: input, shape index: {}]   ;;  %s16468_s5 = inlined_call_operand.vmem [shape: bf16[288,32], index: 5, kind: input, shape index: {}]   ;;  %s16469_s6 = inlined_call_operand.vmem [shape: f32[1,32], index: 6, kind: input, shape index: {}]   ;;  %s16470_s7 = inlined_call_operand.vmem [shape: bf16[32,32], index: 7, kind: input, shape index: {}]   ;;  %s16471_s8 = inlined_call_operand.vmem [shape: f32[1,32], index: 8, kind: input, shape index: {}]   ;;  %s16472_s9 = inlined_call_operand.vmem [shape: bf16[288,6], index: 9, kind: input, shape index: {}]   ;;  %s16473_s10 = inlined_call_operand.vmem [shape: f32[1,6], index: 10, kind: input, shape index: {}]   ;;  %s16474_s11 = inlined_call_operand.vmem [shape: f32[2,256,6], index: 11, kind: output, shape index: {}]  }
   0x1 LB: > { %s8925_s18 = sadd.s32 4294967295, %s11584_s17   ;;  %p8929_p0 = scmp.ge.s32.totalorder %s11584_s17, 1  ;;  %s11584_s17 = sphi %s11659_s17, %s21_s17  }
   0x2   : > { %p337_p1 = scmp.lt.s32.totalorder %s11584_s17, 3 }
   0x4   : > { %p338_p2 = pnand %p8929_p0, %p337_p1 }
   0x6   : > { %341 = sbr.rel (%p338_p2) target bundleno = 2422 (0x976), region = 64 }
   0xb   : > { %vm388_vm0 = vcmask 23552   ;;  %vm391_vm1 = vcmask 17408   ;;  %v16475_v0 = vmov 0.0   ;;  %s11587_s19 = smov 3   ;;  %p377_p3 = scmp.lt.s32.totalorder %s8925_s18, 1  ;;  %vm1910_vm2 = vcmask 48128  }
   0xc   : > { %389 = vst.msk [vmem:[#allocation2] sm:$0xff] %vm388_vm0, %v16475_v0  ;;  %s11588_s24 = smov 6   ;;  %s11589_s25 = smov 9   ;;  %vm1943_vm3 = vcmask 72704   ;;  %vm1976_vm4 = vcmask 97280   ;;  %vm2009_vm5 = vcmask 121856  }
   0xd   : > { %390 = vst.msk [vmem:[#allocation2 + $0x8] sm:$0xff] %vm388_vm0, %v16475_v0  ;;  %s16720_s18 = smov (!%p377_p3, %s8925_s18), 1  ;;  %s11590_s26 = smov 12   ;;  %vm2042_vm6 = vcmask 146432   ;;  %vm2075_vm7 = vcmask 171008   ;;  %vm2225_vm8 = vcmask 1044480  }
   0xe   : > { %392 = vst.msk [vmem:[#allocation2 + $0x10] sm:$0x3] %vm391_vm1, %v16475_v0  ;;  %s9320_s20 = sshll.u32 %s16720_s18, 8  ;;  %s11591_s27 = smov 15   ;;  %vm2226_vm9 = vcmask 1045504   ;;  %vm2108_vm10 = vcmask 195584  }
   0xf   : > { %393 = vst.msk [vmem:[#allocation2 + $0x18] sm:$0xff] %vm388_vm0, %v16475_v0  ;;  %s11778_s23 = scalar_lea.vmem %s16463_s0, %s9320_s20  ;;  %s11592_s28 = smov 18   ;;  %vm2176_vm11 = vcmask 220160   ;;  %vm444_vm12 = vcmask 261120   ;;  %vm447_vm13 = vcmask 254976   ;;  %vm3744_vm14 = vcmask 523264  }
  0x10   : > { %394 = vst.msk [vmem:[#allocation2 + $0x20] sm:$0xff] %vm388_vm0, %v16475_v0  ;;  %v506_v4 = vld [vmem:[%s11778_s23 + $0x30] sm:$0xff]  ;;  %v507_v5 = vld [vmem:[%s11778_s23 + $0x38] sm:$0xff]  ;;  %v500_v8 = vld [vmem:[%s11778_s23] sm:$0xff]  ;;  %s11593_s29 = smov 21   ;;  %s11594_s30 = smov 24  }
  0x11   : > { %395 = vst.msk [vmem:[#allocation2 + $0x28] sm:$0x3] %vm391_vm1, %v16475_v0  ;;  %v502_v6 = vld [vmem:[%s11778_s23 + $0x10] sm:$0xff]  ;;  %v503_v7 = vld [vmem:[%s11778_s23 + $0x18] sm:$0xff]  ;;  %v501_v9 = vld [vmem:[%s11778_s23 + $0x8] sm:$0xff]  ;;  %s11598_s16 = smov 96   ;;  %s16171_s13 = scalar_lea.vmem %s16474_s11, %s9320_s20 }
  0x12   : > { %396 = vst.msk [vmem:[#allocation2 + $0x30] sm:$0xff] %vm388_vm0, %v16475_v0  ;;  %v508_v10 = vld [vmem:[%s11778_s23 + $0x40] sm:$0xff]  ;;  %v509_v11 = vld [vmem:[%s11778_s23 + $0x48] sm:$0xff]  ;;  %v510_v15 = vld [vmem:[%s11778_s23 + $0x50] sm:$0xff]  ;;  %vm3777_vm15 = vcmask 785408  }
  0x13   : > { %397 = vst.msk [vmem:[#allocation2 + $0x38] sm:$0xff] %vm388_vm0, %v16475_v0  ;;  %v504_v12 = vld [vmem:[%s11778_s23 + $0x20] sm:$0xff]  ;;  %v505_v13 = vld [vmem:[%s11778_s23 + $0x28] sm:$0xff]  ;;  %v511_v17 = vld [vmem:[%s11778_s23 + $0x58] sm:$0xff] }
  0x14   : > { %v597_v1 = vld [vmem:[#allocation2 + $0x1] sm:$0xff]  ;;  %398 = vst.msk [vmem:[#allocation2 + $0x40] sm:$0x3] %vm391_vm1, %v16475_v0  ;;  %v514_v20 = vld [vmem:[%s11778_s23 + $0x70] sm:$0xff]  ;;  %v515_v22 = vld [vmem:[%s11778_s23 + $0x78] sm:$0xff] }
  0x15   : > { %v598_v2 = vld [vmem:[#allocation2 + $0x9] sm:$0xff]  ;;  %399 = vst.msk [vmem:[#allocation2 + $0x48] sm:$0xff] %vm388_vm0, %v16475_v0  ;;  %v512_v25 = vld [vmem:[%s11778_s23 + $0x60] sm:$0xff]  ;;  %v519_v42 = vld [vmem:[%s11778_s23 + $0x98] sm:$0xff] }
  0x16   : > { %v9413_v3 = vpack.i.bf16 %v598_v2, %v597_v1  ;;  %400 = vst.msk [vmem:[#allocation2 + $0x50] sm:$0xff] %vm388_vm0, %v16475_v0  ;;  %v513_v27 = vld [vmem:[%s11778_s23 + $0x68] sm:$0xff]  ;;  %v516_v30 = vld [vmem:[%s11778_s23 + $0x80] sm:$0xff]  ;;  %v518_v40 = vld [vmem:[%s11778_s23 + $0x90] sm:$0xff] }
  0x17   : > { %401 = vst.msk [vmem:[#allocation2 + $0x58] sm:$0x3] %vm391_vm1, %v16475_v0  ;;  %v517_v32 = vld [vmem:[%s11778_s23 + $0x88] sm:$0xff]  ;;  %v520_v35 = vld [vmem:[%s11778_s23 + $0xa0] sm:$0xff]  ;;  %v522_v44 = vld [vmem:[%s11778_s23 + $0xb0] sm:$0xff] }
  0x18   : > { %9414 = vrot.lane.b32.xlu0 %v9413_v3, %s11587_s19  ;;  %402 = vst.msk [vmem:[#allocation2 + $0x60] sm:$0xff] %vm388_vm0, %v16475_v0  ;;  %v521_v37 = vld [vmem:[%s11778_s23 + $0xa8] sm:$0xff]  ;;  %v523_v47 = vld [vmem:[%s11778_s23 + $0xb8] sm:$0xff]  ;;  %v526_v48 = vld [vmem:[%s11778_s23 + $0xd0] sm:$0xff] }
  0x19   : > { %403 = vst.msk [vmem:[#allocation2 + $0x68] sm:$0xff] %vm388_vm0, %v16475_v0  ;;  %v527_v51 = vld [vmem:[%s11778_s23 + $0xd8] sm:$0xff]  ;;  %v524_v53 = vld [vmem:[%s11778_s23 + $0xc0] sm:$0xff]  ;;  %v525_v56 = vld [vmem:[%s11778_s23 + $0xc8] sm:$0xff] }
  0x1a   : > { %404 = vst.msk [vmem:[#allocation2 + $0x70] sm:$0x3] %vm391_vm1, %v16475_v0  ;;  %v528_v58 = vld [vmem:[%s11778_s23 + $0xe0] sm:$0xff]  ;;  %v529_v59 = vld [vmem:[%s11778_s23 + $0xe8] sm:$0xff] }
  0x1b   : > { %405 = vst.msk [vmem:[#allocation2 + $0x78] sm:$0xff] %vm388_vm0, %v16475_v0 }
  0x1c   : > { %406 = vst.msk [vmem:[#allocation2 + $0x80] sm:$0xff] %vm388_vm0, %v16475_v0 }
  0x1d   : > { %407 = vst.msk [vmem:[#allocation2 + $0x88] sm:$0x3] %vm391_vm1, %v16475_v0 }
  0x1e   : > { %408 = vst.msk [vmem:[#allocation2 + $0x90] sm:$0xff] %vm388_vm0, %v16475_v0 }
  0x1f   : > { %409 = vst.msk [vmem:[#allocation2 + $0x98] sm:$0xff] %vm388_vm0, %v16475_v0 }
  0x20   : > { %410 = vst.msk [vmem:[#allocation2 + $0xa0] sm:$0x3] %vm391_vm1, %v16475_v0 }
  0x21   : > { %411 = vst.msk [vmem:[#allocation2 + $0xa8] sm:$0xff] %vm388_vm0, %v16475_v0 }
  0x22   : > { %412 = vst.msk [vmem:[#allocation2 + $0xb0] sm:$0xff] %vm388_vm0, %v16475_v0 }
  0x23   : > { %413 = vst.msk [vmem:[#allocation2 + $0xb8] sm:$0x3] %vm391_vm1, %v16475_v0 }
  0x24   : > { %414 = vst.msk [vmem:[#allocation2 + $0xc0] sm:$0xff] %vm388_vm0, %v16475_v0 }
  0x25   : > { %415 = vst.msk [vmem:[#allocation2 + $0xc8] sm:$0xff] %vm388_vm0, %v16475_v0 }
  0x26   : > { %416 = vst.msk [vmem:[#allocation2 + $0xd0] sm:$0x3] %vm391_vm1, %v16475_v0 }
  0x27   : > { %417 = vst.msk [vmem:[#allocation2 + $0xd8] sm:$0xff] %vm388_vm0, %v16475_v0 }
  0x28   : > { %418 = vst.msk [vmem:[#allocation2 + $0xe0] sm:$0xff] %vm388_vm0, %v16475_v0 }
  0x29   : > { %419 = vst.msk [vmem:[#allocation2 + $0xe8] sm:$0x3] %vm391_vm1, %v16475_v0 }
  0x2a   : > { %420 = vst.msk [vmem:[#allocation2 + $0xf0] sm:$0xff] %vm388_vm0, %v16475_v0 }
  0x2b   : > { %421 = vst.msk [vmem:[#allocation2 + $0xf8] sm:$0xff] %vm388_vm0, %v16475_v0 }
  0x2c   : > { %422 = vst.msk [vmem:[#allocation2 + $0x100] sm:$0x3] %vm391_vm1, %v16475_v0 }
  0x2d   : > { %423 = vst.msk [vmem:[#allocation2 + $0x108] sm:$0xff] %vm388_vm0, %v16475_v0 }
  0x2e   : > { %424 = vst.msk [vmem:[#allocation2 + $0x110] sm:$0xff] %vm388_vm0, %v16475_v0 }
  0x2f   : > { %425 = vst.msk [vmem:[#allocation2 + $0x118] sm:$0x3] %vm391_vm1, %v16475_v0 }
  0x30   : > { %426 = vst.msk [vmem:[#allocation2 + $0x120] sm:$0xff] %vm388_vm0, %v16475_v0 }
  0x31   : > { %427 = vst.msk [vmem:[#allocation2 + $0x128] sm:$0xff] %vm388_vm0, %v16475_v0 }
  0x32   : > { %428 = vst.msk [vmem:[#allocation2 + $0x130] sm:$0x3] %vm391_vm1, %v16475_v0 }
  0x33   : > { %429 = vst.msk [vmem:[#allocation2 + $0x138] sm:$0xff] %vm388_vm0, %v16475_v0 }
  0x34   : > { %430 = vst.msk [vmem:[#allocation2 + $0x140] sm:$0xff] %vm388_vm0, %v16475_v0 }
  0x35   : > { %431 = vst.msk [vmem:[#allocation2 + $0x148] sm:$0x3] %vm391_vm1, %v16475_v0 }
  0x36   : > { %432 = vst.msk [vmem:[#allocation2 + $0x150] sm:$0xff] %vm388_vm0, %v16475_v0 }
  0x37   : > { %433 = vst.msk [vmem:[#allocation2 + $0x158] sm:$0xff] %vm388_vm0, %v16475_v0 }
  0x38   : > { %434 = vst.msk [vmem:[#allocation2 + $0x160] sm:$0x3] %vm391_vm1, %v16475_v0 }
  0x39   : > { %435 = vst.msk [vmem:[#allocation2 + $0x168] sm:$0xff] %vm388_vm0, %v16475_v0 }
  0x3a   : > { %436 = vst.msk [vmem:[#allocation2 + $0x170] sm:$0xff] %vm388_vm0, %v16475_v0 }
  0x3b   : > { %437 = vst.msk [vmem:[#allocation2 + $0x178] sm:$0x3] %vm391_vm1, %v16475_v0 }
  0x3c   : > { %438 = vst.msk [vmem:[#allocation2 + $0x180] sm:$0xff] %vm388_vm0, %v16475_v0 }
  0x3d   : > { %439 = vst.msk [vmem:[#allocation2 + $0x188] sm:$0xff] %vm388_vm0, %v16475_v0 }
  0x3e   : > { %440 = vst.msk [vmem:[#allocation2 + $0x190] sm:$0x3] %vm391_vm1, %v16475_v0 }
  0x3f   : > { %441 = vst.msk [vmem:[#allocation2 + $0x198] sm:$0xff] %vm388_vm0, %v16475_v0 }
  0x40   : > { %442 = vst.msk [vmem:[#allocation2 + $0x1a0] sm:$0xff] %vm388_vm0, %v16475_v0 }
  0x41   : > { %443 = vst.msk [vmem:[#allocation2 + $0x1a8] sm:$0x3] %vm391_vm1, %v16475_v0 }
  0x42   : > { %539 = vst.msk [vmem:[#allocation2 + $0x61] sm:$0xff] %vm388_vm0, %v506_v4 }
  0x43   : > { %540 = vst.msk [vmem:[#allocation2 + $0x69] sm:$0xff] %vm388_vm0, %v507_v5 }
  0x44   : > { %535 = vst.msk [vmem:[#allocation2 + $0x31] sm:$0xff] %vm388_vm0, %v502_v6 }
  0x45   : > { %536 = vst.msk [vmem:[#allocation2 + $0x39] sm:$0xff] %vm388_vm0, %v503_v7 }
  0x46   : > { %533 = vst.msk [vmem:[#allocation2 + $0x19] sm:$0xff] %vm388_vm0, %v500_v8 }
  0x47   : > { %534 = vst.msk [vmem:[#allocation2 + $0x21] sm:$0xff] %vm388_vm0, %v501_v9 }
  0x48   : > { %541 = vst.msk [vmem:[#allocation2 + $0x79] sm:$0xff] %vm388_vm0, %v508_v10 }
  0x49   : > { %v605_v14 = vld [vmem:[#allocation2 + $0x61] sm:$0xff]  ;;  %542 = vst.msk [vmem:[#allocation2 + $0x81] sm:$0xff] %vm388_vm0, %v509_v11 }
  0x4a   : > { %v606_v16 = vld [vmem:[#allocation2 + $0x69] sm:$0xff]  ;;  %537 = vst.msk [vmem:[#allocation2 + $0x49] sm:$0xff] %vm388_vm0, %v504_v12 }
  0x4b   : > { %v11811_v18 = vpack.i.bf16 %v606_v16, %v605_v14  ;;  %v601_v19 = vld [vmem:[#allocation2 + $0x31] sm:$0xff]  ;;  %538 = vst.msk [vmem:[#allocation2 + $0x51] sm:$0xff] %vm388_vm0, %v505_v13 }
  0x4c   : > { %v602_v21 = vld [vmem:[#allocation2 + $0x39] sm:$0xff]  ;;  %543 = vst.msk [vmem:[#allocation2 + $0x91] sm:$0xff] %vm388_vm0, %v510_v15 }
  0x4d   : > { %9434 = vrot.lane.b32.xlu2 %v11811_v18, %s11587_s19  ;;  %v11819_v23 = vpack.i.bf16 %v602_v21, %v601_v19  ;;  %v599_v24 = vld [vmem:[#allocation2 + $0x19] sm:$0xff]  ;;  %544 = vst.msk [vmem:[#allocation2 + $0x99] sm:$0xff] %vm388_vm0, %v511_v17  ;;  %v629_v19 = vld [vmem:[#allocation2 + $0x2] sm:$0xff] }
  0x4e   : > { %v600_v26 = vld [vmem:[#allocation2 + $0x21] sm:$0xff]  ;;  %547 = vst.msk [vmem:[#allocation2 + $0xc1] sm:$0xff] %vm388_vm0, %v514_v20  ;;  %v630_v20 = vld [vmem:[#allocation2 + $0xa] sm:$0xff] }
  0x4f   : > { %9424 = vrot.lane.b32.xlu1 %v11819_v23, %s11587_s19  ;;  %v11827_v28 = vpack.i.bf16 %v600_v26, %v599_v24  ;;  %v607_v29 = vld [vmem:[#allocation2 + $0x79] sm:$0xff]  ;;  %548 = vst.msk [vmem:[#allocation2 + $0xc9] sm:$0xff] %vm388_vm0, %v515_v22  ;;  %v632_v17 = vld [vmem:[#allocation2 + $0x22] sm:$0xff] }
  0x50   : > { %v608_v31 = vld [vmem:[#allocation2 + $0x81] sm:$0xff]  ;;  %545 = vst.msk [vmem:[#allocation2 + $0xa9] sm:$0xff] %vm388_vm0, %v512_v25  ;;  %v633_v22 = vld [vmem:[#allocation2 + $0x32] sm:$0xff]  ;;  %v9493_v25 = vpack.i.bf16 %v630_v20, %v629_v19 }
  0x51   : > { %9419 = vrot.lane.b32.xlu0 %v11827_v28, %s11587_s19  ;;  %v11835_v33 = vpack.i.bf16 %v608_v31, %v607_v29  ;;  %v603_v34 = vld [vmem:[#allocation2 + $0x49] sm:$0xff]  ;;  %546 = vst.msk [vmem:[#allocation2 + $0xb1] sm:$0xff] %vm388_vm0, %v513_v27  ;;  %v631_v16 = vld [vmem:[#allocation2 + $0x1a] sm:$0xff] }
  0x52   : > { %v604_v36 = vld [vmem:[#allocation2 + $0x51] sm:$0xff]  ;;  %549 = vst.msk [vmem:[#allocation2 + $0xd9] sm:$0xff] %vm388_vm0, %v516_v30  ;;  %v11910_v21 = vpack.i.bf16 %v632_v17, %v631_v16  ;;  %v634_v24 = vld [vmem:[#allocation2 + $0x3a] sm:$0xff]  ;;  %v637_v27 = vld [vmem:[#allocation2 + $0x62] sm:$0xff] }
  0x53   : > { %v11841_v38 = vpack.i.bf16 %v604_v36, %v603_v34  ;;  %v609_v39 = vld [vmem:[#allocation2 + $0x91] sm:$0xff]  ;;  %550 = vst.msk [vmem:[#allocation2 + $0xe1] sm:$0xff] %vm388_vm0, %v517_v32  ;;  %v11914_v26 = vpack.i.bf16 %v634_v24, %v633_v22  ;;  %v639_v34 = vld [vmem:[#allocation2 + $0x7a] sm:$0xff] }
  0x54   : > { %v610_v41 = vld [vmem:[#allocation2 + $0x99] sm:$0xff]  ;;  %553 = vst.msk [vmem:[#allocation2 + $0x109] sm:$0xff] %vm388_vm0, %v520_v35  ;;  %v638_v29 = vld [vmem:[#allocation2 + $0x6a] sm:$0xff]  ;;  %v640_v35 = vld [vmem:[#allocation2 + $0x82] sm:$0xff] }
  0x55   : > { %9439 = vrot.lane.b32.xlu2 %v11835_v33, %s11587_s19  ;;  %v11849_v43 = vpack.i.bf16 %v610_v41, %v609_v39  ;;  %554 = vst.msk [vmem:[#allocation2 + $0x111] sm:$0xff] %vm388_vm0, %v521_v37  ;;  %v613_v45 = vld [vmem:[#allocation2 + $0xc1] sm:$0xff]  ;;  %v635_v30 = vld [vmem:[#allocation2 + $0x4a] sm:$0xff]  ;;  %v636_v31 = vld [vmem:[#allocation2 + $0x52] sm:$0xff]  ;;  %v11919_v32 = vpack.i.bf16 %v638_v29, %v637_v27  ;;  %v11925_v37 = vpack.i.bf16 %v640_v35, %v639_v34 }
  0x56   : > { %v614_v46 = vld [vmem:[#allocation2 + $0xc9] sm:$0xff]  ;;  %551 = vst.msk [vmem:[#allocation2 + $0xf1] sm:$0xff] %vm388_vm0, %v518_v40  ;;  %v11921_v36 = vpack.i.bf16 %v636_v31, %v635_v30  ;;  %v641_v41 = vld [vmem:[#allocation2 + $0x92] sm:$0xff]  ;;  %v11987_v29 = vld [vmem:[#allocation2 + $0x60] sm:$0xff] }
  0x57   : > { %9429 = vrot.lane.b32.xlu1 %v11841_v38, %s11587_s19  ;;  %552 = vst.msk [vmem:[#allocation2 + $0xf9] sm:$0xff] %vm388_vm0, %v519_v42  ;;  %v611_v49 = vld [vmem:[#allocation2 + $0xa9] sm:$0xff]  ;;  %v11863_v52 = vpack.i.bf16 %v614_v46, %v613_v45  ;;  %v642_v42 = vld [vmem:[#allocation2 + $0x9a] sm:$0xff] }
  0x58   : > { %v612_v50 = vld [vmem:[#allocation2 + $0xb1] sm:$0xff]  ;;  %555 = vst.msk [vmem:[#allocation2 + $0x121] sm:$0xff] %vm388_vm0, %v522_v44  ;;  %v645_v45 = vld [vmem:[#allocation2 + $0xc2] sm:$0xff] }
  0x59   : > { %9444 = vrot.lane.b32.xlu0 %v11849_v43, %s11587_s19  ;;  %556 = vst.msk [vmem:[#allocation2 + $0x129] sm:$0xff] %vm388_vm0, %v523_v47  ;;  %v615_v54 = vld [vmem:[#allocation2 + $0xd9] sm:$0xff]  ;;  %v11869_v57 = vpack.i.bf16 %v612_v50, %v611_v49  ;;  %v643_v39 = vld [vmem:[#allocation2 + $0xaa] sm:$0xff]  ;;  %v11933_v47 = vpack.i.bf16 %v642_v42, %v641_v41 }
  0x5a   : > { %v616_v55 = vld [vmem:[#allocation2 + $0xe1] sm:$0xff]  ;;  %559 = vst.msk [vmem:[#allocation2 + $0x151] sm:$0xff] %vm388_vm0, %v526_v48  ;;  %v644_v40 = vld [vmem:[#allocation2 + $0xb2] sm:$0xff]  ;;  %v646_v46 = vld [vmem:[#allocation2 + $0xca] sm:$0xff] }
  0x5b   : > { %560 = vst.msk [vmem:[#allocation2 + $0x159] sm:$0xff] %vm388_vm0, %v527_v51  ;;  %v11877_v60 = vpack.i.bf16 %v616_v55, %v615_v54  ;;  %v619_v61 = vld [vmem:[#allocation2 + $0x109] sm:$0xff]  ;;  %v11931_v44 = vpack.i.bf16 %v644_v40, %v643_v39  ;;  %v11937_v48 = vpack.i.bf16 %v646_v46, %v645_v45  ;;  %v647_v51 = vld [vmem:[#allocation2 + $0xda] sm:$0xff] }
  0x5c   : > { %557 = vst.msk [vmem:[#allocation2 + $0x139] sm:$0xff] %vm388_vm0, %v524_v53  ;;  %v620_v62 = vld [vmem:[#allocation2 + $0x111] sm:$0xff]  ;;  %v648_v53 = vld [vmem:[#allocation2 + $0xe2] sm:$0xff] }
  0x5d   : > { %9454 = vrot.lane.b32.xlu2 %v11863_v52, %s11587_s19  ;;  %558 = vst.msk [vmem:[#allocation2 + $0x141] sm:$0xff] %vm388_vm0, %v525_v56  ;;  %v617_v63 = vld [vmem:[#allocation2 + $0xf1] sm:$0xff]  ;;  %v11886_v2 = vpack.i.bf16 %v620_v62, %v619_v61  ;;  %v11989_v30 = vld [vmem:[#allocation2 + $0x68] sm:$0xff]  ;;  %v12006_v40 = vld [vmem:[#allocation2 + $0x80] sm:$0xff] }
  0x5e   : > { %561 = vst.msk [vmem:[#allocation2 + $0x169] sm:$0xff] %vm388_vm0, %v528_v58  ;;  %v618_v1 = vld [vmem:[#allocation2 + $0xf9] sm:$0xff]  ;;  %v651_v55 = vld [vmem:[#allocation2 + $0x10a] sm:$0xff]  ;;  %v11945_v58 = vpack.i.bf16 %v648_v53, %v647_v51  ;;  %v12002_v35 = vpack.i.bf16 %v11989_v30, %v11987_v29 }
  0x5f   : > { %9449 = vrot.lane.b32.xlu1 %v11869_v57, %s11587_s19  ;;  %562 = vst.msk [vmem:[#allocation2 + $0x171] sm:$0xff] %vm388_vm0, %v529_v59  ;;  %v621_v3 = vld [vmem:[#allocation2 + $0x121] sm:$0xff]  ;;  %v11888_v5 = vpack.i.bf16 %v618_v1, %v617_v63  ;;  %v649_v49 = vld [vmem:[#allocation2 + $0xf2] sm:$0xff] }
  0x60   : > { %v622_v4 = vld [vmem:[#allocation2 + $0x129] sm:$0xff]  ;;  %v650_v50 = vld [vmem:[#allocation2 + $0xfa] sm:$0xff]  ;;  %v652_v56 = vld [vmem:[#allocation2 + $0x112] sm:$0xff] }
  0x61   : > { %9459 = vrot.lane.b32.xlu0 %v11877_v60, %s11587_s19  ;;  %v11892_v6 = vpack.i.bf16 %v622_v4, %v621_v3  ;;  %v625_v7 = vld [vmem:[#allocation2 + $0x151] sm:$0xff]  ;;  %v11943_v54 = vpack.i.bf16 %v650_v50, %v649_v49  ;;  %v11949_v59 = vpack.i.bf16 %v652_v56, %v651_v55  ;;  %v653_v63 = vld [vmem:[#allocation2 + $0x122] sm:$0xff] }
  0x62   : > { %v626_v8 = vld [vmem:[#allocation2 + $0x159] sm:$0xff]  ;;  %v654_v1 = vld [vmem:[#allocation2 + $0x12a] sm:$0xff] }
  0x63   : > { %v623_v9 = vld [vmem:[#allocation2 + $0x139] sm:$0xff]  ;;  %v11898_v11 = vpack.i.bf16 %v626_v8, %v625_v7  ;;  %v11957_v8 = vpack.i.bf16 %v654_v1, %v653_v63  ;;  %v11973_v19 = vld [vmem:[#allocation2 + $0x30] sm:$0xff]  ;;  %v11994_v31 = vld [vmem:[#allocation2 + $0x48] sm:$0xff] }
  0x64   : > { %v624_v10 = vld [vmem:[#allocation2 + $0x141] sm:$0xff]  ;;  %v657_v4 = vld [vmem:[#allocation2 + $0x152] sm:$0xff]  ;;  %16553 = vst [vmem:[#allocation7_spill] sm:$0xff] %v11973_v19 }
  0x65   : > { %9469 = vrot.lane.b32.xlu2 %v11886_v2, %s11587_s19  ;;  %v627_v12 = vld [vmem:[#allocation2 + $0x169] sm:$0xff]  ;;  %v11900_v14 = vpack.i.bf16 %v624_v10, %v623_v9  ;;  %v655_v61 = vld [vmem:[#allocation2 + $0x13a] sm:$0xff]  ;;  %16555 = vst [vmem:[#allocation9_spill] sm:$0xff] %v11994_v31 }
  0x66   : > { %v628_v13 = vld [vmem:[#allocation2 + $0x171] sm:$0xff]  ;;  %v656_v62 = vld [vmem:[#allocation2 + $0x142] sm:$0xff]  ;;  %v658_v7 = vld [vmem:[#allocation2 + $0x15a] sm:$0xff] }
  0x67   : > { %9464 = vrot.lane.b32.xlu1 %v11888_v5, %s11587_s19  ;;  %v11904_v15 = vpack.i.bf16 %v628_v13, %v627_v12  ;;  %v11955_v3 = vpack.i.bf16 %v656_v62, %v655_v61  ;;  %v11961_v9 = vpack.i.bf16 %v658_v7, %v657_v4  ;;  %v11963_v10 = vld [vmem:[#allocation2 + $0x18] sm:$0xff]  ;;  %v11965_v12 = vld [vmem:[#allocation2 + $0x20] sm:$0xff]  ;;  %v659_v13 = vld [vmem:[#allocation2 + $0x16a] sm:$0xff] }
  0x68   : > { %16551 = vst [vmem:[#allocation5_spill] sm:$0xff] %v11963_v10  ;;  %v660_v16 = vld [vmem:[#allocation2 + $0x172] sm:$0xff]  ;;  %v9573_v17 = vpack.i.bf16 %v11965_v12, %v11963_v10  ;;  %v12018_v45 = vld [vmem:[#allocation2 + $0xa8] sm:$0xff]  ;;  %v12036_v55 = vld [vmem:[#allocation2 + $0xc0] sm:$0xff] }
  0x69   : > { %9474 = vrot.lane.b32.xlu0 %v11892_v6, %s11587_s19  ;;  %16552 = vst [vmem:[#allocation6_spill] sm:$0xff] %v11965_v12  ;;  %v11975_v20 = vld [vmem:[#allocation2 + $0x38] sm:$0xff]  ;;  %v11977_v22 = vpack.i.bf16 %v660_v16, %v659_v13  ;;  %v530_v24 = vld [vmem:[%s11778_s23 + $0xf0] sm:$0xff]  ;;  %v12038_v56 = vld [vmem:[#allocation2 + $0xc8] sm:$0xff] }
  0x6a   : > { %16554 = vst [vmem:[#allocation8_spill] sm:$0xff] %v11975_v20  ;;  %v531_v27 = vld [vmem:[%s11778_s23 + $0xf8] sm:$0xff]  ;;  %v11996_v34 = vld [vmem:[#allocation2 + $0x50] sm:$0xff]  ;;  %v12048_v62 = vpack.i.bf16 %v12038_v56, %v12036_v55  ;;  %v12060_v13 = vld [vmem:[#allocation2 + $0xe0] sm:$0xff] }
  0x6b   : > { %563 = vst.msk [vmem:[#allocation2 + $0x181] sm:$0xff] %vm388_vm0, %v530_v24  ;;  %v12004_v39 = vld [vmem:[#allocation2 + $0x78] sm:$0xff]  ;;  %v12010_v41 = vpack.i.bf16 %v11996_v34, %v11994_v31  ;;  %v12020_v46 = vld [vmem:[#allocation2 + $0xb0] sm:$0xff] }
  0x6c   : > { %564 = vst.msk [vmem:[#allocation2 + $0x189] sm:$0xff] %vm388_vm0, %v531_v27  ;;  %v12016_v42 = vpack.i.bf16 %v12006_v40, %v12004_v39  ;;  %v12026_v50 = vld [vmem:[#allocation2 + $0x90] sm:$0xff]  ;;  %v12028_v51 = vld [vmem:[#allocation2 + $0x98] sm:$0xff]  ;;  %v12034_v53 = vpack.i.bf16 %v12020_v46, %v12018_v45 }
  0x6d   : > { %9484 = vrot.lane.b32.xlu2 %v11898_v11, %s11587_s19  ;;  %16556 = vst [vmem:[#allocation10_spill] sm:$0xff] %v11996_v34  ;;  %v12042_v61 = vpack.i.bf16 %v12028_v51, %v12026_v50  ;;  %v12050_v63 = vld [vmem:[#allocation2 + $0xf0] sm:$0xff]  ;;  %v12052_v1 = vld [vmem:[#allocation2 + $0xf8] sm:$0xff] }
  0x6e   : > { %16557 = vst [vmem:[#allocation11_spill] sm:$0xff] %v12018_v45  ;;  %v12058_v7 = vld [vmem:[#allocation2 + $0xd8] sm:$0xff]  ;;  %v12066_v16 = vpack.i.bf16 %v12052_v1, %v12050_v63  ;;  %v12070_v24 = vld [vmem:[#allocation2 + $0x110] sm:$0xff] }
  0x6f   : > { %9479 = vrot.lane.b32.xlu1 %v11900_v14, %s11587_s19  ;;  %16558 = vst [vmem:[#allocation12_spill] sm:$0xff] %v12020_v46  ;;  %v12074_v27 = vpack.i.bf16 %v12060_v13, %v12058_v7  ;;  %v12082_v45 = vld [vmem:[#allocation2 + $0x138] sm:$0xff]  ;;  %v12084_v46 = vld [vmem:[#allocation2 + $0x140] sm:$0xff] }
  0x70   : > { %16559 = vst [vmem:[#allocation13_spill] sm:$0xff] %v12026_v50  ;;  %v12100_v50 = vpack.i.bf16 %v12084_v46, %v12082_v45  ;;  %v12104_v31 = vld [vmem:[#allocation2 + $0x158] sm:$0xff] }
  0x71   : > { %9489 = vrot.lane.b32.xlu0 %v11904_v15, %s11587_s19  ;;  %16560 = vst [vmem:[#allocation14_spill] sm:$0xff] %v12028_v51  ;;  %v12102_v51 = vld [vmem:[#allocation2 + $0x150] sm:$0xff] }
  0x72   : > { %16561 = vst [vmem:[#allocation15_spill] sm:$0xff] %v12050_v63  ;;  %v12114_v12 = vpack.i.bf16 %v12104_v31, %v12102_v51 }
  0x73   : > { %16562 = vst [vmem:[#allocation16_spill] sm:$0xff] %v12052_v1  ;;  %v12090_v1 = vld [vmem:[#allocation2 + $0x120] sm:$0xff]  ;;  %v692_v10 = vld [vmem:[#allocation2 + $0x188] sm:$0xff] }
  0x74   : > { %16563 = vst [vmem:[#allocation17_spill] sm:$0xff] %v12058_v7  ;;  %v12092_v7 = vld [vmem:[#allocation2 + $0x128] sm:$0xff] }
  0x75   : > { %9499 = vrot.lane.b32.xlu2 %v11910_v21, %s11588_s24  ;;  %16564 = vst [vmem:[#allocation18_spill] sm:$0xff] %v12060_v13  ;;  %v12108_v34 = vpack.i.bf16 %v12092_v7, %v12090_v1 }
  0x76   : > { %16566 = vst [vmem:[#allocation20_spill] sm:$0xff] %v12070_v24 }
  0x77   : > { %9494 = vrot.lane.b32.xlu1 %v9493_v25, %s11588_s24  ;;  %v11983_v25 = vpack.i.bf16 %v11975_v20, %v11973_v19  ;;  %16567 = vst [vmem:[#allocation21_spill] sm:$0xff] %v12082_v45  ;;  %v691_v20 = vld [vmem:[#allocation2 + $0x180] sm:$0xff]  ;;  %v12122_v19 = vld [vmem:[#allocation2 + $0x170] sm:$0xff] }
  0x78   : > { %16568 = vst [vmem:[#allocation22_spill] sm:$0xff] %v12084_v46  ;;  %v12120_v46 = vld [vmem:[#allocation2 + $0x168] sm:$0xff] }
  0x79   : > { %9504 = vrot.lane.b32.xlu0 %v11914_v26, %s11588_s24  ;;  %16569 = vst [vmem:[#allocation23_spill] sm:$0xff] %v12090_v1 }
  0x7a   : > { %16570 = vst [vmem:[#allocation24_spill] sm:$0xff] %v12092_v7  ;;  %v12128_v7 = vpack.i.bf16 %v692_v10, %v691_v20 }
  0x7b   : > { %16572 = vst [vmem:[#allocation26_spill] sm:$0xff] %v12120_v46 }
  0x7c   : > { %16573 = vst [vmem:[#allocation27_spill] sm:$0xff] %v12122_v19 }
  0x7d   : > { %9514 = vrot.lane.b32.xlu2 %v11919_v32, %s11588_s24 }
  0x7f   : > { %9509 = vrot.lane.b32.xlu1 %v11921_v36, %s11588_s24 }
  0x81   : > { %9519 = vrot.lane.b32.xlu0 %v11925_v37, %s11588_s24 }
  0x85   : > { %9529 = vrot.lane.b32.xlu2 %v11931_v44, %s11588_s24 }
  0x87   : > { %9524 = vrot.lane.b32.xlu1 %v11933_v47, %s11588_s24 }
  0x89   : > { %9534 = vrot.lane.b32.xlu0 %v11937_v48, %s11588_s24 }
  0x8a   : > { %v12096_v13 = vpop.permute.xlu0 %9414 }
  0x8d   : > { %9544 = vrot.lane.b32.xlu2 %v11943_v54, %s11588_s24 }
  0x8f   : > { %9539 = vrot.lane.b32.xlu1 %v11945_v58, %s11588_s24 }
  0x91   : > { %9549 = vrot.lane.b32.xlu0 %v11949_v59, %s11588_s24 }
  0x95   : > { %9559 = vrot.lane.b32.xlu2 %v11955_v3, %s11588_s24 }
  0x97   : > { %9554 = vrot.lane.b32.xlu1 %v11957_v8, %s11588_s24 }
  0x99   : > { %9564 = vrot.lane.b32.xlu0 %v11961_v9, %s11588_s24 }
  0x9d   : > { %9574 = vrot.lane.b32.xlu2 %v9573_v17, %s11589_s25  ;;  %v12068_v17 = vld [vmem:[#allocation2 + $0x108] sm:$0xff] }
  0x9e   : > { %16565 = vst [vmem:[#allocation19_spill] sm:$0xff] %v12068_v17  ;;  %v12080_v0 = vpack.i.bf16 %v12070_v24, %v12068_v17  ;;  %v12134_v24 = vpack.i.bf16 %v12122_v19, %v12120_v46 }
  0x9f   : > { %9569 = vrot.lane.b32.xlu1 %v11977_v22, %s11588_s24 }
  0xa1   : > { %9579 = vrot.lane.b32.xlu0 %v11983_v25, %s11589_s25 }
  0xa5   : > { %9589 = vrot.lane.b32.xlu2 %v12002_v35, %s11589_s25 }
  0xa7   : > { %9584 = vrot.lane.b32.xlu1 %v12010_v41, %s11589_s25  ;;  %v12024_v49 = vpop.permute.xlu2 %9434 }
  0xa9   : > { %9594 = vrot.lane.b32.xlu0 %v12016_v42, %s11589_s25 }
  0xad   : > { %9604 = vrot.lane.b32.xlu2 %v12034_v53, %s11589_s25 }
  0xaf   : > { %9599 = vrot.lane.b32.xlu1 %v12042_v61, %s11589_s25  ;;  %v12056_v4 = vpop.permute.xlu2 %9439 }
  0xb1   : > { %9609 = vrot.lane.b32.xlu0 %v12048_v62, %s11589_s25 }
  0xb5   : > { %9619 = vrot.lane.b32.xlu2 %v12066_v16, %s11589_s25 }
  0xb7   : > { %9614 = vrot.lane.b32.xlu1 %v12074_v27, %s11589_s25  ;;  %v12088_v63 = vpop.permute.xlu2 %9454 }
  0xb9   : > { %9624 = vrot.lane.b32.xlu0 %v12080_v0, %s11589_s25 }
  0xbd   : > { %9634 = vrot.lane.b32.xlu2 %v12100_v50, %s11589_s25 }
  0xbf   : > { %9629 = vrot.lane.b32.xlu1 %v12108_v34, %s11589_s25  ;;  %v12118_v45 = vpop.permute.xlu2 %9469 }
  0xc0   : > { %16571 = vst [vmem:[#allocation25_spill] sm:$0xff] %v12118_v45 }
  0xc1   : > { %v12124_v1 = vpop.permute.xlu1 %9424  ;;  %9639 = vrot.lane.b32.xlu0 %v12114_v12, %s11589_s25 }
  0xc2   : > { %16574 = vst [vmem:[#allocation28_spill] sm:$0xff] %v12124_v1 }
  0xc3   : > { %v12130_v17 = vpop.permute.xlu0 %9419 }
  0xc5   : > { %9649 = vrot.lane.b32.xlu2 %v12128_v7, %s11589_s25 }
  0xc7   : > { %9644 = vrot.lane.b32.xlu1 %v12134_v24, %s11589_s25  ;;  %v12140_v45 = vpop.permute.xlu2 %9484 }
  0xc9   : > { %v12142_v1 = vpop.permute.xlu1 %9429  ;;  %9654 = vrot.lane.b32.xlu0 %v11827_v28, %s11590_s26 }
  0xcb   : > { %v12146_v10 = vpop.permute.xlu0 %9444 }
  0xcd   : > { %9664 = vrot.lane.b32.xlu2 %v11841_v38, %s11590_s26 }
  0xcf   : > { %9659 = vrot.lane.b32.xlu1 %v11819_v23, %s11590_s26  ;;  %v12152_v20 = vpop.permute.xlu2 %9499 }
  0xd1   : > { %v12154_v46 = vpop.permute.xlu1 %9449  ;;  %9669 = vrot.lane.b32.xlu0 %v11811_v18, %s11590_s26 }
  0xd3   : > { %v12158_v19 = vpop.permute.xlu0 %9459 }
  0xd5   : > { %9679 = vrot.lane.b32.xlu2 %v11849_v43, %s11590_s26 }
  0xd7   : > { %9674 = vrot.lane.b32.xlu1 %v11835_v33, %s11590_s26  ;;  %v12164_v28 = vpop.permute.xlu2 %9514 }
  0xd9   : > { %v12166_v38 = vpop.permute.xlu1 %9464  ;;  %9684 = vrot.lane.b32.xlu0 %v11869_v57, %s11590_s26 }
  0xdb   : > { %v12170_v23 = vpop.permute.xlu0 %9474 }
  0xdd   : > { %9694 = vrot.lane.b32.xlu2 %v11877_v60, %s11590_s26 }
  0xdf   : > { %9689 = vrot.lane.b32.xlu1 %v11863_v52, %s11590_s26  ;;  %v12176_v18 = vpop.permute.xlu2 %9529  ;;  %v723_v52 = vld [vmem:[#allocation2 + $0x181] sm:$0xff] }
  0xe0   : > { %16575 = vst [vmem:[#allocation29_spill] sm:$0xff] %v12176_v18  ;;  %v724_v18 = vld [vmem:[#allocation2 + $0x189] sm:$0xff] }
  0xe1   : > { %v12178_v43 = vpop.permute.xlu1 %9479  ;;  %9699 = vrot.lane.b32.xlu0 %v11888_v5, %s11590_s26  ;;  %v12198_v5 = vpack.i.bf16 %v724_v18, %v723_v52 }
  0xe2   : > { %16576 = vst [vmem:[#allocation30_spill] sm:$0xff] %v12178_v43 }
  0xe3   : > { %v12182_v33 = vpop.permute.xlu0 %9489 }
  0xe5   : > { %9709 = vrot.lane.b32.xlu2 %v11892_v6, %s11590_s26 }
  0xe7   : > { %9704 = vrot.lane.b32.xlu1 %v11886_v2, %s11590_s26  ;;  %v12188_v57 = vpop.permute.xlu2 %9544 }
  0xe9   : > { %v12190_v60 = vpop.permute.xlu1 %9494  ;;  %9714 = vrot.lane.b32.xlu0 %v11900_v14, %s11590_s26 }
  0xeb   : > { %v12194_v43 = vpop.permute.xlu0 %9504 }
  0xed   : > { %9724 = vrot.lane.b32.xlu2 %v11904_v15, %s11590_s26 }
  0xef   : > { %9719 = vrot.lane.b32.xlu1 %v11898_v11, %s11590_s26  ;;  %v12202_v2 = vpop.permute.xlu2 %9559 }
  0xf1   : > { %v12204_v6 = vpop.permute.xlu1 %9509  ;;  %9729 = vrot.lane.b32.xlu0 %v12198_v5, %s11590_s26 }
  0xf3   : > { %v12208_v14 = vpop.permute.xlu0 %9519 }
  0xf5   : > { %9739 = vrot.lane.b32.xlu2 %v11914_v26, %s11591_s27 }
  0xf7   : > { %9734 = vrot.lane.b32.xlu1 %v11910_v21, %s11591_s27  ;;  %v12214_v15 = vpop.permute.xlu2 %9574 }
  0xf9   : > { %v12216_v18 = vpop.permute.xlu1 %9524  ;;  %9744 = vrot.lane.b32.xlu0 %v11921_v36, %s11591_s27 }
  0xfb   : > { %v12220_v11 = vpop.permute.xlu0 %9534 }
  0xfd   : > { %9754 = vrot.lane.b32.xlu2 %v11925_v37, %s11591_s27 }
  0xff   : > { %9749 = vrot.lane.b32.xlu1 %v11919_v32, %s11591_s27  ;;  %v12226_v52 = vpop.permute.xlu2 %9589 }
 0x100   : > { %16577 = vst [vmem:[#allocation31_spill] sm:$0xff] %v12226_v52  ;;  %v756_v52 = vld [vmem:[#allocation2 + $0x18a] sm:$0xff] }
 0x101   : > { %v12228_v26 = vpop.permute.xlu1 %9539  ;;  %9759 = vrot.lane.b32.xlu0 %v11933_v47, %s11591_s27 }
 0x103   : > { %v12232_v21 = vpop.permute.xlu0 %9549 }
 0x105   : > { %9769 = vrot.lane.b32.xlu2 %v11937_v48, %s11591_s27 }
 0x107   : > { %9764 = vrot.lane.b32.xlu1 %v11931_v44, %s11591_s27  ;;  %v12238_v36 = vpop.permute.xlu2 %9604 }
 0x109   : > { %v12240_v37 = vpop.permute.xlu1 %9554  ;;  %9774 = vrot.lane.b32.xlu0 %v11945_v58, %s11591_s27 }
 0x10b   : > { %v12244_v32 = vpop.permute.xlu0 %9564 }
 0x10d   : > { %9784 = vrot.lane.b32.xlu2 %v11949_v59, %s11591_s27  ;;  %v755_v59 = vld [vmem:[#allocation2 + $0x182] sm:$0xff] }
 0x10f   : > { %9779 = vrot.lane.b32.xlu1 %v11943_v54, %s11591_s27  ;;  %v12250_v47 = vpop.permute.xlu2 %9619 }
 0x110   : > { %16578 = vst [vmem:[#allocation32_spill] sm:$0xff] %v12250_v47 }
 0x111   : > { %v12252_v48 = vpop.permute.xlu1 %9569  ;;  %9789 = vrot.lane.b32.xlu0 %v11957_v8, %s11591_s27  ;;  %v12270_v8 = vpack.i.bf16 %v756_v52, %v755_v59  ;;  %v9442_v52 = vunpack.i.h.bf16 %v12056_v4  ;;  %v9441_v59 = vunpack.i.l.bf16 %v12056_v4 }
 0x113   : > { %v12256_v44 = vpop.permute.xlu0 %9579 }
 0x114   : > { %16579 = vst [vmem:[#allocation33_spill] sm:$0xff] %v12256_v44 }
 0x115   : > { %9799 = vrot.lane.b32.xlu2 %v11961_v9, %s11591_s27 }
 0x117   : > { %9794 = vrot.lane.b32.xlu1 %v11955_v3, %s11591_s27  ;;  %v12262_v58 = vpop.permute.xlu2 %9634 }
 0x118   : > { %16580 = vst [vmem:[#allocation34_spill] sm:$0xff] %v12262_v58 }
 0x119   : > { %v12264_v54 = vpop.permute.xlu1 %9584  ;;  %9804 = vrot.lane.b32.xlu0 %v11977_v22, %s11591_s27 }
 0x11a   : > { %16581 = vst [vmem:[#allocation35_spill] sm:$0xff] %v12264_v54 }
 0x11b   : > { %v12268_v47 = vpop.permute.xlu0 %9594 }
 0x11d   : > { %9814 = vrot.lane.b32.xlu2 %v11983_v25, %s11592_s28 }
 0x11f   : > { %9809 = vrot.lane.b32.xlu1 %v12270_v8, %s11591_s27  ;;  %v12276_v3 = vpop.permute.xlu2 %9649  ;;  %s11596_s27 = smov 64  }
 0x120   : > { %16582 = vst [vmem:[#allocation36_spill] sm:$0xff] %v12276_v3  ;;  %v9521_v3 = vunpack.i.l.bf16 %v12208_v14 }
 0x121   : > { %v9600_v9 = vpop.permute.xlu1 %9599  ;;  %9819 = vrot.lane.b32.xlu0 %v12010_v41, %s11592_s28  ;;  %v9522_v41 = vunpack.i.h.bf16 %v12208_v14 }
 0x122   : > { %v9601_v58 = vunpack.i.l.bf16 %v9600_v9 }
 0x123   : > { %v12280_v54 = vpop.permute.xlu0 %9609 }
 0x124   : > { %16583 = vst [vmem:[#allocation37_spill] sm:$0xff] %v12280_v54 }
 0x125   : > { %9829 = vrot.lane.b32.xlu2 %v12016_v42, %s11592_s28  ;;  %v9602_v42 = vunpack.i.h.bf16 %v9600_v9 }
 0x127   : > { %9824 = vrot.lane.b32.xlu1 %v12002_v35, %s11592_s28  ;;  %v12286_v22 = vpop.permute.xlu2 %9664  ;;  %v1889_v35 = vsel %vm388_vm0, %v12006_v40, %v9442_v52  ;;  %v9456_v52 = vunpack.i.l.bf16 %v12088_v63 }
 0x128   : > { %16584 = vst [vmem:[#allocation38_spill] sm:$0xff] %v12286_v22 }
 0x129   : > { %v9615_v25 = vpop.permute.xlu1 %9614  ;;  %9834 = vrot.lane.b32.xlu0 %v12042_v61, %s11592_s28  ;;  %v1888_v61 = vsel %vm388_vm0, %v12004_v39, %v9441_v59 }
 0x12a   : > { %v1921_v14 = vsel %vm1910_vm2, %v1888_v61, %v9521_v3  ;;  %v9457_v3 = vunpack.i.h.bf16 %v12088_v63 }
 0x12b   : > { %v12292_v44 = vpop.permute.xlu0 %9624 }
 0x12c   : > { %16585 = vst [vmem:[#allocation39_spill] sm:$0xff] %v12292_v44  ;;  %v1922_v44 = vsel %vm1910_vm2, %v1889_v35, %v9522_v41  ;;  %v9617_v41 = vunpack.i.h.bf16 %v9615_v25 }
 0x12d   : > { %9844 = vrot.lane.b32.xlu2 %v12048_v62, %s11592_s28  ;;  %v1954_v62 = vsel %vm1943_vm3, %v1921_v14, %v9601_v58  ;;  %v1955_v54 = vsel %vm1943_vm3, %v1922_v44, %v9602_v42  ;;  %v9537_v44 = vunpack.i.h.bf16 %v12220_v11  ;;  %v9536_v58 = vunpack.i.l.bf16 %v12220_v11  ;;  %v788_v14 = vld [vmem:[#allocation2 + $0x198] sm:$0xff] }
 0x12e   : > { %v9616_v42 = vunpack.i.l.bf16 %v9615_v25 }
 0x12f   : > { %9839 = vrot.lane.b32.xlu1 %v12034_v53, %s11592_s28  ;;  %v9680_v4 = vpop.permute.xlu2 %9679 }
 0x130   : > { %v9682_v9 = vunpack.i.h.bf16 %v9680_v4  ;;  %v9681_v22 = vunpack.i.l.bf16 %v9680_v4 }
 0x131   : > { %v12308_v40 = vpop.permute.xlu1 %9629  ;;  %9849 = vrot.lane.b32.xlu0 %v12074_v27, %s11592_s28  ;;  %v1895_v27 = vsel %vm388_vm0, %v12038_v56, %v9457_v3 }
 0x132   : > { %16586 = vst [vmem:[#allocation40_spill] sm:$0xff] %v12308_v40  ;;  %v12313_v39 = vsel %vm1976_vm4, %v1954_v62, %v9681_v22  ;;  %v12316_v53 = vsel %vm1976_vm4, %v1955_v54, %v9682_v9  ;;  %v1894_v54 = vsel %vm388_vm0, %v12036_v55, %v9456_v52  ;;  %v1928_v22 = vsel %vm1910_vm2, %v1895_v27, %v9537_v44  ;;  %v789_v9 = vld [vmem:[#allocation2 + $0x1a0] sm:$0xff] }
 0x133   : > { %v12320_v59 = vpop.permute.xlu0 %9639  ;;  %v1927_v35 = vsel %vm1910_vm2, %v1894_v54, %v9536_v58  ;;  %v9437_v52 = vunpack.i.h.bf16 %v12024_v49  ;;  %v9436_v44 = vunpack.i.l.bf16 %v12024_v49  ;;  %v9487_v58 = vunpack.i.h.bf16 %v12140_v45  ;;  %v847_v40 = vld [vmem:[#allocation2 + $0x15a] sm:$0xff] }
 0x134   : > { %16587 = vst [vmem:[#allocation41_spill] sm:$0xff] %v12320_v59  ;;  %v1960_v25 = vsel %vm1943_vm3, %v1927_v35, %v9616_v42  ;;  %v9486_v42 = vunpack.i.l.bf16 %v12140_v45  ;;  %v9567_v54 = vunpack.i.h.bf16 %v12244_v32 }
 0x135   : > { %9859 = vrot.lane.b32.xlu2 %v12080_v0, %s11592_s28  ;;  %v1961_v0 = vsel %vm1943_vm3, %v1928_v22, %v9617_v41  ;;  %v791_v41 = vld [vmem:[#allocation2 + $0x39] sm:$0xff]  ;;  %v1887_v45 = vsel %vm388_vm0, %v11989_v30, %v9437_v52  ;;  %v792_v52 = vld [vmem:[#allocation2 + $0x49] sm:$0xff] }
 0x137   : > { %9854 = vrot.lane.b32.xlu1 %v12066_v16, %s11592_s28  ;;  %v9695_v63 = vpop.permute.xlu2 %9694 }
 0x138   : > { %v9697_v11 = vunpack.i.h.bf16 %v9695_v63  ;;  %v9696_v61 = vunpack.i.l.bf16 %v9695_v63  ;;  %v9566_v63 = vunpack.i.l.bf16 %v12244_v32  ;;  %v1906_v32 = vsel %vm388_vm0, %v12102_v51, %v9486_v42 }
 0x139   : > { %v9645_v4 = vpop.permute.xlu1 %9644  ;;  %9864 = vrot.lane.b32.xlu0 %v12108_v34, %s11592_s28  ;;  %v9888_v34 = vpack.i.bf16 %v789_v9, %v788_v14  ;;  %v9596_v14 = vunpack.i.l.bf16 %v12268_v47 }
 0x13a   : > { %v12339_v55 = vsel %vm1976_vm4, %v1960_v25, %v9696_v61  ;;  %v12342_v56 = vsel %vm1976_vm4, %v1961_v0, %v9697_v11  ;;  %v9647_v22 = vunpack.i.h.bf16 %v9645_v4  ;;  %v9646_v35 = vunpack.i.l.bf16 %v9645_v4  ;;  %v794_v25 = vld [vmem:[#allocation2 + $0x61] sm:$0xff]  ;;  %v795_v0 = vld [vmem:[#allocation2 + $0x69] sm:$0xff] }
 0x13b   : > { %v12344_v16 = vpop.permute.xlu0 %9654  ;;  %v1886_v11 = vsel %vm388_vm0, %v11987_v29, %v9436_v44  ;;  %v1907_v61 = vsel %vm388_vm0, %v12104_v31, %v9487_v58  ;;  %v9597_v4 = vunpack.i.h.bf16 %v12268_v47  ;;  %v1939_v9 = vsel %vm1910_vm2, %v1906_v32, %v9566_v63  ;;  %v793_v44 = vld [vmem:[#allocation2 + $0x51] sm:$0xff]  ;;  %v796_v63 = vld [vmem:[#allocation2 + $0x79] sm:$0xff] }
 0x13c   : > { %16588 = vst [vmem:[#allocation42_spill] sm:$0xff] %v12344_v16  ;;  %v1940_v30 = vsel %vm1910_vm2, %v1907_v61, %v9567_v54  ;;  %v1972_v58 = vsel %vm1943_vm3, %v1939_v9, %v9646_v35  ;;  %v801_v32 = vld [vmem:[#allocation2 + $0xb1] sm:$0xff]  ;;  %v802_v9 = vld [vmem:[#allocation2 + $0xc1] sm:$0xff]  ;;  %v9467_v16 = vunpack.i.h.bf16 %v12166_v38 }
 0x13d   : > { %9874 = vrot.lane.b32.xlu2 %v12114_v12, %s11592_s28  ;;  %v790_v12 = vld [vmem:[#allocation2 + $0x31] sm:$0xff] }
 0x13e   : > { %v9893_v49 = vpack.i.bf16 %v791_v41, %v790_v12  ;;  %v1973_v12 = vsel %vm1943_vm3, %v1940_v30, %v9647_v22 }
 0x13f   : > { %9869 = vrot.lane.b32.xlu1 %v12100_v50, %s11592_s28  ;;  %v12350_v62 = vpop.permute.xlu2 %9709  ;;  %v9517_v50 = vunpack.i.h.bf16 %v12164_v28 }
 0x140   : > { %16589 = vst [vmem:[#allocation43_spill] sm:$0xff] %v12350_v62 }
 0x141   : > { %v12352_v3 = vpop.permute.xlu1 %9659  ;;  %9879 = vrot.lane.b32.xlu0 %v12134_v24, %s11592_s28  ;;  %v9516_v24 = vunpack.i.l.bf16 %v12164_v28  ;;  %v1920_v28 = vsel %vm1910_vm2, %v1887_v45, %v9517_v50  ;;  %v797_v45 = vld [vmem:[#allocation2 + $0x81] sm:$0xff] }
 0x142   : > { %16590 = vst [vmem:[#allocation44_spill] sm:$0xff] %v12352_v3 }
 0x143   : > { %v12361_v27 = vpop.permute.xlu0 %9669  ;;  %v1919_v51 = vsel %vm1910_vm2, %v1886_v11, %v9516_v24  ;;  %v1953_v24 = vsel %vm1943_vm3, %v1920_v28, %v9597_v4  ;;  %v9898_v11 = vpack.i.bf16 %v793_v44, %v792_v52  ;;  %v798_v28 = vld [vmem:[#allocation2 + $0x91] sm:$0xff]  ;;  %v799_v4 = vld [vmem:[#allocation2 + $0x99] sm:$0xff] }
 0x144   : > { %16591 = vst [vmem:[#allocation45_spill] sm:$0xff] %v12361_v27  ;;  %v1952_v35 = vsel %vm1943_vm3, %v1919_v51, %v9596_v14  ;;  %v9913_v52 = vpack.i.bf16 %v799_v4, %v798_v28  ;;  %v806_v51 = vld [vmem:[#allocation2 + $0xf1] sm:$0xff]  ;;  %v810_v28 = vld [vmem:[#allocation2 + $0x121] sm:$0xff]  ;;  %v811_v4 = vld [vmem:[#allocation2 + $0x129] sm:$0xff] }
 0x145   : > { %9889 = vrot.lane.b32.xlu2 %v9888_v34, %s11592_s28  ;;  %v826_v27 = vld [vmem:[#allocation2 + $0x62] sm:$0xff] }
 0x147   : > { %9884 = vrot.lane.b32.xlu1 %v12128_v7, %s11592_s28  ;;  %v9725_v29 = vpop.permute.xlu2 %9724  ;;  %v9903_v7 = vpack.i.bf16 %v795_v0, %v794_v25  ;;  %v9908_v25 = vpack.i.bf16 %v797_v45, %v796_v63  ;;  %v800_v0 = vld [vmem:[#allocation2 + $0xa9] sm:$0xff]  ;;  %v809_v45 = vld [vmem:[#allocation2 + $0x111] sm:$0xff]  ;;  %s11597_s28 = smov 32  }
 0x148   : > { %v9727_v31 = vunpack.i.h.bf16 %v9725_v29  ;;  %v9726_v34 = vunpack.i.l.bf16 %v9725_v29  ;;  %v9918_v30 = vpack.i.bf16 %v801_v32, %v800_v0  ;;  %v808_v63 = vld [vmem:[#allocation2 + $0x109] sm:$0xff]  ;;  %v813_v0 = vld [vmem:[#allocation2 + $0x141] sm:$0xff] }
 0x149   : > { %v9675_v41 = vpop.permute.xlu1 %9674  ;;  %9894 = vrot.lane.b32.xlu0 %v9893_v49, %s11593_s29 }
 0x14a   : > { %v9677_v47 = vunpack.i.h.bf16 %v9675_v41  ;;  %v9676_v42 = vunpack.i.l.bf16 %v9675_v41  ;;  %v12387_v50 = vsel %vm1976_vm4, %v1972_v58, %v9726_v34  ;;  %v12390_v54 = vsel %vm1976_vm4, %v1973_v12, %v9727_v31  ;;  %v803_v31 = vld [vmem:[#allocation2 + $0xc9] sm:$0xff]  ;;  %v807_v58 = vld [vmem:[#allocation2 + $0xf9] sm:$0xff] }
 0x14b   : > { %v12394_v22 = vpop.permute.xlu0 %9684  ;;  %v9923_v44 = vpack.i.bf16 %v803_v31, %v802_v9  ;;  %v804_v41 = vld [vmem:[#allocation2 + $0xd9] sm:$0xff]  ;;  %v814_v31 = vld [vmem:[#allocation2 + $0x151] sm:$0xff] }
 0x14c   : > { %v12397_v49 = vsel %vm1976_vm4, %v1952_v35, %v9676_v42  ;;  %v12400_v61 = vsel %vm1976_vm4, %v1953_v24, %v9677_v47  ;;  %v9933_v42 = vpack.i.bf16 %v807_v58, %v806_v51  ;;  %v9943_v51 = vpack.i.bf16 %v811_v4, %v810_v28  ;;  %v824_v28 = vld [vmem:[#allocation2 + $0x4a] sm:$0xff]  ;;  %v825_v4 = vld [vmem:[#allocation2 + $0x52] sm:$0xff] }
 0x14d   : > { %9904 = vrot.lane.b32.xlu2 %v9903_v7, %s11593_s29  ;;  %v805_v7 = vld [vmem:[#allocation2 + $0xe1] sm:$0xff] }
 0x14e   : > { %v9928_v35 = vpack.i.bf16 %v805_v7, %v804_v41  ;;  %v816_v7 = vld [vmem:[#allocation2 + $0x169] sm:$0xff] }
 0x14f   : > { %9899 = vrot.lane.b32.xlu1 %v9898_v11, %s11593_s29  ;;  %v12404_v29 = vpop.permute.xlu2 %9739  ;;  %v9938_v11 = vpack.i.bf16 %v809_v45, %v808_v63  ;;  %v820_v45 = vld [vmem:[#allocation2 + $0x199] sm:$0xff] }
 0x150   : > { %16592 = vst [vmem:[#allocation46_spill] sm:$0xff] %v12404_v29  ;;  %v835_v29 = vld [vmem:[#allocation2 + $0xca] sm:$0xff] }
 0x151   : > { %v12406_v14 = vpop.permute.xlu1 %9689  ;;  %9909 = vrot.lane.b32.xlu0 %v9908_v25, %s11593_s29  ;;  %v812_v25 = vld [vmem:[#allocation2 + $0x139] sm:$0xff] }
 0x152   : > { %16593 = vst [vmem:[#allocation47_spill] sm:$0xff] %v12406_v14  ;;  %v9948_v9 = vpack.i.bf16 %v813_v0, %v812_v25  ;;  %v9547_v14 = vunpack.i.h.bf16 %v12188_v57 }
 0x153   : > { %v12409_v34 = vpop.permute.xlu0 %9699 }
 0x154   : > { %16594 = vst [vmem:[#allocation48_spill] sm:$0xff] %v12409_v34  ;;  %v834_v34 = vld [vmem:[#allocation2 + $0xc2] sm:$0xff] }
 0x155   : > { %9919 = vrot.lane.b32.xlu2 %v9918_v30, %s11593_s29 }
 0x157   : > { %9914 = vrot.lane.b32.xlu1 %v9913_v52, %s11593_s29  ;;  %v12413_v12 = vpop.permute.xlu2 %9754  ;;  %v815_v52 = vld [vmem:[#allocation2 + $0x159] sm:$0xff] }
 0x158   : > { %v9953_v58 = vpack.i.bf16 %v815_v52, %v814_v31  ;;  %v822_v31 = vld [vmem:[#allocation2 + $0x32] sm:$0xff]  ;;  %v823_v52 = vld [vmem:[#allocation2 + $0x3a] sm:$0xff] }
 0x159   : > { %v12415_v47 = vpop.permute.xlu1 %9704  ;;  %9924 = vrot.lane.b32.xlu0 %v9923_v44, %s11593_s29 }
 0x15a   : > { %16595 = vst [vmem:[#allocation49_spill] sm:$0xff] %v12415_v47 }
 0x15b   : > { %v12418_v24 = vpop.permute.xlu0 %9714 }
 0x15c   : > { %16596 = vst [vmem:[#allocation50_spill] sm:$0xff] %v12418_v24  ;;  %v16627_v24 = vld [vmem:[#allocation10_spill] sm:$0xff] }
 0x15d   : > { %9934 = vrot.lane.b32.xlu2 %v9933_v42, %s11593_s29  ;;  %v817_v42 = vld [vmem:[#allocation2 + $0x171] sm:$0xff] }
 0x15e   : > { %v9958_v25 = vpack.i.bf16 %v817_v42, %v816_v7  ;;  %v9973_v42 = vpack.i.bf16 %v823_v52, %v822_v31 }
 0x15f   : > { %9929 = vrot.lane.b32.xlu1 %v9928_v35, %s11593_s29  ;;  %v12422_v32 = vpop.permute.xlu2 %9769  ;;  %v821_v35 = vld [vmem:[#allocation2 + $0x1a1] sm:$0xff] }
 0x160   : > { %16597 = vst [vmem:[#allocation51_spill] sm:$0xff] %v12422_v32  ;;  %v9968_v0 = vpack.i.bf16 %v821_v35, %v820_v45  ;;  %v830_v45 = vld [vmem:[#allocation2 + $0x92] sm:$0xff]  ;;  %v831_v35 = vld [vmem:[#allocation2 + $0x9a] sm:$0xff] }
 0x161   : > { %v12424_v30 = vpop.permute.xlu1 %9719  ;;  %9939 = vrot.lane.b32.xlu0 %v9938_v11, %s11593_s29 }
 0x162   : > { %16598 = vst [vmem:[#allocation52_spill] sm:$0xff] %v12424_v30  ;;  %v16622_v30 = vld [vmem:[#allocation7_spill] sm:$0xff] }
 0x163   : > { %v12427_v44 = vpop.permute.xlu0 %9729 }
 0x164   : > { %16599 = vst [vmem:[#allocation53_spill] sm:$0xff] %v12427_v44 }
 0x165   : > { %9949 = vrot.lane.b32.xlu2 %v9948_v9, %s11593_s29 }
 0x167   : > { %9944 = vrot.lane.b32.xlu1 %v9943_v51, %s11593_s29  ;;  %v12431_v41 = vpop.permute.xlu2 %9784 }
 0x168   : > { %16600 = vst [vmem:[#allocation54_spill] sm:$0xff] %v12431_v41  ;;  %v827_v41 = vld [vmem:[#allocation2 + $0x6a] sm:$0xff] }
 0x169   : > { %v12433_v63 = vpop.permute.xlu1 %9734  ;;  %9954 = vrot.lane.b32.xlu0 %v9953_v58, %s11593_s29  ;;  %v9978_v58 = vpack.i.bf16 %v825_v4, %v824_v28  ;;  %v832_v28 = vld [vmem:[#allocation2 + $0xaa] sm:$0xff]  ;;  %v833_v4 = vld [vmem:[#allocation2 + $0xb2] sm:$0xff] }
 0x16a   : > { %16601 = vst [vmem:[#allocation55_spill] sm:$0xff] %v12433_v63 }
 0x16b   : > { %v12436_v11 = vpop.permute.xlu0 %9744 }
 0x16c   : > { %16602 = vst [vmem:[#allocation56_spill] sm:$0xff] %v12436_v11  ;;  %v828_v11 = vld [vmem:[#allocation2 + $0x7a] sm:$0xff] }
 0x16d   : > { %9964 = vrot.lane.b32.xlu2 %v12198_v5, %s11593_s29  ;;  %v9983_v5 = vpack.i.bf16 %v827_v41, %v826_v27  ;;  %v9998_v27 = vpack.i.bf16 %v833_v4, %v832_v28  ;;  %v836_v41 = vld [vmem:[#allocation2 + $0xda] sm:$0xff]  ;;  %v843_v28 = vld [vmem:[#allocation2 + $0x12a] sm:$0xff] }
 0x16f   : > { %9959 = vrot.lane.b32.xlu1 %v9958_v25, %s11593_s29  ;;  %v12441_v9 = vpop.permute.xlu2 %9799 }
 0x170   : > { %16603 = vst [vmem:[#allocation57_spill] sm:$0xff] %v12441_v9  ;;  %v16621_v9 = vld [vmem:[#allocation19_spill] sm:$0xff] }
 0x171   : > { %v12443_v51 = vpop.permute.xlu1 %9749  ;;  %9969 = vrot.lane.b32.xlu0 %v9968_v0, %s11593_s29  ;;  %v9993_v0 = vpack.i.bf16 %v831_v35, %v830_v45  ;;  %v838_v45 = vld [vmem:[#allocation2 + $0xf2] sm:$0xff]  ;;  %v839_v35 = vld [vmem:[#allocation2 + $0xfa] sm:$0xff] }
 0x172   : > { %16604 = vst [vmem:[#allocation58_spill] sm:$0xff] %v12443_v51  ;;  %v829_v51 = vld [vmem:[#allocation2 + $0x82] sm:$0xff] }
 0x173   : > { %v12446_v7 = vpop.permute.xlu0 %9759  ;;  %v9988_v52 = vpack.i.bf16 %v829_v51, %v828_v11  ;;  %v10003_v11 = vpack.i.bf16 %v835_v29, %v834_v34  ;;  %v10013_v51 = vpack.i.bf16 %v839_v35, %v838_v45  ;;  %v849_v45 = vld [vmem:[#allocation2 + $0x172] sm:$0xff] }
 0x175   : > { %9979 = vrot.lane.b32.xlu2 %v9978_v58, %s11594_s30  ;;  %v837_v58 = vld [vmem:[#allocation2 + $0xe2] sm:$0xff] }
 0x177   : > { %9974 = vrot.lane.b32.xlu1 %v9973_v42, %s11594_s30  ;;  %v12450_v25 = vpop.permute.xlu2 %9814 }
 0x178   : > { %16605 = vst [vmem:[#allocation59_spill] sm:$0xff] %v12450_v25 }
 0x179   : > { %v12452_v47 = vpop.permute.xlu1 %9764  ;;  %9984 = vrot.lane.b32.xlu0 %v9983_v5, %s11594_s30  ;;  %v10008_v5 = vpack.i.bf16 %v837_v58, %v836_v41  ;;  %v844_v41 = vld [vmem:[#allocation2 + $0x13a] sm:$0xff]  ;;  %v845_v58 = vld [vmem:[#allocation2 + $0x142] sm:$0xff] }
 0x17a   : > { %v10028_v34 = vpack.i.bf16 %v845_v58, %v844_v41 }
 0x17b   : > { %v12455_v31 = vpop.permute.xlu0 %9774 }
 0x17d   : > { %9994 = vrot.lane.b32.xlu2 %v9993_v0, %s11594_s30  ;;  %v842_v0 = vld [vmem:[#allocation2 + $0x122] sm:$0xff] }
 0x17f   : > { %9989 = vrot.lane.b32.xlu1 %v9988_v52, %s11594_s30  ;;  %v12459_v42 = vpop.permute.xlu2 %9829  ;;  %v840_v52 = vld [vmem:[#allocation2 + $0x10a] sm:$0xff] }
 0x180   : > { %16606 = vst [vmem:[#allocation60_spill] sm:$0xff] %v12459_v42  ;;  %v841_v42 = vld [vmem:[#allocation2 + $0x112] sm:$0xff] }
 0x181   : > { %v12461_v3 = vpop.permute.xlu1 %9779  ;;  %9999 = vrot.lane.b32.xlu0 %v9998_v27, %s11594_s30  ;;  %v10023_v27 = vpack.i.bf16 %v843_v28, %v842_v0  ;;  %v10018_v29 = vpack.i.bf16 %v841_v42, %v840_v52  ;;  %v852_v52 = vld [vmem:[#allocation2 + $0x19a] sm:$0xff] }
 0x182   : > { %16607 = vst [vmem:[#allocation61_spill] sm:$0xff] %v12461_v3 }
 0x183   : > { %v12464_v62 = vpop.permute.xlu0 %9789 }
 0x184   : > { %16608 = vst [vmem:[#allocation62_spill] sm:$0xff] %v12464_v62 }
 0x185   : > { %10009 = vrot.lane.b32.xlu2 %v10008_v5, %s11594_s30  ;;  %v848_v5 = vld [vmem:[#allocation2 + $0x16a] sm:$0xff] }
 0x187   : > { %10004 = vrot.lane.b32.xlu1 %v10003_v11, %s11594_s30  ;;  %v12468_v4 = vpop.permute.xlu2 %9844  ;;  %v846_v11 = vld [vmem:[#allocation2 + $0x152] sm:$0xff] }
 0x188   : > { %16609 = vst [vmem:[#allocation63_spill] sm:$0xff] %v12468_v4  ;;  %v10033_v28 = vpack.i.bf16 %v847_v40, %v846_v11  ;;  %v16617_v11 = vld [vmem:[#allocation25_spill] sm:$0xff]  ;;  %v9546_v4 = vunpack.i.l.bf16 %v12188_v57 }
 0x189   : > { %v12470_v3 = vpop.permute.xlu1 %9794  ;;  %10014 = vrot.lane.b32.xlu0 %v10013_v51, %s11594_s30  ;;  %v10038_v51 = vpack.i.bf16 %v849_v45, %v848_v5  ;;  %v566_v5 = vld [vmem:[#allocation2 + $0x8] sm:$0xff]  ;;  %v9416_v45 = vunpack.i.l.bf16 %v12096_v13 }
 0x18a   : > { %16610 = vst [vmem:[#allocation64_spill] sm:$0xff] %v12470_v3 }
 0x18b   : > { %v12473_v62 = vpop.permute.xlu0 %9804 }
 0x18d   : > { %10024 = vrot.lane.b32.xlu2 %v10023_v27, %s11594_s30  ;;  %v853_v27 = vld [vmem:[#allocation2 + $0x1a2] sm:$0xff] }
 0x18f   : > { %10019 = vrot.lane.b32.xlu1 %v10018_v29, %s11594_s30  ;;  %v12477_v35 = vpop.permute.xlu2 %9859  ;;  %v10048_v29 = vpack.i.bf16 %v853_v27, %v852_v52  ;;  %v9421_v52 = vunpack.i.l.bf16 %v12130_v17 }
 0x190   : > { %16611 = vst [vmem:[#allocation65_spill] sm:$0xff] %v12477_v35  ;;  %v16618_v35 = vld [vmem:[#allocation28_spill] sm:$0xff] }
 0x191   : > { %v12479_v25 = vpop.permute.xlu1 %9809  ;;  %10029 = vrot.lane.b32.xlu0 %v10028_v34, %s11594_s30  ;;  %v9417_v34 = vunpack.i.h.bf16 %v12096_v13  ;;  %v16620_v13 = vld [vmem:[#allocation20_spill] sm:$0xff] }
 0x192   : > { %16612 = vst [vmem:[#allocation66_spill] sm:$0xff] %v12479_v25  ;;  %v9422_v25 = vunpack.i.h.bf16 %v12130_v17  ;;  %v9501_v17 = vunpack.i.l.bf16 %v12152_v20 }
 0x193   : > { %v12482_v0 = vpop.permute.xlu0 %9819  ;;  %v12506_v27 = vsel %vm388_vm0, %v566_v5, %v9417_v34  ;;  %v9432_v5 = vunpack.i.h.bf16 %v12142_v1 }
 0x194   : > { %16613 = vst [vmem:[#allocation67_spill] sm:$0xff] %v12482_v0  ;;  %v9426_v0 = vunpack.i.l.bf16 %v16618_v35 }
 0x195   : > { %10039 = vrot.lane.b32.xlu2 %v10038_v51, %s11594_s30  ;;  %v9472_v51 = vunpack.i.h.bf16 %v16617_v11 }
 0x196   : > { %v12525_v34 = vsel %vm388_vm0, %v16622_v30, %v9426_v0  ;;  %v9502_v30 = vunpack.i.h.bf16 %v12152_v20  ;;  %v9462_v0 = vunpack.i.h.bf16 %v12158_v19  ;;  %v16629_v20 = vld [vmem:[#allocation9_spill] sm:$0xff] }
 0x197   : > { %10034 = vrot.lane.b32.xlu1 %v10033_v28, %s11594_s30  ;;  %v12486_v42 = vpop.permute.xlu2 %9874  ;;  %v565_v28 = vld [vmem:[#allocation2] sm:$0xff] }
 0x198   : > { %16614 = vst [vmem:[#allocation68_spill] sm:$0xff] %v12486_v42  ;;  %v12511_v63 = vsel %vm388_vm0, %v565_v28, %v9416_v45  ;;  %v9431_v45 = vunpack.i.l.bf16 %v12142_v1  ;;  %v16623_v28 = vld [vmem:[#allocation5_spill] sm:$0xff]  ;;  %v16625_v1 = vld [vmem:[#allocation8_spill] sm:$0xff] }
 0x199   : > { %v12488_v41 = vpop.permute.xlu1 %9824  ;;  %10044 = vrot.lane.b32.xlu0 %v12270_v8, %s11594_s30 }
 0x19a   : > { %16615 = vst [vmem:[#allocation69_spill] sm:$0xff] %v12488_v41  ;;  %v9471_v41 = vunpack.i.l.bf16 %v16617_v11  ;;  %v9427_v11 = vunpack.i.h.bf16 %v16618_v35  ;;  %v9446_v35 = vunpack.i.l.bf16 %v12146_v10  ;;  %v12554_v59 = vsel %vm388_vm0, %v16629_v20, %v9431_v45  ;;  %v16634_v45 = vld [vmem:[#allocation12_spill] sm:$0xff]  ;;  %v16635_v20 = vld [vmem:[#allocation11_spill] sm:$0xff] }
 0x19b   : > { %v12492_v58 = vpop.permute.xlu0 %9834  ;;  %16630 = vst [vmem:[#allocation19_spill] sm:$0xff] %v12554_v59 }
 0x19c   : > { %v12521_v44 = vsel %vm388_vm0, %v16621_v9, %v9471_v41  ;;  %v9452_v9 = vunpack.i.h.bf16 %v12154_v46  ;;  %v9451_v41 = vunpack.i.l.bf16 %v12154_v46  ;;  %v12542_v3 = vsel %vm388_vm0, %v16625_v1, %v9427_v11 }
 0x19d   : > { %v12550_v46 = vsel %vm388_vm0, %v16627_v24, %v9432_v5  ;;  %v9477_v11 = vunpack.i.h.bf16 %v12170_v23  ;;  %v9476_v5 = vunpack.i.l.bf16 %v12170_v23  ;;  %v16640_v23 = vld [vmem:[#allocation16_spill] sm:$0xff] }
 0x19e   : > { %16628 = vst [vmem:[#allocation20_spill] sm:$0xff] %v12550_v46  ;;  %v1892_v46 = vsel %vm388_vm0, %v16635_v20, %v9451_v41  ;;  %v9761_v41 = vunpack.i.l.bf16 %v12446_v7 }
 0x19f   : > { %10049 = vrot.lane.b32.xlu1 %v10048_v29, %s11594_s30  ;;  %v12496_v40 = vpop.permute.xlu2 %9889 }
 0x1a0   : > { %16616 = vst [vmem:[#allocation70_spill] sm:$0xff] %v12496_v40  ;;  %v12515_v40 = vsel %vm388_vm0, %v16620_v13, %v9472_v51  ;;  %v1880_v51 = vsel %vm388_vm0, %v16623_v28, %v9421_v52  ;;  %v9447_v13 = vunpack.i.h.bf16 %v12146_v10  ;;  %v16626_v52 = vld [vmem:[#allocation6_spill] sm:$0xff]  ;;  %v9461_v10 = vunpack.i.l.bf16 %v12158_v19  ;;  %v16632_v19 = vld [vmem:[#allocation13_spill] sm:$0xff] }
 0x1a1   : > { %v12502_v8 = vpop.permute.xlu1 %9839  ;;  %v1881_v28 = vsel %vm388_vm0, %v16626_v52, %v9422_v25  ;;  %v12566_v52 = vsel %vm388_vm0, %v16632_v19, %v9446_v35  ;;  %v12569_v24 = vsel %vm1910_vm2, %v1880_v51, %v9501_v17  ;;  %v16639_v19 = vld [vmem:[#allocation17_spill] sm:$0xff]  ;;  %v1899_v17 = vsel %vm388_vm0, %v16640_v23, %v9467_v16  ;;  %v16644_v16 = vld [vmem:[#allocation30_spill] sm:$0xff] }
 0x1a2   : > { %16633 = vst [vmem:[#allocation7_spill] sm:$0xff] %v12569_v24  ;;  %v12577_v59 = vsel %vm1910_vm2, %v1881_v28, %v9502_v30  ;;  %v12587_v51 = vsel %vm388_vm0, %v16639_v19, %v9461_v10  ;;  %v16642_v28 = vld [vmem:[#allocation24_spill] sm:$0xff]  ;;  %v9842_v20 = vunpack.i.h.bf16 %v12502_v8  ;;  %v16643_v10 = vld [vmem:[#allocation23_spill] sm:$0xff]  ;;  %v9482_v23 = vunpack.i.h.bf16 %v16644_v16 }
 0x1a3   : > { %v12508_v29 = vpop.permute.xlu0 %9849  ;;  %16636 = vst [vmem:[#allocation5_spill] sm:$0xff] %v12577_v59  ;;  %v12603_v19 = vsel %vm388_vm0, %v16643_v10, %v9476_v5  ;;  %v9491_v24 = vunpack.i.l.bf16 %v12182_v33 }
 0x1a4   : > { %16619 = vst [vmem:[#allocation25_spill] sm:$0xff] %v12508_v29  ;;  %v16631_v29 = vld [vmem:[#allocation14_spill] sm:$0xff] }
 0x1a5   : > { %v12562_v25 = vsel %vm388_vm0, %v16631_v29, %v9447_v13  ;;  %v16637_v29 = vld [vmem:[#allocation18_spill] sm:$0xff] }
 0x1a6   : > { %v12581_v13 = vsel %vm388_vm0, %v16637_v29, %v9462_v0  ;;  %v12597_v0 = vsel %vm388_vm0, %v16642_v28, %v9477_v11  ;;  %v9841_v29 = vunpack.i.l.bf16 %v12502_v8  ;;  %v2020_v8 = vsel %vm2009_vm5, %v12313_v39, %v9761_v41 }
 0x1a7   : > { %v12538_v42 = vpop.permute.xlu2 %9904  ;;  %v9507_v41 = vunpack.i.h.bf16 %v12194_v43 }
 0x1a8   : > { %16624 = vst [vmem:[#allocation28_spill] sm:$0xff] %v12538_v42  ;;  %v9466_v42 = vunpack.i.l.bf16 %v12166_v38  ;;  %v1893_v38 = vsel %vm388_vm0, %v16634_v45, %v9452_v9  ;;  %v9762_v9 = vunpack.i.h.bf16 %v12446_v7  ;;  %v16641_v45 = vld [vmem:[#allocation15_spill] sm:$0xff]  ;;  %v2053_v32 = vsel %vm2042_vm6, %v2020_v8, %v9841_v29 }
 0x1a9   : > { %v12558_v1 = vpop.permute.xlu1 %9854  ;;  %v9776_v8 = vunpack.i.l.bf16 %v12455_v31 }
 0x1aa   : > { %v1898_v30 = vsel %vm388_vm0, %v16641_v45, %v9466_v42  ;;  %v9481_v42 = vunpack.i.l.bf16 %v16644_v16  ;;  %v9492_v45 = vunpack.i.h.bf16 %v12182_v33  ;;  %v2021_v5 = vsel %vm2009_vm5, %v12316_v53, %v9762_v9 }
 0x1ab   : > { %v12583_v35 = vpop.permute.xlu0 %9864  ;;  %v9497_v9 = vunpack.i.h.bf16 %v12190_v60  ;;  %v9496_v33 = vunpack.i.l.bf16 %v12190_v60  ;;  %v16648_v60 = vld [vmem:[#allocation21_spill] sm:$0xff] }
 0x1ac   : > { %16638 = vst [vmem:[#allocation8_spill] sm:$0xff] %v12583_v35  ;;  %v16645_v35 = vld [vmem:[#allocation29_spill] sm:$0xff] }
 0x1ad   : > { %v9532_v59 = vunpack.i.h.bf16 %v16645_v35  ;;  %v9531_v7 = vunpack.i.l.bf16 %v16645_v35  ;;  %v2054_v35 = vsel %vm2042_vm6, %v2021_v5, %v9842_v20  ;;  %v9506_v20 = vunpack.i.l.bf16 %v12194_v43  ;;  %v16647_v5 = vld [vmem:[#allocation22_spill] sm:$0xff] }
 0x1ae   : > { %v9857_v43 = vunpack.i.h.bf16 %v12558_v1 }
 0x1af   : > { %v9920_v11 = vpop.permute.xlu2 %9919  ;;  %v12637_v57 = vsel %vm1910_vm2, %v1892_v46, %v9531_v7  ;;  %v16650_v46 = vld [vmem:[#allocation26_spill] sm:$0xff]  ;;  %v1912_v7 = vsel %vm1910_vm2, %v12506_v27, %v9497_v9 }
 0x1b0   : > { %v9922_v28 = vunpack.i.h.bf16 %v9920_v11  ;;  %v9921_v10 = vunpack.i.l.bf16 %v9920_v11  ;;  %v12634_v11 = vsel %vm1910_vm2, %v1893_v38, %v9532_v59  ;;  %v12653_v38 = vsel %vm388_vm0, %v16650_v46, %v9491_v24 }
 0x1b1   : > { %v12617_v16 = vpop.permute.xlu1 %9869  ;;  %v12671_v24 = vsel %vm1910_vm2, %v12525_v34, %v9506_v20  ;;  %v9577_v34 = vunpack.i.h.bf16 %v12214_v15  ;;  %v9526_v20 = vunpack.i.l.bf16 %v12216_v18  ;;  %v9557_v46 = vunpack.i.h.bf16 %v12240_v37 }
 0x1b2   : > { %16646 = vst [vmem:[#allocation6_spill] sm:$0xff] %v12617_v16  ;;  %v12622_v39 = vsel %vm2075_vm7, %v2053_v32, %v9921_v10  ;;  %v12625_v53 = vsel %vm2075_vm7, %v2054_v35, %v9922_v28  ;;  %v9777_v32 = vunpack.i.h.bf16 %v12455_v31  ;;  %v1905_v28 = vsel %vm388_vm0, %v16647_v5, %v9482_v23  ;;  %v16649_v16 = vld [vmem:[#allocation27_spill] sm:$0xff] }
 0x1b3   : > { %v12631_v29 = vpop.permute.xlu0 %9879  ;;  %v1904_v10 = vsel %vm388_vm0, %v16648_v60, %v9481_v42  ;;  %v9856_v35 = vunpack.i.l.bf16 %v12558_v1  ;;  %v12649_v59 = vsel %vm388_vm0, %v16649_v16, %v9492_v45  ;;  %v12656_v31 = vsel %vm1910_vm2, %v1899_v17, %v9547_v14 }
 0x1b4   : > { %v12659_v23 = vsel %vm1910_vm2, %v1898_v30, %v9546_v4  ;;  %v1911_v1 = vsel %vm1910_vm2, %v12511_v63, %v9496_v33  ;;  %v12667_v42 = vsel %vm1910_vm2, %v12542_v3, %v9507_v41  ;;  %v2026_v14 = vsel %vm2009_vm5, %v12339_v55, %v9776_v8 }
 0x1b5   : > { %v2027_v4 = vsel %vm2009_vm5, %v12342_v56, %v9777_v32  ;;  %v9562_v30 = vunpack.i.h.bf16 %v12202_v2  ;;  %v9561_v63 = vunpack.i.l.bf16 %v12202_v2  ;;  %v2059_v3 = vsel %vm2042_vm6, %v2026_v14, %v9856_v35 }
 0x1b6   : > { %v2060_v16 = vsel %vm2042_vm6, %v2027_v4, %v9857_v43  ;;  %v9576_v33 = vunpack.i.l.bf16 %v12214_v15  ;;  %v9527_v2 = vunpack.i.h.bf16 %v12216_v18  ;;  %v9541_v32 = vunpack.i.l.bf16 %v12228_v26 }
 0x1b7   : > { %v9935_v45 = vpop.permute.xlu2 %9934  ;;  %v9542_v5 = vunpack.i.h.bf16 %v12228_v26  ;;  %v9552_v15 = vunpack.i.h.bf16 %v12232_v21  ;;  %v9551_v60 = vunpack.i.l.bf16 %v12232_v21  ;;  %v9606_v43 = vunpack.i.l.bf16 %v12238_v36 }
 0x1b8   : > { %v9937_v17 = vunpack.i.h.bf16 %v9935_v45  ;;  %v9936_v27 = vunpack.i.l.bf16 %v9935_v45  ;;  %v9556_v45 = vunpack.i.l.bf16 %v12240_v37  ;;  %v9607_v18 = vunpack.i.h.bf16 %v12238_v36 }
 0x1b9   : > { %v12681_v9 = vpop.permute.xlu1 %9884  ;;  %v12706_v14 = vsel %vm1910_vm2, %v1905_v28, %v9562_v30  ;;  %v12709_v4 = vsel %vm1910_vm2, %v1904_v10, %v9561_v63  ;;  %v12712_v26 = vsel %vm1943_vm3, %v1912_v7, %v9577_v34  ;;  %v12715_v21 = vsel %vm1943_vm3, %v1911_v1, %v9576_v33 }
 0x1ba   : > { %v12686_v55 = vsel %vm2075_vm7, %v2059_v3, %v9936_v27  ;;  %v12689_v56 = vsel %vm2075_vm7, %v2060_v16, %v9937_v17  ;;  %v1923_v17 = vsel %vm1910_vm2, %v12566_v52, %v9526_v20  ;;  %v1924_v37 = vsel %vm1910_vm2, %v12562_v25, %v9527_v2  ;;  %v9323_v2 = vld [vmem:[%s16464_s1 + $0x8] sm:$0x30] }
 0x1bb   : > { %v12695_v8 = vpop.permute.xlu0 %9894  ;;  %v12723_v36 = vsel %vm1910_vm2, %v12587_v51, %v9541_v32  ;;  %v9686_v28 = vunpack.i.l.bf16 %v12394_v22  ;;  %v12730_v7 = vsel %vm1910_vm2, %v12581_v13, %v9542_v5  ;;  %v12734_v1 = vsel %vm1910_vm2, %v12515_v40, %v9552_v15 }
 0x1bc   : > { %v12738_v52 = vsel %vm1910_vm2, %v12521_v44, %v9551_v60  ;;  %v1956_v25 = vsel %vm1943_vm3, %v1923_v17, %v9606_v43  ;;  %v12743_v51 = vsel %vm1910_vm2, %v12603_v19, %v9556_v45  ;;  %v12747_v27 = vsel %vm1910_vm2, %v12597_v0, %v9557_v46  ;;  %v16651_v44 = vld [vmem:[#allocation37_spill] sm:$0xff] }
 0x1bd   : > { %v1957_v13 = vsel %vm1943_vm3, %v1924_v37, %v9607_v18  ;;  %v9687_v30 = vunpack.i.h.bf16 %v12394_v22  ;;  %v9572_v63 = vunpack.i.h.bf16 %v12252_v48  ;;  %v9612_v3 = vunpack.i.h.bf16 %v16651_v44  ;;  %v8940_v22 = vld [vmem:[%s16464_s1 + $0x8] sm:$0xf] }
 0x1be   : > { %v9757_v16 = vunpack.i.h.bf16 %v12413_v12  ;;  %v9756_v34 = vunpack.i.l.bf16 %v12413_v12  ;;  %v9611_v19 = vunpack.i.l.bf16 %v16651_v44  ;;  %v1989_v33 = vsel %vm1976_vm4, %v1956_v25, %v9686_v28 }
 0x1bf   : > { %v12726_v10 = vpop.permute.xlu2 %9949  ;;  %v9807_v20 = vunpack.i.h.bf16 %v12473_v62  ;;  %v9806_v32 = vunpack.i.l.bf16 %v12473_v62  ;;  %v8941_v12 = vor.u32 %v9323_v2, %v8940_v22  ;;  %v1990_v5 = vsel %vm1976_vm4, %v1957_v13, %v9687_v30 }
 0x1c0   : > { %v9887_v15 = vunpack.i.h.bf16 %v12681_v9  ;;  %v9886_v60 = vunpack.i.l.bf16 %v12681_v9  ;;  %v11595_v43 = vmov 65535   ;;  %v2018_v45 = vsel %vm2009_vm5, %v12397_v49, %v9756_v34 }
 0x1c1   : > { %v12751_v40 = vpop.permute.xlu1 %9899  ;;  %v2227_v46 = vsel %vm2225_vm8, 4294967295, %v11595_v43  ;;  %v2019_v18 = vsel %vm2009_vm5, %v12400_v61, %v9757_v16  ;;  %v9767_v17 = vunpack.i.h.bf16 %v12452_v47  ;;  %v9766_v62 = vunpack.i.l.bf16 %v12452_v47  ;;  %v16652_v61 = vld [vmem:[#allocation63_spill] sm:$0xff] }
 0x1c2   : > { %v2228_v37 = vsel %vm2226_vm9, %v2227_v46, 0  ;;  %v9837_v28 = vunpack.i.h.bf16 %v12492_v58  ;;  %v9836_v25 = vunpack.i.l.bf16 %v12492_v58  ;;  %v2038_v9 = vsel %vm2009_vm5, %v12387_v50, %v9806_v32  ;;  %v9322_v50 = vld [vmem:[%s16464_s1] sm:$0xff] }
 0x1c3   : > { %v12759_v0 = vpop.permute.xlu0 %9909  ;;  %v2230_v30 = vand.u32 %v8941_v12, %v2228_v37  ;;  %v2039_v49 = vsel %vm2009_vm5, %v12390_v54, %v9807_v20  ;;  %v9847_v16 = vunpack.i.h.bf16 %v16652_v61  ;;  %v9846_v2 = vunpack.i.l.bf16 %v16652_v61  ;;  %v16653_v61 = vld [vmem:[#allocation47_spill] sm:$0xff] }
 0x1c4   : > { %v2071_v47 = vsel %vm2042_vm6, %v2038_v9, %v9886_v60  ;;  %v2072_v43 = vsel %vm2042_vm6, %v2039_v49, %v9887_v15  ;;  %v2022_v32 = vsel %vm2009_vm5, %v1989_v33, %v9766_v62  ;;  %v2023_v60 = vsel %vm2009_vm5, %v1990_v5, %v9767_v17 }
 0x1c5   : > { %2238 = vmatpush.bf16.msra.mxu0 %v2230_v30  ;;  %9386 = vmatpush.bf16.msra.mxu2 %v2230_v30  ;;  %v2051_v15 = vsel %vm2042_vm6, %v2018_v45, %v9836_v25  ;;  %v2052_v37 = vsel %vm2042_vm6, %v2019_v18, %v9837_v28  ;;  %v2055_v33 = vsel %vm2042_vm6, %v2022_v32, %v9846_v2  ;;  %v16654_v45 = vld [vmem:[#allocation51_spill] sm:$0xff]  ;;  %v9571_v25 = vunpack.i.l.bf16 %v12252_v48  ;;  %v16657_v32 = vld [vmem:[#allocation36_spill] sm:$0xff] }
 0x1c6   : > { %v2056_v5 = vsel %vm2042_vm6, %v2023_v60, %v9847_v16  ;;  %v9772_v18 = vunpack.i.h.bf16 %v16654_v45  ;;  %v9771_v17 = vunpack.i.l.bf16 %v16654_v45  ;;  %v9652_v60 = vunpack.i.h.bf16 %v16657_v32 }
 0x1c7   : > { %v9965_v13 = vpop.permute.xlu2 %9964 }
 0x1c8   : > { %v9967_v34 = vunpack.i.h.bf16 %v9965_v13  ;;  %v9966_v22 = vunpack.i.l.bf16 %v9965_v13 }
 0x1c9   : > { %v9915_v46 = vpop.permute.xlu1 %9914  ;;  %2239 = vmatpush.bf16.msra.mxu0 %v9322_v50  ;;  %9387 = vmatpush.bf16.msra.mxu2 %v9322_v50 }
 0x1ca   : > { %v9917_v58 = vunpack.i.h.bf16 %v9915_v46  ;;  %v9916_v12 = vunpack.i.l.bf16 %v9915_v46  ;;  %v12792_v54 = vsel %vm2075_vm7, %v2071_v47, %v9966_v22  ;;  %v12795_v20 = vsel %vm2075_vm7, %v2072_v43, %v9967_v34  ;;  %v16655_v43 = vld [vmem:[#allocation34_spill] sm:$0xff] }
 0x1cb   : > { %v9925_v13 = vpop.permute.xlu0 %9924  ;;  %v9692_v34 = vunpack.i.h.bf16 %v16653_v61  ;;  %v9691_v47 = vunpack.i.l.bf16 %v16653_v61  ;;  %v9637_v46 = vunpack.i.h.bf16 %v16655_v43  ;;  %v9636_v50 = vunpack.i.l.bf16 %v16655_v43 }
 0x1cc   : > { %v9927_v30 = vunpack.i.h.bf16 %v9925_v13  ;;  %v9926_v9 = vunpack.i.l.bf16 %v9925_v13  ;;  %v12802_v49 = vsel %vm2075_vm7, %v2051_v15, %v9916_v12  ;;  %v12805_v22 = vsel %vm2075_vm7, %v2052_v37, %v9917_v58  ;;  %v16656_v58 = vld [vmem:[#allocation25_spill] sm:$0xff] }
 0x1cd   : > { %v9852_v2 = vunpack.i.h.bf16 %v16656_v58  ;;  %v9851_v16 = vunpack.i.l.bf16 %v16656_v58  ;;  %v1959_v15 = vsel %vm1943_vm3, %v12634_v11, %v9612_v3  ;;  %v1958_v37 = vsel %vm1943_vm3, %v12637_v57, %v9611_v19  ;;  %v16659_v3 = vld [vmem:[#allocation50_spill] sm:$0xff] }
 0x1ce   : > { %v12814_v62 = vsel %vm2075_vm7, %v2055_v33, %v9926_v9  ;;  %v12817_v28 = vsel %vm2075_vm7, %v2056_v5, %v9927_v30  ;;  %v9651_v13 = vunpack.i.l.bf16 %v16657_v32  ;;  %v16658_v30 = vld [vmem:[#allocation41_spill] sm:$0xff]  ;;  %v1991_v61 = vsel %vm1976_vm4, %v1958_v37, %v9691_v47  ;;  %v16660_v47 = vld [vmem:[#allocation32_spill] sm:$0xff] }
 0x1cf   : > { %v12823_v12 = vpop.permute.xlu2 %9979  ;;  %v9642_v9 = vunpack.i.h.bf16 %v16658_v30  ;;  %v1992_v33 = vsel %vm1976_vm4, %v1959_v15, %v9692_v34  ;;  %v2024_v45 = vsel %vm2009_vm5, %v1991_v61, %v9771_v17  ;;  %v9641_v44 = vunpack.i.l.bf16 %v16658_v30 }
 0x1d0   : > { %v2025_v43 = vsel %vm2009_vm5, %v1992_v33, %v9772_v18  ;;  %v9716_v41 = vunpack.i.l.bf16 %v16659_v3  ;;  %v2057_v57 = vsel %vm2042_vm6, %v2024_v45, %v9851_v16  ;;  %v9622_v37 = vunpack.i.h.bf16 %v16660_v47  ;;  %v16662_v45 = vld [vmem:[#allocation64_spill] sm:$0xff] }
 0x1d1   : > { %v9930_v5 = vpop.permute.xlu1 %9929  ;;  %v2058_v19 = vsel %vm2042_vm6, %v2025_v43, %v9852_v2  ;;  %v9621_v34 = vunpack.i.l.bf16 %v16660_v47  ;;  %v1941_v15 = vsel %vm1910_vm2, %v12653_v38, %v9571_v25  ;;  %v1942_v16 = vsel %vm1910_vm2, %v12649_v59, %v9572_v63  ;;  %v16661_v25 = vld [vmem:[#allocation42_spill] sm:$0xff] }
 0x1d2   : > { %v9932_v58 = vunpack.i.h.bf16 %v9930_v5  ;;  %v9931_v11 = vunpack.i.l.bf16 %v9930_v5  ;;  %v1968_v2 = vsel %vm1943_vm3, %v12743_v51, %v9636_v50  ;;  %v9717_v30 = vunpack.i.h.bf16 %v16659_v3 }
 0x1d3   : > { %v12845_v32 = vpop.permute.xlu0 %9939  ;;  %v1969_v61 = vsel %vm1943_vm3, %v12747_v27, %v9637_v46  ;;  %v1974_v33 = vsel %vm1943_vm3, %v1941_v15, %v9651_v13  ;;  %v1975_v5 = vsel %vm1943_vm3, %v1942_v16, %v9652_v60  ;;  %v1971_v38 = vsel %vm1943_vm3, %v12706_v14, %v9642_v9 }
 0x1d4   : > { %v2090_v17 = vsel %vm2075_vm7, %v2057_v57, %v9931_v11  ;;  %v2091_v18 = vsel %vm2075_vm7, %v2058_v19, %v9932_v58  ;;  %v1970_v48 = vsel %vm1943_vm3, %v12709_v4, %v9641_v44  ;;  %v2001_v51 = vsel %vm1976_vm4, %v1968_v2, %v9716_v41  ;;  %v16663_v58 = vld [vmem:[#allocation68_spill] sm:$0xff]  ;;  %v16665_v19 = vld [vmem:[#allocation53_spill] sm:$0xff] }
 0x1d5   : > { %v9797_v43 = vunpack.i.h.bf16 %v16662_v45  ;;  %v9796_v27 = vunpack.i.l.bf16 %v16662_v45  ;;  %v2002_v60 = vsel %vm1976_vm4, %v1969_v61, %v9717_v30  ;;  %v9877_v14 = vunpack.i.h.bf16 %v16663_v58  ;;  %v16664_v11 = vld [vmem:[#allocation52_spill] sm:$0xff]  ;;  %v16666_v2 = vld [vmem:[#allocation57_spill] sm:$0xff] }
 0x1d6   : > { %v9876_v9 = vunpack.i.l.bf16 %v16663_v58  ;;  %v9722_v44 = vunpack.i.h.bf16 %v16664_v11  ;;  %v9721_v41 = vunpack.i.l.bf16 %v16664_v11  ;;  %v9732_v15 = vunpack.i.h.bf16 %v16665_v19 }
 0x1d7   : > { %v9995_v50 = vpop.permute.xlu2 %9994  ;;  %v9731_v16 = vunpack.i.l.bf16 %v16665_v19  ;;  %v9801_v30 = vunpack.i.l.bf16 %v16666_v2  ;;  %v2034_v45 = vsel %vm2009_vm5, %v2001_v51, %v9796_v27  ;;  %v2035_v58 = vsel %vm2009_vm5, %v2002_v60, %v9797_v43 }
 0x1d8   : > { %v9997_v46 = vunpack.i.h.bf16 %v9995_v50  ;;  %v9996_v13 = vunpack.i.l.bf16 %v9995_v50  ;;  %v9802_v11 = vunpack.i.h.bf16 %v16666_v2  ;;  %v2067_v35 = vsel %vm2042_vm6, %v2034_v45, %v9876_v9 }
 0x1d9   : > { %v12876_v4 = vpop.permute.xlu1 %9944  ;;  %v2068_v19 = vsel %vm2042_vm6, %v2035_v58, %v9877_v14  ;;  %v2003_v63 = vsel %vm1976_vm4, %v1970_v48, %v9721_v41  ;;  %v2004_v59 = vsel %vm1976_vm4, %v1971_v38, %v9722_v44  ;;  %v2007_v43 = vsel %vm1976_vm4, %v1974_v33, %v9731_v16 }
 0x1da   : > { %v12882_v3 = vsel %vm2108_vm10, %v12802_v49, %v9996_v13  ;;  %v12886_v57 = vsel %vm2108_vm10, %v12805_v22, %v9997_v46  ;;  %v16667_v22 = vld [vmem:[#allocation66_spill] sm:$0xff]  ;;  %v9882_v60 = vunpack.i.h.bf16 %v12631_v29  ;;  %v9881_v9 = vunpack.i.l.bf16 %v12631_v29 }
 0x1db   : > { %v9955_v61 = vpop.permute.xlu0 %9954  ;;  %v9811_v46 = vunpack.i.l.bf16 %v16667_v22  ;;  %v9812_v27 = vunpack.i.h.bf16 %v16667_v22  ;;  %v2008_v14 = vsel %vm1976_vm4, %v1975_v5, %v9732_v15  ;;  %v2036_v48 = vsel %vm2009_vm5, %v2003_v63, %v9801_v30 }
 0x1dc   : > { %v9957_v49 = vunpack.i.h.bf16 %v9955_v61  ;;  %v9956_v13 = vunpack.i.l.bf16 %v9955_v61  ;;  %v16668_v61 = vld [vmem:[#allocation70_spill] sm:$0xff]  ;;  %v2069_v15 = vsel %vm2042_vm6, %v2036_v48, %v9881_v9  ;;  %v16670_v9 = vld [vmem:[#allocation59_spill] sm:$0xff]  ;;  %v16673_v47 = vunpack.i.l.bf16 %v16661_v25 }
 0x1dd   : > { %v2040_v41 = vsel %vm2009_vm5, %v2007_v43, %v9811_v46  ;;  %v9892_v45 = vunpack.i.h.bf16 %v16668_v61  ;;  %v9891_v33 = vunpack.i.l.bf16 %v16668_v61  ;;  %v2041_v63 = vsel %vm2009_vm5, %v2008_v14, %v9812_v27 }
 0x1de   : > { %v12902_v50 = vsel %vm2075_vm7, %v2067_v35, %v9956_v13  ;;  %v12905_v51 = vsel %vm2075_vm7, %v2068_v19, %v9957_v49  ;;  %v2037_v35 = vsel %vm2009_vm5, %v2004_v59, %v9802_v11  ;;  %v9816_v14 = vunpack.i.l.bf16 %v16670_v9 }
 0x1df   : > { %v10010_v2 = vpop.permute.xlu2 %10009  ;;  %v2070_v59 = vsel %vm2042_vm6, %v2037_v35, %v9882_v60  ;;  %v2073_v27 = vsel %vm2042_vm6, %v2040_v41, %v9891_v33  ;;  %v2074_v60 = vsel %vm2042_vm6, %v2041_v63, %v9892_v45  ;;  %v12956_v35 = vsel %vm1943_vm3, %v12730_v7, %v9622_v37  ;;  %v16671_v33 = vld [vmem:[#allocation33_spill] sm:$0xff]  ;;  %v16674_v37 = vld [vmem:[#allocation35_spill] sm:$0xff] }
 0x1e0   : > { %v10012_v38 = vunpack.i.h.bf16 %v10010_v2  ;;  %v10011_v44 = vunpack.i.l.bf16 %v10010_v2  ;;  %v9817_v2 = vunpack.i.h.bf16 %v16670_v9  ;;  %v9897_v41 = vunpack.i.h.bf16 %v12695_v8 }
 0x1e1   : > { %v9960_v16 = vpop.permute.xlu1 %9959  ;;  %v9896_v61 = vunpack.i.l.bf16 %v12695_v8  ;;  %v1977_v7 = vsel %vm1976_vm4, %v12715_v21, %v16673_v47  ;;  %v9586_v8 = vunpack.i.l.bf16 %v16674_v37  ;;  %v16678_v47 = vld [vmem:[#allocation43_spill] sm:$0xff] }
 0x1e2   : > { %v9962_v58 = vunpack.i.h.bf16 %v9960_v16  ;;  %v9961_v49 = vunpack.i.l.bf16 %v9960_v16  ;;  %v12918_v29 = vsel %vm2108_vm10, %v2090_v17, %v10011_v44  ;;  %v12921_v5 = vsel %vm2108_vm10, %v2091_v18, %v10012_v38  ;;  %v16669_v18 = vld [vmem:[#allocation55_spill] sm:$0xff] }
 0x1e3   : > { %v9970_v30 = vpop.permute.xlu0 %9969  ;;  %v9737_v19 = vunpack.i.h.bf16 %v16669_v18  ;;  %v9736_v43 = vunpack.i.l.bf16 %v16669_v18  ;;  %v12950_v44 = vsel %vm1943_vm3, %v12723_v36, %v9621_v34  ;;  %v9582_v16 = vunpack.i.h.bf16 %v16671_v33  ;;  %v16675_v18 = vld [vmem:[#allocation38_spill] sm:$0xff] }
 0x1e4   : > { %v9972_v11 = vunpack.i.h.bf16 %v9970_v30  ;;  %v9971_v22 = vunpack.i.l.bf16 %v9970_v30  ;;  %v12929_v46 = vsel %vm2075_vm7, %v2069_v15, %v9961_v49  ;;  %v12932_v17 = vsel %vm2075_vm7, %v2070_v59, %v9962_v58 }
 0x1e5   : > { %v9581_v58 = vunpack.i.l.bf16 %v16671_v33  ;;  %v16672_v49 = vunpack.i.h.bf16 %v16661_v25  ;;  %v9587_v34 = vunpack.i.h.bf16 %v16674_v37  ;;  %v2010_v63 = vsel %vm2009_vm5, %v1977_v7, %v9736_v43  ;;  %v16676_v43 = vld [vmem:[#allocation40_spill] sm:$0xff] }
 0x1e6   : > { %v12941_v48 = vsel %vm2075_vm7, %v2073_v27, %v9971_v22  ;;  %v12944_v38 = vsel %vm2075_vm7, %v2074_v60, %v9972_v11  ;;  %v2043_v30 = vsel %vm2042_vm6, %v2010_v63, %v9816_v14  ;;  %v9667_v25 = vunpack.i.h.bf16 %v16675_v18  ;;  %v16679_v63 = vld [vmem:[#allocation44_spill] sm:$0xff] }
 0x1e7   : > { %v12960_v45 = vpop.permute.xlu2 %10024  ;;  %v1978_v36 = vsel %vm1976_vm4, %v12712_v26, %v16672_v49  ;;  %v9666_v27 = vunpack.i.l.bf16 %v16675_v18  ;;  %v2076_v60 = vsel %vm2075_vm7, %v2043_v30, %v9896_v61  ;;  %v9631_v33 = vunpack.i.l.bf16 %v16676_v43  ;;  %v16680_v30 = vld [vmem:[#allocation5_spill] sm:$0xff] }
 0x1e8   : > { %v2011_v15 = vsel %vm2009_vm5, %v1978_v36, %v9737_v19  ;;  %v9632_v36 = vunpack.i.h.bf16 %v16676_v43  ;;  %v9711_v7 = vunpack.i.l.bf16 %v16678_v47  ;;  %v1948_v61 = vsel %vm1943_vm3, %v12671_v24, %v9586_v8 }
 0x1e9   : > { %v9975_v59 = vpop.permute.xlu1 %9974  ;;  %v2044_v11 = vsel %vm2042_vm6, %v2011_v15, %v9817_v2  ;;  %v16677_v2 = vld [vmem:[#allocation7_spill] sm:$0xff]  ;;  %v9661_v15 = vunpack.i.l.bf16 %v16679_v63 }
 0x1ea   : > { %v9977_v22 = vunpack.i.h.bf16 %v9975_v59  ;;  %v9976_v26 = vunpack.i.l.bf16 %v9975_v59  ;;  %v2077_v9 = vsel %vm2075_vm7, %v2044_v11, %v9897_v41  ;;  %v1946_v49 = vsel %vm1943_vm3, %v16677_v2, %v9581_v58 }
 0x1eb   : > { %v12980_v21 = vpop.permute.xlu0 %9984  ;;  %v1949_v41 = vsel %vm1943_vm3, %v12667_v42, %v9587_v34  ;;  %v9712_v59 = vunpack.i.h.bf16 %v16678_v47  ;;  %v1947_v11 = vsel %vm1943_vm3, %v16680_v30, %v9582_v16  ;;  %v13000_v58 = vsel %vm1976_vm4, %v1948_v61, %v9666_v27  ;;  %v16684_v61 = vld [vmem:[#allocation67_spill] sm:$0xff] }
 0x1ec   : > { %v2109_v19 = vsel %vm2108_vm10, %v2076_v60, %v9976_v26  ;;  %v2110_v14 = vsel %vm2108_vm10, %v2077_v9, %v9977_v22  ;;  %v13003_v22 = vsel %vm1976_vm4, %v1949_v41, %v9667_v25  ;;  %v16681_v26 = vld [vmem:[#allocation39_spill] sm:$0xff]  ;;  %v1966_v34 = vsel %vm1943_vm3, %v12738_v52, %v9631_v33  ;;  %v16682_v9 = vld [vmem:[#allocation46_spill] sm:$0xff] }
 0x1ed   : > { %v2141_v37 = vpack.c.bf16 %v2110_v14, %v2109_v19  ;;  %v9627_v18 = vunpack.i.h.bf16 %v16681_v26  ;;  %v9626_v42 = vunpack.i.l.bf16 %v16681_v26  ;;  %v1967_v16 = vsel %vm1943_vm3, %v12734_v1, %v9632_v36  ;;  %v16683_v36 = vld [vmem:[#allocation48_spill] sm:$0xff] }
 0x1ee   : > { %v9662_v27 = vunpack.i.h.bf16 %v16679_v63  ;;  %v13014_v25 = vsel %vm1976_vm4, %v1966_v34, %v9711_v7  ;;  %v9741_v43 = vunpack.i.l.bf16 %v16682_v9  ;;  %v1979_v14 = vsel %vm1976_vm4, %v1946_v49, %v9661_v15 }
 0x1ef   : > { %8942 = vmatmul.msk.bf16.vlgmr.msra.gmra.mxu0 %vm2176_vm11, %v2141_v37  ;;  %v10040_v24 = vpop.permute.xlu2 %10039  ;;  %v2000_v2 = vsel %vm1976_vm4, %v1967_v16, %v9712_v59  ;;  %v9742_v33 = vunpack.i.h.bf16 %v16682_v9  ;;  %v9702_v47 = vunpack.i.h.bf16 %v16683_v36  ;;  %v9701_v7 = vunpack.i.l.bf16 %v16683_v36  ;;  %v16686_v36 = vld [vmem:[#allocation56_spill] sm:$0xff] }
 0x1f0   : > { %v10042_v8 = vunpack.i.h.bf16 %v10040_v24  ;;  %v10041_v60 = vunpack.i.l.bf16 %v10040_v24  ;;  %v9822_v41 = vunpack.i.h.bf16 %v16684_v61  ;;  %v9821_v63 = vunpack.i.l.bf16 %v16684_v61 }
 0x1f1   : > { %v13017_v19 = vpop.permute.xlu1 %9989  ;;  %v1980_v59 = vsel %vm1976_vm4, %v1947_v11, %v9662_v27  ;;  %v9902_v30 = vunpack.i.h.bf16 %v12751_v40  ;;  %v9901_v24 = vunpack.i.l.bf16 %v12751_v40  ;;  %v9982_v34 = vunpack.i.h.bf16 %v12823_v12 }
 0x1f2   : > { %v13023_v52 = vsel %vm2108_vm10, %v12929_v46, %v10041_v60  ;;  %v13027_v1 = vsel %vm2108_vm10, %v12932_v17, %v10042_v8  ;;  %v2012_v17 = vsel %vm2009_vm5, %v1979_v14, %v9741_v43  ;;  %v9981_v8 = vunpack.i.l.bf16 %v12823_v12  ;;  %v16685_v12 = vld [vmem:[#allocation49_spill] sm:$0xff] }
 0x1f3   : > { %v10000_v37 = vpop.permute.xlu0 %9999  ;;  %v2013_v11 = vsel %vm2009_vm5, %v1980_v59, %v9742_v33  ;;  %v1995_v27 = vsel %vm1976_vm4, %v12950_v44, %v9701_v7  ;;  %v1996_v40 = vsel %vm1976_vm4, %v12956_v35, %v9702_v47  ;;  %v2045_v14 = vsel %vm2042_vm6, %v2012_v17, %v9821_v63  ;;  %v16687_v33 = vld [vmem:[#allocation61_spill] sm:$0xff]  ;;  %v16688_v63 = vld [vmem:[#allocation62_spill] sm:$0xff] }
 0x1f4   : > { %v10002_v46 = vunpack.i.h.bf16 %v10000_v37  ;;  %v10001_v15 = vunpack.i.l.bf16 %v10000_v37  ;;  %v9747_v37 = vunpack.i.h.bf16 %v16686_v36  ;;  %v9781_v61 = vunpack.i.l.bf16 %v16687_v33 }
 0x1f5   : > { %v2078_v44 = vsel %vm2075_vm7, %v2045_v14, %v9901_v24  ;;  %v9782_v13 = vunpack.i.h.bf16 %v16687_v33  ;;  %v9792_v17 = vunpack.i.h.bf16 %v16688_v63 }
 0x1f6   : > { %v13044_v60 = vsel %vm2108_vm10, %v12622_v39, %v10001_v15  ;;  %v13048_v16 = vsel %vm2108_vm10, %v12625_v53, %v10002_v46  ;;  %v2046_v53 = vsel %vm2042_vm6, %v2013_v11, %v9822_v41  ;;  %v2111_v15 = vsel %vm2108_vm10, %v2078_v44, %v9981_v8  ;;  %v16689_v11 = vld [vmem:[#allocation65_spill] sm:$0xff] }
 0x1f7   : > { %v2079_v35 = vsel %vm2075_vm7, %v2046_v53, %v9902_v30  ;;  %v9791_v41 = vunpack.i.l.bf16 %v16688_v63  ;;  %v9861_v49 = vunpack.i.l.bf16 %v16689_v11  ;;  %v9862_v8 = vunpack.i.h.bf16 %v16689_v11 }
 0x1f8   : > { %v2112_v59 = vsel %vm2108_vm10, %v2079_v35, %v9982_v34  ;;  %v9746_v34 = vunpack.i.l.bf16 %v16686_v36  ;;  %v2028_v33 = vsel %vm2009_vm5, %v1995_v27, %v9781_v61  ;;  %v9942_v35 = vunpack.i.h.bf16 %v12845_v32 }
 0x1f9   : > { %v10005_v46 = vpop.permute.xlu1 %10004  ;;  %v2142_v14 = vpack.c.bf16 %v2112_v59, %v2111_v15  ;;  %v2029_v61 = vsel %vm2009_vm5, %v1996_v40, %v9782_v13  ;;  %v9951_v59 = vunpack.i.l.bf16 %v12726_v10 }
 0x1fa   : > { %v10007_v47 = vunpack.i.h.bf16 %v10005_v46  ;;  %v10006_v7 = vunpack.i.l.bf16 %v10005_v46  ;;  %v16690_v46 = vld [vmem:[#allocation6_spill] sm:$0xff] }
 0x1fb   : > { %v10015_v9 = vpop.permute.xlu0 %10014  ;;  %v9871_v44 = vunpack.i.l.bf16 %v16690_v46 }
 0x1fc   : > { %v10017_v43 = vunpack.i.h.bf16 %v10015_v9  ;;  %v10016_v39 = vunpack.i.l.bf16 %v10015_v9  ;;  %v13073_v30 = vsel %vm2108_vm10, %v12814_v62, %v10006_v7  ;;  %v13077_v24 = vsel %vm2108_vm10, %v12817_v28, %v10007_v47  ;;  %v16691_v7 = vld [vmem:[#allocation69_spill] sm:$0xff] }
 0x1fd   : > { %v2147_v53 = vpack.c.bf16 %v13077_v24, %v13073_v30  ;;  %v9872_v9 = vunpack.i.h.bf16 %v16690_v46  ;;  %v9941_v47 = vunpack.i.l.bf16 %v12845_v32  ;;  %v9827_v15 = vunpack.i.h.bf16 %v16691_v7 }
 0x1fe   : > { %v13087_v62 = vsel %vm2108_vm10, %v12686_v55, %v10016_v39  ;;  %v13091_v28 = vsel %vm2108_vm10, %v12689_v56, %v10017_v43  ;;  %v2032_v55 = vsel %vm2009_vm5, %v13014_v25, %v9791_v41  ;;  %v2033_v39 = vsel %vm2009_vm5, %v2000_v2, %v9792_v17 }
 0x1ff   : > { %8943 = vmatmul.msk.bf16.gmra.mxu0 %vm2176_vm11, %v2142_v14  ;;  %v2061_v56 = vsel %vm2042_vm6, %v2028_v33, %v9861_v49  ;;  %v2062_v43 = vsel %vm2042_vm6, %v2029_v61, %v9862_v8  ;;  %v9952_v32 = vunpack.i.h.bf16 %v12726_v10  ;;  %v9826_v11 = vunpack.i.l.bf16 %v16691_v7  ;;  %v16692_v14 = vld [vmem:[#allocation28_spill] sm:$0xff] }
 0x200   : > { %v9907_v13 = vunpack.i.h.bf16 %v16692_v14  ;;  %v2065_v25 = vsel %vm2042_vm6, %v2032_v55, %v9871_v44  ;;  %v2066_v2 = vsel %vm2042_vm6, %v2033_v39, %v9872_v9  ;;  %v2094_v17 = vsel %vm2075_vm7, %v2061_v56, %v9941_v47  ;;  %v16693_v39 = vld [vmem:[#allocation31_spill] sm:$0xff] }
 0x201   : > { %v10020_v63 = vpop.permute.xlu1 %10019  ;;  %v2095_v41 = vsel %vm2075_vm7, %v2062_v43, %v9942_v35  ;;  %v9906_v7 = vunpack.i.l.bf16 %v16692_v14  ;;  %v2099_v44 = vsel %vm2075_vm7, %v2066_v2, %v9952_v32  ;;  %v9987_v9 = vunpack.i.h.bf16 %v12980_v21  ;;  %v16697_v2 = vld [vmem:[#allocation8_spill] sm:$0xff] }
 0x202   : > { %v10022_v40 = vunpack.i.h.bf16 %v10020_v63  ;;  %v10021_v46 = vunpack.i.l.bf16 %v10020_v63  ;;  %v2098_v63 = vsel %vm2075_vm7, %v2065_v25, %v9951_v59  ;;  %v9986_v55 = vunpack.i.l.bf16 %v12980_v21 }
 0x203   : > { %v10030_v49 = vpop.permute.xlu0 %10029  ;;  %v9592_v56 = vunpack.i.h.bf16 %v16693_v39  ;;  %v2014_v43 = vsel %vm2009_vm5, %v13000_v58, %v9746_v34  ;;  %v2015_v32 = vsel %vm2009_vm5, %v13003_v22, %v9747_v37  ;;  %v1965_v59 = vsel %vm1943_vm3, %v12656_v31, %v9627_v18 }
 0x204   : > { %v10032_v8 = vunpack.i.h.bf16 %v10030_v49  ;;  %v10031_v33 = vunpack.i.l.bf16 %v10030_v49  ;;  %v2127_v10 = vsel %vm2108_vm10, %v2094_v17, %v10021_v46  ;;  %v2128_v61 = vsel %vm2108_vm10, %v2095_v41, %v10022_v40 }
 0x205   : > { %v2150_v27 = vpack.c.bf16 %v2128_v61, %v2127_v10  ;;  %v1964_v58 = vsel %vm1943_vm3, %v12659_v23, %v9626_v42  ;;  %v2047_v36 = vsel %vm2042_vm6, %v2014_v43, %v9826_v11  ;;  %v2048_v34 = vsel %vm2042_vm6, %v2015_v32, %v9827_v15  ;;  %v16696_v15 = vld [vmem:[#allocation54_spill] sm:$0xff] }
 0x206   : > { %v13122_v47 = vsel %vm2108_vm10, %v2098_v63, %v10031_v33  ;;  %v13125_v35 = vsel %vm2108_vm10, %v2099_v44, %v10032_v8  ;;  %v16694_v22 = vunpack.i.l.bf16 %v16685_v12  ;;  %v2080_v31 = vsel %vm2075_vm7, %v2047_v36, %v9906_v7 }
 0x207   : > { %8951 = vmatmul.msk.bf16.vlgmr.msra.gmra.mxu2 %vm2176_vm11, %v2150_v27  ;;  %v2152_v21 = vpack.c.bf16 %v13125_v35, %v13122_v47  ;;  %v16695_v27 = vunpack.i.h.bf16 %v16685_v12  ;;  %v2081_v26 = vsel %vm2075_vm7, %v2048_v34, %v9907_v13  ;;  %v2113_v23 = vsel %vm2108_vm10, %v2080_v31, %v9986_v55 }
 0x208   : > { %v1997_v37 = vsel %vm1976_vm4, %v1964_v58, %v16694_v22  ;;  %v2114_v42 = vsel %vm2108_vm10, %v2081_v26, %v9987_v9  ;;  %v9787_v11 = vunpack.i.h.bf16 %v16696_v15  ;;  %v9786_v25 = vunpack.i.l.bf16 %v16696_v15  ;;  %v16702_v22 = vld [vmem:[#allocation45_spill] sm:$0xff]  ;;  %v16703_v15 = vld [vmem:[#allocation58_spill] sm:$0xff] }
 0x209   : > { %v1998_v14 = vsel %vm1976_vm4, %v1965_v59, %v16695_v27  ;;  %v10035_v40 = vpop.permute.xlu1 %10034  ;;  %v9867_v49 = vunpack.i.h.bf16 %v16697_v2  ;;  %v9866_v12 = vunpack.i.l.bf16 %v16697_v2  ;;  %v9947_v10 = vunpack.i.h.bf16 %v12876_v4  ;;  %v16699_v59 = vld [vmem:[#allocation19_spill] sm:$0xff]  ;;  %v16704_v2 = vld [vmem:[#allocation60_spill] sm:$0xff] }
 0x20a   : > { %v10037_v18 = vunpack.i.h.bf16 %v10035_v40  ;;  %v10036_v46 = vunpack.i.l.bf16 %v10035_v40  ;;  %v9946_v61 = vunpack.i.l.bf16 %v12876_v4  ;;  %v2143_v7 = vpack.c.bf16 %v2114_v42, %v2113_v23 }
 0x20b   : > { %v10045_v17 = vpop.permute.xlu0 %10044  ;;  %v10027_v44 = vunpack.i.h.bf16 %v12960_v45  ;;  %v10026_v9 = vunpack.i.l.bf16 %v12960_v45  ;;  %v2030_v43 = vsel %vm2009_vm5, %v1997_v37, %v9786_v25  ;;  %v2031_v4 = vsel %vm2009_vm5, %v1998_v14, %v9787_v11 }
 0x20c   : > { %v10047_v41 = vunpack.i.h.bf16 %v10045_v17  ;;  %v10046_v8 = vunpack.i.l.bf16 %v10045_v17  ;;  %v2133_v13 = vsel %vm2108_vm10, %v12902_v50, %v10036_v46  ;;  %v2134_v33 = vsel %vm2108_vm10, %v12905_v51, %v10037_v18 }
 0x20d   : > { %v2153_v63 = vpack.c.bf16 %v2134_v33, %v2133_v13  ;;  %v9591_v51 = vunpack.i.l.bf16 %v16693_v39  ;;  %v16698_v45 = vunpack.i.l.bf16 %v12204_v6  ;;  %v16700_v58 = vunpack.i.h.bf16 %v12204_v6 }
 0x20e   : > { %v13171_v55 = vsel %vm2108_vm10, %v12792_v54, %v10046_v8  ;;  %v13175_v50 = vsel %vm2108_vm10, %v12795_v20, %v10047_v41  ;;  %v16701_v20 = vld [vmem:[#allocation20_spill] sm:$0xff]  ;;  %v2063_v39 = vsel %vm2042_vm6, %v2030_v43, %v9866_v12  ;;  %v2064_v34 = vsel %vm2042_vm6, %v2031_v4, %v9867_v49 }
 0x20f   : > { %8944 = vmatmul.msk.bf16.gmra.mxu0 %vm2176_vm11, %v2143_v7  ;;  %v2155_v32 = vpack.c.bf16 %v13175_v50, %v13171_v55  ;;  %v1917_v54 = vsel %vm1910_vm2, %v16699_v59, %v16698_v45  ;;  %v1918_v36 = vsel %vm1910_vm2, %v16701_v20, %v16700_v58  ;;  %v9672_v37 = vunpack.i.h.bf16 %v16702_v22 }
 0x210   : > { %v9671_v27 = vunpack.i.l.bf16 %v16702_v22  ;;  %v2096_v40 = vsel %vm2075_vm7, %v2063_v39, %v9946_v61  ;;  %v2097_v31 = vsel %vm2075_vm7, %v2064_v34, %v9947_v10  ;;  %v1951_v23 = vsel %vm1943_vm3, %v1918_v36, %v9592_v56 }
 0x211   : > { %v10050_v14 = vpop.permute.xlu1 %10049  ;;  %v2129_v6 = vsel %vm2108_vm10, %v2096_v40, %v10026_v9  ;;  %v2130_v46 = vsel %vm2108_vm10, %v2097_v31, %v10027_v44  ;;  %v1950_v42 = vsel %vm1943_vm3, %v1917_v54, %v9591_v51  ;;  %v9752_v11 = vunpack.i.h.bf16 %v16703_v15 }
 0x212   : > { %v10052_v26 = vunpack.i.h.bf16 %v10050_v14  ;;  %v10051_v18 = vunpack.i.l.bf16 %v10050_v14  ;;  %v9751_v25 = vunpack.i.l.bf16 %v16703_v15  ;;  %v9832_v49 = vunpack.i.h.bf16 %v16704_v2 }
 0x213   : > { %v9831_v12 = vunpack.i.l.bf16 %v16704_v2  ;;  %v9912_v56 = vunpack.i.h.bf16 %v12759_v0  ;;  %v9911_v8 = vunpack.i.l.bf16 %v12759_v0  ;;  %v2151_v13 = vpack.c.bf16 %v2130_v46, %v2129_v6 }
 0x214   : > { %v13207_v17 = vsel %vm2108_vm10, %v12941_v48, %v10051_v18  ;;  %v13211_v41 = vsel %vm2108_vm10, %v12944_v38, %v10052_v26  ;;  %v1984_v10 = vsel %vm1976_vm4, %v1951_v23, %v9672_v37  ;;  %v1983_v61 = vsel %vm1976_vm4, %v1950_v42, %v9671_v27 }
 0x215   : > { %v2156_v33 = vpack.c.bf16 %v13211_v41, %v13207_v17  ;;  %v9992_v7 = vunpack.i.h.bf16 %v13017_v19  ;;  %v9991_v48 = vunpack.i.l.bf16 %v13017_v19  ;;  %v2016_v44 = vsel %vm2009_vm5, %v1983_v61, %v9751_v25 }
 0x216   : > { %v2017_v38 = vsel %vm2009_vm5, %v1984_v10, %v9752_v11  ;;  %v2049_v0 = vsel %vm2042_vm6, %v2016_v44, %v9831_v12  ;;  %v16705_v19 = vpack.c.bf16 %v12886_v57, %v12882_v3  ;;  %v16706_v54 = vpack.c.bf16 %v13048_v16, %v13044_v60  ;;  %v9325_v3 = vld [vmem:[%s16466_s3 + $0x8] sm:$0xff] }
 0x217   : > { %8952 = vmatmul.msk.bf16.gmra.mxu2 %vm2176_vm11, %v2151_v13  ;;  %v2050_v9 = vsel %vm2042_vm6, %v2017_v38, %v9832_v49  ;;  %v2082_v51 = vsel %vm2075_vm7, %v2049_v0, %v9911_v8  ;;  %v16707_v58 = vpack.c.bf16 %v13027_v1, %v13023_v52  ;;  %v16708_v47 = vmov 0.0   ;;  %2507 = vmatpush.bf16.msra.mxu1 %v9325_v3  ;;  %v9324_v52 = vld [vmem:[%s16466_s3] sm:$0xff] }
 0x218   : > { %v2083_v43 = vsel %vm2075_vm7, %v2050_v9, %v9912_v56  ;;  %v2115_v4 = vsel %vm2108_vm10, %v2082_v51, %v9991_v48  ;;  %445 = vst.msk [vmem:[#allocation3] sm:$0xff] %vm444_vm12, %v16708_v47  ;;  %9388 = vmatpush.bf16.msra.mxu3 %v9325_v3  ;;  %v16709_v57 = vpack.c.bf16 %v12921_v5, %v12918_v29  ;;  %v13336_v29 = vld [vmem:[%s16465_s2] ss:$0 sm:$0xff] }
 0x219   : > { %v2116_v45 = vsel %vm2108_vm10, %v2083_v43, %v9992_v7  ;;  %446 = vst.msk [vmem:[#allocation3 + $0x8] sm:$0xff] %vm444_vm12, %v16708_v47  ;;  %v16710_v16 = vpack.c.bf16 %v13091_v28, %v13087_v62 }
 0x21a   : > { %v2144_v59 = vpack.c.bf16 %v2116_v45, %v2115_v4  ;;  %449 = vst.msk [vmem:[#allocation3 + $0x18] sm:$0xff] %vm444_vm12, %v16708_v47 }
 0x21b   : > { %450 = vst.msk [vmem:[#allocation3 + $0x20] sm:$0xff] %vm444_vm12, %v16708_v47  ;;  %2508 = vmatpush.bf16.msra.mxu1 %v9324_v52 }
 0x21c   : > { %452 = vst.msk [vmem:[#allocation3 + $0x30] sm:$0xff] %vm444_vm12, %v16708_v47  ;;  %9389 = vmatpush.bf16.msra.mxu3 %v9324_v52 }
 0x21d   : > { %453 = vst.msk [vmem:[#allocation3 + $0x38] sm:$0xff] %vm444_vm12, %v16708_v47 }
 0x21e   : > { %455 = vst.msk [vmem:[#allocation3 + $0x48] sm:$0xff] %vm444_vm12, %v16708_v47 }
 0x21f   : > { %8945 = vmatmul.msk.bf16.gmra.mxu0 %vm2176_vm11, %v2144_v59  ;;  %456 = vst.msk [vmem:[#allocation3 + $0x50] sm:$0xff] %vm444_vm12, %v16708_v47 }
 0x220   : > { %458 = vst.msk [vmem:[#allocation3 + $0x60] sm:$0xff] %vm444_vm12, %v16708_v47 }
 0x221   : > { %459 = vst.msk [vmem:[#allocation3 + $0x68] sm:$0xff] %vm444_vm12, %v16708_v47 }
 0x222   : > { %461 = vst.msk [vmem:[#allocation3 + $0x78] sm:$0xff] %vm444_vm12, %v16708_v47 }
 0x223   : > { %462 = vst.msk [vmem:[#allocation3 + $0x80] sm:$0xff] %vm444_vm12, %v16708_v47 }
 0x224   : > { %464 = vst.msk [vmem:[#allocation3 + $0x90] sm:$0xff] %vm444_vm12, %v16708_v47 }
 0x225   : > { %465 = vst.msk [vmem:[#allocation3 + $0x98] sm:$0xff] %vm444_vm12, %v16708_v47 }
 0x226   : > { %467 = vst.msk [vmem:[#allocation3 + $0xa8] sm:$0xff] %vm444_vm12, %v16708_v47 }
 0x227   : > { %8953 = vmatmul.msk.bf16.gmra.mxu2 %vm2176_vm11, %v2152_v21  ;;  %468 = vst.msk [vmem:[#allocation3 + $0xb0] sm:$0xff] %vm444_vm12, %v16708_v47 }
 0x228   : > { %470 = vst.msk [vmem:[#allocation3 + $0xc0] sm:$0xff] %vm444_vm12, %v16708_v47 }
 0x229   : > { %471 = vst.msk [vmem:[#allocation3 + $0xc8] sm:$0xff] %vm444_vm12, %v16708_v47 }
 0x22a   : > { %473 = vst.msk [vmem:[#allocation3 + $0xd8] sm:$0xff] %vm444_vm12, %v16708_v47 }
 0x22b   : > { %474 = vst.msk [vmem:[#allocation3 + $0xe0] sm:$0xff] %vm444_vm12, %v16708_v47 }
 0x22c   : > { %476 = vst.msk [vmem:[#allocation3 + $0xf0] sm:$0xff] %vm444_vm12, %v16708_v47 }
 0x22d   : > { %477 = vst.msk [vmem:[#allocation3 + $0xf8] sm:$0xff] %vm444_vm12, %v16708_v47 }
 0x22e   : > { %479 = vst.msk [vmem:[#allocation3 + $0x108] sm:$0xff] %vm444_vm12, %v16708_v47 }
 0x22f   : > { %8946 = vmatmul.msk.bf16.gmra.mxu0 %vm2176_vm11, %v16705_v19  ;;  %480 = vst.msk [vmem:[#allocation3 + $0x110] sm:$0xff] %vm444_vm12, %v16708_v47 }
 0x230   : > { %482 = vst.msk [vmem:[#allocation3 + $0x120] sm:$0xff] %vm444_vm12, %v16708_v47 }
 0x231   : > { %483 = vst.msk [vmem:[#allocation3 + $0x128] sm:$0xff] %vm444_vm12, %v16708_v47 }
 0x232   : > { %485 = vst.msk [vmem:[#allocation3 + $0x138] sm:$0xff] %vm444_vm12, %v16708_v47 }
 0x233   : > { %486 = vst.msk [vmem:[#allocation3 + $0x140] sm:$0xff] %vm444_vm12, %v16708_v47 }
 0x234   : > { %488 = vst.msk [vmem:[#allocation3 + $0x150] sm:$0xff] %vm444_vm12, %v16708_v47 }
 0x235   : > { %489 = vst.msk [vmem:[#allocation3 + $0x158] sm:$0xff] %vm444_vm12, %v16708_v47 }
 0x236   : > { %491 = vst.msk [vmem:[#allocation3 + $0x168] sm:$0xff] %vm444_vm12, %v16708_v47 }
 0x237   : > { %8954 = vmatmul.msk.bf16.gmra.mxu2 %vm2176_vm11, %v2153_v63  ;;  %492 = vst.msk [vmem:[#allocation3 + $0x170] sm:$0xff] %vm444_vm12, %v16708_v47 }
 0x238   : > { %494 = vst.msk [vmem:[#allocation3 + $0x180] sm:$0xff] %vm444_vm12, %v16708_v47 }
 0x239   : > { %495 = vst.msk [vmem:[#allocation3 + $0x188] sm:$0xff] %vm444_vm12, %v16708_v47 }
 0x23a   : > { %497 = vst.msk [vmem:[#allocation3 + $0x198] sm:$0xff] %vm444_vm12, %v16708_v47 }
 0x23b   : > { %498 = vst.msk [vmem:[#allocation3 + $0x1a0] sm:$0xff] %vm444_vm12, %v16708_v47 }
 0x23c   : > { %451 = vst.msk [vmem:[#allocation3 + $0x28] sm:$0x3] %vm447_vm13, %v16708_v47 }
 0x23d   : > { %448 = vst.msk [vmem:[#allocation3 + $0x10] sm:$0x3] %vm447_vm13, %v16708_v47 }
 0x23e   : > { %454 = vst.msk [vmem:[#allocation3 + $0x40] sm:$0x3] %vm447_vm13, %v16708_v47 }
 0x23f   : > { %8947 = vmatmul.msk.bf16.gmra.mxu0 %vm2176_vm11, %v16706_v54  ;;  %457 = vst.msk [vmem:[#allocation3 + $0x58] sm:$0x3] %vm447_vm13, %v16708_v47 }
 0x240   : > { %460 = vst.msk [vmem:[#allocation3 + $0x70] sm:$0x3] %vm447_vm13, %v16708_v47 }
 0x241   : > { %463 = vst.msk [vmem:[#allocation3 + $0x88] sm:$0x3] %vm447_vm13, %v16708_v47 }
 0x242   : > { %466 = vst.msk [vmem:[#allocation3 + $0xa0] sm:$0x3] %vm447_vm13, %v16708_v47 }
 0x243   : > { %469 = vst.msk [vmem:[#allocation3 + $0xb8] sm:$0x3] %vm447_vm13, %v16708_v47 }
 0x244   : > { %472 = vst.msk [vmem:[#allocation3 + $0xd0] sm:$0x3] %vm447_vm13, %v16708_v47 }
 0x245   : > { %475 = vst.msk [vmem:[#allocation3 + $0xe8] sm:$0x3] %vm447_vm13, %v16708_v47 }
 0x246   : > { %478 = vst.msk [vmem:[#allocation3 + $0x100] sm:$0x3] %vm447_vm13, %v16708_v47 }
 0x247   : > { %8955 = vmatmul.msk.bf16.gmra.mxu2 %vm2176_vm11, %v16707_v58  ;;  %481 = vst.msk [vmem:[#allocation3 + $0x118] sm:$0x3] %vm447_vm13, %v16708_v47 }
 0x248   : > { %484 = vst.msk [vmem:[#allocation3 + $0x130] sm:$0x3] %vm447_vm13, %v16708_v47 }
 0x249   : > { %487 = vst.msk [vmem:[#allocation3 + $0x148] sm:$0x3] %vm447_vm13, %v16708_v47 }
 0x24a   : > { %490 = vst.msk [vmem:[#allocation3 + $0x160] sm:$0x3] %vm447_vm13, %v16708_v47 }
 0x24b   : > { %493 = vst.msk [vmem:[#allocation3 + $0x178] sm:$0x3] %vm447_vm13, %v16708_v47 }
 0x24c   : > { %496 = vst.msk [vmem:[#allocation3 + $0x190] sm:$0x3] %vm447_vm13, %v16708_v47 }
 0x24d   : > { %499 = vst.msk [vmem:[#allocation3 + $0x1a8] sm:$0x3] %vm447_vm13, %v16708_v47  ;;  %v13475_v47 = vld [vmem:[%s16468_s5 + $0x80] sm:$0xff] }
 0x24f   : > { %8948 = vmatmul.msk.bf16.gmra.mxu0 %vm2176_vm11, %v2147_v53 }
 0x257   : > { %8956 = vmatmul.msk.bf16.gmra.mxu2 %vm2176_vm11, %v2155_v32 }
 0x25f   : > { %8949 = vmatmul.msk.bf16.gmra.mxu0 %vm2176_vm11, %v16709_v57 }
 0x267   : > { %8957 = vmatmul.msk.bf16.gmra.mxu2 %vm2176_vm11, %v2156_v33 }
 0x26c   : > { %v2241_v5 = vpop.f32.mrf.mxu0 }
 0x26d   : > { %v2242_v1 = vadd.f32 %v13336_v29, %v2241_v5 }
 0x26f   : > { %v2321_v60 = vmax.f32 %v2242_v1, 0.0  ;;  %8950 = vmatmul.msk.bf16.gmra.mxu0 %vm2176_vm11, %v16710_v16 }
 0x271   : > { %2353 = vst.msk [vmem:[#allocation4] sm:$0xff] %vm444_vm12, %v2321_v60 }
 0x274   : > { %v2243_v30 = vpop.f32.mrf.mxu0 }
 0x275   : > { %v2244_v24 = vadd.f32 %v13336_v29, %v2243_v30 }
 0x277   : > { %v2322_v53 = vmax.f32 %v2244_v24, 0.0 }
 0x278   : > { %v2385_v55 = vld [vmem:[#allocation4] sm:$0xff] }
 0x279   : > { %2354 = vst.msk [vmem:[#allocation4 + $0x8] sm:$0xff] %vm444_vm12, %v2322_v53 }
 0x27c   : > { %v2246_v35 = vpop.f32.mrf.mxu0 }
 0x27d   : > { %v2247_v21 = vadd.f32 %v13336_v29, %v2246_v35 }
 0x27f   : > { %v2323_v63 = vmax.f32 %v2247_v21, 0.0 }
 0x280   : > { %v2386_v50 = vld [vmem:[#allocation4 + $0x8] sm:$0xff] }
 0x281   : > { %2355 = vst.msk [vmem:[#allocation4 + $0x10] sm:$0xff] %vm444_vm12, %v2323_v63  ;;  %v2417_v32 = vpack.c.bf16 %v2386_v50, %v2385_v55 }
 0x283   : > { %8966 = vmatmul.msk.bf16.vlgmr.msra.gmra.mxu1 %vm444_vm12, %v2417_v32 }
 0x284   : > { %v2248_v62 = vpop.f32.mrf.mxu0 }
 0x285   : > { %v2249_v28 = vadd.f32 %v13336_v29, %v2248_v62 }
 0x287   : > { %v2324_v20 = vmax.f32 %v2249_v28, 0.0 }
 0x288   : > { %v2387_v14 = vld [vmem:[#allocation4 + $0x10] sm:$0xff] }
 0x289   : > { %2356 = vst.msk [vmem:[#allocation4 + $0x18] sm:$0xff] %vm444_vm12, %v2324_v20 }
 0x28a   : > { %v2286_v36 = vpop.f32.mrf.mxu2 }
 0x28b   : > { %v2287_v39 = vadd.f32 %v13336_v29, %v2286_v36 }
 0x28c   : > { %v2251_v34 = vpop.f32.mrf.mxu0 }
 0x28d   : > { %v2339_v22 = vmax.f32 %v2287_v39, 0.0  ;;  %v2252_v37 = vadd.f32 %v13336_v29, %v2251_v34 }
 0x28f   : > { %2371 = vst.msk [vmem:[#allocation4 + $0x90] sm:$0xff] %vm444_vm12, %v2339_v22  ;;  %v2325_v27 = vmax.f32 %v2252_v37, 0.0 }
 0x290   : > { %v2388_v40 = vld [vmem:[#allocation4 + $0x18] sm:$0xff] }
 0x291   : > { %2357 = vst.msk [vmem:[#allocation4 + $0x20] sm:$0xff] %vm444_vm12, %v2325_v27  ;;  %v2418_v31 = vpack.c.bf16 %v2388_v40, %v2387_v14 }
 0x292   : > { %v2288_v26 = vpop.f32.mrf.mxu2 }
 0x293   : > { %v2289_v18 = vadd.f32 %v13336_v29, %v2288_v26  ;;  %8967 = vmatmul.msk.bf16.gmra.mxu1 %vm444_vm12, %v2418_v31 }
 0x294   : > { %v2253_v6 = vpop.f32.mrf.mxu0 }
 0x295   : > { %v2340_v46 = vmax.f32 %v2289_v18, 0.0  ;;  %v2254_v23 = vadd.f32 %v13336_v29, %v2253_v6 }
 0x297   : > { %2372 = vst.msk [vmem:[#allocation4 + $0x98] sm:$0xff] %vm444_vm12, %v2340_v46  ;;  %v2326_v42 = vmax.f32 %v2254_v23, 0.0 }
 0x298   : > { %v2389_v17 = vld [vmem:[#allocation4 + $0x20] sm:$0xff] }
 0x299   : > { %2358 = vst.msk [vmem:[#allocation4 + $0x28] sm:$0xff] %vm444_vm12, %v2326_v42 }
 0x29a   : > { %v2291_v15 = vpop.f32.mrf.mxu2 }
 0x29b   : > { %v2292_v11 = vadd.f32 %v13336_v29, %v2291_v15 }
 0x29c   : > { %v2256_v25 = vpop.f32.mrf.mxu0 }
 0x29d   : > { %v2341_v2 = vmax.f32 %v2292_v11, 0.0  ;;  %v2257_v49 = vadd.f32 %v13336_v29, %v2256_v25 }
 0x29f   : > { %2373 = vst.msk [vmem:[#allocation4 + $0xa0] sm:$0xff] %vm444_vm12, %v2341_v2  ;;  %v2327_v12 = vmax.f32 %v2257_v49, 0.0 }
 0x2a0   : > { %v2390_v41 = vld [vmem:[#allocation4 + $0x28] sm:$0xff] }
 0x2a1   : > { %2359 = vst.msk [vmem:[#allocation4 + $0x30] sm:$0xff] %vm444_vm12, %v2327_v12  ;;  %v2419_v56 = vpack.c.bf16 %v2390_v41, %v2389_v17 }
 0x2a2   : > { %v2293_v8 = vpop.f32.mrf.mxu2 }
 0x2a3   : > { %v2294_v13 = vadd.f32 %v13336_v29, %v2293_v8  ;;  %8968 = vmatmul.msk.bf16.gmra.mxu1 %vm444_vm12, %v2419_v56 }
 0x2a4   : > { %v2258_v33 = vpop.f32.mrf.mxu0 }
 0x2a5   : > { %v2342_v10 = vmax.f32 %v2294_v13, 0.0  ;;  %v2259_v61 = vadd.f32 %v13336_v29, %v2258_v33 }
 0x2a7   : > { %2374 = vst.msk [vmem:[#allocation4 + $0xa8] sm:$0xff] %vm444_vm12, %v2342_v10  ;;  %v2328_v7 = vmax.f32 %v2259_v61, 0.0 }
 0x2a8   : > { %v2391_v43 = vld [vmem:[#allocation4 + $0x30] sm:$0xff] }
 0x2a9   : > { %2360 = vst.msk [vmem:[#allocation4 + $0x38] sm:$0xff] %vm444_vm12, %v2328_v7 }
 0x2aa   : > { %v2296_v48 = vpop.f32.mrf.mxu2 }
 0x2ab   : > { %v2297_v44 = vadd.f32 %v13336_v29, %v2296_v48 }
 0x2ac   : > { %v2261_v38 = vpop.f32.mrf.mxu0 }
 0x2ad   : > { %v2343_v0 = vmax.f32 %v2297_v44, 0.0  ;;  %v2262_v9 = vadd.f32 %v13336_v29, %v2261_v38 }
 0x2af   : > { %2375 = vst.msk [vmem:[#allocation4 + $0xb0] sm:$0xff] %vm444_vm12, %v2343_v0  ;;  %v2329_v51 = vmax.f32 %v2262_v9, 0.0  ;;  %v2878_v0 = vld [vmem:[#allocation3 + $0x198] sm:$0xff]  ;;  %v2879_v9 = vld [vmem:[#allocation3 + $0x1a0] sm:$0xff] }
 0x2b0   : > { %v2392_v4 = vld [vmem:[#allocation4 + $0x38] sm:$0xff] }
 0x2b1   : > { %2361 = vst.msk [vmem:[#allocation4 + $0x40] sm:$0xff] %vm444_vm12, %v2329_v51  ;;  %v2420_v45 = vpack.c.bf16 %v2392_v4, %v2391_v43  ;;  %v2687_v51 = vld [vmem:[#allocation3 + $0x1] sm:$0xff]  ;;  %v10063_v43 = vpack.i.bf16 %v2879_v9, %v2878_v0 }
 0x2b2   : > { %v2298_v59 = vpop.f32.mrf.mxu2  ;;  %v2719_v4 = vld [vmem:[#allocation3 + $0x2] sm:$0xff] }
 0x2b3   : > { %v2299_v19 = vadd.f32 %v13336_v29, %v2298_v59  ;;  %8969 = vmatmul.msk.bf16.gmra.mxu1 %vm444_vm12, %v2420_v45  ;;  %v2688_v59 = vld [vmem:[#allocation3 + $0x9] sm:$0xff]  ;;  %10064 = vrot.lane.b32.xlu1 %v10063_v43, %s11596_s27 }
 0x2b4   : > { %v2263_v54 = vpop.f32.mrf.mxu0 }
 0x2b5   : > { %v2344_v58 = vmax.f32 %v2299_v19, 0.0  ;;  %v2264_v3 = vadd.f32 %v13336_v29, %v2263_v54  ;;  %v2720_v19 = vld [vmem:[#allocation3 + $0xa] sm:$0xff] }
 0x2b7   : > { %2376 = vst.msk [vmem:[#allocation4 + $0xb8] sm:$0xff] %vm444_vm12, %v2344_v58  ;;  %v2330_v57 = vmax.f32 %v2264_v3, 0.0  ;;  %v10053_v3 = vpack.i.bf16 %v2688_v59, %v2687_v51 }
 0x2b8   : > { %v2393_v24 = vld [vmem:[#allocation4 + $0x40] sm:$0xff] }
 0x2b9   : > { %2362 = vst.msk [vmem:[#allocation4 + $0x48] sm:$0xff] %vm444_vm12, %v2330_v57  ;;  %v10058_v57 = vpack.i.bf16 %v2720_v19, %v2719_v4  ;;  %10054 = vrot.lane.b32.xlu2 %v10053_v3, %s11597_s28  ;;  %v9341_v4 = vld [vmem:[%s16468_s5 + $0x78] sm:$0xff]  ;;  %v2407_v19 = vld [vmem:[#allocation4 + $0xb0] sm:$0xff] }
 0x2ba   : > { %v2301_v52 = vpop.f32.mrf.mxu2  ;;  %4239 = vmatpush.bf16.msrb.mxu3 %v9341_v4 }
 0x2bb   : > { %v2302_v5 = vadd.f32 %v13336_v29, %v2301_v52  ;;  %10059 = vrot.lane.b32.xlu0 %v10058_v57, %s11596_s27 }
 0x2bc   : > { %v2266_v1 = vpop.f32.mrf.mxu0 }
 0x2bd   : > { %v2345_v60 = vmax.f32 %v2302_v5, 0.0  ;;  %v2267_v16 = vadd.f32 %v13336_v29, %v2266_v1 }
 0x2bf   : > { %2377 = vst.msk [vmem:[#allocation4 + $0xc0] sm:$0xff] %vm444_vm12, %v2345_v60  ;;  %v2331_v30 = vmax.f32 %v2267_v16, 0.0 }
 0x2c0   : > { %v2394_v53 = vld [vmem:[#allocation4 + $0x48] sm:$0xff] }
 0x2c1   : > { %2363 = vst.msk [vmem:[#allocation4 + $0x50] sm:$0xff] %vm444_vm12, %v2331_v30  ;;  %v2421_v35 = vpack.c.bf16 %v2394_v53, %v2393_v24  ;;  %v13467_v53 = vld [vmem:[%s16468_s5 + $0x88] sm:$0xff] }
 0x2c2   : > { %v2303_v21 = vpop.f32.mrf.mxu2  ;;  %4334 = vmatpush.bf16.msrb.mxu0 %v13467_v53 }
 0x2c3   : > { %v2304_v63 = vadd.f32 %v13336_v29, %v2303_v21  ;;  %8970 = vmatmul.msk.bf16.gmra.mxu1 %vm444_vm12, %v2421_v35 }
 0x2c4   : > { %v2268_v55 = vpop.f32.mrf.mxu0 }
 0x2c5   : > { %v2346_v50 = vmax.f32 %v2304_v63, 0.0  ;;  %v2269_v32 = vadd.f32 %v13336_v29, %v2268_v55 }
 0x2c6   : > { %4335 = vmatpush.bf16.msrb.mxu0 %v13475_v47 }
 0x2c7   : > { %2378 = vst.msk [vmem:[#allocation4 + $0xc8] sm:$0xff] %vm444_vm12, %v2346_v50  ;;  %v2332_v62 = vmax.f32 %v2269_v32, 0.0 }
 0x2c8   : > { %v2395_v37 = vld [vmem:[#allocation4 + $0x50] sm:$0xff] }
 0x2c9   : > { %2364 = vst.msk [vmem:[#allocation4 + $0x58] sm:$0xff] %vm444_vm12, %v2332_v62 }
 0x2ca   : > { %v2306_v28 = vpop.f32.mrf.mxu2 }
 0x2cb   : > { %v2307_v20 = vadd.f32 %v13336_v29, %v2306_v28 }
 0x2cc   : > { %v2271_v36 = vpop.f32.mrf.mxu0 }
 0x2cd   : > { %v2347_v39 = vmax.f32 %v2307_v20, 0.0  ;;  %v2272_v34 = vadd.f32 %v13336_v29, %v2271_v36  ;;  %v2404_v36 = vld [vmem:[#allocation4 + $0x98] sm:$0xff] }
 0x2cf   : > { %2379 = vst.msk [vmem:[#allocation4 + $0xd0] sm:$0xff] %vm444_vm12, %v2347_v39  ;;  %v2333_v22 = vmax.f32 %v2272_v34, 0.0  ;;  %v2403_v34 = vld [vmem:[#allocation4 + $0x90] sm:$0xff] }
 0x2d0   : > { %v2396_v27 = vld [vmem:[#allocation4 + $0x58] sm:$0xff] }
 0x2d1   : > { %2365 = vst.msk [vmem:[#allocation4 + $0x60] sm:$0xff] %vm444_vm12, %v2333_v22  ;;  %v2422_v14 = vpack.c.bf16 %v2396_v27, %v2395_v37  ;;  %v2426_v37 = vpack.c.bf16 %v2404_v36, %v2403_v34  ;;  %v2409_v36 = vld [vmem:[#allocation4 + $0xc0] sm:$0xff] }
 0x2d2   : > { %v2308_v40 = vpop.f32.mrf.mxu2 }
 0x2d3   : > { %v2309_v31 = vadd.f32 %v13336_v29, %v2308_v40  ;;  %8971 = vmatmul.msk.bf16.gmra.mxu1 %vm444_vm12, %v2422_v14 }
 0x2d4   : > { %v2273_v26 = vpop.f32.mrf.mxu0 }
 0x2d5   : > { %v2348_v18 = vmax.f32 %v2309_v31, 0.0  ;;  %v2274_v6 = vadd.f32 %v13336_v29, %v2273_v26 }
 0x2d7   : > { %2380 = vst.msk [vmem:[#allocation4 + $0xd8] sm:$0xff] %vm444_vm12, %v2348_v18  ;;  %v2334_v46 = vmax.f32 %v2274_v6, 0.0 }
 0x2d8   : > { %v2397_v49 = vld [vmem:[#allocation4 + $0x60] sm:$0xff] }
 0x2d9   : > { %2366 = vst.msk [vmem:[#allocation4 + $0x68] sm:$0xff] %vm444_vm12, %v2334_v46 }
 0x2da   : > { %v2311_v23 = vpop.f32.mrf.mxu2 }
 0x2db   : > { %v2312_v42 = vadd.f32 %v13336_v29, %v2311_v23 }
 0x2dc   : > { %v2276_v15 = vpop.f32.mrf.mxu0 }
 0x2dd   : > { %v2349_v11 = vmax.f32 %v2312_v42, 0.0  ;;  %v2277_v25 = vadd.f32 %v13336_v29, %v2276_v15 }
 0x2df   : > { %2381 = vst.msk [vmem:[#allocation4 + $0xe0] sm:$0xff] %vm444_vm12, %v2349_v11  ;;  %v2335_v2 = vmax.f32 %v2277_v25, 0.0 }
 0x2e0   : > { %v2398_v12 = vld [vmem:[#allocation4 + $0x68] sm:$0xff] }
 0x2e1   : > { %2367 = vst.msk [vmem:[#allocation4 + $0x70] sm:$0xff] %vm444_vm12, %v2335_v2  ;;  %v2423_v17 = vpack.c.bf16 %v2398_v12, %v2397_v49  ;;  %v2406_v2 = vld [vmem:[#allocation4 + $0xa8] sm:$0xff]  ;;  %v2405_v12 = vld [vmem:[#allocation4 + $0xa0] sm:$0xff] }
 0x2e2   : > { %v2313_v41 = vpop.f32.mrf.mxu2 }
 0x2e3   : > { %v2314_v56 = vadd.f32 %v13336_v29, %v2313_v41  ;;  %8972 = vmatmul.msk.bf16.gmra.mxu1 %vm444_vm12, %v2423_v17  ;;  %v2427_v41 = vpack.c.bf16 %v2406_v2, %v2405_v12  ;;  %v9339_v12 = vld [vmem:[%s16468_s5 + $0x68] sm:$0xff] }
 0x2e4   : > { %v2278_v8 = vpop.f32.mrf.mxu0 }
 0x2e5   : > { %v2350_v13 = vmax.f32 %v2314_v56, 0.0  ;;  %v2279_v33 = vadd.f32 %v13336_v29, %v2278_v8 }
 0x2e7   : > { %2382 = vst.msk [vmem:[#allocation4 + $0xe8] sm:$0xff] %vm444_vm12, %v2350_v13  ;;  %v2336_v10 = vmax.f32 %v2279_v33, 0.0 }
 0x2e8   : > { %v2399_v54 = vld [vmem:[#allocation4 + $0x70] sm:$0xff] }
 0x2e9   : > { %2368 = vst.msk [vmem:[#allocation4 + $0x78] sm:$0xff] %vm444_vm12, %v2336_v10 }
 0x2ea   : > { %v2316_v61 = vpop.f32.mrf.mxu2 }
 0x2eb   : > { %v2317_v7 = vadd.f32 %v13336_v29, %v2316_v61 }
 0x2ec   : > { %v2281_v48 = vpop.f32.mrf.mxu0 }
 0x2ed   : > { %v2351_v44 = vmax.f32 %v2317_v7, 0.0  ;;  %v2282_v38 = vadd.f32 %v13336_v29, %v2281_v48 }
 0x2ef   : > { %2383 = vst.msk [vmem:[#allocation4 + $0xf0] sm:$0xff] %vm444_vm12, %v2351_v44  ;;  %v2337_v45 = vmax.f32 %v2282_v38, 0.0 }
 0x2f0   : > { %v2400_v58 = vld [vmem:[#allocation4 + $0x78] sm:$0xff] }
 0x2f1   : > { %2369 = vst.msk [vmem:[#allocation4 + $0x80] sm:$0xff] %vm444_vm12, %v2337_v45  ;;  %v2424_v52 = vpack.c.bf16 %v2400_v58, %v2399_v54  ;;  %v2408_v45 = vld [vmem:[#allocation4 + $0xb8] sm:$0xff] }
 0x2f2   : > { %v2318_v5 = vpop.f32.mrf.mxu2  ;;  %v2428_v58 = vpack.c.bf16 %v2408_v45, %v2407_v19  ;;  %v9331_v45 = vld [vmem:[%s16468_s5 + $0x28] sm:$0xff] }
 0x2f3   : > { %v2319_v1 = vadd.f32 %v13336_v29, %v2318_v5  ;;  %8973 = vmatmul.msk.bf16.gmra.mxu1 %vm444_vm12, %v2424_v52 }
 0x2f4   : > { %v2283_v60 = vpop.f32.mrf.mxu0 }
 0x2f5   : > { %v2352_v16 = vmax.f32 %v2319_v1, 0.0  ;;  %v2284_v30 = vadd.f32 %v13336_v29, %v2283_v60  ;;  %v13460_v29 = vld [vmem:[%s16467_s4] ss:$0 sm:$0xff] }
 0x2f7   : > { %2384 = vst.msk [vmem:[#allocation4 + $0xf8] sm:$0xff] %vm444_vm12, %v2352_v16  ;;  %v2338_v24 = vmax.f32 %v2284_v30, 0.0 }
 0x2f8   : > { %v2401_v21 = vld [vmem:[#allocation4 + $0x80] sm:$0xff] }
 0x2f9   : > { %2370 = vst.msk [vmem:[#allocation4 + $0x88] sm:$0xff] %vm444_vm12, %v2338_v24 }
 0x300   : > { %v2510_v35 = vpop.f32.mrf.mxu1  ;;  %v2402_v63 = vld [vmem:[#allocation4 + $0x88] sm:$0xff] }
 0x301   : > { %v2511_v55 = vadd.f32 %v13460_v29, %v2510_v35  ;;  %v2425_v50 = vpack.c.bf16 %v2402_v63, %v2401_v21 }
 0x303   : > { %v2590_v32 = vmax.f32 %v2511_v55, 0.0  ;;  %8974 = vmatmul.msk.bf16.vlgmr.msra.gmra.mxu3 %vm444_vm12, %v2425_v50  ;;  %v9333_v50 = vld [vmem:[%s16468_s5 + $0x38] sm:$0xff] }
 0x304   : > { %4150 = vmatpush.bf16.msrb.mxu2 %v9333_v50 }
 0x305   : > { %2623 = vst.msk [vmem:[#allocation3 + $0x19] sm:$0xff] %vm444_vm12, %v2590_v32  ;;  %v9340_v32 = vld [vmem:[%s16468_s5 + $0x70] sm:$0xff] }
 0x306   : > { %4240 = vmatpush.bf16.msrb.mxu3 %v9340_v32  ;;  %v9329_v32 = vld [vmem:[%s16468_s5 + $0x18] sm:$0xff] }
 0x308   : > { %v2512_v62 = vpop.f32.mrf.mxu1 }
 0x309   : > { %v2513_v28 = vadd.f32 %v13460_v29, %v2512_v62 }
 0x30a   : > { %4241 = vmatpush.bf16.msrb.mxu3 %v9339_v12 }
 0x30b   : > { %v2591_v20 = vmax.f32 %v2513_v28, 0.0  ;;  %v2410_v28 = vld [vmem:[#allocation4 + $0xc8] sm:$0xff] }
 0x30c   : > { %v13483_v14 = vld [vmem:[#allocation3 + $0x19] sm:$0xff]  ;;  %v2429_v34 = vpack.c.bf16 %v2410_v28, %v2409_v36 }
 0x30d   : > { %2624 = vst.msk [vmem:[#allocation3 + $0x21] sm:$0xff] %vm444_vm12, %v2591_v20  ;;  %v13496_v11 = vld [vmem:[#allocation3 + $0x18] sm:$0xff] }
 0x310   : > { %v2515_v39 = vpop.f32.mrf.mxu1 }
 0x311   : > { %v2516_v22 = vadd.f32 %v13460_v29, %v2515_v39 }
 0x313   : > { %v2592_v27 = vmax.f32 %v2516_v22, 0.0  ;;  %8975 = vmatmul.msk.bf16.gmra.mxu3 %vm444_vm12, %v2426_v37  ;;  %v10055_v12 = vpop.permute.xlu2 %10054 }
 0x314   : > { %v2815_v40 = vld [vmem:[#allocation3 + $0x1a] sm:$0xff]  ;;  %v2816_v31 = vld [vmem:[#allocation3 + $0x22] sm:$0xff] }
 0x315   : > { %v13485_v26 = vld [vmem:[#allocation3 + $0x21] sm:$0xff]  ;;  %2625 = vst.msk [vmem:[#allocation3 + $0x31] sm:$0xff] %vm444_vm12, %v2592_v27  ;;  %v10083_v18 = vpack.i.bf16 %v2816_v31, %v2815_v40 }
 0x316   : > { %v10068_v6 = vpack.i.bf16 %v13485_v26, %v13483_v14  ;;  %v13494_v42 = vld [vmem:[#allocation3 + $0x20] sm:$0xff] }
 0x317   : > { %10084 = vrot.lane.b32.xlu2 %v10083_v18, %s11597_s28  ;;  %10074 = vrot.lane.b32.xlu1 %v10083_v18, %s11596_s27  ;;  %v10078_v25 = vpack.i.bf16 %v13494_v42, %v13496_v11 }
 0x318   : > { %10069 = vrot.lane.b32.xlu0 %v10068_v6, %s11597_s28  ;;  %v2517_v46 = vpop.f32.mrf.mxu1 }
 0x319   : > { %v2518_v23 = vadd.f32 %v13460_v29, %v2517_v46 }
 0x31b   : > { %v2593_v15 = vmax.f32 %v2518_v23, 0.0 }
 0x31c   : > { %v2691_v8 = vld [vmem:[#allocation3 + $0x31] sm:$0xff] }
 0x31d   : > { %2626 = vst.msk [vmem:[#allocation3 + $0x39] sm:$0xff] %vm444_vm12, %v2593_v15  ;;  %v13512_v51 = vld [vmem:[#allocation3 + $0x30] sm:$0xff] }
 0x31f   : > { %10079 = vrot.lane.b32.xlu1 %v10078_v25, %s11598_s16  ;;  %v9332_v25 = vld [vmem:[%s16468_s5 + $0x30] sm:$0xff] }
 0x320   : > { %v2520_v49 = vpop.f32.mrf.mxu1  ;;  %4151 = vmatpush.bf16.msrb.mxu2 %v9332_v25 }
 0x321   : > { %v2521_v17 = vadd.f32 %v13460_v29, %v2520_v49  ;;  %v2412_v49 = vld [vmem:[#allocation4 + $0xd8] sm:$0xff] }
 0x323   : > { %v2594_v56 = vmax.f32 %v2521_v17, 0.0  ;;  %8976 = vmatmul.msk.bf16.gmra.mxu3 %vm444_vm12, %v2427_v41  ;;  %v2411_v41 = vld [vmem:[#allocation4 + $0xd0] sm:$0xff] }
 0x324   : > { %v2912_v13 = vld [vmem:[#allocation3 + $0x32] sm:$0xff]  ;;  %v2913_v33 = vld [vmem:[#allocation3 + $0x3a] sm:$0xff]  ;;  %4152 = vmatpush.bf16.msrb.mxu2 %v9331_v45 }
 0x325   : > { %v2692_v10 = vld [vmem:[#allocation3 + $0x39] sm:$0xff]  ;;  %2627 = vst.msk [vmem:[#allocation3 + $0x49] sm:$0xff] %vm444_vm12, %v2594_v56  ;;  %v3908_v61 = vpack.c.bf16 %v2913_v33, %v2912_v13  ;;  %v10103_v7 = vpack.i.bf16 %v2913_v33, %v2912_v13 }
 0x326   : > { %v10088_v48 = vpack.i.bf16 %v2692_v10, %v2691_v8  ;;  %v13510_v0 = vld [vmem:[#allocation3 + $0x38] sm:$0xff]  ;;  %v2430_v8 = vpack.c.bf16 %v2412_v49, %v2411_v41  ;;  %v9326_v49 = vld [vmem:[%s16468_s5] sm:$0xff] }
 0x327   : > { %9054 = vmatmul.msk.bf16.vlgmr.msrb.gmra.mxu0 %vm444_vm12, %v3908_v61  ;;  %10104 = vrot.lane.b32.xlu0 %v10103_v7, %s11597_s28  ;;  %v10108_v43 = vpack.i.bf16 %v13510_v0, %v13512_v51 }
 0x328   : > { %10094 = vrot.lane.b32.xlu2 %v10103_v7, %s11596_s27  ;;  %10089 = vrot.lane.b32.xlu1 %v10088_v48, %s11597_s28  ;;  %v2522_v44 = vpop.f32.mrf.mxu1 }
 0x329   : > { %v2523_v38 = vadd.f32 %v13460_v29, %v2522_v44 }
 0x32b   : > { %v2595_v9 = vmax.f32 %v2523_v38, 0.0 }
 0x32c   : > { %v2693_v57 = vld [vmem:[#allocation3 + $0x49] sm:$0xff] }
 0x32d   : > { %2628 = vst.msk [vmem:[#allocation3 + $0x51] sm:$0xff] %vm444_vm12, %v2595_v9  ;;  %v2850_v55 = vld [vmem:[#allocation3 + $0x48] sm:$0xff] }
 0x32f   : > { %10109 = vrot.lane.b32.xlu0 %v10108_v43, %s11596_s27 }
 0x330   : > { %10099 = vrot.lane.b32.xlu2 %v10108_v43, %s11598_s16  ;;  %v2525_v59 = vpop.f32.mrf.mxu1 }
 0x331   : > { %v2526_v54 = vadd.f32 %v13460_v29, %v2525_v59 }
 0x333   : > { %v2596_v3 = vmax.f32 %v2526_v54, 0.0  ;;  %8977 = vmatmul.msk.bf16.gmra.mxu3 %vm444_vm12, %v2428_v58 }
 0x334   : > { %v2914_v52 = vld [vmem:[#allocation3 + $0x4a] sm:$0xff]  ;;  %v2915_v5 = vld [vmem:[#allocation3 + $0x52] sm:$0xff] }
 0x335   : > { %v2694_v1 = vld [vmem:[#allocation3 + $0x51] sm:$0xff]  ;;  %2629 = vst.msk [vmem:[#allocation3 + $0x61] sm:$0xff] %vm444_vm12, %v2596_v3  ;;  %v3911_v60 = vpack.c.bf16 %v2915_v5, %v2914_v52  ;;  %v10133_v30 = vpack.i.bf16 %v2915_v5, %v2914_v52 }
 0x336   : > { %v10118_v16 = vpack.i.bf16 %v2694_v1, %v2693_v57  ;;  %v2851_v63 = vld [vmem:[#allocation3 + $0x50] sm:$0xff]  ;;  %v2414_v5 = vld [vmem:[#allocation4 + $0xe8] sm:$0xff] }
 0x337   : > { %9055 = vmatmul.msk.bf16.gmra.mxu0 %vm444_vm12, %v3911_v60  ;;  %10114 = vrot.lane.b32.xlu0 %v10088_v48, %s11598_s16  ;;  %v10138_v62 = vpack.i.bf16 %v2851_v63, %v2850_v55  ;;  %v9338_v57 = vld [vmem:[%s16468_s5 + $0x60] sm:$0xff] }
 0x338   : > { %10119 = vrot.lane.b32.xlu2 %v10118_v16, %s11597_s28  ;;  %10134 = vrot.lane.b32.xlu1 %v10133_v30, %s11597_s28  ;;  %v2527_v24 = vpop.f32.mrf.mxu1  ;;  %v2413_v60 = vld [vmem:[#allocation4 + $0xe0] sm:$0xff] }
 0x339   : > { %v2528_v35 = vadd.f32 %v13460_v29, %v2527_v24  ;;  %4242 = vmatpush.bf16.msrb.mxu3 %v9338_v57 }
 0x33b   : > { %v2597_v21 = vmax.f32 %v2528_v35, 0.0  ;;  %v9330_v35 = vld [vmem:[%s16468_s5 + $0x20] sm:$0xff] }
 0x33c   : > { %v2852_v15 = vld [vmem:[#allocation3 + $0x60] sm:$0xff]  ;;  %4153 = vmatpush.bf16.msrb.mxu2 %v9330_v35  ;;  %v10057_v35 = vunpack.i.h.bf16 %v10055_v12 }
 0x33d   : > { %2630 = vst.msk [vmem:[#allocation3 + $0x69] sm:$0xff] %vm444_vm12, %v2597_v21  ;;  %v2695_v10 = vld [vmem:[#allocation3 + $0x61] sm:$0xff] }
 0x33f   : > { %10124 = vrot.lane.b32.xlu0 %v10133_v30, %s11596_s27  ;;  %v2431_v30 = vpack.c.bf16 %v2414_v5, %v2413_v60 }
 0x340   : > { %10139 = vrot.lane.b32.xlu1 %v10138_v62, %s11596_s27  ;;  %v2530_v20 = vpop.f32.mrf.mxu1  ;;  %4154 = vmatpush.bf16.msrb.mxu2 %v9329_v32 }
 0x341   : > { %v2531_v39 = vadd.f32 %v13460_v29, %v2530_v20 }
 0x343   : > { %v2598_v22 = vmax.f32 %v2531_v39, 0.0  ;;  %8978 = vmatmul.msk.bf16.gmra.mxu3 %vm444_vm12, %v2429_v34  ;;  %v9328_v34 = vld [vmem:[%s16468_s5 + $0x10] sm:$0xff] }
 0x344   : > { %v2916_v37 = vld [vmem:[#allocation3 + $0x62] sm:$0xff]  ;;  %v2917_v27 = vld [vmem:[#allocation3 + $0x6a] sm:$0xff]  ;;  %4155 = vmatpush.bf16.msrb.mxu2 %v9328_v34 }
 0x345   : > { %2631 = vst.msk [vmem:[#allocation3 + $0x79] sm:$0xff] %vm444_vm12, %v2598_v22  ;;  %v3914_v40 = vpack.c.bf16 %v2917_v27, %v2916_v37  ;;  %v10163_v31 = vpack.i.bf16 %v2917_v27, %v2916_v37  ;;  %v2853_v23 = vld [vmem:[#allocation3 + $0x68] sm:$0xff] }
 0x346   : > { %v10168_v2 = vpack.i.bf16 %v2853_v23, %v2852_v15  ;;  %v2696_v13 = vld [vmem:[#allocation3 + $0x69] sm:$0xff]  ;;  %v2415_v23 = vld [vmem:[#allocation4 + $0xf0] sm:$0xff] }
 0x347   : > { %9056 = vmatmul.msk.bf16.gmra.mxu0 %vm444_vm12, %v3914_v40  ;;  %10129 = vrot.lane.b32.xlu0 %v10138_v62, %s11598_s16  ;;  %v10148_v9 = vpack.i.bf16 %v2696_v13, %v2695_v10  ;;  %v9337_v22 = vld [vmem:[%s16468_s5 + $0x58] sm:$0xff] }
 0x348   : > { %10164 = vrot.lane.b32.xlu2 %v10163_v31, %s11597_s28  ;;  %10154 = vrot.lane.b32.xlu1 %v10163_v31, %s11596_s27  ;;  %v2532_v18 = vpop.f32.mrf.mxu1 }
 0x349   : > { %v2533_v6 = vadd.f32 %v13460_v29, %v2532_v18  ;;  %4243 = vmatpush.bf16.msrb.mxu3 %v9337_v22  ;;  %v2416_v18 = vld [vmem:[#allocation4 + $0xf8] sm:$0xff] }
 0x34a   : > { %v2432_v25 = vpack.c.bf16 %v2416_v18, %v2415_v23 }
 0x34b   : > { %v2599_v46 = vmax.f32 %v2533_v6, 0.0  ;;  %v9327_v6 = vld [vmem:[%s16468_s5 + $0x8] sm:$0xff] }
 0x34c   : > { %v2697_v61 = vld [vmem:[#allocation3 + $0x79] sm:$0xff]  ;;  %4156 = vmatpush.bf16.msrb.mxu2 %v9327_v6 }
 0x34d   : > { %2632 = vst.msk [vmem:[#allocation3 + $0x81] sm:$0xff] %vm444_vm12, %v2599_v46  ;;  %v13571_v3 = vld [vmem:[#allocation3 + $0x78] sm:$0xff] }
 0x34f   : > { %10144 = vrot.lane.b32.xlu0 %v10118_v16, %s11598_s16 }
 0x350   : > { %10169 = vrot.lane.b32.xlu2 %v10168_v2, %s11596_s27  ;;  %10159 = vrot.lane.b32.xlu1 %v10168_v2, %s11598_s16  ;;  %v2535_v17 = vpop.f32.mrf.mxu1 }
 0x351   : > { %v2536_v56 = vadd.f32 %v13460_v29, %v2535_v17  ;;  %4157 = vmatpush.bf16.msrb.mxu2 %v9326_v49 }
 0x353   : > { %v2600_v33 = vmax.f32 %v2536_v56, 0.0  ;;  %8979 = vmatmul.msk.bf16.gmra.mxu3 %vm444_vm12, %v2430_v8 }
 0x354   : > { %v2918_v7 = vld [vmem:[#allocation3 + $0x7a] sm:$0xff]  ;;  %v2919_v48 = vld [vmem:[#allocation3 + $0x82] sm:$0xff] }
 0x355   : > { %v2698_v44 = vld [vmem:[#allocation3 + $0x81] sm:$0xff]  ;;  %2633 = vst.msk [vmem:[#allocation3 + $0x91] sm:$0xff] %vm444_vm12, %v2600_v33  ;;  %v3917_v38 = vpack.c.bf16 %v2919_v48, %v2918_v7  ;;  %v10183_v43 = vpack.i.bf16 %v2919_v48, %v2918_v7  ;;  %9390 = vmatpush.bf16.msra.mxu2 %v13467_v53 }
 0x356   : > { %v10178_v4 = vpack.i.bf16 %v2698_v44, %v2697_v61  ;;  %v13568_v58 = vld [vmem:[#allocation3 + $0x80] sm:$0xff] }
 0x357   : > { %9057 = vmatmul.msk.bf16.gmra.mxu0 %vm444_vm12, %v3917_v38  ;;  %10149 = vrot.lane.b32.xlu0 %v10148_v9, %s11597_s28  ;;  %v10188_v52 = vpack.i.bf16 %v13568_v58, %v13571_v3  ;;  %v9336_v7 = vld [vmem:[%s16468_s5 + $0x50] sm:$0xff]  ;;  %v13633_v38 = vpop.permute.xlu1 %10064 }
 0x358   : > { %10184 = vrot.lane.b32.xlu2 %v10183_v43, %s11596_s27  ;;  %10179 = vrot.lane.b32.xlu1 %v10178_v4, %s11597_s28  ;;  %v2537_v59 = vpop.f32.mrf.mxu1 }
 0x359   : > { %v2538_v19 = vadd.f32 %v13460_v29, %v2537_v59  ;;  %9391 = vmatpush.bf16.msra.mxu2 %v13475_v47  ;;  %4244 = vmatpush.bf16.msrb.mxu3 %v9336_v7 }
 0x35b   : > { %v2601_v54 = vmax.f32 %v2538_v19, 0.0 }
 0x35c   : > { %v2699_v37 = vld [vmem:[#allocation3 + $0x91] sm:$0xff] }
 0x35d   : > { %2634 = vst.msk [vmem:[#allocation3 + $0x99] sm:$0xff] %vm444_vm12, %v2601_v54  ;;  %v13603_v27 = vld [vmem:[#allocation3 + $0x90] sm:$0xff] }
 0x35f   : > { %10174 = vrot.lane.b32.xlu0 %v10148_v9, %s11598_s16 }
 0x360   : > { %10189 = vrot.lane.b32.xlu2 %v10188_v52, %s11598_s16  ;;  %v2540_v1 = vpop.f32.mrf.mxu1 }
 0x361   : > { %v2541_v16 = vadd.f32 %v13460_v29, %v2540_v1  ;;  %v10060_v1 = vpop.permute.xlu0 %10059 }
 0x362   : > { %v10062_v32 = vunpack.i.h.bf16 %v10060_v1 }
 0x363   : > { %v2602_v24 = vmax.f32 %v2541_v16, 0.0  ;;  %8980 = vmatmul.msk.bf16.gmra.mxu3 %vm444_vm12, %v2431_v30  ;;  %v9335_v16 = vld [vmem:[%s16468_s5 + $0x48] sm:$0xff] }
 0x364   : > { %v2920_v21 = vld [vmem:[#allocation3 + $0x92] sm:$0xff]  ;;  %v2921_v63 = vld [vmem:[#allocation3 + $0x9a] sm:$0xff]  ;;  %4245 = vmatpush.bf16.msrb.mxu3 %v9335_v16 }
 0x365   : > { %2635 = vst.msk [vmem:[#allocation3 + $0xa9] sm:$0xff] %vm444_vm12, %v2602_v24  ;;  %v3920_v55 = vpack.c.bf16 %v2921_v63, %v2920_v21  ;;  %v10223_v50 = vpack.i.bf16 %v2921_v63, %v2920_v21  ;;  %v2700_v20 = vld [vmem:[#allocation3 + $0x99] sm:$0xff]  ;;  %v10056_v21 = vunpack.i.l.bf16 %v10055_v12 }
 0x366   : > { %v13594_v39 = vld [vmem:[#allocation3 + $0x98] sm:$0xff]  ;;  %v10208_v40 = vpack.i.bf16 %v2700_v20, %v2699_v37  ;;  %v2655_v63 = vld [vmem:[#allocation3] sm:$0xff] }
 0x367   : > { %9058 = vmatmul.msk.bf16.gmra.mxu0 %vm444_vm12, %v3920_v55  ;;  %10194 = vrot.lane.b32.xlu0 %v10183_v43, %s11597_s28  ;;  %v10228_v31 = vpack.i.bf16 %v13594_v39, %v13603_v27  ;;  %v2656_v55 = vld [vmem:[#allocation3 + $0x8] sm:$0xff] }
 0x368   : > { %10204 = vrot.lane.b32.xlu2 %v10178_v4, %s11598_s16  ;;  %10224 = vrot.lane.b32.xlu1 %v10223_v50, %s11597_s28  ;;  %v2542_v62 = vpop.f32.mrf.mxu1  ;;  %v3713_v20 = vsel %vm444_vm12, %v2656_v55, %v10057_v35 }
 0x369   : > { %v2543_v28 = vadd.f32 %v13460_v29, %v2542_v62  ;;  %v10061_v62 = vunpack.i.l.bf16 %v10060_v1 }
 0x36b   : > { %v2603_v36 = vmax.f32 %v2543_v28, 0.0 }
 0x36c   : > { %v2763_v53 = vld [vmem:[#allocation3 + $0xa8] sm:$0xff] }
 0x36d   : > { %2636 = vst.msk [vmem:[#allocation3 + $0xb1] sm:$0xff] %vm444_vm12, %v2603_v36  ;;  %v2701_v9 = vld [vmem:[#allocation3 + $0xa9] sm:$0xff]  ;;  %v3712_v36 = vsel %vm444_vm12, %v2655_v63, %v10056_v21 }
 0x36e   : > { %v3745_v6 = vsel %vm3744_vm14, %v3712_v36, %v10061_v62 }
 0x36f   : > { %10199 = vrot.lane.b32.xlu0 %v10188_v52, %s11596_s27 }
 0x370   : > { %10209 = vrot.lane.b32.xlu2 %v10208_v40, %s11597_s28  ;;  %10229 = vrot.lane.b32.xlu1 %v10228_v31, %s11596_s27  ;;  %v2545_v46 = vpop.f32.mrf.mxu1 }
 0x371   : > { %v2546_v15 = vadd.f32 %v13460_v29, %v2545_v46  ;;  %v13630_v48 = vpop.permute.xlu2 %10084  ;;  %v3746_v46 = vsel %vm3744_vm14, %v3713_v20, %v10062_v32 }
 0x372   : > { %v10087_v20 = vunpack.i.h.bf16 %v13630_v48  ;;  %v10086_v36 = vunpack.i.l.bf16 %v13630_v48 }
 0x373   : > { %v2604_v2 = vmax.f32 %v2546_v15, 0.0  ;;  %8981 = vmatmul.msk.bf16.gmra.mxu3 %vm444_vm12, %v2432_v25 }
 0x374   : > { %v2922_v17 = vld [vmem:[#allocation3 + $0xaa] sm:$0xff]  ;;  %v2923_v41 = vld [vmem:[#allocation3 + $0xb2] sm:$0xff] }
 0x375   : > { %2637 = vst.msk [vmem:[#allocation3 + $0xc1] sm:$0xff] %vm444_vm12, %v2604_v2  ;;  %v3923_v56 = vpack.c.bf16 %v2923_v41, %v2922_v17  ;;  %v10243_v8 = vpack.i.bf16 %v2923_v41, %v2922_v17  ;;  %v2764_v61 = vld [vmem:[#allocation3 + $0xb0] sm:$0xff] }
 0x376   : > { %v10248_v44 = vpack.i.bf16 %v2764_v61, %v2763_v53  ;;  %v2702_v47 = vld [vmem:[#allocation3 + $0xb1] sm:$0xff] }
 0x377   : > { %9059 = vmatmul.msk.bf16.gmra.mxu0 %vm444_vm12, %v3923_v56  ;;  %10214 = vrot.lane.b32.xlu0 %v10223_v50, %s11596_s27  ;;  %v13637_v54 = vpack.i.bf16 %v2702_v47, %v2701_v9  ;;  %v9334_v50 = vld [vmem:[%s16468_s5 + $0x40] sm:$0xff] }
 0x378   : > { %10234 = vrot.lane.b32.xlu2 %v10208_v40, %s11598_s16  ;;  %10244 = vrot.lane.b32.xlu1 %v10243_v8, %s11596_s27  ;;  %v2547_v13 = vpop.f32.mrf.mxu1 }
 0x379   : > { %v2548_v33 = vadd.f32 %v13460_v29, %v2547_v13  ;;  %4246 = vmatpush.bf16.msrb.mxu3 %v9334_v50 }
 0x37b   : > { %v2605_v10 = vmax.f32 %v2548_v33, 0.0 }
 0x37c   : > { %v2703_v43 = vld [vmem:[#allocation3 + $0xc1] sm:$0xff] }
 0x37d   : > { %2638 = vst.msk [vmem:[#allocation3 + $0xc9] sm:$0xff] %vm444_vm12, %v2605_v10  ;;  %v13669_v12 = vld [vmem:[#allocation3 + $0xc0] sm:$0xff] }
 0x37f   : > { %10219 = vrot.lane.b32.xlu0 %v10228_v31, %s11598_s16 }
 0x380   : > { %10254 = vrot.lane.b32.xlu2 %v10243_v8, %s11597_s28  ;;  %10249 = vrot.lane.b32.xlu1 %v10248_v44, %s11598_s16 }
 0x382   : > { %v13639_v52 = vpop.permute.xlu2 %10094 }
 0x384   : > { %v2924_v4 = vld [vmem:[#allocation3 + $0xc2] sm:$0xff]  ;;  %v2925_v45 = vld [vmem:[#allocation3 + $0xca] sm:$0xff] }
 0x385   : > { %v2704_v59 = vld [vmem:[#allocation3 + $0xc9] sm:$0xff]  ;;  %v3926_v19 = vpack.c.bf16 %v2925_v45, %v2924_v4  ;;  %v10278_v28 = vpack.i.bf16 %v2925_v45, %v2924_v4 }
 0x386   : > { %v10263_v57 = vpack.i.bf16 %v2704_v59, %v2703_v43  ;;  %v2550_v5 = vpop.f32.mrf.mxu3  ;;  %v13664_v25 = vld [vmem:[#allocation3 + $0xc8] sm:$0xff] }
 0x387   : > { %v2551_v60 = vadd.f32 %v13460_v29, %v2550_v5  ;;  %9060 = vmatmul.msk.bf16.gmra.mxu0 %vm444_vm12, %v3926_v19  ;;  %10239 = vrot.lane.b32.xlu0 %v13637_v54, %s11597_s28  ;;  %v10283_v41 = vpack.i.bf16 %v13664_v25, %v13669_v12 }
 0x388   : > { %10259 = vrot.lane.b32.xlu2 %v10248_v44, %s11596_s27  ;;  %10264 = vrot.lane.b32.xlu1 %v10263_v57, %s11597_s28 }
 0x389   : > { %v2606_v30 = vmax.f32 %v2551_v60, 0.0  ;;  %v13650_v24 = vpop.permute.xlu1 %10074 }
 0x38a   : > { %v10100_v37 = vpop.permute.xlu2 %10099  ;;  %v10070_v40 = vpop.permute.xlu0 %10069  ;;  %v10077_v47 = vunpack.i.h.bf16 %v13650_v24  ;;  %v10076_v9 = vunpack.i.l.bf16 %v13650_v24 }
 0x38b   : > { %2639 = vst.msk [vmem:[#allocation3 + $0xd9] sm:$0xff] %vm444_vm12, %v2606_v30  ;;  %v10072_v13 = vunpack.i.h.bf16 %v10070_v40  ;;  %v10071_v33 = vunpack.i.l.bf16 %v10070_v40  ;;  %v10101_v24 = vunpack.i.l.bf16 %v10100_v37 }
 0x38d   : > { %v3714_v59 = vsel %vm444_vm12, %v13496_v11, %v10071_v33  ;;  %v3715_v19 = vsel %vm444_vm12, %v13494_v42, %v10072_v13  ;;  %v10102_v11 = vunpack.i.h.bf16 %v10100_v37 }
 0x38e   : > { %v2552_v34 = vpop.f32.mrf.mxu3  ;;  %v3747_v16 = vsel %vm3744_vm14, %v3714_v59, %v10076_v9  ;;  %v3748_v30 = vsel %vm3744_vm14, %v3715_v19, %v10077_v47 }
 0x38f   : > { %v2553_v22 = vadd.f32 %v13460_v29, %v2552_v34  ;;  %10279 = vrot.lane.b32.xlu0 %v10278_v28, %s11597_s28  ;;  %v3781_v32 = vsel %vm3777_vm15, %v3748_v30, %v10102_v11 }
 0x390   : > { %10269 = vrot.lane.b32.xlu2 %v10278_v28, %s11596_s27  ;;  %10294 = vrot.lane.b32.xlu1 %v10263_v57, %s11598_s16 }
 0x391   : > { %v2607_v31 = vmax.f32 %v2553_v22, 0.0  ;;  %v10080_v18 = vpop.permute.xlu1 %10079 }
 0x392   : > { %v10082_v23 = vunpack.i.h.bf16 %v10080_v18  ;;  %v10081_v15 = vunpack.i.l.bf16 %v10080_v18  ;;  %v13678_v7 = vpop.permute.xlu2 %10119  ;;  %v2705_v57 = vld [vmem:[#allocation3 + $0xd9] sm:$0xff] }
 0x393   : > { %2640 = vst.msk [vmem:[#allocation3 + $0xe1] sm:$0xff] %vm444_vm12, %v2607_v31  ;;  %v13701_v50 = vld [vmem:[#allocation3 + $0xd8] sm:$0xff] }
 0x394   : > { %v3778_v2 = vsel %vm3777_vm15, %v3745_v6, %v10081_v15  ;;  %v3779_v49 = vsel %vm3777_vm15, %v3746_v46, %v10082_v23  ;;  %v3811_v6 = vsel %vm444_vm12, %v13485_v26, %v10087_v20  ;;  %v3810_v46 = vsel %vm444_vm12, %v13483_v14, %v10086_v36 }
 0x395   : > { %v3906_v17 = vpack.c.bf16 %v3779_v49, %v3778_v2 }
 0x396   : > { %v2555_v56 = vpop.f32.mrf.mxu3 }
 0x397   : > { %v2556_v8 = vadd.f32 %v13460_v29, %v2555_v56  ;;  %4158 = vmatmul.bf16.vlgmr.msrb.gmra.mxu2 %v3906_v17  ;;  %10284 = vrot.lane.b32.xlu0 %v10283_v41, %s11596_s27 }
 0x398   : > { %10274 = vrot.lane.b32.xlu2 %v10283_v41, %s11598_s16 }
 0x399   : > { %v2608_v10 = vmax.f32 %v2556_v8, 0.0  ;;  %v13676_v61 = vpop.permute.xlu0 %10104 }
 0x39a   : > { %v2926_v53 = vld [vmem:[#allocation3 + $0xda] sm:$0xff]  ;;  %v2927_v44 = vld [vmem:[#allocation3 + $0xe2] sm:$0xff]  ;;  %v13697_v63 = vpop.permute.xlu1 %10089 }
 0x39b   : > { %2641 = vst.msk [vmem:[#allocation3 + $0xf1] sm:$0xff] %vm444_vm12, %v2608_v10  ;;  %v3929_v43 = vpack.c.bf16 %v2927_v44, %v2926_v53  ;;  %v10313_v4 = vpack.i.bf16 %v2927_v44, %v2926_v53  ;;  %v2706_v45 = vld [vmem:[#allocation3 + $0xe1] sm:$0xff]  ;;  %v10091_v19 = vunpack.i.l.bf16 %v13697_v63 }
 0x39c   : > { %v10298_v1 = vpack.i.bf16 %v2706_v45, %v2705_v57  ;;  %v13695_v42 = vld [vmem:[#allocation3 + $0xe0] sm:$0xff] }
 0x39d   : > { %9061 = vmatmul.msk.bf16.gmra.mxu0 %vm444_vm12, %v3929_v43  ;;  %10314 = vrot.lane.b32.xlu1 %v10313_v4, %s11597_s28  ;;  %v10318_v62 = vpack.i.bf16 %v13695_v42, %v13701_v50  ;;  %v3716_v11 = vsel %vm444_vm12, %v13512_v51, %v10091_v19 }
 0x39e   : > { %v2557_v5 = vpop.f32.mrf.mxu3 }
 0x39f   : > { %v2558_v60 = vadd.f32 %v13460_v29, %v2557_v5  ;;  %10289 = vrot.lane.b32.xlu0 %v13637_v54, %s11598_s16  ;;  %v3780_v54 = vsel %vm3777_vm15, %v3747_v16, %v10101_v24  ;;  %v10096_v24 = vunpack.i.l.bf16 %v13639_v52 }
 0x3a0   : > { %10299 = vrot.lane.b32.xlu2 %v10298_v1, %s11597_s28  ;;  %v3909_v28 = vpack.c.bf16 %v3781_v32, %v3780_v54  ;;  %v10097_v54 = vunpack.i.h.bf16 %v13639_v52 }
 0x3a1   : > { %v2609_v35 = vmax.f32 %v2558_v60, 0.0  ;;  %v10110_v21 = vpop.permute.xlu0 %10109 }
 0x3a2   : > { %v13699_v55 = vpop.permute.xlu2 %10164  ;;  %v10112_v22 = vunpack.i.h.bf16 %v10110_v21  ;;  %v10111_v37 = vunpack.i.l.bf16 %v10110_v21  ;;  %v2769_v59 = vld [vmem:[#allocation3 + $0xf0] sm:$0xff] }
 0x3a3   : > { %2642 = vst.msk [vmem:[#allocation3 + $0xf9] sm:$0xff] %vm444_vm12, %v2609_v35  ;;  %v13742_v5 = vld [vmem:[#allocation3 + $0xf1] sm:$0xff] }
 0x3a4   : > { %v3842_v41 = vsel %vm3744_vm14, %v3810_v46, %v10111_v37  ;;  %v3843_v56 = vsel %vm3744_vm14, %v3811_v6, %v10112_v22  ;;  %v3749_v37 = vsel %vm3744_vm14, %v3716_v11, %v10096_v24  ;;  %v10107_v6 = vunpack.i.h.bf16 %v13676_v61 }
 0x3a5   : > { %10319 = vrot.lane.b32.xlu1 %v10318_v62, %s11596_s27  ;;  %v10106_v46 = vunpack.i.l.bf16 %v13676_v61  ;;  %v10122_v11 = vunpack.i.h.bf16 %v13678_v7  ;;  %v10121_v24 = vunpack.i.l.bf16 %v13678_v7  ;;  %v2662_v7 = vld [vmem:[#allocation3 + $0x50] sm:$0xff] }
 0x3a6   : > { %v2560_v34 = vpop.f32.mrf.mxu3 }
 0x3a7   : > { %v2561_v40 = vadd.f32 %v13460_v29, %v2560_v34  ;;  %10304 = vrot.lane.b32.xlu0 %v10313_v4, %s11596_s27  ;;  %4163 = vmatmul.bf16.gmra.mxu2 %v3909_v28 }
 0x3a8   : > { %10324 = vrot.lane.b32.xlu2 %v10298_v1, %s11598_s16  ;;  %v10092_v1 = vunpack.i.h.bf16 %v13697_v63 }
 0x3a9   : > { %v2610_v31 = vmax.f32 %v2561_v40, 0.0  ;;  %v10115_v18 = vpop.permute.xlu0 %10114 }
 0x3aa   : > { %v10117_v23 = vunpack.i.h.bf16 %v10115_v18  ;;  %v10116_v48 = vunpack.i.l.bf16 %v10115_v18  ;;  %v13718_v15 = vpop.permute.xlu2 %10169  ;;  %v13720_v2 = vpop.permute.xlu1 %10134  ;;  %v2928_v49 = vld [vmem:[#allocation3 + $0xf2] sm:$0xff]  ;;  %v2929_v17 = vld [vmem:[#allocation3 + $0xfa] sm:$0xff]  ;;  %v3717_v63 = vsel %vm444_vm12, %v13510_v0, %v10092_v1 }
 0x3ab   : > { %2643 = vst.msk [vmem:[#allocation3 + $0x109] sm:$0xff] %vm444_vm12, %v2610_v31  ;;  %v3932_v8 = vpack.c.bf16 %v2929_v17, %v2928_v49  ;;  %v10333_v13 = vpack.i.bf16 %v2929_v17, %v2928_v49  ;;  %v2770_v9 = vld [vmem:[#allocation3 + $0xf8] sm:$0xff]  ;;  %v3750_v0 = vsel %vm3744_vm14, %v3717_v63, %v10097_v54 }
 0x3ac   : > { %v3874_v26 = vsel %vm3777_vm15, %v3842_v41, %v10116_v48  ;;  %v3875_v14 = vsel %vm3777_vm15, %v3843_v56, %v10117_v23  ;;  %v13738_v45 = vld [vmem:[#allocation3 + $0xf9] sm:$0xff]  ;;  %v10338_v57 = vpack.i.bf16 %v2770_v9, %v2769_v59 }
 0x3ad   : > { %v3907_v33 = vpack.c.bf16 %v3875_v14, %v3874_v26  ;;  %9062 = vmatmul.msk.bf16.gmra.mxu0 %vm444_vm12, %v3932_v8  ;;  %10334 = vrot.lane.b32.xlu1 %v10333_v13, %s11596_s27  ;;  %v10328_v60 = vpack.i.bf16 %v13738_v45, %v13742_v5  ;;  %v2785_v26 = vld [vmem:[#allocation3 + $0x31] sm:$0xff]  ;;  %v2786_v14 = vld [vmem:[#allocation3 + $0x39] sm:$0xff] }
 0x3ae   : > { %v2562_v10 = vpop.f32.mrf.mxu3  ;;  %v3813_v9 = vsel %vm444_vm12, %v2786_v14, %v10107_v6 }
 0x3af   : > { %v2563_v53 = vadd.f32 %v13460_v29, %v2562_v10  ;;  %10309 = vrot.lane.b32.xlu0 %v10318_v62, %s11598_s16  ;;  %4247 = vmatmul.bf16.vlgmr.msrb.gmra.mxu3 %v3907_v33 }
 0x3b0   : > { %10344 = vrot.lane.b32.xlu2 %v10333_v13, %s11597_s28 }
 0x3b1   : > { %v2611_v44 = vmax.f32 %v2563_v53, 0.0  ;;  %v13732_v47 = vpop.permute.xlu0 %10124 }
 0x3b2   : > { %v13734_v43 = vpop.permute.xlu2 %10184  ;;  %v13736_v4 = vpop.permute.xlu1 %10139  ;;  %v2709_v51 = vld [vmem:[#allocation3 + $0x109] sm:$0xff]  ;;  %v10126_v63 = vunpack.i.l.bf16 %v13732_v47 }
 0x3b3   : > { %2644 = vst.msk [vmem:[#allocation3 + $0x111] sm:$0xff] %vm444_vm12, %v2611_v44  ;;  %v10142_v17 = vunpack.i.h.bf16 %v13736_v4  ;;  %v10141_v41 = vunpack.i.l.bf16 %v13736_v4  ;;  %v3812_v44 = vsel %vm444_vm12, %v2785_v26, %v10106_v46  ;;  %v13785_v4 = vld [vmem:[#allocation3 + $0x108] sm:$0xff] }
 0x3b5   : > { %10339 = vrot.lane.b32.xlu1 %v10338_v57, %s11598_s16  ;;  %v3844_v59 = vsel %vm3744_vm14, %v3812_v44, %v10141_v41  ;;  %v3845_v19 = vsel %vm3744_vm14, %v3813_v9, %v10142_v17  ;;  %v10136_v17 = vunpack.i.l.bf16 %v13720_v2  ;;  %v2787_v44 = vld [vmem:[#allocation3 + $0x49] sm:$0xff]  ;;  %v2788_v9 = vld [vmem:[#allocation3 + $0x51] sm:$0xff] }
 0x3b6   : > { %v2565_v16 = vpop.f32.mrf.mxu3 }
 0x3b7   : > { %v2566_v30 = vadd.f32 %v13460_v29, %v2565_v16  ;;  %10329 = vrot.lane.b32.xlu0 %v10328_v60, %s11597_s28 }
 0x3b8   : > { %10349 = vrot.lane.b32.xlu2 %v10338_v57, %s11596_s27  ;;  %v9345_v57 = vld [vmem:[%s16470_s7 + $0x8] sm:$0xff] }
 0x3b9   : > { %v2612_v35 = vmax.f32 %v2566_v30, 0.0  ;;  %v10130_v21 = vpop.permute.xlu0 %10129  ;;  %4539 = vmatpush.bf16.msrb.mxu1 %v9345_v57 }
 0x3ba   : > { %v10132_v32 = vunpack.i.h.bf16 %v10130_v21  ;;  %v10131_v62 = vunpack.i.l.bf16 %v10130_v21  ;;  %v13757_v28 = vpop.permute.xlu2 %10189  ;;  %v13759_v20 = vpop.permute.xlu1 %10154  ;;  %v2930_v36 = vld [vmem:[#allocation3 + $0x10a] sm:$0xff]  ;;  %v2931_v34 = vld [vmem:[#allocation3 + $0x112] sm:$0xff]  ;;  %v10127_v21 = vunpack.i.h.bf16 %v13732_v47  ;;  %v3719_v47 = vsel %vm444_vm12, %v2662_v7, %v10122_v11 }
 0x3bb   : > { %v2710_v22 = vld [vmem:[#allocation3 + $0x111] sm:$0xff]  ;;  %2645 = vst.msk [vmem:[#allocation3 + $0x121] sm:$0xff] %vm444_vm12, %v2612_v35  ;;  %v3935_v40 = vpack.c.bf16 %v2931_v34, %v2930_v36  ;;  %v10363_v48 = vpack.i.bf16 %v2931_v34, %v2930_v36  ;;  %v2661_v34 = vld [vmem:[#allocation3 + $0x48] sm:$0xff] }
 0x3bc   : > { %v13763_v31 = vpack.i.bf16 %v2710_v22, %v2709_v51  ;;  %v3782_v52 = vsel %vm3777_vm15, %v3749_v37, %v10131_v62  ;;  %v3783_v18 = vsel %vm3777_vm15, %v3750_v0, %v10132_v32  ;;  %v13778_v13 = vld [vmem:[#allocation3 + $0x110] sm:$0xff]  ;;  %v3718_v37 = vsel %vm444_vm12, %v2661_v34, %v10121_v24  ;;  %v2664_v34 = vld [vmem:[#allocation3 + $0x68] sm:$0xff] }
 0x3bd   : > { %9063 = vmatmul.msk.bf16.gmra.mxu0 %vm444_vm12, %v3935_v40  ;;  %v3912_v49 = vpack.c.bf16 %v3783_v18, %v3782_v52  ;;  %v3751_v18 = vsel %vm3744_vm14, %v3718_v37, %v10126_v63  ;;  %v3752_v6 = vsel %vm3744_vm14, %v3719_v47, %v10127_v21  ;;  %v10157_v37 = vunpack.i.h.bf16 %v13759_v20 }
 0x3be   : > { %10359 = vrot.lane.b32.xlu1 %v13763_v31, %s11597_s28  ;;  %v2567_v23 = vpop.f32.mrf.mxu3  ;;  %v10156_v47 = vunpack.i.l.bf16 %v13759_v20  ;;  %v10192_v20 = vunpack.i.h.bf16 %v13757_v28 }
 0x3bf   : > { %v2568_v56 = vadd.f32 %v13460_v29, %v2567_v23  ;;  %10354 = vrot.lane.b32.xlu0 %v10328_v60, %s11598_s16  ;;  %4168 = vmatmul.bf16.gmra.mxu2 %v3912_v49  ;;  %v10378_v60 = vpack.i.bf16 %v13778_v13, %v13785_v4  ;;  %v10137_v49 = vunpack.i.h.bf16 %v13720_v2 }
 0x3c0   : > { %10364 = vrot.lane.b32.xlu2 %v10363_v48, %s11596_s27 }
 0x3c1   : > { %v2613_v61 = vmax.f32 %v2568_v56, 0.0  ;;  %v10145_v8 = vpop.permute.xlu0 %10144 }
 0x3c2   : > { %v10147_v33 = vunpack.i.h.bf16 %v10145_v8  ;;  %v10146_v10 = vunpack.i.l.bf16 %v10145_v8  ;;  %v13780_v53 = vpop.permute.xlu2 %10204  ;;  %v10160_v1 = vpop.permute.xlu1 %10159  ;;  %v13843_v21 = vld [vmem:[#allocation3 + $0x120] sm:$0xff] }
 0x3c3   : > { %2646 = vst.msk [vmem:[#allocation3 + $0x129] sm:$0xff] %vm444_vm12, %v2613_v61  ;;  %v10162_v32 = vunpack.i.h.bf16 %v10160_v1  ;;  %v10161_v62 = vunpack.i.l.bf16 %v10160_v1  ;;  %v13817_v61 = vld [vmem:[#allocation3 + $0x121] sm:$0xff] }
 0x3c4   : > { %v3876_v16 = vsel %vm3777_vm15, %v3844_v59, %v10146_v10  ;;  %v3877_v30 = vsel %vm3777_vm15, %v3845_v19, %v10147_v33  ;;  %v10172_v33 = vunpack.i.h.bf16 %v13718_v15  ;;  %v10171_v10 = vunpack.i.l.bf16 %v13718_v15 }
 0x3c5   : > { %v3910_v35 = vpack.c.bf16 %v3877_v30, %v3876_v16  ;;  %v3784_v23 = vsel %vm3777_vm15, %v3751_v18, %v10161_v62  ;;  %v3815_v59 = vsel %vm444_vm12, %v2788_v9, %v10137_v49  ;;  %v10191_v49 = vunpack.i.l.bf16 %v13757_v28 }
 0x3c6   : > { %10379 = vrot.lane.b32.xlu1 %v10378_v60, %s11596_s27  ;;  %v2570_v54 = vpop.f32.mrf.mxu3 }
 0x3c7   : > { %v2571_v36 = vadd.f32 %v13460_v29, %v2570_v54  ;;  %10374 = vrot.lane.b32.xlu0 %v10363_v48, %s11597_s28  ;;  %4252 = vmatmul.bf16.gmra.mxu3 %v3910_v35  ;;  %v3785_v48 = vsel %vm3777_vm15, %v3752_v6, %v10162_v32  ;;  %v3847_v35 = vsel %vm3744_vm14, %v3815_v59, %v10172_v33  ;;  %v13873_v33 = vpop.f32.mrf.mxu0 }
 0x3c8   : > { %10369 = vrot.lane.b32.xlu2 %v10378_v60, %s11598_s16  ;;  %v3915_v14 = vpack.c.bf16 %v3785_v48, %v3784_v23 }
 0x3c9   : > { %v2614_v22 = vmax.f32 %v2571_v36, 0.0  ;;  %v10150_v51 = vpop.permute.xlu0 %10149  ;;  %v2663_v36 = vld [vmem:[#allocation3 + $0x60] sm:$0xff] }
 0x3ca   : > { %v13806_v40 = vpop.permute.xlu2 %10209  ;;  %v2932_v0 = vld [vmem:[#allocation3 + $0x122] sm:$0xff]  ;;  %v2933_v52 = vld [vmem:[#allocation3 + $0x12a] sm:$0xff]  ;;  %v10152_v1 = vunpack.i.h.bf16 %v10150_v51  ;;  %v10151_v60 = vunpack.i.l.bf16 %v10150_v51  ;;  %v13834_v16 = vpop.permute.xlu1 %10179 }
 0x3cb   : > { %2647 = vst.msk [vmem:[#allocation3 + $0x139] sm:$0xff] %vm444_vm12, %v2614_v22  ;;  %v13811_v46 = vld [vmem:[#allocation3 + $0x129] sm:$0xff]  ;;  %v3938_v41 = vpack.c.bf16 %v2933_v52, %v2932_v0  ;;  %v10393_v56 = vpack.i.bf16 %v2933_v52, %v2932_v0 }
 0x3cc   : > { %v13824_v26 = vpack.i.bf16 %v13811_v46, %v13817_v61  ;;  %v13838_v11 = vld [vmem:[#allocation3 + $0x128] sm:$0xff]  ;;  %v3720_v22 = vsel %vm444_vm12, %v2663_v36, %v10151_v60  ;;  %v3721_v51 = vsel %vm444_vm12, %v2664_v34, %v10152_v1  ;;  %v13857_v0 = vld [vmem:[%s16467_s4] ss:$0 sm:$0xff]  ;;  %v10207_v36 = vunpack.i.h.bf16 %v13780_v53 }
 0x3cd   : > { %9064 = vmatmul.msk.bf16.gmra.mxu0 %vm444_vm12, %v3938_v41  ;;  %v10398_v32 = vpack.i.bf16 %v13838_v11, %v13843_v21  ;;  %v3753_v23 = vsel %vm3744_vm14, %v3720_v22, %v10156_v47  ;;  %v3754_v48 = vsel %vm3744_vm14, %v3721_v51, %v10157_v37  ;;  %v10206_v34 = vunpack.i.l.bf16 %v13780_v53 }
 0x3ce   : > { %10384 = vrot.lane.b32.xlu1 %v13763_v31, %s11598_s16  ;;  %v2572_v8 = vpop.f32.mrf.mxu3  ;;  %v3814_v31 = vsel %vm444_vm12, %v2787_v44, %v10136_v17  ;;  %v3786_v44 = vsel %vm3777_vm15, %v3753_v23, %v10191_v49  ;;  %v3787_v9 = vsel %vm3777_vm15, %v3754_v48, %v10192_v20 }
 0x3cf   : > { %v2573_v2 = vadd.f32 %v13460_v29, %v2572_v8  ;;  %10394 = vrot.lane.b32.xlu0 %v10393_v56, %s11596_s27  ;;  %4173 = vmatmul.bf16.gmra.mxu2 %v3915_v14  ;;  %v3846_v24 = vsel %vm3744_vm14, %v3814_v31, %v10171_v10  ;;  %v3918_v60 = vpack.c.bf16 %v3787_v9, %v3786_v44  ;;  %v13905_v53 = vpop.f32.mrf.mxu0  ;;  %v10182_v9 = vunpack.i.h.bf16 %v13834_v16 }
 0x3d0   : > { %10389 = vrot.lane.b32.xlu2 %v13824_v26, %s11597_s28 }
 0x3d1   : > { %v2615_v19 = vmax.f32 %v2573_v2, 0.0  ;;  %v10175_v57 = vpop.permute.xlu0 %10174 }
 0x3d2   : > { %v10177_v15 = vunpack.i.h.bf16 %v10175_v57  ;;  %v10176_v29 = vunpack.i.l.bf16 %v10175_v57  ;;  %v13836_v30 = vpop.permute.xlu2 %10234  ;;  %v13877_v31 = vld [vmem:[#allocation3 + $0x139] sm:$0xff]  ;;  %v10166_v57 = vunpack.i.l.bf16 %v13699_v55 }
 0x3d3   : > { %2648 = vst.msk [vmem:[#allocation3 + $0x141] sm:$0xff] %vm444_vm12, %v2615_v19  ;;  %v10167_v19 = vunpack.i.h.bf16 %v13699_v55  ;;  %v2790_v55 = vld [vmem:[#allocation3 + $0x69] sm:$0xff] }
 0x3d4   : > { %v3878_v63 = vsel %vm3777_vm15, %v3846_v24, %v10176_v29  ;;  %v3879_v54 = vsel %vm3777_vm15, %v3847_v35, %v10177_v15 }
 0x3d5   : > { %v3913_v62 = vpack.c.bf16 %v3879_v54, %v3878_v63  ;;  %v3817_v22 = vsel %vm444_vm12, %v2790_v55, %v10167_v19 }
 0x3d6   : > { %10404 = vrot.lane.b32.xlu1 %v10393_v56, %s11597_s28  ;;  %v2575_v7 = vpop.f32.mrf.mxu3 }
 0x3d7   : > { %v2576_v52 = vadd.f32 %v13857_v0, %v2575_v7  ;;  %10399 = vrot.lane.b32.xlu0 %v10398_v32, %s11598_s16  ;;  %4257 = vmatmul.bf16.gmra.mxu3 %v3913_v62  ;;  %v2789_v62 = vld [vmem:[#allocation3 + $0x61] sm:$0xff]  ;;  %v13895_v7 = vld [vmem:[#allocation3 + $0x138] sm:$0xff]  ;;  %v13929_v55 = vpop.f32.mrf.mxu0 }
 0x3d8   : > { %10409 = vrot.lane.b32.xlu2 %v10398_v32, %s11596_s27 }
 0x3d9   : > { %v2616_v18 = vmax.f32 %v2576_v52, 0.0  ;;  %v13862_v6 = vpop.permute.xlu0 %10194 }
 0x3da   : > { %v13868_v17 = vpop.permute.xlu2 %10254  ;;  %v13870_v41 = vpop.permute.xlu1 %10224  ;;  %v2934_v56 = vld [vmem:[#allocation3 + $0x13a] sm:$0xff]  ;;  %v2935_v8 = vld [vmem:[#allocation3 + $0x142] sm:$0xff] }
 0x3db   : > { %2649 = vst.msk [vmem:[#allocation3 + $0x151] sm:$0xff] %vm444_vm12, %v2616_v18  ;;  %v2714_v14 = vld [vmem:[#allocation3 + $0x141] sm:$0xff]  ;;  %v3941_v10 = vpack.c.bf16 %v2935_v8, %v2934_v56  ;;  %v10423_v2 = vpack.i.bf16 %v2935_v8, %v2934_v56 }
 0x3dc   : > { %v10418_v59 = vpack.i.bf16 %v2714_v14, %v13877_v31  ;;  %v13888_v24 = vld [vmem:[#allocation3 + $0x140] sm:$0xff] }
 0x3dd   : > { %9065 = vmatmul.msk.bf16.gmra.mxu0 %vm444_vm12, %v3941_v10  ;;  %v10428_v51 = vpack.i.bf16 %v13888_v24, %v13895_v7 }
 0x3de   : > { %10424 = vrot.lane.b32.xlu1 %v10423_v2, %s11596_s27  ;;  %v2577_v28 = vpop.f32.mrf.mxu3 }
 0x3df   : > { %v2578_v1 = vadd.f32 %v13857_v0, %v2577_v28  ;;  %10419 = vrot.lane.b32.xlu0 %v10418_v59, %s11597_s28  ;;  %4178 = vmatmul.bf16.gmra.mxu2 %v3918_v60  ;;  %v10196_v28 = vunpack.i.l.bf16 %v13862_v6  ;;  %v2791_v60 = vld [vmem:[#allocation3 + $0x79] sm:$0xff] }
 0x3e0   : > { %10414 = vrot.lane.b32.xlu2 %v13824_v26, %s11598_s16  ;;  %v3816_v26 = vsel %vm444_vm12, %v2789_v62, %v10166_v57 }
 0x3e1   : > { %v2617_v15 = vmax.f32 %v2578_v1, 0.0  ;;  %v10200_v29 = vpop.permute.xlu0 %10199  ;;  %v3818_v62 = vsel %vm444_vm12, %v2791_v60, %v10196_v28 }
 0x3e2   : > { %v10202_v35 = vunpack.i.h.bf16 %v10200_v29  ;;  %v10201_v63 = vunpack.i.l.bf16 %v10200_v29  ;;  %v13890_v54 = vpop.permute.xlu2 %10259  ;;  %v10230_v32 = vpop.permute.xlu1 %10229 }
 0x3e3   : > { %2650 = vst.msk [vmem:[#allocation3 + $0x159] sm:$0xff] %vm444_vm12, %v2617_v15  ;;  %v10231_v19 = vunpack.i.l.bf16 %v10230_v32  ;;  %v10232_v1 = vunpack.i.h.bf16 %v10230_v32 }
 0x3e4   : > { %v3848_v37 = vsel %vm3744_vm14, %v3816_v26, %v10201_v63  ;;  %v3849_v47 = vsel %vm3744_vm14, %v3817_v22, %v10202_v35  ;;  %v3723_v35 = vsel %vm444_vm12, %v13568_v58, %v10182_v9  ;;  %v2792_v63 = vld [vmem:[#allocation3 + $0x81] sm:$0xff]  ;;  %v10236_v26 = vunpack.i.l.bf16 %v13836_v30 }
 0x3e5   : > { %v3880_v52 = vsel %vm3777_vm15, %v3848_v37, %v10206_v34  ;;  %v3881_v18 = vsel %vm3777_vm15, %v3849_v47, %v10207_v36  ;;  %v3850_v58 = vsel %vm3744_vm14, %v3818_v62, %v10231_v19  ;;  %v10186_v34 = vunpack.i.l.bf16 %v13734_v43 }
 0x3e6   : > { %10429 = vrot.lane.b32.xlu1 %v10428_v51, %s11598_s16  ;;  %v2580_v23 = vpop.f32.mrf.mxu3  ;;  %v3916_v48 = vpack.c.bf16 %v3881_v18, %v3880_v52 }
 0x3e7   : > { %v2581_v20 = vadd.f32 %v13857_v0, %v2580_v23  ;;  %10444 = vrot.lane.b32.xlu0 %v10418_v59, %s11598_s16  ;;  %v10181_v59 = vunpack.i.l.bf16 %v13834_v16 }
 0x3e8   : > { %10434 = vrot.lane.b32.xlu2 %v10423_v2, %s11597_s28  ;;  %4262 = vmatmul.bf16.gmra.mxu3 %v3916_v48  ;;  %v10197_v2 = vunpack.i.h.bf16 %v13862_v6  ;;  %v10187_v6 = vunpack.i.h.bf16 %v13734_v43  ;;  %v13944_v48 = vld [vmem:[#allocation3 + $0x151] sm:$0xff] }
 0x3e9   : > { %v2618_v49 = vmax.f32 %v2581_v20, 0.0  ;;  %v13911_v56 = vpop.permute.xlu0 %10214  ;;  %v3722_v32 = vsel %vm444_vm12, %v13571_v3, %v10181_v59  ;;  %v10237_v3 = vunpack.i.h.bf16 %v13836_v30 }
 0x3ea   : > { %v13913_v8 = vpop.permute.xlu2 %10269  ;;  %v13915_v14 = vpop.permute.xlu1 %10244  ;;  %v2936_v10 = vld [vmem:[#allocation3 + $0x152] sm:$0xff]  ;;  %v2937_v44 = vld [vmem:[#allocation3 + $0x15a] sm:$0xff]  ;;  %v3819_v36 = vsel %vm444_vm12, %v2792_v63, %v10197_v2  ;;  %v3755_v43 = vsel %vm3744_vm14, %v3722_v32, %v10186_v34  ;;  %v10211_v32 = vunpack.i.l.bf16 %v13806_v40  ;;  %v10217_v34 = vunpack.i.h.bf16 %v13911_v56 }
 0x3eb   : > { %2651 = vst.msk [vmem:[#allocation3 + $0x169] sm:$0xff] %vm444_vm12, %v2618_v49  ;;  %v3944_v57 = vpack.c.bf16 %v2937_v44, %v2936_v10  ;;  %v10463_v29 = vpack.i.bf16 %v2937_v44, %v2936_v10  ;;  %v13939_v37 = vld [vmem:[#allocation3 + $0x159] sm:$0xff]  ;;  %v3851_v47 = vsel %vm3744_vm14, %v3819_v36, %v10232_v1  ;;  %v3756_v49 = vsel %vm3744_vm14, %v3723_v35, %v10187_v6  ;;  %v13960_v2 = vld [vmem:[#allocation3 + $0x150] sm:$0xff]  ;;  %v13968_v63 = vpop.f32.mrf.mxu0 }
 0x3ec   : > { %v13946_v20 = vld [vmem:[#allocation3 + $0x158] sm:$0xff]  ;;  %v3882_v10 = vsel %vm3777_vm15, %v3850_v58, %v10236_v26  ;;  %v13955_v30 = vpack.i.bf16 %v13939_v37, %v13944_v48  ;;  %v3883_v59 = vsel %vm3777_vm15, %v3851_v47, %v10237_v3  ;;  %v10212_v6 = vunpack.i.h.bf16 %v13806_v40 }
 0x3ed   : > { %9066 = vmatmul.msk.bf16.gmra.mxu0 %vm444_vm12, %v3944_v57  ;;  %v10458_v1 = vpack.i.bf16 %v13946_v20, %v13960_v2  ;;  %v10216_v26 = vunpack.i.l.bf16 %v13911_v56  ;;  %v3724_v56 = vsel %vm444_vm12, %v13603_v27, %v10211_v32 }
 0x3ee   : > { %10439 = vrot.lane.b32.xlu1 %v10428_v51, %s11596_s27  ;;  %v2582_v15 = vpop.f32.mrf.mxu3 }
 0x3ef   : > { %v2583_v16 = vadd.f32 %v13857_v0, %v2582_v15  ;;  %10464 = vrot.lane.b32.xlu0 %v10463_v29, %s11597_s28  ;;  %v3919_v15 = vpack.c.bf16 %v3883_v59, %v3882_v10  ;;  %v3757_v10 = vsel %vm3744_vm14, %v3724_v56, %v10216_v26 }
 0x3f0   : > { %10454 = vrot.lane.b32.xlu2 %v10463_v29, %s11596_s27 }
 0x3f1   : > { %v2619_v22 = vmax.f32 %v2583_v16, 0.0  ;;  %v10220_v51 = vpop.permute.xlu0 %10219 }
 0x3f2   : > { %v10222_v52 = vunpack.i.h.bf16 %v10220_v51  ;;  %v10221_v18 = vunpack.i.l.bf16 %v10220_v51  ;;  %v10250_v23 = vpop.permute.xlu1 %10249  ;;  %v13951_v44 = vpop.permute.xlu2 %10274  ;;  %v14000_v27 = vld [vmem:[#allocation3 + $0x168] sm:$0xff] }
 0x3f3   : > { %2652 = vst.msk [vmem:[#allocation3 + $0x171] sm:$0xff] %vm444_vm12, %v2619_v22  ;;  %v10252_v51 = vunpack.i.h.bf16 %v10250_v23  ;;  %v10251_v47 = vunpack.i.l.bf16 %v10250_v23 }
 0x3f4   : > { %v3788_v9 = vsel %vm3777_vm15, %v3755_v43, %v10221_v18  ;;  %v3789_v28 = vsel %vm3777_vm15, %v3756_v49, %v10222_v52  ;;  %v3725_v18 = vsel %vm444_vm12, %v13594_v39, %v10212_v6 }
 0x3f5   : > { %v3921_v19 = vpack.c.bf16 %v3789_v28, %v3788_v9  ;;  %v3758_v9 = vsel %vm3744_vm14, %v3725_v18, %v10217_v34  ;;  %v3790_v39 = vsel %vm3777_vm15, %v3757_v10, %v10251_v47  ;;  %v2670_v47 = vld [vmem:[#allocation3 + $0xb0] sm:$0xff]  ;;  %v10247_v10 = vunpack.i.h.bf16 %v13915_v14 }
 0x3f6   : > { %10449 = vrot.lane.b32.xlu1 %v13955_v30, %s11597_s28  ;;  %v2585_v57 = vpop.f32.mrf.mxu3  ;;  %v3791_v28 = vsel %vm3777_vm15, %v3758_v9, %v10252_v51  ;;  %v2669_v51 = vld [vmem:[#allocation3 + $0xa8] sm:$0xff]  ;;  %v10246_v9 = vunpack.i.l.bf16 %v13915_v14  ;;  %v10277_v14 = vunpack.i.h.bf16 %v13951_v44 }
 0x3f7   : > { %v2586_v60 = vadd.f32 %v13857_v0, %v2585_v57  ;;  %4183 = vmatmul.bf16.gmra.mxu2 %v3921_v19  ;;  %v14004_v19 = vpop.f32.mrf.mxu0 }
 0x3f8   : > { %10459 = vrot.lane.b32.xlu2 %v10458_v1, %s11598_s16  ;;  %4267 = vmatmul.bf16.gmra.mxu3 %v3919_v15 }
 0x3f9   : > { %v2620_v29 = vmax.f32 %v2586_v60, 0.0  ;;  %v10240_v35 = vpop.permute.xlu0 %10239  ;;  %v3924_v60 = vpack.c.bf16 %v3791_v28, %v3790_v39  ;;  %v10262_v28 = vunpack.i.h.bf16 %v13890_v54 }
 0x3fa   : > { %v2938_v62 = vld [vmem:[#allocation3 + $0x16a] sm:$0xff]  ;;  %v2939_v16 = vld [vmem:[#allocation3 + $0x172] sm:$0xff]  ;;  %v13975_v22 = vpop.permute.xlu1 %10264  ;;  %v13977_v3 = vpop.permute.xlu2 %10299 }
 0x3fb   : > { %2653 = vst.msk [vmem:[#allocation3 + $0x181] sm:$0xff] %vm444_vm12, %v2620_v29  ;;  %v3947_v36 = vpack.c.bf16 %v2939_v16, %v2938_v62  ;;  %v10478_v58 = vpack.i.bf16 %v2939_v16, %v2938_v62  ;;  %v13990_v49 = vld [vmem:[#allocation3 + $0x170] sm:$0xff]  ;;  %v10242_v62 = vunpack.i.h.bf16 %v10240_v35  ;;  %v10241_v16 = vunpack.i.l.bf16 %v10240_v35 }
 0x3fc   : > { %v14002_v59 = vld [vmem:[#allocation3 + $0x171] sm:$0xff]  ;;  %v10483_v57 = vpack.i.bf16 %v13990_v49, %v14000_v27  ;;  %v10227_v35 = vunpack.i.h.bf16 %v13870_v41 }
 0x3fd   : > { %9067 = vmatmul.msk.bf16.gmra.mxu0 %vm444_vm12, %v3947_v36  ;;  %10479 = vrot.lane.b32.xlu0 %v10478_v58, %s11596_s27  ;;  %v3727_v18 = vsel %vm444_vm12, %v2670_v47, %v10242_v62  ;;  %v3726_v56 = vsel %vm444_vm12, %v2669_v51, %v10241_v16  ;;  %v10276_v16 = vunpack.i.l.bf16 %v13951_v44 }
 0x3fe   : > { %v2587_v52 = vpop.f32.mrf.mxu3  ;;  %10489 = vrot.lane.b32.xlu1 %v10478_v58, %s11597_s28  ;;  %v3760_v62 = vsel %vm3744_vm14, %v3727_v18, %v10247_v10 }
 0x3ff   : > { %v2588_v40 = vadd.f32 %v13857_v0, %v2587_v52  ;;  %v9344_v0 = vld [vmem:[%s16470_s7] sm:$0xff] }
 0x400   : > { %10469 = vrot.lane.b32.xlu2 %v10458_v1, %s11596_s27  ;;  %4540 = vmatpush.bf16.msrb.mxu1 %v9344_v0  ;;  %v14008_v1 = vld [vmem:[#allocation3 + $0x169] sm:$0xff]  ;;  %v14027_v0 = vpop.f32.mrf.mxu0 }
 0x401   : > { %v2621_v23 = vmax.f32 %v2588_v40, 0.0  ;;  %v13988_v43 = vpop.permute.xlu0 %10279  ;;  %v10473_v15 = vpack.i.bf16 %v14002_v59, %v14008_v1 }
 0x402   : > { %v14013_v29 = vpop.permute.xlu1 %10294  ;;  %v14016_v6 = vpop.permute.xlu2 %10324  ;;  %v2876_v36 = vld [vmem:[#allocation3 + $0x180] sm:$0xff] }
 0x403   : > { %2654 = vst.msk [vmem:[#allocation3 + $0x189] sm:$0xff] %vm444_vm12, %v2621_v23  ;;  %v10226_v23 = vunpack.i.l.bf16 %v13870_v41  ;;  %v3759_v41 = vsel %vm3744_vm14, %v3726_v56, %v10246_v9  ;;  %v3793_v56 = vsel %vm3777_vm15, %v3760_v62, %v10277_v14  ;;  %v14049_v44 = vld [vmem:[#allocation3 + $0x181] sm:$0xff]  ;;  %v10257_v14 = vunpack.i.h.bf16 %v13868_v17 }
 0x404   : > { %v3792_v18 = vsel %vm3777_vm15, %v3759_v41, %v10276_v16  ;;  %v10256_v16 = vunpack.i.l.bf16 %v13868_v17 }
 0x405   : > { %10484 = vrot.lane.b32.xlu0 %v10483_v57, %s11598_s16 }
 0x406   : > { %10494 = vrot.lane.b32.xlu1 %v10483_v57, %s11596_s27  ;;  %v10261_v57 = vunpack.i.l.bf16 %v13890_v54 }
 0x407   : > { %4188 = vmatmul.bf16.gmra.mxu2 %v3924_v60 }
 0x408   : > { %10474 = vrot.lane.b32.xlu2 %v10473_v15, %s11597_s28 }
 0x409   : > { %v14019_v32 = vpop.permute.xlu0 %10284 }
 0x40a   : > { %v2940_v58 = vld [vmem:[#allocation3 + $0x182] sm:$0xff]  ;;  %v2941_v34 = vld [vmem:[#allocation3 + $0x18a] sm:$0xff]  ;;  %v14045_v47 = vpop.permute.xlu2 %10344 }
 0x40b   : > { %v2877_v26 = vld [vmem:[#allocation3 + $0x188] sm:$0xff]  ;;  %v3950_v52 = vpack.c.bf16 %v2941_v34, %v2940_v58  ;;  %v10508_v39 = vpack.i.bf16 %v2941_v34, %v2940_v58  ;;  %v11503_v34 = vld [vmem:[#allocation3 + $0x91] sm:$0xff] }
 0x40c   : > { %v10518_v40 = vpack.i.bf16 %v2877_v26, %v2876_v36  ;;  %v11502_v36 = vld [vmem:[#allocation3 + $0x99] sm:$0xff]  ;;  %v3820_v54 = vsel %vm444_vm12, %v11503_v34, %v10226_v23  ;;  %v14043_v51 = vld [vmem:[#allocation3 + $0x189] sm:$0xff] }
 0x40d   : > { %9068 = vmatmul.msk.bf16.gmra.mxu0 %vm444_vm12, %v3950_v52  ;;  %v3821_v58 = vsel %vm444_vm12, %v11502_v36, %v10227_v35  ;;  %v3852_v10 = vsel %vm3744_vm14, %v3820_v54, %v10261_v57  ;;  %v10523_v23 = vpack.i.bf16 %v14043_v51, %v14049_v44  ;;  %v3927_v36 = vpack.c.bf16 %v3793_v56, %v3792_v18  ;;  %v2911_v57 = vld [vmem:[#allocation3 + $0x1a1] sm:$0xff]  ;;  %v11504_v18 = vld [vmem:[#allocation3 + $0xb1] sm:$0xff] }
 0x40e   : > { %10519 = vrot.lane.b32.xlu0 %v10518_v40, %s11596_s27  ;;  %10499 = vrot.lane.b32.xlu1 %v10518_v40, %s11598_s16  ;;  %v3853_v35 = vsel %vm3744_vm14, %v3821_v58, %v10262_v28  ;;  %v2910_v28 = vld [vmem:[#allocation3 + $0x199] sm:$0xff]  ;;  %v10267_v54 = vunpack.i.h.bf16 %v13975_v22  ;;  %v3823_v56 = vsel %vm444_vm12, %v11504_v18, %v10257_v14 }
 0x40f   : > { %v14034_v60 = vpop.permute.xlu1 %10314  ;;  %v10528_v58 = vpack.i.bf16 %v2911_v57, %v2910_v28  ;;  %v10296_v28 = vunpack.i.l.bf16 %v14013_v29 }
 0x410   : > { %10509 = vrot.lane.b32.xlu2 %v10508_v39, %s11597_s28  ;;  %v3729_v17 = vsel %vm444_vm12, %v13664_v25, %v10267_v54 }
 0x411   : > { %v10290_v26 = vpop.permute.xlu0 %10289 }
 0x412   : > { %v10292_v52 = vunpack.i.h.bf16 %v10290_v26  ;;  %v10291_v40 = vunpack.i.l.bf16 %v10290_v26  ;;  %v10266_v26 = vunpack.i.l.bf16 %v13975_v22 }
 0x414   : > { %v3884_v9 = vsel %vm3777_vm15, %v3852_v10, %v10291_v40  ;;  %v3885_v39 = vsel %vm3777_vm15, %v3853_v35, %v10292_v52  ;;  %v10286_v52 = vunpack.i.l.bf16 %v14019_v32  ;;  %v14071_v40 = vpop.permute.xlu2 %10349  ;;  %v11505_v10 = vld [vmem:[#allocation3 + $0xa9] sm:$0xff]  ;;  %v3728_v22 = vsel %vm444_vm12, %v13669_v12, %v10266_v26 }
 0x415   : > { %v3922_v34 = vpack.c.bf16 %v3885_v39, %v3884_v9  ;;  %v3822_v35 = vsel %vm444_vm12, %v11505_v10, %v10256_v16  ;;  %v10272_v39 = vunpack.i.h.bf16 %v13913_v8 }
 0x416   : > { %10524 = vrot.lane.b32.xlu0 %v10523_v23, %s11598_s16  ;;  %10504 = vrot.lane.b32.xlu1 %v13955_v30, %s11598_s16  ;;  %v10287_v30 = vunpack.i.h.bf16 %v14019_v32  ;;  %v3854_v32 = vsel %vm3744_vm14, %v3822_v35, %v10286_v52  ;;  %v10282_v35 = vunpack.i.h.bf16 %v13988_v43 }
 0x417   : > { %v14060_v41 = vpop.permute.xlu1 %10319  ;;  %4193 = vmatmul.bf16.gmra.mxu2 %v3927_v36  ;;  %4272 = vmatmul.bf16.gmra.mxu3 %v3922_v34  ;;  %v10271_v36 = vunpack.i.l.bf16 %v13913_v8  ;;  %v10297_v34 = vunpack.i.h.bf16 %v14013_v29  ;;  %v3762_v12 = vsel %vm3744_vm14, %v3729_v17, %v10272_v39  ;;  %v10281_v17 = vunpack.i.l.bf16 %v13988_v43 }
 0x418   : > { %10514 = vrot.lane.b32.xlu2 %v10473_v15, %s11598_s16  ;;  %v3855_v9 = vsel %vm3744_vm14, %v3823_v56, %v10287_v30  ;;  %v10321_v39 = vunpack.i.l.bf16 %v14060_v41 }
 0x419   : > { %v14063_v62 = vpop.permute.xlu0 %10304  ;;  %v3761_v16 = vsel %vm3744_vm14, %v3728_v22, %v10271_v36  ;;  %v3887_v54 = vsel %vm3777_vm15, %v3855_v9, %v10297_v34  ;;  %v10302_v22 = vunpack.i.h.bf16 %v13977_v3  ;;  %v10322_v9 = vunpack.i.h.bf16 %v14060_v41 }
 0x41a   : > { %v14073_v15 = vpop.f32.mrf.mxu2  ;;  %v10307_v36 = vunpack.i.h.bf16 %v14063_v62  ;;  %v10306_v34 = vunpack.i.l.bf16 %v14063_v62 }
 0x41c   : > { %v14096_v52 = vpop.permute.xlu2 %10364 }
 0x41e   : > { %10529 = vrot.lane.b32.xlu1 %v10528_v58, %s11598_s16  ;;  %v3886_v58 = vsel %vm3777_vm15, %v3854_v32, %v10296_v28  ;;  %v10301_v32 = vunpack.i.l.bf16 %v13977_v3  ;;  %v2797_v28 = vld [vmem:[#allocation3 + $0xc1] sm:$0xff] }
 0x41f   : > { %v14082_v23 = vpop.permute.xlu1 %10334  ;;  %v3925_v18 = vpack.c.bf16 %v3887_v54, %v3886_v58  ;;  %v3824_v43 = vsel %vm444_vm12, %v2797_v28, %v10281_v17 }
 0x420   : > { %v3730_v3 = vsel %vm444_vm12, %v13701_v50, %v10301_v32  ;;  %v3856_v54 = vsel %vm3744_vm14, %v3824_v43, %v10321_v39  ;;  %v14125_v50 = vld [vmem:[%s16469_s6] ss:$0 sm:$0xff]  ;;  %v10316_v43 = vunpack.i.l.bf16 %v14034_v60 }
 0x421   : > { %v10310_v57 = vpop.permute.xlu0 %10309  ;;  %v4160_v39 = vadd.f32 %v14125_v50, %v14073_v15  ;;  %v2676_v15 = vld [vmem:[#allocation3 + $0xf8] sm:$0xff] }
 0x422   : > { %v10312_v14 = vunpack.i.h.bf16 %v10310_v57  ;;  %v10311_v25 = vunpack.i.l.bf16 %v10310_v57  ;;  %v4161_v29 = vpop.f32.mrf.mxu2  ;;  %v2798_v57 = vld [vmem:[#allocation3 + $0xc9] sm:$0xff] }
 0x424   : > { %v3794_v26 = vsel %vm3777_vm15, %v3761_v16, %v10311_v25  ;;  %v3795_v30 = vsel %vm3777_vm15, %v3762_v12, %v10312_v14  ;;  %v3825_v16 = vsel %vm444_vm12, %v2798_v57, %v10282_v35  ;;  %v3731_v12 = vsel %vm444_vm12, %v13695_v42, %v10302_v22  ;;  %v10370_v58 = vpop.permute.xlu2 %10369 }
 0x425   : > { %v3930_v8 = vpack.c.bf16 %v3795_v30, %v3794_v26  ;;  %v3857_v62 = vsel %vm3744_vm14, %v3825_v16, %v10322_v9  ;;  %v10327_v26 = vunpack.i.h.bf16 %v14016_v6  ;;  %v10326_v30 = vunpack.i.l.bf16 %v14016_v6 }
 0x426   : > { %v3764_v42 = vsel %vm3744_vm14, %v3731_v12, %v10307_v36  ;;  %v4162_v12 = vadd.f32 %v14125_v50, %v4161_v29  ;;  %v10337_v29 = vunpack.i.h.bf16 %v14082_v23 }
 0x427   : > { %4198 = vmatmul.bf16.gmra.mxu2 %v3930_v8  ;;  %v10340_v56 = vpop.permute.xlu1 %10339  ;;  %4277 = vmatmul.bf16.gmra.mxu3 %v3925_v18  ;;  %v3888_v32 = vsel %vm3777_vm15, %v3856_v54, %v10326_v30  ;;  %v3889_v6 = vsel %vm3777_vm15, %v3857_v62, %v10327_v26  ;;  %v2675_v54 = vld [vmem:[#allocation3 + $0xf0] sm:$0xff] }
 0x428   : > { %v10342_v14 = vunpack.i.h.bf16 %v10340_v56  ;;  %v10341_v25 = vunpack.i.l.bf16 %v10340_v56  ;;  %v3763_v56 = vsel %vm3744_vm14, %v3730_v3, %v10306_v34  ;;  %v3928_v34 = vpack.c.bf16 %v3889_v6, %v3888_v32 }
 0x429   : > { %v10330_v10 = vpop.permute.xlu0 %10329 }
 0x42a   : > { %v14118_v8 = vpop.f32.mrf.mxu2  ;;  %v3796_v35 = vsel %vm3777_vm15, %v3763_v56, %v10341_v25  ;;  %v3797_v17 = vsel %vm3777_vm15, %v3764_v42, %v10342_v14  ;;  %v10332_v36 = vunpack.i.h.bf16 %v10330_v10  ;;  %v10331_v28 = vunpack.i.l.bf16 %v10330_v10 }
 0x42b   : > { %v3933_v9 = vpack.c.bf16 %v3797_v17, %v3796_v35  ;;  %v10317_v14 = vunpack.i.h.bf16 %v14034_v60  ;;  %v2799_v35 = vld [vmem:[#allocation3 + $0xd9] sm:$0xff]  ;;  %v2800_v17 = vld [vmem:[#allocation3 + $0xe1] sm:$0xff]  ;;  %v10351_v60 = vunpack.i.l.bf16 %v14071_v40 }
 0x42c   : > { %v14140_v3 = vpop.permute.xlu2 %10389  ;;  %v3733_v10 = vsel %vm444_vm12, %v2676_v15, %v10332_v36  ;;  %v3732_v30 = vsel %vm444_vm12, %v2675_v54, %v10331_v28  ;;  %v3826_v6 = vsel %vm444_vm12, %v2799_v35, %v10316_v43 }
 0x42d   : > { %v3827_v32 = vsel %vm444_vm12, %v2800_v17, %v10317_v14  ;;  %v3766_v28 = vsel %vm3744_vm14, %v3733_v10, %v10337_v29  ;;  %v3858_v14 = vsel %vm3744_vm14, %v3826_v6, %v10351_v60 }
 0x430   : > { %v14112_v41 = vpop.permute.xlu1 %10359 }
 0x431   : > { %v10355_v18 = vpop.permute.xlu0 %10354  ;;  %v10362_v60 = vunpack.i.h.bf16 %v14112_v41  ;;  %v10361_v29 = vunpack.i.l.bf16 %v14112_v41 }
 0x432   : > { %v4248_v22 = vpop.f32.mrf.mxu3  ;;  %v14142_v62 = vpop.f32.mrf.mxu2  ;;  %v10356_v36 = vunpack.i.l.bf16 %v10355_v18 }
 0x433   : > { %v4249_v57 = vadd.f32 %v4248_v22, %v4160_v39  ;;  %v10336_v22 = vunpack.i.l.bf16 %v14082_v23 }
 0x434   : > { %v3890_v10 = vsel %vm3777_vm15, %v3858_v14, %v10356_v36  ;;  %v3735_v36 = vsel %vm444_vm12, %v13778_v13, %v10362_v60 }
 0x435   : > { %v4338_v56 = vadd.f32 %v13873_v33, %v4249_v57  ;;  %v3765_v33 = vsel %vm3744_vm14, %v3732_v30, %v10336_v22  ;;  %v10372_v57 = vunpack.i.h.bf16 %v10370_v58  ;;  %v14166_v30 = vpop.permute.xlu2 %10409 }
 0x437   : > { %4203 = vmatmul.bf16.gmra.mxu2 %v3933_v9  ;;  %4282 = vmatmul.bf16.gmra.mxu3 %v3928_v34  ;;  %v10352_v9 = vunpack.i.h.bf16 %v14071_v40  ;;  %v10357_v34 = vunpack.i.h.bf16 %v10355_v18  ;;  %v4417_v54 = vmax.f32 %v4338_v56, 0.0 }
 0x438   : > { %v14133_v16 = vpop.permute.xlu1 %10379 }
 0x439   : > { %v14135_v25 = vpop.permute.xlu0 %10374  ;;  %v3859_v18 = vsel %vm3744_vm14, %v3827_v32, %v10352_v9  ;;  %v10347_v9 = vunpack.i.h.bf16 %v14045_v47  ;;  %v10381_v41 = vunpack.i.l.bf16 %v14133_v16 }
 0x43a   : > { %v4250_v26 = vpop.f32.mrf.mxu3 }
 0x43b   : > { %v4251_v42 = vadd.f32 %v4250_v26, %v4162_v12  ;;  %v10371_v12 = vunpack.i.l.bf16 %v10370_v58  ;;  %v3891_v58 = vsel %vm3777_vm15, %v3859_v18, %v10357_v34  ;;  %v4165_v34 = vadd.f32 %v14125_v50, %v14118_v8 }
 0x43c   : > { %v3931_v35 = vpack.c.bf16 %v3891_v58, %v3890_v10  ;;  %v3829_v13 = vsel %vm444_vm12, %v13738_v45, %v10347_v9 }
 0x43d   : > { %v4340_v39 = vadd.f32 %v13905_v53, %v4251_v42  ;;  %v3798_v40 = vsel %vm3777_vm15, %v3765_v33, %v10371_v12  ;;  %v3799_v53 = vsel %vm3777_vm15, %v3766_v28, %v10372_v57  ;;  %v3734_v33 = vsel %vm444_vm12, %v13785_v4, %v10361_v29  ;;  %v14185_v57 = vpop.permute.xlu2 %10414 }
 0x43e   : > { %v3936_v56 = vpack.c.bf16 %v3799_v53, %v3798_v40  ;;  %v10382_v28 = vunpack.i.h.bf16 %v14133_v16  ;;  %v4167_v16 = vadd.f32 %v14125_v50, %v14142_v62 }
 0x43f   : > { %v4418_v15 = vmax.f32 %v4340_v39, 0.0  ;;  %v10346_v39 = vunpack.i.l.bf16 %v14045_v47  ;;  %v10366_v47 = vunpack.i.l.bf16 %v14096_v52 }
 0x440   : > { %v10385_v26 = vpop.permute.xlu1 %10384  ;;  %v3861_v45 = vsel %vm3744_vm14, %v3829_v13, %v10382_v28 }
 0x441   : > { %v14156_v23 = vpop.permute.xlu0 %10394  ;;  %v4449_v43 = vpack.c.bf16 %v4418_v15, %v4417_v54  ;;  %v10367_v15 = vunpack.i.h.bf16 %v14096_v52  ;;  %v10387_v14 = vunpack.i.h.bf16 %v10385_v26  ;;  %v10386_v8 = vunpack.i.l.bf16 %v10385_v26 }
 0x442   : > { %v14162_v42 = vpop.f32.mrf.mxu2  ;;  %v3828_v4 = vsel %vm444_vm12, %v13742_v5, %v10346_v39  ;;  %v3767_v53 = vsel %vm3744_vm14, %v3734_v33, %v10366_v47  ;;  %v14211_v39 = vpop.f32.mrf.mxu0  ;;  %v10412_v47 = vunpack.i.h.bf16 %v14166_v30 }
 0x443   : > { %9078 = vmatmul.msk.bf16.vlgmr.msrb.gmra.mxu1 %vm444_vm12, %v4449_v43  ;;  %v3768_v18 = vsel %vm3744_vm14, %v3735_v36, %v10367_v15  ;;  %v3860_v10 = vsel %vm3744_vm14, %v3828_v4, %v10381_v41  ;;  %v3893_v5 = vsel %vm3777_vm15, %v3861_v45, %v10387_v14  ;;  %v10376_v41 = vunpack.i.l.bf16 %v14135_v25  ;;  %v2803_v14 = vld [vmem:[#allocation3 + $0x109] sm:$0xff] }
 0x444   : > { %v10397_v4 = vunpack.i.h.bf16 %v14156_v23 }
 0x447   : > { %4208 = vmatmul.bf16.gmra.mxu2 %v3936_v56  ;;  %4287 = vmatmul.bf16.gmra.mxu3 %v3931_v35  ;;  %v3892_v56 = vsel %vm3777_vm15, %v3860_v10, %v10386_v8  ;;  %v2804_v8 = vld [vmem:[#allocation3 + $0x111] sm:$0xff] }
 0x448   : > { %v14169_v17 = vpop.permute.xlu1 %10404  ;;  %v3934_v9 = vpack.c.bf16 %v3893_v5, %v3892_v56  ;;  %v10416_v5 = vunpack.i.l.bf16 %v14185_v57 }
 0x449   : > { %v10400_v32 = vpop.permute.xlu0 %10399 }
 0x44a   : > { %v4253_v22 = vpop.f32.mrf.mxu3  ;;  %v14173_v6 = vpop.f32.mrf.mxu2  ;;  %v10402_v12 = vunpack.i.h.bf16 %v10400_v32  ;;  %v10401_v54 = vunpack.i.l.bf16 %v10400_v32 }
 0x44b   : > { %v4254_v43 = vadd.f32 %v4253_v22, %v4165_v34  ;;  %v14213_v34 = vpop.permute.xlu2 %10434 }
 0x44c   : > { %v3800_v52 = vsel %vm3777_vm15, %v3767_v53, %v10401_v54  ;;  %v3801_v26 = vsel %vm3777_vm15, %v3768_v18, %v10402_v12  ;;  %v10392_v54 = vunpack.i.h.bf16 %v14140_v3  ;;  %v4170_v53 = vadd.f32 %v14125_v50, %v14162_v42 }
 0x44d   : > { %v4343_v35 = vadd.f32 %v13929_v55, %v4254_v43  ;;  %v3939_v22 = vpack.c.bf16 %v3801_v26, %v3800_v52  ;;  %v10377_v55 = vunpack.i.h.bf16 %v14135_v25  ;;  %v3830_v43 = vsel %vm444_vm12, %v2803_v14, %v10376_v41 }
 0x44e   : > { %v10396_v25 = vunpack.i.l.bf16 %v14156_v23  ;;  %v3737_v26 = vsel %vm444_vm12, %v13838_v11, %v10392_v54  ;;  %v10417_v42 = vunpack.i.h.bf16 %v14185_v57  ;;  %v14242_v11 = vpop.f32.mrf.mxu0 }
 0x44f   : > { %v4419_v36 = vmax.f32 %v4343_v35, 0.0  ;;  %v3831_v13 = vsel %vm444_vm12, %v2804_v8, %v10377_v55 }
 0x450   : > { %v14191_v40 = vpop.permute.xlu1 %10424 }
 0x451   : > { %v14208_v29 = vpop.permute.xlu0 %10419 }
 0x452   : > { %v4255_v58 = vpop.f32.mrf.mxu3  ;;  %v14206_v62 = vpop.f32.mrf.mxu2 }
 0x453   : > { %v4256_v60 = vadd.f32 %v4255_v58, %v4167_v16  ;;  %v10411_v16 = vunpack.i.l.bf16 %v14166_v30  ;;  %v3863_v30 = vsel %vm3744_vm14, %v3831_v13, %v10412_v47 }
 0x454   : > { %v3895_v57 = vsel %vm3777_vm15, %v3863_v30, %v10417_v42 }
 0x455   : > { %v4345_v32 = vadd.f32 %v13968_v63, %v4256_v60  ;;  %v10391_v63 = vunpack.i.l.bf16 %v14140_v3  ;;  %v3862_v23 = vsel %vm3744_vm14, %v3830_v43, %v10411_v16  ;;  %v3770_v60 = vsel %vm3744_vm14, %v3737_v26, %v10397_v4 }
 0x456   : > { %v10406_v4 = vunpack.i.l.bf16 %v14169_v17  ;;  %v10426_v26 = vunpack.i.l.bf16 %v14191_v40 }
 0x457   : > { %4213 = vmatmul.bf16.gmra.mxu2 %v3939_v22  ;;  %v4420_v33 = vmax.f32 %v4345_v32, 0.0  ;;  %4292 = vmatmul.bf16.gmra.mxu3 %v3934_v9  ;;  %v3736_v45 = vsel %vm444_vm12, %v13843_v21, %v10391_v63  ;;  %v14244_v22 = vpop.permute.xlu2 %10454  ;;  %v4172_v21 = vadd.f32 %v14125_v50, %v14173_v6  ;;  %v10421_v6 = vunpack.i.l.bf16 %v14208_v29 }
 0x458   : > { %v10430_v28 = vpop.permute.xlu1 %10429  ;;  %v3769_v35 = vsel %vm3744_vm14, %v3736_v45, %v10396_v25 }
 0x459   : > { %v4450_v12 = vpack.c.bf16 %v4420_v33, %v4419_v36  ;;  %v10432_v3 = vunpack.i.h.bf16 %v10430_v28  ;;  %v10431_v18 = vunpack.i.l.bf16 %v10430_v28  ;;  %v14232_v10 = vpop.permute.xlu0 %10444  ;;  %v3894_v33 = vsel %vm3777_vm15, %v3862_v23, %v10416_v5 }
 0x45a   : > { %v4258_v15 = vpop.f32.mrf.mxu3  ;;  %v14228_v52 = vpop.f32.mrf.mxu2  ;;  %v3937_v54 = vpack.c.bf16 %v3895_v57, %v3894_v33  ;;  %v10447_v5 = vunpack.i.h.bf16 %v14232_v10 }
 0x45b   : > { %9079 = vmatmul.msk.bf16.gmra.mxu1 %vm444_vm12, %v4450_v12  ;;  %v4259_v58 = vadd.f32 %v4258_v15, %v4170_v53  ;;  %v3802_v32 = vsel %vm3777_vm15, %v3769_v35, %v10431_v18  ;;  %v3803_v9 = vsel %vm3777_vm15, %v3770_v60, %v10432_v3  ;;  %v10422_v15 = vunpack.i.h.bf16 %v14208_v29 }
 0x45c   : > { %v3942_v41 = vpack.c.bf16 %v3803_v9, %v3802_v32  ;;  %v3738_v29 = vsel %vm444_vm12, %v13895_v7, %v10421_v6  ;;  %v10427_v18 = vunpack.i.h.bf16 %v14191_v40  ;;  %v4177_v33 = vadd.f32 %v14125_v50, %v14228_v52 }
 0x45d   : > { %v4348_v28 = vadd.f32 %v14004_v19, %v4259_v58  ;;  %v10407_v19 = vunpack.i.h.bf16 %v14169_v17  ;;  %v3739_v25 = vsel %vm444_vm12, %v13888_v24, %v10422_v15  ;;  %v3832_v58 = vsel %vm444_vm12, %v13817_v61, %v10406_v4 }
 0x45e   : > { %v3771_v23 = vsel %vm3744_vm14, %v3738_v29, %v10426_v26  ;;  %v3772_v7 = vsel %vm3744_vm14, %v3739_v25, %v10427_v18 }
 0x45f   : > { %v4421_v63 = vmax.f32 %v4348_v28, 0.0  ;;  %v10460_v16 = vpop.permute.xlu2 %10459  ;;  %v3833_v17 = vsel %vm444_vm12, %v13811_v46, %v10407_v19  ;;  %v10446_v46 = vunpack.i.l.bf16 %v14232_v10 }
 0x460   : > { %v10440_v56 = vpop.permute.xlu1 %10439  ;;  %v10462_v24 = vunpack.i.h.bf16 %v10460_v16  ;;  %v10461_v30 = vunpack.i.l.bf16 %v10460_v16 }
 0x461   : > { %v14258_v13 = vpop.permute.xlu0 %10464  ;;  %v10442_v53 = vunpack.i.h.bf16 %v10440_v56  ;;  %v10441_v3 = vunpack.i.l.bf16 %v10440_v56  ;;  %v4175_v56 = vadd.f32 %v14125_v50, %v14206_v62 }
 0x462   : > { %v4260_v36 = vpop.f32.mrf.mxu3  ;;  %v14256_v47 = vpop.f32.mrf.mxu2  ;;  %v3804_v32 = vsel %vm3777_vm15, %v3771_v23, %v10461_v30  ;;  %v3805_v9 = vsel %vm3777_vm15, %v3772_v7, %v10462_v24  ;;  %v10437_v30 = vunpack.i.h.bf16 %v14213_v34 }
 0x463   : > { %v4261_v55 = vadd.f32 %v4260_v36, %v4172_v21  ;;  %v3864_v42 = vsel %vm3744_vm14, %v3832_v58, %v10441_v3  ;;  %v3865_v40 = vsel %vm3744_vm14, %v3833_v17, %v10442_v53  ;;  %v3945_v28 = vpack.c.bf16 %v3805_v9, %v3804_v32  ;;  %v11506_v9 = vld [vmem:[#allocation3 + $0x141] sm:$0xff] }
 0x464   : > { %v3896_v62 = vsel %vm3777_vm15, %v3864_v42, %v10446_v46  ;;  %v3897_v36 = vsel %vm3777_vm15, %v3865_v40, %v10447_v5  ;;  %v10457_v3 = vunpack.i.h.bf16 %v14244_v22  ;;  %v4180_v26 = vadd.f32 %v14125_v50, %v14256_v47 }
 0x465   : > { %v4350_v12 = vadd.f32 %v14027_v0, %v4261_v55  ;;  %v14262_v0 = vpop.f32.mrf.mxu0 }
 0x467   : > { %4218 = vmatmul.bf16.gmra.mxu2 %v3942_v41  ;;  %v4422_v14 = vmax.f32 %v4350_v12, 0.0  ;;  %4297 = vmatmul.bf16.gmra.mxu3 %v3937_v54  ;;  %v3940_v12 = vpack.c.bf16 %v3897_v36, %v3896_v62  ;;  %v10470_v54 = vpop.permute.xlu2 %10469  ;;  %v3835_v62 = vsel %vm444_vm12, %v11506_v9, %v10437_v30 }
 0x468   : > { %v10450_v8 = vpop.permute.xlu1 %10449  ;;  %v10472_v46 = vunpack.i.h.bf16 %v10470_v54 }
 0x469   : > { %v4451_v43 = vpack.c.bf16 %v4422_v14, %v4421_v63  ;;  %v10452_v63 = vunpack.i.h.bf16 %v10450_v8  ;;  %v10451_v14 = vunpack.i.l.bf16 %v10450_v8  ;;  %v10456_v8 = vunpack.i.l.bf16 %v14244_v22 }
 0x46a   : > { %v4181_v60 = vpop.f32.mrf.mxu2 }
 0x46b   : > { %9080 = vmatmul.msk.bf16.gmra.mxu1 %vm444_vm12, %v4451_v43  ;;  %v4263_v45 = vpop.f32.mrf.mxu3  ;;  %v3740_v16 = vsel %vm444_vm12, %v13960_v2, %v10451_v14  ;;  %v4182_v22 = vadd.f32 %v14125_v50, %v4181_v60 }
 0x46c   : > { %v4264_v21 = vadd.f32 %v4263_v45, %v4175_v56  ;;  %v10436_v56 = vunpack.i.l.bf16 %v14213_v34 }
 0x46d   : > { %v4359_v10 = vpop.f32.mrf.mxu0 }
 0x46e   : > { %v4353_v55 = vadd.f32 %v14211_v39, %v4264_v21  ;;  %v3741_v39 = vsel %vm444_vm12, %v13946_v20, %v10452_v63  ;;  %v3773_v20 = vsel %vm3744_vm14, %v3740_v16, %v10456_v8  ;;  %v10471_v21 = vunpack.i.l.bf16 %v10470_v54 }
 0x46f   : > { %v14283_v35 = vpop.permute.xlu0 %10479  ;;  %v10475_v45 = vpop.permute.xlu2 %10474  ;;  %v3774_v58 = vsel %vm3744_vm14, %v3741_v39, %v10457_v3  ;;  %v3834_v36 = vsel %vm444_vm12, %v13877_v31, %v10436_v56  ;;  %v3867_v54 = vsel %vm3744_vm14, %v3835_v62, %v10472_v46  ;;  %v10467_v3 = vunpack.i.h.bf16 %v14258_v13 }
 0x470   : > { %v14285_v61 = vpop.permute.xlu1 %10489  ;;  %v4423_v19 = vmax.f32 %v4353_v55, 0.0 }
 0x473   : > { %v4265_v57 = vpop.f32.mrf.mxu3 }
 0x474   : > { %v4266_v41 = vadd.f32 %v4265_v57, %v4177_v33 }
 0x475   : > { %v14306_v18 = vpop.f32.mrf.mxu0 }
 0x476   : > { %v4355_v15 = vadd.f32 %v14242_v11, %v4266_v41 }
 0x477   : > { %4223 = vmatmul.bf16.gmra.mxu2 %v3945_v28  ;;  %4302 = vmatmul.bf16.gmra.mxu3 %v3940_v12  ;;  %v10485_v52 = vpop.permute.xlu0 %10484  ;;  %v14327_v12 = vpop.permute.xlu2 %10509 }
 0x478   : > { %v14295_v6 = vpop.permute.xlu1 %10494  ;;  %v4424_v43 = vmax.f32 %v4355_v15, 0.0  ;;  %v10487_v53 = vunpack.i.h.bf16 %v10485_v52  ;;  %v10486_v11 = vunpack.i.l.bf16 %v10485_v52  ;;  %v10476_v15 = vunpack.i.l.bf16 %v10475_v45 }
 0x47a   : > { %v14297_v4 = vpop.f32.mrf.mxu2  ;;  %v4452_v25 = vpack.c.bf16 %v4424_v43, %v4423_v19  ;;  %v3806_v23 = vsel %vm3777_vm15, %v3773_v20, %v10486_v11  ;;  %v3807_v7 = vsel %vm3777_vm15, %v3774_v58, %v10487_v53  ;;  %v10482_v19 = vunpack.i.h.bf16 %v14283_v35 }
 0x47b   : > { %v4268_v29 = vpop.f32.mrf.mxu3  ;;  %v3948_v42 = vpack.c.bf16 %v3807_v7, %v3806_v23  ;;  %v10481_v43 = vunpack.i.l.bf16 %v14283_v35  ;;  %v3742_v16 = vsel %vm444_vm12, %v14000_v27, %v10476_v15  ;;  %v10466_v35 = vunpack.i.l.bf16 %v14258_v13 }
 0x47c   : > { %9081 = vmatmul.msk.bf16.gmra.mxu1 %vm444_vm12, %v4452_v25  ;;  %v4269_v2 = vadd.f32 %v4268_v29, %v4180_v26 }
 0x47d   : > { %v14323_v33 = vpop.f32.mrf.mxu0  ;;  %v3775_v53 = vsel %vm3744_vm14, %v3742_v16, %v10481_v43  ;;  %v3836_v13 = vsel %vm444_vm12, %v13944_v48, %v10466_v35  ;;  %v4185_v48 = vadd.f32 %v14125_v50, %v14297_v4  ;;  %v10511_v35 = vunpack.i.l.bf16 %v14327_v12 }
 0x47e   : > { %v4358_v40 = vadd.f32 %v14262_v0, %v4269_v2  ;;  %v10477_v0 = vunpack.i.h.bf16 %v10475_v45  ;;  %v3837_v2 = vsel %vm444_vm12, %v13939_v37, %v10467_v3  ;;  %v10512_v3 = vunpack.i.h.bf16 %v14327_v12 }
 0x47f   : > { %v10515_v27 = vpop.permute.xlu2 %10514  ;;  %v3840_v12 = vsel %vm444_vm12, %v14049_v44, %v10511_v35 }
 0x480   : > { %v10500_v17 = vpop.permute.xlu1 %10499  ;;  %v4425_v57 = vmax.f32 %v4358_v40, 0.0  ;;  %v3743_v39 = vsel %vm444_vm12, %v13990_v49, %v10477_v0  ;;  %v10496_v49 = vunpack.i.l.bf16 %v14295_v6  ;;  %v10516_v30 = vunpack.i.l.bf16 %v10515_v27  ;;  %v10520_v56 = vpop.permute.xlu0 %10519 }
 0x481   : > { %v10502_v25 = vunpack.i.h.bf16 %v10500_v17  ;;  %v10501_v29 = vunpack.i.l.bf16 %v10500_v17  ;;  %v3776_v11 = vsel %vm3744_vm14, %v3743_v39, %v10482_v19  ;;  %v10497_v17 = vunpack.i.h.bf16 %v14295_v6 }
 0x482   : > { %v14312_v24 = vpop.f32.mrf.mxu2  ;;  %v3868_v23 = vsel %vm3744_vm14, %v3836_v13, %v10496_v49  ;;  %v10522_v4 = vunpack.i.h.bf16 %v10520_v56 }
 0x483   : > { %v4270_v47 = vpop.f32.mrf.mxu3  ;;  %v3808_v26 = vsel %vm3777_vm15, %v3775_v53, %v10501_v29  ;;  %v3809_v45 = vsel %vm3777_vm15, %v3776_v11, %v10502_v25  ;;  %v3869_v7 = vsel %vm3744_vm14, %v3837_v2, %v10497_v17  ;;  %v3900_v6 = vsel %vm3777_vm15, %v3868_v23, %v10516_v30  ;;  %v9347_v11 = vld [vmem:[%s16466_s3 + $0x8] sm:$0xff]  ;;  %v9346_v2 = vld [vmem:[%s16466_s3] sm:$0xff] }
 0x484   : > { %v4271_v5 = vadd.f32 %v4270_v47, %v4182_v22  ;;  %v3951_v58 = vpack.c.bf16 %v3809_v45, %v3808_v26  ;;  %v10517_v22 = vunpack.i.h.bf16 %v10515_v27  ;;  %v4187_v9 = vadd.f32 %v14125_v50, %v14312_v24  ;;  %4808 = vmatpush.bf16.msrb.mxu2 %v9347_v11 }
 0x485   : > { %v14350_v20 = vpop.f32.mrf.mxu0 }
 0x486   : > { %v4360_v32 = vadd.f32 %v4359_v10, %v4271_v5  ;;  %v3866_v10 = vsel %vm3744_vm14, %v3834_v36, %v10471_v21  ;;  %v2942_v21 = vld [vmem:[#allocation3 + $0x19a] sm:$0xff] }
 0x487   : > { %4228 = vmatmul.bf16.gmra.mxu2 %v3948_v42  ;;  %v3901_v42 = vsel %vm3777_vm15, %v3869_v7, %v10517_v22  ;;  %v10067_v7 = vunpack.i.h.bf16 %v13633_v38  ;;  %v10066_v22 = vunpack.i.l.bf16 %v13633_v38 }
 0x488   : > { %v10505_v60 = vpop.permute.xlu1 %10504  ;;  %v4426_v34 = vmax.f32 %v4360_v32, 0.0  ;;  %v3946_v5 = vpack.c.bf16 %v3901_v42, %v3900_v6  ;;  %v2943_v32 = vld [vmem:[#allocation3 + $0x1a2] sm:$0xff]  ;;  %v10525_v36 = vpop.permute.xlu0 %10524  ;;  %4809 = vmatpush.bf16.msrb.mxu2 %v9346_v2 }
 0x489   : > { %v10507_v28 = vunpack.i.h.bf16 %v10505_v60  ;;  %v10506_v55 = vunpack.i.l.bf16 %v10505_v60  ;;  %v10527_v15 = vunpack.i.h.bf16 %v10525_v36 }
 0x48a   : > { %v14325_v41 = vpop.f32.mrf.mxu2  ;;  %v4453_v63 = vpack.c.bf16 %v4426_v34, %v4425_v57  ;;  %v3953_v57 = vpack.c.bf16 %v2943_v32, %v2942_v21  ;;  %v10492_v34 = vunpack.i.h.bf16 %v14285_v61 }
 0x48b   : > { %v3898_v31 = vsel %vm3777_vm15, %v3866_v10, %v10506_v55  ;;  %v3899_v14 = vsel %vm3777_vm15, %v3867_v54, %v10507_v28  ;;  %v10491_v28 = vunpack.i.l.bf16 %v14285_v61  ;;  %v10521_v10 = vunpack.i.l.bf16 %v10520_v56 }
 0x48c   : > { %v3943_v52 = vpack.c.bf16 %v3899_v14, %v3898_v31  ;;  %9082 = vmatmul.msk.bf16.gmra.mxu1 %vm444_vm12, %v4453_v63  ;;  %v10526_v63 = vunpack.i.l.bf16 %v10525_v36  ;;  %v3839_v31 = vsel %vm444_vm12, %v14002_v59, %v10492_v34  ;;  %v3872_v56 = vsel %vm3744_vm14, %v3840_v12, %v10066_v22 }
 0x48d   : > { %v4369_v37 = vpop.f32.mrf.mxu0  ;;  %v3838_v14 = vsel %vm444_vm12, %v14008_v1, %v10491_v28  ;;  %v3871_v43 = vsel %vm3744_vm14, %v3839_v31, %v10522_v4  ;;  %v4190_v1 = vadd.f32 %v14125_v50, %v14325_v41 }
 0x48e   : > { %4307 = vmatmul.bf16.gmra.mxu3 %v3943_v52 }
 0x490   : > { %v10530_v17 = vpop.permute.xlu1 %10529 }
 0x491   : > { %v10532_v13 = vunpack.i.h.bf16 %v10530_v17  ;;  %v10531_v23 = vunpack.i.l.bf16 %v10530_v17 }
 0x492   : > { %v14344_v8 = vpop.f32.mrf.mxu2 }
 0x493   : > { %v4192_v26 = vadd.f32 %v14125_v50, %v14344_v8 }
 0x495   : > { %v14371_v54 = vpop.f32.mrf.mxu0 }
 0x497   : > { %4233 = vmatmul.bf16.gmra.mxu2 %v3951_v58  ;;  %v3841_v58 = vsel %vm444_vm12, %v14043_v51, %v10512_v3 }
 0x498   : > { %v3873_v51 = vsel %vm3744_vm14, %v3841_v58, %v10067_v7 }
 0x499   : > { %v3905_v44 = vsel %vm3777_vm15, %v3873_v51, %v10532_v13 }
 0x49a   : > { %v14358_v47 = vpop.f32.mrf.mxu2  ;;  %v4273_v40 = vpop.f32.mrf.mxu3 }
 0x49b   : > { %v4274_v46 = vadd.f32 %v4273_v40, %v4185_v48  ;;  %v4195_v38 = vadd.f32 %v14125_v50, %v14358_v47 }
 0x49d   : > { %v4363_v55 = vadd.f32 %v14306_v18, %v4274_v46  ;;  %v3870_v18 = vsel %vm3744_vm14, %v3838_v14, %v10521_v10  ;;  %v4374_v16 = vpop.f32.mrf.mxu0  ;;  %v14415_v46 = vld [vmem:[%s16471_s8] ss:$0 sm:$0xff] }
 0x49e   : > { %4312 = vmatmul.bf16.gmra.mxu3 %v3946_v5  ;;  %v3902_v29 = vsel %vm3777_vm15, %v3870_v18, %v10526_v63  ;;  %v3904_v5 = vsel %vm3777_vm15, %v3872_v56, %v10531_v23 }
 0x49f   : > { %v4427_v61 = vmax.f32 %v4363_v55, 0.0  ;;  %v11507_v55 = vld [vmem:[#allocation4] sm:$0xff] }
 0x4a2   : > { %v14366_v62 = vpop.f32.mrf.mxu2  ;;  %v4275_v60 = vpop.f32.mrf.mxu3 }
 0x4a3   : > { %v4276_v0 = vadd.f32 %v4275_v60, %v4187_v9  ;;  %v4197_v9 = vadd.f32 %v14125_v50, %v14366_v62 }
 0x4a5   : > { %v4365_v24 = vadd.f32 %v14323_v33, %v4276_v0  ;;  %v3903_v33 = vsel %vm3777_vm15, %v3871_v43, %v10527_v15  ;;  %v4377_v6 = vpop.f32.mrf.mxu0 }
 0x4a6   : > { %v3949_v59 = vpack.c.bf16 %v3903_v33, %v3902_v29 }
 0x4a7   : > { %9069 = vmatmul.msk.bf16.vlgmr.msra.gmra.mxu2 %vm444_vm12, %v3953_v57  ;;  %v4428_v19 = vmax.f32 %v4365_v24, 0.0 }
 0x4a9   : > { %v4454_v52 = vpack.c.bf16 %v4428_v19, %v4427_v61  ;;  %v11508_v61 = vld [vmem:[#allocation4 + $0x8] sm:$0xff] }
 0x4aa   : > { %v14381_v25 = vpop.f32.mrf.mxu2  ;;  %v4278_v39 = vpop.f32.mrf.mxu3 }
 0x4ab   : > { %9083 = vmatmul.msk.bf16.gmra.mxu1 %vm444_vm12, %v4454_v52  ;;  %v4279_v53 = vadd.f32 %v4278_v39, %v4190_v1 }
 0x4ad   : > { %v4368_v41 = vadd.f32 %v14350_v20, %v4279_v53  ;;  %v4379_v34 = vpop.f32.mrf.mxu0 }
 0x4ae   : > { %4317 = vmatmul.bf16.gmra.mxu3 %v3949_v59 }
 0x4af   : > { %v4429_v20 = vmax.f32 %v4368_v41, 0.0 }
 0x4b2   : > { %v4201_v45 = vpop.f32.mrf.mxu2  ;;  %v4280_v49 = vpop.f32.mrf.mxu3 }
 0x4b3   : > { %v4281_v27 = vadd.f32 %v4280_v49, %v4192_v26  ;;  %v4202_v52 = vadd.f32 %v14125_v50, %v4201_v45 }
 0x4b5   : > { %v4370_v8 = vadd.f32 %v4369_v37, %v4281_v27  ;;  %v3952_v37 = vpack.c.bf16 %v3905_v44, %v3904_v5  ;;  %v4382_v18 = vpop.f32.mrf.mxu0  ;;  %v11509_v27 = vld [vmem:[#allocation4 + $0x10] sm:$0xff] }
 0x4b7   : > { %v4430_v30 = vmax.f32 %v4370_v8, 0.0 }
 0x4b9   : > { %v4455_v42 = vpack.c.bf16 %v4430_v30, %v4429_v20  ;;  %v11510_v30 = vld [vmem:[#allocation4 + $0x18] sm:$0xff] }
 0x4ba   : > { %v4204_v40 = vpop.f32.mrf.mxu2  ;;  %v4283_v48 = vpop.f32.mrf.mxu3 }
 0x4bb   : > { %9084 = vmatmul.msk.bf16.gmra.mxu1 %vm444_vm12, %v4455_v42  ;;  %v4284_v21 = vadd.f32 %v4283_v48, %v4195_v38  ;;  %v4205_v58 = vadd.f32 %v14125_v50, %v4204_v40 }
 0x4bd   : > { %v4373_v28 = vadd.f32 %v14371_v54, %v4284_v21  ;;  %v4200_v54 = vadd.f32 %v14125_v50, %v14381_v25  ;;  %v4384_v3 = vpop.f32.mrf.mxu0 }
 0x4be   : > { %4322 = vmatmul.bf16.gmra.mxu3 %v3952_v37 }
 0x4bf   : > { %v4431_v10 = vmax.f32 %v4373_v28, 0.0 }
 0x4c0   : > { %v4542_v32 = vpop.f32.mrf.mxu1 }
 0x4c1   : > { %v4543_v36 = vadd.f32 %v14415_v46, %v4542_v32  ;;  %v11511_v32 = vld [vmem:[#allocation4 + $0x20] sm:$0xff] }
 0x4c2   : > { %v4206_v60 = vpop.f32.mrf.mxu2  ;;  %v4285_v57 = vpop.f32.mrf.mxu3 }
 0x4c3   : > { %v4622_v47 = vadd.f32 %v11507_v55, %v4543_v36  ;;  %v4286_v0 = vadd.f32 %v4285_v57, %v4197_v9  ;;  %v4207_v8 = vadd.f32 %v14125_v50, %v4206_v60 }
 0x4c5   : > { %4654 = vst.msk [vmem:[#allocation4] sm:$0xff] %vm444_vm12, %v4622_v47  ;;  %v4375_v4 = vadd.f32 %v4374_v16, %v4286_v0  ;;  %v4387_v23 = vpop.f32.mrf.mxu0 }
 0x4c7   : > { %v4432_v15 = vmax.f32 %v4375_v4, 0.0 }
 0x4c8   : > { %v4544_v63 = vpop.f32.mrf.mxu1 }
 0x4c9   : > { %v4456_v24 = vpack.c.bf16 %v4432_v15, %v4431_v10  ;;  %v4545_v31 = vadd.f32 %v14415_v46, %v4544_v63  ;;  %v11512_v63 = vld [vmem:[#allocation4 + $0x28] sm:$0xff] }
 0x4ca   : > { %v4209_v62 = vpop.f32.mrf.mxu2  ;;  %v4288_v14 = vpop.f32.mrf.mxu3 }
 0x4cb   : > { %v4623_v19 = vadd.f32 %v11508_v61, %v4545_v31  ;;  %9085 = vmatmul.msk.bf16.gmra.mxu1 %vm444_vm12, %v4456_v24  ;;  %v4289_v43 = vadd.f32 %v4288_v14, %v4200_v54  ;;  %v4210_v57 = vadd.f32 %v14125_v50, %v4209_v62 }
 0x4cc   : > { %v4686_v1 = vld [vmem:[#allocation4] sm:$0xff] }
 0x4cd   : > { %4655 = vst.msk [vmem:[#allocation4 + $0x8] sm:$0xff] %vm444_vm12, %v4623_v19  ;;  %v4378_v33 = vadd.f32 %v4377_v6, %v4289_v43  ;;  %v4389_v21 = vpop.f32.mrf.mxu0 }
 0x4cf   : > { %v4433_v35 = vmax.f32 %v4378_v33, 0.0 }
 0x4d2   : > { %v4290_v29 = vpop.f32.mrf.mxu3  ;;  %v4211_v39 = vpop.f32.mrf.mxu2 }
 0x4d3   : > { %v4291_v59 = vadd.f32 %v4290_v29, %v4202_v52  ;;  %v4212_v47 = vadd.f32 %v14125_v50, %v4211_v39 }
 0x4d4   : > { %v4687_v16 = vld [vmem:[#allocation4 + $0x8] sm:$0xff] }
 0x4d5   : > { %v4380_v53 = vadd.f32 %v4379_v34, %v4291_v59  ;;  %v4718_v11 = vpack.c.bf16 %v4687_v16, %v4686_v1  ;;  %v4392_v14 = vpop.f32.mrf.mxu0  ;;  %v11513_v1 = vld [vmem:[#allocation4 + $0x30] sm:$0xff] }
 0x4d7   : > { %v4434_v26 = vmax.f32 %v4380_v53, 0.0  ;;  %9102 = vmatmul.msk.bf16.vlgmr.msrb.gmra.mxu2 %vm444_vm12, %v4718_v11 }
 0x4d8   : > { %v4547_v17 = vpop.f32.mrf.mxu1 }
 0x4d9   : > { %v4457_v25 = vpack.c.bf16 %v4434_v26, %v4433_v35  ;;  %v4548_v49 = vadd.f32 %v14415_v46, %v4547_v17 }
 0x4da   : > { %v4293_v41 = vpop.f32.mrf.mxu3  ;;  %v4214_v2 = vpop.f32.mrf.mxu2 }
 0x4db   : > { %v4624_v45 = vadd.f32 %v11509_v27, %v4548_v49  ;;  %9086 = vmatmul.msk.bf16.gmra.mxu1 %vm444_vm12, %v4457_v25  ;;  %v4294_v12 = vadd.f32 %v4293_v41, %v4205_v58  ;;  %v4215_v59 = vadd.f32 %v14125_v50, %v4214_v2 }
 0x4dd   : > { %4656 = vst.msk [vmem:[#allocation4 + $0x10] sm:$0xff] %vm444_vm12, %v4624_v45  ;;  %v4383_v20 = vadd.f32 %v4382_v18, %v4294_v12  ;;  %v4394_v11 = vpop.f32.mrf.mxu0  ;;  %v11514_v45 = vld [vmem:[#allocation4 + $0x38] sm:$0xff] }
 0x4df   : > { %v4435_v42 = vmax.f32 %v4383_v20, 0.0  ;;  %v11515_v20 = vld [vmem:[#allocation4 + $0x40] sm:$0xff] }
 0x4e0   : > { %v4549_v13 = vpop.f32.mrf.mxu1 }
 0x4e1   : > { %v4550_v7 = vadd.f32 %v14415_v46, %v4549_v13 }
 0x4e2   : > { %v4295_v22 = vpop.f32.mrf.mxu3  ;;  %v4216_v40 = vpop.f32.mrf.mxu2 }
 0x4e3   : > { %v4625_v56 = vadd.f32 %v11510_v30, %v4550_v7  ;;  %v4296_v51 = vadd.f32 %v4295_v22, %v4207_v8  ;;  %v4217_v35 = vadd.f32 %v14125_v50, %v4216_v40  ;;  %v9355_v40 = vld [vmem:[%s16468_s5 + $0x38] sm:$0xff] }
 0x4e4   : > { %v4688_v36 = vld [vmem:[#allocation4 + $0x10] sm:$0xff]  ;;  %6447 = vmatpush.bf16.msra.mxu3 %v9355_v40 }
 0x4e5   : > { %4657 = vst.msk [vmem:[#allocation4 + $0x18] sm:$0xff] %vm444_vm12, %v4625_v56  ;;  %v4385_v6 = vadd.f32 %v4384_v3, %v4296_v51 }
 0x4e7   : > { %v4436_v5 = vmax.f32 %v4385_v6, 0.0 }
 0x4e8   : > { %v4552_v44 = vpop.f32.mrf.mxu1 }
 0x4e9   : > { %v4458_v48 = vpack.c.bf16 %v4436_v5, %v4435_v42  ;;  %v4553_v37 = vadd.f32 %v14415_v46, %v4552_v44 }
 0x4ea   : > { %v4298_v38 = vpop.f32.mrf.mxu3  ;;  %v4219_v0 = vpop.f32.mrf.mxu2 }
 0x4eb   : > { %v4626_v9 = vadd.f32 %v11511_v32, %v4553_v37  ;;  %9087 = vmatmul.msk.bf16.gmra.mxu1 %vm444_vm12, %v4458_v48  ;;  %v4299_v28 = vadd.f32 %v4298_v38, %v4210_v57  ;;  %v4220_v38 = vadd.f32 %v14125_v50, %v4219_v0  ;;  %v9365_v0 = vld [vmem:[%s16468_s5 + $0x88] sm:$0xff] }
 0x4ec   : > { %v4689_v60 = vld [vmem:[#allocation4 + $0x18] sm:$0xff]  ;;  %6631 = vmatpush.bf16.msra.mxu1 %v9365_v0  ;;  %v5177_v0 = vld [vmem:[#allocation3 + $0x198] sm:$0xff] }
 0x4ed   : > { %4658 = vst.msk [vmem:[#allocation4 + $0x20] sm:$0xff] %vm444_vm12, %v4626_v9  ;;  %v4719_v34 = vpack.c.bf16 %v4689_v60, %v4688_v36  ;;  %v4388_v15 = vadd.f32 %v4387_v23, %v4299_v28  ;;  %v4397_v23 = vpop.f32.mrf.mxu0 }
 0x4ef   : > { %9103 = vmatmul.msk.bf16.gmra.mxu2 %vm444_vm12, %v4719_v34  ;;  %v4437_v61 = vmax.f32 %v4388_v15, 0.0 }
 0x4f0   : > { %v4554_v55 = vpop.f32.mrf.mxu1 }
 0x4f1   : > { %v4555_v4 = vadd.f32 %v14415_v46, %v4554_v55 }
 0x4f2   : > { %v4300_v10 = vpop.f32.mrf.mxu3  ;;  %v4221_v52 = vpop.f32.mrf.mxu2 }
 0x4f3   : > { %v4627_v24 = vadd.f32 %v11512_v63, %v4555_v4  ;;  %v4301_v31 = vadd.f32 %v4300_v10, %v4212_v47  ;;  %v4222_v36 = vadd.f32 %v14125_v50, %v4221_v52 }
 0x4f4   : > { %v4690_v33 = vld [vmem:[#allocation4 + $0x20] sm:$0xff] }
 0x4f5   : > { %4659 = vst.msk [vmem:[#allocation4 + $0x28] sm:$0xff] %vm444_vm12, %v4627_v24  ;;  %v4390_v62 = vadd.f32 %v4389_v21, %v4301_v31  ;;  %v4399_v48 = vpop.f32.mrf.mxu0  ;;  %v11516_v21 = vld [vmem:[#allocation4 + $0x48] sm:$0xff] }
 0x4f7   : > { %v4438_v19 = vmax.f32 %v4390_v62, 0.0  ;;  %v14471_v62 = vld [vmem:[%s16469_s6] ss:$0 sm:$0xff] }
 0x4f9   : > { %v4459_v18 = vpack.c.bf16 %v4438_v19, %v4437_v61  ;;  %v4557_v54 = vpop.f32.mrf.mxu1 }
 0x4fa   : > { %v4303_v43 = vpop.f32.mrf.mxu3  ;;  %v4558_v29 = vadd.f32 %v14415_v46, %v4557_v54  ;;  %v4224_v27 = vpop.f32.mrf.mxu2 }
 0x4fb   : > { %9088 = vmatmul.msk.bf16.gmra.mxu1 %vm444_vm12, %v4459_v18  ;;  %v4304_v3 = vadd.f32 %v4303_v43, %v4215_v59  ;;  %v4225_v61 = vadd.f32 %v14471_v62, %v4224_v27  ;;  %v9363_v18 = vld [vmem:[%s16468_s5 + $0x78] sm:$0xff] }
 0x4fc   : > { %v4691_v39 = vld [vmem:[#allocation4 + $0x28] sm:$0xff]  ;;  %v4628_v16 = vadd.f32 %v11513_v1, %v4558_v29  ;;  %6536 = vmatpush.bf16.msra.mxu0 %v9363_v18  ;;  %v11518_v1 = vld [vmem:[#allocation4 + $0x50] sm:$0xff] }
 0x4fd   : > { %v4720_v53 = vpack.c.bf16 %v4691_v39, %v4690_v33  ;;  %v4393_v25 = vadd.f32 %v4392_v14, %v4304_v3  ;;  %v4402_v47 = vpop.f32.mrf.mxu0  ;;  %v5178_v18 = vld [vmem:[#allocation3 + $0x1a0] sm:$0xff] }
 0x4fe   : > { %4660 = vst.msk [vmem:[#allocation4 + $0x30] sm:$0xff] %vm444_vm12, %v4628_v16 }
 0x4ff   : > { %9104 = vmatmul.msk.bf16.gmra.mxu2 %vm444_vm12, %v4720_v53  ;;  %v4439_v12 = vmax.f32 %v4393_v25, 0.0  ;;  %v9354_v25 = vld [vmem:[%s16468_s5 + $0x30] sm:$0xff] }
 0x500   : > { %6448 = vmatpush.bf16.msra.mxu3 %v9354_v25 }
 0x501   : > { %v4559_v26 = vpop.f32.mrf.mxu1 }
 0x502   : > { %v4305_v17 = vpop.f32.mrf.mxu3  ;;  %v4560_v49 = vadd.f32 %v14415_v46, %v4559_v26  ;;  %v4226_v6 = vpop.f32.mrf.mxu2 }
 0x503   : > { %v4306_v41 = vadd.f32 %v4305_v17, %v4217_v35  ;;  %v4227_v43 = vadd.f32 %v14471_v62, %v4226_v6 }
 0x504   : > { %v4629_v58 = vadd.f32 %v11514_v45, %v4560_v49  ;;  %v11519_v45 = vld [vmem:[#allocation4 + $0x58] sm:$0xff] }
 0x505   : > { %v4395_v2 = vadd.f32 %v4394_v11, %v4306_v41  ;;  %v4692_v56 = vld [vmem:[#allocation4 + $0x30] sm:$0xff]  ;;  %v4404_v54 = vpop.f32.mrf.mxu0 }
 0x506   : > { %4661 = vst.msk [vmem:[#allocation4 + $0x38] sm:$0xff] %vm444_vm12, %v4629_v58 }
 0x507   : > { %v4440_v13 = vmax.f32 %v4395_v2, 0.0 }
 0x509   : > { %v4460_v8 = vpack.c.bf16 %v4440_v13, %v4439_v12  ;;  %v4562_v7 = vpop.f32.mrf.mxu1 }
 0x50a   : > { %v4563_v22 = vadd.f32 %v14415_v46, %v4562_v7  ;;  %v4229_v60 = vpop.f32.mrf.mxu2 }
 0x50b   : > { %9089 = vmatmul.msk.bf16.gmra.mxu1 %vm444_vm12, %v4460_v8  ;;  %v4230_v2 = vadd.f32 %v14471_v62, %v4229_v60 }
 0x50c   : > { %v4630_v30 = vadd.f32 %v11515_v20, %v4563_v22 }
 0x50d   : > { %v4693_v51 = vld [vmem:[#allocation4 + $0x38] sm:$0xff]  ;;  %v4407_v49 = vpop.f32.mrf.mxu0 }
 0x50e   : > { %4662 = vst.msk [vmem:[#allocation4 + $0x40] sm:$0xff] %vm444_vm12, %v4630_v30  ;;  %v4721_v42 = vpack.c.bf16 %v4693_v51, %v4692_v56  ;;  %v11520_v51 = vld [vmem:[#allocation4 + $0x60] sm:$0xff] }
 0x510   : > { %9105 = vmatmul.msk.bf16.gmra.mxu2 %vm444_vm12, %v4721_v42 }
 0x511   : > { %v4308_v5 = vpop.f32.mrf.mxu3  ;;  %v4564_v44 = vpop.f32.mrf.mxu1 }
 0x512   : > { %v4565_v37 = vadd.f32 %v14415_v46, %v4564_v44  ;;  %v4309_v9 = vadd.f32 %v4308_v5, %v4220_v38  ;;  %v4231_v50 = vpop.f32.mrf.mxu2 }
 0x514   : > { %v4631_v32 = vadd.f32 %v11516_v21, %v4565_v37  ;;  %v4398_v34 = vadd.f32 %v4397_v23, %v4309_v9  ;;  %v4232_v23 = vadd.f32 %v14471_v62, %v4231_v50  ;;  %v4987_v9 = vld [vmem:[#allocation3 + $0x1] sm:$0xff] }
 0x515   : > { %v4694_v15 = vld [vmem:[#allocation4 + $0x40] sm:$0xff]  ;;  %v4409_v56 = vpop.f32.mrf.mxu0 }
 0x516   : > { %4663 = vst.msk [vmem:[#allocation4 + $0x48] sm:$0xff] %vm444_vm12, %v4631_v32  ;;  %v4441_v4 = vmax.f32 %v4398_v34, 0.0 }
 0x519   : > { %v4310_v57 = vpop.f32.mrf.mxu3 }
 0x51a   : > { %v4311_v28 = vadd.f32 %v4310_v57, %v4222_v36  ;;  %v4234_v11 = vpop.f32.mrf.mxu2  ;;  %v4988_v36 = vld [vmem:[#allocation3 + $0x9] sm:$0xff] }
 0x51b   : > { %v10533_v34 = vpack.i.bf16 %v4988_v36, %v4987_v9 }
 0x51c   : > { %v4400_v55 = vadd.f32 %v4399_v48, %v4311_v28  ;;  %v11521_v28 = vld [vmem:[#allocation4 + $0x68] sm:$0xff] }
 0x51d   : > { %v4695_v63 = vld [vmem:[#allocation4 + $0x48] sm:$0xff]  ;;  %10534 = vrot.lane.b32.xlu2 %v10533_v34, %s11597_s28 }
 0x51e   : > { %v4442_v10 = vmax.f32 %v4400_v55, 0.0  ;;  %v4722_v24 = vpack.c.bf16 %v4695_v63, %v4694_v15 }
 0x520   : > { %v4461_v31 = vpack.c.bf16 %v4442_v10, %v4441_v4  ;;  %9106 = vmatmul.msk.bf16.gmra.mxu2 %vm444_vm12, %v4722_v24  ;;  %v9362_v10 = vld [vmem:[%s16468_s5 + $0x70] sm:$0xff] }
 0x521   : > { %v4313_v14 = vpop.f32.mrf.mxu3  ;;  %v5019_v24 = vld [vmem:[#allocation3 + $0x2] sm:$0xff]  ;;  %6537 = vmatpush.bf16.msra.mxu0 %v9362_v10 }
 0x522   : > { %9090 = vmatmul.msk.bf16.gmra.mxu1 %vm444_vm12, %v4461_v31  ;;  %v4314_v19 = vadd.f32 %v4313_v14, %v4225_v61  ;;  %v4236_v13 = vpop.f32.mrf.mxu2  ;;  %v5020_v31 = vld [vmem:[#allocation3 + $0xa] sm:$0xff] }
 0x523   : > { %v4237_v15 = vadd.f32 %v14471_v62, %v4236_v13 }
 0x524   : > { %v4403_v39 = vadd.f32 %v4402_v47, %v4314_v19  ;;  %v4235_v47 = vadd.f32 %v14471_v62, %v4234_v11  ;;  %v10538_v19 = vpack.i.bf16 %v5020_v31, %v5019_v24 }
 0x526   : > { %v4443_v3 = vmax.f32 %v4403_v39, 0.0  ;;  %10539 = vrot.lane.b32.xlu0 %v10538_v19, %s11596_s27 }
 0x528   : > { %v4567_v52 = vpop.f32.mrf.mxu1 }
 0x529   : > { %v4315_v29 = vpop.f32.mrf.mxu3  ;;  %v4568_v33 = vadd.f32 %v14415_v46, %v4567_v52  ;;  %v10543_v52 = vpack.i.bf16 %v5178_v18, %v5177_v0 }
 0x52a   : > { %v4316_v59 = vadd.f32 %v4315_v29, %v4227_v43  ;;  %v4412_v38 = vpop.f32.mrf.mxu2  ;;  %v11522_v29 = vld [vmem:[#allocation4 + $0x70] sm:$0xff] }
 0x52b   : > { %v4632_v16 = vadd.f32 %v11518_v1, %v4568_v33  ;;  %10544 = vrot.lane.b32.xlu2 %v10543_v52, %s11596_s27 }
 0x52c   : > { %v4405_v53 = vadd.f32 %v4404_v54, %v4316_v59 }
 0x52d   : > { %4664 = vst.msk [vmem:[#allocation4 + $0x50] sm:$0xff] %vm444_vm12, %v4632_v16  ;;  %v9353_v16 = vld [vmem:[%s16468_s5 + $0x28] sm:$0xff] }
 0x52e   : > { %v4444_v35 = vmax.f32 %v4405_v53, 0.0  ;;  %6449 = vmatpush.bf16.msra.mxu3 %v9353_v16 }
 0x530   : > { %v4462_v26 = vpack.c.bf16 %v4444_v35, %v4443_v3  ;;  %v4569_v17 = vpop.f32.mrf.mxu1 }
 0x531   : > { %v4318_v41 = vpop.f32.mrf.mxu3  ;;  %v4570_v27 = vadd.f32 %v14415_v46, %v4569_v17  ;;  %v11523_v17 = vld [vmem:[#allocation4 + $0x78] sm:$0xff] }
 0x532   : > { %9091 = vmatmul.msk.bf16.gmra.mxu1 %vm444_vm12, %v4462_v26  ;;  %v4319_v12 = vadd.f32 %v4318_v41, %v4230_v2  ;;  %v4414_v61 = vpop.f32.mrf.mxu2 }
 0x533   : > { %v4633_v58 = vadd.f32 %v11519_v45, %v4570_v27 }
 0x534   : > { %v4408_v20 = vadd.f32 %v4407_v49, %v4319_v12  ;;  %v4696_v40 = vld [vmem:[#allocation4 + $0x50] sm:$0xff]  ;;  %v14514_v49 = vld [vmem:[%s16467_s4] ss:$0 sm:$0xff] }
 0x535   : > { %4665 = vst.msk [vmem:[#allocation4 + $0x58] sm:$0xff] %vm444_vm12, %v4633_v58  ;;  %v11524_v58 = vld [vmem:[#allocation4 + $0x80] sm:$0xff] }
 0x536   : > { %v4445_v48 = vmax.f32 %v4408_v20, 0.0 }
 0x538   : > { %v4572_v8 = vpop.f32.mrf.mxu1 }
 0x539   : > { %v4320_v7 = vpop.f32.mrf.mxu3  ;;  %v4573_v22 = vadd.f32 %v14415_v46, %v4572_v8 }
 0x53a   : > { %v4321_v30 = vadd.f32 %v4320_v7, %v4232_v23 }
 0x53b   : > { %v4634_v6 = vadd.f32 %v11520_v51, %v4573_v22 }
 0x53c   : > { %v4410_v42 = vadd.f32 %v4409_v56, %v4321_v30  ;;  %v4697_v5 = vld [vmem:[#allocation4 + $0x58] sm:$0xff]  ;;  %v11525_v56 = vld [vmem:[#allocation4 + $0x88] sm:$0xff] }
 0x53d   : > { %4666 = vst.msk [vmem:[#allocation4 + $0x60] sm:$0xff] %vm444_vm12, %v4634_v6  ;;  %v4723_v44 = vpack.c.bf16 %v4697_v5, %v4696_v40  ;;  %v9364_v40 = vld [vmem:[%s16468_s5 + $0x80] sm:$0xff]  ;;  %v9361_v5 = vld [vmem:[%s16468_s5 + $0x68] sm:$0xff] }
 0x53e   : > { %v4446_v37 = vmax.f32 %v4410_v42, 0.0  ;;  %6632 = vmatpush.bf16.msra.mxu1 %v9364_v40  ;;  %6538 = vmatpush.bf16.msra.mxu0 %v9361_v5 }
 0x53f   : > { %9107 = vmatmul.msk.bf16.gmra.mxu2 %vm444_vm12, %v4723_v44 }
 0x540   : > { %v4463_v21 = vpack.c.bf16 %v4446_v37, %v4445_v48  ;;  %v4574_v32 = vpop.f32.mrf.mxu1  ;;  %v11526_v37 = vld [vmem:[#allocation4 + $0x90] sm:$0xff] }
 0x541   : > { %v4323_v60 = vpop.f32.mrf.mxu3  ;;  %v4575_v57 = vadd.f32 %v14415_v46, %v4574_v32 }
 0x542   : > { %9092 = vmatmul.msk.bf16.gmra.mxu1 %vm444_vm12, %v4463_v21  ;;  %v4324_v4 = vadd.f32 %v4323_v60, %v4235_v47  ;;  %v9352_v47 = vld [vmem:[%s16468_s5 + $0x20] sm:$0xff] }
 0x543   : > { %v4635_v55 = vadd.f32 %v11521_v28, %v4575_v57  ;;  %6450 = vmatpush.bf16.msra.mxu3 %v9352_v47 }
 0x544   : > { %v4413_v54 = vadd.f32 %v4412_v38, %v4324_v4  ;;  %v4698_v62 = vld [vmem:[#allocation4 + $0x60] sm:$0xff] }
 0x545   : > { %4667 = vst.msk [vmem:[#allocation4 + $0x68] sm:$0xff] %vm444_vm12, %v4635_v55 }
 0x546   : > { %v4447_v53 = vmax.f32 %v4413_v54, 0.0 }
 0x548   : > { %v4577_v63 = vpop.f32.mrf.mxu1 }
 0x549   : > { %v4325_v14 = vpop.f32.mrf.mxu3  ;;  %v4578_v50 = vadd.f32 %v14415_v46, %v4577_v63  ;;  %v11527_v63 = vld [vmem:[#allocation4 + $0x98] sm:$0xff] }
 0x54a   : > { %v4326_v43 = vadd.f32 %v4325_v14, %v4237_v15 }
 0x54b   : > { %v4636_v33 = vadd.f32 %v11522_v29, %v4578_v50 }
 0x54c   : > { %v4415_v39 = vadd.f32 %v4414_v61, %v4326_v43  ;;  %v4699_v59 = vld [vmem:[#allocation4 + $0x68] sm:$0xff]  ;;  %v11528_v43 = vld [vmem:[#allocation4 + $0xa0] sm:$0xff] }
 0x54d   : > { %4668 = vst.msk [vmem:[#allocation4 + $0x70] sm:$0xff] %vm444_vm12, %v4636_v33  ;;  %v4724_v1 = vpack.c.bf16 %v4699_v59, %v4698_v62 }
 0x54e   : > { %v4448_v11 = vmax.f32 %v4415_v39, 0.0 }
 0x54f   : > { %9108 = vmatmul.msk.bf16.gmra.mxu2 %vm444_vm12, %v4724_v1 }
 0x550   : > { %v4464_v3 = vpack.c.bf16 %v4448_v11, %v4447_v53  ;;  %v4579_v35 = vpop.f32.mrf.mxu1  ;;  %v11529_v11 = vld [vmem:[#allocation4 + $0xa8] sm:$0xff] }
 0x551   : > { %v4580_v26 = vadd.f32 %v14415_v46, %v4579_v35 }
 0x552   : > { %9093 = vmatmul.msk.bf16.gmra.mxu1 %vm444_vm12, %v4464_v3 }
 0x553   : > { %v4637_v25 = vadd.f32 %v11523_v17, %v4580_v26  ;;  %v9360_v26 = vld [vmem:[%s16468_s5 + $0x60] sm:$0xff] }
 0x554   : > { %v4700_v13 = vld [vmem:[#allocation4 + $0x70] sm:$0xff]  ;;  %6539 = vmatpush.bf16.msra.mxu0 %v9360_v26 }
 0x555   : > { %4669 = vst.msk [vmem:[#allocation4 + $0x78] sm:$0xff] %vm444_vm12, %v4637_v25 }
 0x558   : > { %v4582_v41 = vpop.f32.mrf.mxu1 }
 0x559   : > { %v4583_v27 = vadd.f32 %v14415_v46, %v4582_v41 }
 0x55a   : > { %v4811_v45 = vpop.f32.mrf.mxu2 }
 0x55b   : > { %v4638_v2 = vadd.f32 %v11524_v58, %v4583_v27  ;;  %v4812_v12 = vadd.f32 %v14514_v49, %v4811_v45 }
 0x55c   : > { %v4701_v23 = vld [vmem:[#allocation4 + $0x78] sm:$0xff] }
 0x55d   : > { %4670 = vst.msk [vmem:[#allocation4 + $0x80] sm:$0xff] %vm444_vm12, %v4638_v2  ;;  %v4891_v8 = vmax.f32 %v4812_v12, 0.0  ;;  %v4725_v7 = vpack.c.bf16 %v4701_v23, %v4700_v13 }
 0x55f   : > { %4923 = vst.msk [vmem:[#allocation3 + $0x19] sm:$0xff] %vm444_vm12, %v4891_v8  ;;  %9109 = vmatmul.msk.bf16.gmra.mxu2 %vm444_vm12, %v4725_v7  ;;  %v11530_v7 = vld [vmem:[#allocation4 + $0xb0] sm:$0xff] }
 0x560   : > { %v4584_v22 = vpop.f32.mrf.mxu1 }
 0x561   : > { %v4585_v20 = vadd.f32 %v14415_v46, %v4584_v22 }
 0x562   : > { %v4813_v30 = vpop.f32.mrf.mxu2 }
 0x563   : > { %v4639_v51 = vadd.f32 %v11525_v56, %v4585_v20  ;;  %v4814_v6 = vadd.f32 %v14514_v49, %v4813_v30 }
 0x564   : > { %v4702_v21 = vld [vmem:[#allocation4 + $0x80] sm:$0xff] }
 0x565   : > { %4671 = vst.msk [vmem:[#allocation4 + $0x88] sm:$0xff] %vm444_vm12, %v4639_v51  ;;  %v4892_v42 = vmax.f32 %v4814_v6, 0.0 }
 0x566   : > { %v14533_v36 = vld [vmem:[#allocation3 + $0x19] sm:$0xff] }
 0x567   : > { %4924 = vst.msk [vmem:[#allocation3 + $0x21] sm:$0xff] %vm444_vm12, %v4892_v42  ;;  %v14551_v50 = vld [vmem:[#allocation3 + $0x18] sm:$0xff] }
 0x568   : > { %v4587_v44 = vpop.f32.mrf.mxu1 }
 0x569   : > { %v4588_v48 = vadd.f32 %v14415_v46, %v4587_v44 }
 0x56b   : > { %v4640_v38 = vadd.f32 %v11526_v37, %v4588_v48  ;;  %v11531_v37 = vld [vmem:[#allocation4 + $0xb8] sm:$0xff] }
 0x56c   : > { %v4703_v32 = vld [vmem:[#allocation4 + $0x88] sm:$0xff] }
 0x56d   : > { %4672 = vst.msk [vmem:[#allocation4 + $0x90] sm:$0xff] %vm444_vm12, %v4640_v38  ;;  %v4726_v9 = vpack.c.bf16 %v4703_v32, %v4702_v21  ;;  %v9351_v32 = vld [vmem:[%s16468_s5 + $0x18] sm:$0xff] }
 0x56e   : > { %v5115_v60 = vld [vmem:[#allocation3 + $0x1a] sm:$0xff]  ;;  %v5116_v57 = vld [vmem:[#allocation3 + $0x22] sm:$0xff]  ;;  %6451 = vmatpush.bf16.msra.mxu3 %v9351_v32 }
 0x56f   : > { %v14535_v34 = vld [vmem:[#allocation3 + $0x21] sm:$0xff]  ;;  %9110 = vmatmul.msk.bf16.gmra.mxu2 %vm444_vm12, %v4726_v9  ;;  %v10563_v28 = vpack.i.bf16 %v5116_v57, %v5115_v60 }
 0x570   : > { %v10548_v55 = vpack.i.bf16 %v14535_v34, %v14533_v36  ;;  %v4589_v4 = vpop.f32.mrf.mxu1  ;;  %v14548_v0 = vld [vmem:[#allocation3 + $0x20] sm:$0xff] }
 0x571   : > { %v4590_v10 = vadd.f32 %v14415_v46, %v4589_v4  ;;  %10564 = vrot.lane.b32.xlu2 %v10563_v28, %s11597_s28  ;;  %10554 = vrot.lane.b32.xlu1 %v10563_v28, %s11596_s27  ;;  %v10558_v61 = vpack.i.bf16 %v14548_v0, %v14551_v50 }
 0x572   : > { %10549 = vrot.lane.b32.xlu0 %v10548_v55, %s11597_s28  ;;  %v4816_v15 = vpop.f32.mrf.mxu2 }
 0x573   : > { %v4641_v24 = vadd.f32 %v11527_v63, %v4590_v10  ;;  %v4817_v31 = vadd.f32 %v14514_v49, %v4816_v15 }
 0x574   : > { %v4704_v33 = vld [vmem:[#allocation4 + $0x90] sm:$0xff] }
 0x575   : > { %4673 = vst.msk [vmem:[#allocation4 + $0x98] sm:$0xff] %vm444_vm12, %v4641_v24  ;;  %v4893_v14 = vmax.f32 %v4817_v31, 0.0 }
 0x577   : > { %4925 = vst.msk [vmem:[#allocation3 + $0x31] sm:$0xff] %vm444_vm12, %v4893_v14 }
 0x578   : > { %v4592_v19 = vpop.f32.mrf.mxu1 }
 0x579   : > { %v4593_v18 = vadd.f32 %v14415_v46, %v4592_v19  ;;  %10559 = vrot.lane.b32.xlu1 %v10558_v61, %s11598_s16 }
 0x57a   : > { %v4818_v54 = vpop.f32.mrf.mxu2 }
 0x57b   : > { %v4642_v52 = vadd.f32 %v11528_v43, %v4593_v18  ;;  %v4819_v29 = vadd.f32 %v14514_v49, %v4818_v54 }
 0x57c   : > { %v4705_v39 = vld [vmem:[#allocation4 + $0x98] sm:$0xff] }
 0x57d   : > { %4674 = vst.msk [vmem:[#allocation4 + $0xa0] sm:$0xff] %vm444_vm12, %v4642_v52  ;;  %v4894_v62 = vmax.f32 %v4819_v29, 0.0  ;;  %v4727_v59 = vpack.c.bf16 %v4705_v39, %v4704_v33  ;;  %v11532_v33 = vld [vmem:[#allocation4 + $0xc0] sm:$0xff] }
 0x57e   : > { %v14568_v25 = vld [vmem:[#allocation3 + $0x31] sm:$0xff] }
 0x57f   : > { %4926 = vst.msk [vmem:[#allocation3 + $0x39] sm:$0xff] %vm444_vm12, %v4894_v62  ;;  %9111 = vmatmul.msk.bf16.gmra.mxu2 %vm444_vm12, %v4727_v59  ;;  %v14584_v40 = vld [vmem:[#allocation3 + $0x30] sm:$0xff]  ;;  %v9359_v59 = vld [vmem:[%s16468_s5 + $0x58] sm:$0xff] }
 0x580   : > { %v4594_v1 = vpop.f32.mrf.mxu1  ;;  %6540 = vmatpush.bf16.msra.mxu0 %v9359_v59 }
 0x581   : > { %v4595_v16 = vadd.f32 %v14415_v46, %v4594_v1 }
 0x582   : > { %v4821_v53 = vpop.f32.mrf.mxu2 }
 0x583   : > { %v4643_v3 = vadd.f32 %v11529_v11, %v4595_v16  ;;  %v4822_v35 = vadd.f32 %v14514_v49, %v4821_v53  ;;  %v9367_v11 = vld [vmem:[%s16470_s7 + $0x8] sm:$0xff] }
 0x584   : > { %v4706_v30 = vld [vmem:[#allocation4 + $0xa0] sm:$0xff]  ;;  %6836 = vmatpush.bf16.msra.mxu2 %v9367_v11 }
 0x585   : > { %4675 = vst.msk [vmem:[#allocation4 + $0xa8] sm:$0xff] %vm444_vm12, %v4643_v3  ;;  %v4895_v17 = vmax.f32 %v4822_v35, 0.0 }
 0x586   : > { %v5023_v41 = vld [vmem:[#allocation3 + $0x32] sm:$0xff]  ;;  %v5024_v27 = vld [vmem:[#allocation3 + $0x3a] sm:$0xff] }
 0x587   : > { %v14570_v45 = vld [vmem:[#allocation3 + $0x39] sm:$0xff]  ;;  %4927 = vst.msk [vmem:[#allocation3 + $0x49] sm:$0xff] %vm444_vm12, %v4895_v17  ;;  %v10573_v58 = vpack.i.bf16 %v5024_v27, %v5023_v41  ;;  %v6205_v12 = vpack.c.bf16 %v5024_v27, %v5023_v41 }
 0x588   : > { %v10568_v2 = vpack.i.bf16 %v14570_v45, %v14568_v25  ;;  %v4597_v13 = vpop.f32.mrf.mxu1  ;;  %v14581_v51 = vld [vmem:[#allocation3 + $0x38] sm:$0xff] }
 0x589   : > { %v4598_v23 = vadd.f32 %v14415_v46, %v4597_v13  ;;  %10574 = vrot.lane.b32.xlu2 %v10573_v58, %s11596_s27  ;;  %10584 = vrot.lane.b32.xlu0 %v10573_v58, %s11597_s28  ;;  %v10578_v5 = vpack.i.bf16 %v14581_v51, %v14584_v40  ;;  %v11533_v27 = vld [vmem:[#allocation4 + $0xc8] sm:$0xff] }
 0x58a   : > { %10569 = vrot.lane.b32.xlu1 %v10568_v2, %s11597_s28  ;;  %9190 = vmatmul.msk.bf16.vlgmr.msra.gmra.mxu1 %vm444_vm12, %v6205_v12  ;;  %v4823_v8 = vpop.f32.mrf.mxu2 }
 0x58b   : > { %v4644_v22 = vadd.f32 %v11530_v7, %v4598_v23  ;;  %v4824_v20 = vadd.f32 %v14514_v49, %v4823_v8 }
 0x58c   : > { %v4707_v56 = vld [vmem:[#allocation4 + $0xa8] sm:$0xff] }
 0x58d   : > { %4676 = vst.msk [vmem:[#allocation4 + $0xb0] sm:$0xff] %vm444_vm12, %v4644_v22  ;;  %v4896_v6 = vmax.f32 %v4824_v20, 0.0  ;;  %v4728_v42 = vpack.c.bf16 %v4707_v56, %v4706_v30 }
 0x58e   : > { %v14608_v61 = vld [vmem:[#allocation3 + $0x49] sm:$0xff] }
 0x58f   : > { %4928 = vst.msk [vmem:[#allocation3 + $0x51] sm:$0xff] %vm444_vm12, %v4896_v6  ;;  %9112 = vmatmul.msk.bf16.gmra.mxu2 %vm444_vm12, %v4728_v42  ;;  %v14613_v43 = vld [vmem:[#allocation3 + $0x48] sm:$0xff]  ;;  %v11534_v42 = vld [vmem:[#allocation4 + $0xd0] sm:$0xff] }
 0x590   : > { %v4599_v44 = vpop.f32.mrf.mxu1 }
 0x591   : > { %v4600_v48 = vadd.f32 %v14415_v46, %v4599_v44  ;;  %10579 = vrot.lane.b32.xlu2 %v10578_v5, %s11598_s16 }
 0x592   : > { %10589 = vrot.lane.b32.xlu1 %v10578_v5, %s11596_s27 }
 0x593   : > { %v4645_v38 = vadd.f32 %v11531_v37, %v4600_v48  ;;  %v4826_v21 = vpop.f32.mrf.mxu2 }
 0x594   : > { %v4827_v9 = vadd.f32 %v14514_v49, %v4826_v21  ;;  %v4708_v10 = vld [vmem:[#allocation4 + $0xb0] sm:$0xff] }
 0x595   : > { %4677 = vst.msk [vmem:[#allocation4 + $0xb8] sm:$0xff] %vm444_vm12, %v4645_v38  ;;  %v9350_v38 = vld [vmem:[%s16468_s5 + $0x10] sm:$0xff] }
 0x596   : > { %v5213_v60 = vld [vmem:[#allocation3 + $0x4a] sm:$0xff]  ;;  %v5214_v57 = vld [vmem:[#allocation3 + $0x52] sm:$0xff]  ;;  %v4897_v28 = vmax.f32 %v4827_v9, 0.0  ;;  %6452 = vmatpush.bf16.msra.mxu3 %v9350_v38 }
 0x597   : > { %v6208_v55 = vpack.c.bf16 %v5214_v57, %v5213_v60  ;;  %v10613_v47 = vpack.i.bf16 %v5214_v57, %v5213_v60  ;;  %v14603_v63 = vld [vmem:[#allocation3 + $0x51] sm:$0xff] }
 0x598   : > { %4929 = vst.msk [vmem:[#allocation3 + $0x61] sm:$0xff] %vm444_vm12, %v4897_v28  ;;  %v14606_v14 = vld [vmem:[#allocation3 + $0x50] sm:$0xff]  ;;  %v10623_v54 = vpack.i.bf16 %v14603_v63, %v14608_v61 }
 0x599   : > { %10594 = vrot.lane.b32.xlu2 %v10568_v2, %s11598_s16  ;;  %10604 = vrot.lane.b32.xlu0 %v10613_v47, %s11596_s27  ;;  %v10608_v29 = vpack.i.bf16 %v14606_v14, %v14613_v43 }
 0x59a   : > { %10614 = vrot.lane.b32.xlu1 %v10613_v47, %s11597_s28  ;;  %9191 = vmatmul.msk.bf16.gmra.mxu1 %vm444_vm12, %v6208_v55  ;;  %v11535_v55 = vld [vmem:[#allocation4 + $0xd8] sm:$0xff] }
 0x59b   : > { %v4828_v4 = vpop.f32.mrf.mxu2 }
 0x59c   : > { %v4709_v15 = vld [vmem:[#allocation4 + $0xb8] sm:$0xff]  ;;  %v4829_v24 = vadd.f32 %v14514_v49, %v4828_v4 }
 0x59d   : > { %v4729_v31 = vpack.c.bf16 %v4709_v15, %v4708_v10 }
 0x59e   : > { %v4898_v19 = vmax.f32 %v4829_v24, 0.0  ;;  %v9358_v24 = vld [vmem:[%s16468_s5 + $0x50] sm:$0xff] }
 0x59f   : > { %v4602_v18 = vpop.f32.mrf.mxu1  ;;  %9113 = vmatmul.msk.bf16.gmra.mxu2 %vm444_vm12, %v4729_v31  ;;  %v14642_v22 = vld [vmem:[#allocation3 + $0x61] sm:$0xff]  ;;  %6541 = vmatpush.bf16.msra.mxu0 %v9358_v24 }
 0x5a0   : > { %v4603_v52 = vadd.f32 %v14415_v46, %v4602_v18  ;;  %4930 = vst.msk [vmem:[#allocation3 + $0x69] sm:$0xff] %vm444_vm12, %v4898_v19  ;;  %v14647_v56 = vld [vmem:[#allocation3 + $0x60] sm:$0xff]  ;;  %v11539_v24 = vld [vmem:[#allocation4 + $0xf8] sm:$0xff] }
 0x5a1   : > { %10599 = vrot.lane.b32.xlu2 %v10623_v54, %s11597_s28  ;;  %10609 = vrot.lane.b32.xlu0 %v10608_v29, %s11598_s16 }
 0x5a2   : > { %10624 = vrot.lane.b32.xlu1 %v10623_v54, %s11598_s16  ;;  %v4646_v39 = vadd.f32 %v11532_v33, %v4603_v52  ;;  %v11536_v52 = vld [vmem:[#allocation4 + $0xe0] sm:$0xff] }
 0x5a3   : > { %v4831_v62 = vpop.f32.mrf.mxu2 }
 0x5a4   : > { %4678 = vst.msk [vmem:[#allocation4 + $0xc0] sm:$0xff] %vm444_vm12, %v4646_v39  ;;  %v4832_v1 = vadd.f32 %v14514_v49, %v4831_v62 }
 0x5a6   : > { %v4899_v16 = vmax.f32 %v4832_v1, 0.0 }
 0x5a7   : > { %v4604_v53 = vpop.f32.mrf.mxu1  ;;  %v5215_v35 = vld [vmem:[#allocation3 + $0x62] sm:$0xff]  ;;  %v5216_v26 = vld [vmem:[#allocation3 + $0x6a] sm:$0xff] }
 0x5a8   : > { %v4605_v3 = vadd.f32 %v14415_v46, %v4604_v53  ;;  %4931 = vst.msk [vmem:[#allocation3 + $0x79] sm:$0xff] %vm444_vm12, %v4899_v16  ;;  %v6211_v17 = vpack.c.bf16 %v5216_v26, %v5215_v35  ;;  %v10633_v41 = vpack.i.bf16 %v5216_v26, %v5215_v35  ;;  %v14638_v13 = vld [vmem:[#allocation3 + $0x69] sm:$0xff]  ;;  %v11537_v35 = vld [vmem:[#allocation4 + $0xe8] sm:$0xff] }
 0x5a9   : > { %10619 = vrot.lane.b32.xlu0 %v10608_v29, %s11596_s27  ;;  %v14640_v23 = vld [vmem:[#allocation3 + $0x68] sm:$0xff]  ;;  %v10628_v30 = vpack.i.bf16 %v14638_v13, %v14642_v22 }
 0x5aa   : > { %v4647_v58 = vadd.f32 %v11533_v27, %v4605_v3  ;;  %9192 = vmatmul.msk.bf16.gmra.mxu1 %vm444_vm12, %v6211_v17  ;;  %10634 = vrot.lane.b32.xlu1 %v10633_v41, %s11596_s27  ;;  %v10638_v6 = vpack.i.bf16 %v14640_v23, %v14647_v56 }
 0x5ab   : > { %10644 = vrot.lane.b32.xlu2 %v10633_v41, %s11597_s28  ;;  %v4833_v2 = vpop.f32.mrf.mxu2  ;;  %v4710_v44 = vld [vmem:[#allocation4 + $0xc0] sm:$0xff]  ;;  %v9349_v41 = vld [vmem:[%s16468_s5 + $0x8] sm:$0xff] }
 0x5ac   : > { %4679 = vst.msk [vmem:[#allocation4 + $0xc8] sm:$0xff] %vm444_vm12, %v4647_v58  ;;  %v4834_v12 = vadd.f32 %v14514_v49, %v4833_v2  ;;  %6453 = vmatpush.bf16.msra.mxu3 %v9349_v41  ;;  %v9348_v2 = vld [vmem:[%s16468_s5] sm:$0xff]  ;;  %v4956_v41 = vld [vmem:[#allocation3 + $0x8] sm:$0xff] }
 0x5ae   : > { %v4900_v8 = vmax.f32 %v4834_v12, 0.0  ;;  %v14699_v12 = vpop.permute.xlu2 %10534 }
 0x5af   : > { %v4607_v7 = vpop.f32.mrf.mxu1  ;;  %v14673_v19 = vld [vmem:[#allocation3 + $0x79] sm:$0xff] }
 0x5b0   : > { %v4608_v20 = vadd.f32 %v14415_v46, %v4607_v7  ;;  %4932 = vst.msk [vmem:[#allocation3 + $0x81] sm:$0xff] %vm444_vm12, %v4900_v8  ;;  %v14677_v54 = vld [vmem:[#allocation3 + $0x78] sm:$0xff]  ;;  %6454 = vmatpush.bf16.msra.mxu3 %v9348_v2  ;;  %v10540_v2 = vpop.permute.xlu0 %10539 }
 0x5b1   : > { %10629 = vrot.lane.b32.xlu0 %v10628_v30, %s11597_s28 }
 0x5b2   : > { %v4648_v5 = vadd.f32 %v11534_v42, %v4608_v20  ;;  %10639 = vrot.lane.b32.xlu1 %v10638_v6, %s11598_s16  ;;  %v11538_v20 = vld [vmem:[#allocation4 + $0xf0] sm:$0xff] }
 0x5b3   : > { %v4711_v48 = vld [vmem:[#allocation4 + $0xc8] sm:$0xff] }
 0x5b4   : > { %4680 = vst.msk [vmem:[#allocation4 + $0xd0] sm:$0xff] %vm444_vm12, %v4648_v5  ;;  %v4730_v37 = vpack.c.bf16 %v4711_v48, %v4710_v44 }
 0x5b6   : > { %9114 = vmatmul.msk.bf16.gmra.mxu2 %vm444_vm12, %v4730_v37 }
 0x5b7   : > { %v4609_v21 = vpop.f32.mrf.mxu1  ;;  %v5217_v9 = vld [vmem:[#allocation3 + $0x7a] sm:$0xff]  ;;  %v5218_v60 = vld [vmem:[#allocation3 + $0x82] sm:$0xff] }
 0x5b8   : > { %v4610_v32 = vadd.f32 %v14415_v46, %v4609_v21  ;;  %v6214_v57 = vpack.c.bf16 %v5218_v60, %v5217_v9  ;;  %v10663_v28 = vpack.i.bf16 %v5218_v60, %v5217_v9  ;;  %v14665_v4 = vld [vmem:[#allocation3 + $0x81] sm:$0xff] }
 0x5b9   : > { %10649 = vrot.lane.b32.xlu0 %v10638_v6, %s11596_s27  ;;  %v14667_v15 = vld [vmem:[#allocation3 + $0x80] sm:$0xff]  ;;  %v10658_v18 = vpack.i.bf16 %v14665_v4, %v14673_v19 }
 0x5ba   : > { %v4649_v47 = vadd.f32 %v11535_v55, %v4610_v32  ;;  %9193 = vmatmul.msk.bf16.gmra.mxu1 %vm444_vm12, %v6214_v57  ;;  %10654 = vrot.lane.b32.xlu1 %v10628_v30, %s11598_s16  ;;  %v10668_v39 = vpack.i.bf16 %v14667_v15, %v14677_v54 }
 0x5bb   : > { %10664 = vrot.lane.b32.xlu2 %v10663_v28, %s11596_s27  ;;  %v4712_v59 = vld [vmem:[#allocation4 + $0xd0] sm:$0xff] }
 0x5bc   : > { %4681 = vst.msk [vmem:[#allocation4 + $0xd8] sm:$0xff] %vm444_vm12, %v4649_v47 }
 0x5bf   : > { %v4612_v10 = vpop.f32.mrf.mxu1 }
 0x5c0   : > { %v4613_v31 = vadd.f32 %v14415_v46, %v4612_v10  ;;  %v14714_v10 = vpop.permute.xlu2 %10544 }
 0x5c1   : > { %10674 = vrot.lane.b32.xlu0 %v10663_v28, %s11597_s28  ;;  %16711 = vst [vmem:[#allocation10_spill] sm:$0xff] %v14714_v10 }
 0x5c2   : > { %v4650_v29 = vadd.f32 %v11536_v52, %v4613_v31  ;;  %v4836_v33 = vpop.f32.mrf.mxu2  ;;  %10659 = vrot.lane.b32.xlu1 %v10658_v18, %s11597_s28 }
 0x5c3   : > { %v4837_v62 = vadd.f32 %v14514_v49, %v4836_v33  ;;  %v4713_v1 = vld [vmem:[#allocation4 + $0xd8] sm:$0xff]  ;;  %10669 = vrot.lane.b32.xlu2 %v10668_v39, %s11598_s16 }
 0x5c4   : > { %4682 = vst.msk [vmem:[#allocation4 + $0xe0] sm:$0xff] %vm444_vm12, %v4650_v29  ;;  %v4731_v16 = vpack.c.bf16 %v4713_v1, %v4712_v59 }
 0x5c5   : > { %v4901_v53 = vmax.f32 %v4837_v62, 0.0 }
 0x5c6   : > { %9115 = vmatmul.msk.bf16.gmra.mxu2 %vm444_vm12, %v4731_v16 }
 0x5c7   : > { %4933 = vst.msk [vmem:[#allocation3 + $0x91] sm:$0xff] %vm444_vm12, %v4901_v53  ;;  %v4614_v11 = vpop.f32.mrf.mxu1 }
 0x5c8   : > { %v4615_v3 = vadd.f32 %v14415_v46, %v4614_v11 }
 0x5c9   : > { %10679 = vrot.lane.b32.xlu0 %v10668_v39, %s11596_s27  ;;  %v9357_v39 = vld [vmem:[%s16468_s5 + $0x48] sm:$0xff] }
 0x5ca   : > { %v4651_v26 = vadd.f32 %v11537_v35, %v4615_v3  ;;  %v4838_v17 = vpop.f32.mrf.mxu2  ;;  %10684 = vrot.lane.b32.xlu1 %v10658_v18, %s11598_s16  ;;  %6542 = vmatpush.bf16.msra.mxu0 %v9357_v39  ;;  %v10537_v3 = vunpack.i.h.bf16 %v14699_v12  ;;  %v10536_v35 = vunpack.i.l.bf16 %v14699_v12 }
 0x5cb   : > { %v4839_v27 = vadd.f32 %v14514_v49, %v4838_v17  ;;  %v4714_v5 = vld [vmem:[#allocation4 + $0xe0] sm:$0xff]  ;;  %v14734_v1 = vpop.permute.xlu2 %10564  ;;  %v4955_v17 = vld [vmem:[#allocation3] sm:$0xff] }
 0x5cc   : > { %4683 = vst.msk [vmem:[#allocation4 + $0xe8] sm:$0xff] %vm444_vm12, %v4651_v26  ;;  %v6012_v12 = vsel %vm444_vm12, %v4956_v41, %v10537_v3 }
 0x5cd   : > { %v4902_v58 = vmax.f32 %v4839_v27, 0.0 }
 0x5ce   : > { %v14705_v38 = vld [vmem:[#allocation3 + $0x91] sm:$0xff] }
 0x5cf   : > { %4934 = vst.msk [vmem:[#allocation3 + $0x99] sm:$0xff] %vm444_vm12, %v4902_v58  ;;  %v4617_v8 = vpop.f32.mrf.mxu1 }
 0x5d0   : > { %v4618_v7 = vadd.f32 %v14415_v46, %v4617_v8 }
 0x5d2   : > { %v4652_v30 = vadd.f32 %v11538_v20, %v4618_v7  ;;  %v4841_v6 = vpop.f32.mrf.mxu2  ;;  %v10542_v20 = vunpack.i.h.bf16 %v10540_v2 }
 0x5d3   : > { %v4842_v42 = vadd.f32 %v14514_v49, %v4841_v6  ;;  %v4715_v44 = vld [vmem:[#allocation4 + $0xe8] sm:$0xff] }
 0x5d4   : > { %4684 = vst.msk [vmem:[#allocation4 + $0xf0] sm:$0xff] %vm444_vm12, %v4652_v30  ;;  %v4732_v48 = vpack.c.bf16 %v4715_v44, %v4714_v5  ;;  %v10541_v30 = vunpack.i.l.bf16 %v10540_v2  ;;  %v6011_v5 = vsel %vm444_vm12, %v4955_v17, %v10536_v35 }
 0x5d5   : > { %v4903_v37 = vmax.f32 %v4842_v42, 0.0  ;;  %v9356_v42 = vld [vmem:[%s16468_s5 + $0x40] sm:$0xff] }
 0x5d6   : > { %9116 = vmatmul.msk.bf16.gmra.mxu2 %vm444_vm12, %v4732_v48  ;;  %v5219_v21 = vld [vmem:[#allocation3 + $0x92] sm:$0xff]  ;;  %v5220_v32 = vld [vmem:[#allocation3 + $0x9a] sm:$0xff]  ;;  %6543 = vmatpush.bf16.msra.mxu0 %v9356_v42 }
 0x5d7   : > { %v14708_v9 = vld [vmem:[#allocation3 + $0x99] sm:$0xff]  ;;  %4935 = vst.msk [vmem:[#allocation3 + $0xa9] sm:$0xff] %vm444_vm12, %v4903_v37  ;;  %v4619_v60 = vpop.f32.mrf.mxu1  ;;  %v6217_v57 = vpack.c.bf16 %v5220_v32, %v5219_v21  ;;  %v10703_v28 = vpack.i.bf16 %v5220_v32, %v5219_v21  ;;  %v6043_v37 = vsel %vm3744_vm14, %v6011_v5, %v10541_v30  ;;  %v6044_v21 = vsel %vm3744_vm14, %v6012_v12, %v10542_v20 }
 0x5d8   : > { %v10688_v55 = vpack.i.bf16 %v14708_v9, %v14705_v38  ;;  %v4620_v47 = vadd.f32 %v14415_v46, %v4619_v60  ;;  %v14722_v33 = vld [vmem:[#allocation3 + $0x98] sm:$0xff]  ;;  %v14725_v46 = vld [vmem:[#allocation3 + $0x90] sm:$0xff] }
 0x5d9   : > { %9194 = vmatmul.msk.bf16.gmra.mxu1 %vm444_vm12, %v6217_v57  ;;  %10704 = vrot.lane.b32.xlu1 %v10703_v28, %s11597_s28  ;;  %v10698_v62 = vpack.i.bf16 %v14722_v33, %v14725_v46 }
 0x5da   : > { %v4653_v31 = vadd.f32 %v11539_v24, %v4620_v47  ;;  %10694 = vrot.lane.b32.xlu0 %v10703_v28, %s11596_s27  ;;  %10689 = vrot.lane.b32.xlu2 %v10688_v55, %s11597_s28  ;;  %v4843_v18 = vpop.f32.mrf.mxu2 }
 0x5db   : > { %v4844_v52 = vadd.f32 %v14514_v49, %v4843_v18  ;;  %v4716_v26 = vld [vmem:[#allocation4 + $0xf0] sm:$0xff] }
 0x5dc   : > { %4685 = vst.msk [vmem:[#allocation4 + $0xf8] sm:$0xff] %vm444_vm12, %v4653_v31 }
 0x5dd   : > { %v4904_v29 = vmax.f32 %v4844_v52, 0.0 }
 0x5de   : > { %v14764_v39 = vld [vmem:[#allocation3 + $0xa8] sm:$0xff] }
 0x5df   : > { %4936 = vst.msk [vmem:[#allocation3 + $0xb1] sm:$0xff] %vm444_vm12, %v4904_v29 }
 0x5e2   : > { %10699 = vrot.lane.b32.xlu0 %v10698_v62, %s11598_s16  ;;  %10709 = vrot.lane.b32.xlu2 %v10698_v62, %s11596_s27  ;;  %v4846_v59 = vpop.f32.mrf.mxu2  ;;  %v14766_v62 = vld [vmem:[#allocation3 + $0xa9] sm:$0xff] }
 0x5e3   : > { %v4847_v16 = vadd.f32 %v14514_v49, %v4846_v59  ;;  %v14737_v53 = vpop.permute.xlu1 %10554  ;;  %v4717_v11 = vld [vmem:[#allocation4 + $0xf8] sm:$0xff]  ;;  %v14753_v32 = vpop.permute.xlu2 %10574 }
 0x5e4   : > { %v4733_v58 = vpack.c.bf16 %v4717_v11, %v4716_v26  ;;  %v10550_v11 = vpop.permute.xlu0 %10549 }
 0x5e5   : > { %v4905_v27 = vmax.f32 %v4847_v16, 0.0  ;;  %v10552_v26 = vunpack.i.h.bf16 %v10550_v11  ;;  %v10551_v17 = vunpack.i.l.bf16 %v10550_v11 }
 0x5e6   : > { %v5221_v8 = vld [vmem:[#allocation3 + $0xaa] sm:$0xff]  ;;  %v5222_v7 = vld [vmem:[#allocation3 + $0xb2] sm:$0xff]  ;;  %9117 = vmatmul.msk.bf16.gmra.mxu2 %vm444_vm12, %v4733_v58 }
 0x5e7   : > { %4937 = vst.msk [vmem:[#allocation3 + $0xc1] sm:$0xff] %vm444_vm12, %v4905_v27  ;;  %v6220_v6 = vpack.c.bf16 %v5222_v7, %v5221_v8  ;;  %v10723_v44 = vpack.i.bf16 %v5222_v7, %v5221_v8  ;;  %v14757_v31 = vld [vmem:[#allocation3 + $0xb0] sm:$0xff]  ;;  %v10557_v8 = vunpack.i.h.bf16 %v14737_v53  ;;  %v10556_v7 = vunpack.i.l.bf16 %v14737_v53 }
 0x5e8   : > { %v14759_v18 = vld [vmem:[#allocation3 + $0xb1] sm:$0xff]  ;;  %v10728_v59 = vpack.i.bf16 %v14757_v31, %v14764_v39  ;;  %v6014_v42 = vsel %vm444_vm12, %v14548_v0, %v10552_v26 }
 0x5e9   : > { %9195 = vmatmul.msk.bf16.gmra.mxu1 %vm444_vm12, %v6220_v6  ;;  %10724 = vrot.lane.b32.xlu1 %v10723_v44, %s11596_s27  ;;  %v10718_v16 = vpack.i.bf16 %v14759_v18, %v14766_v62  ;;  %v6013_v6 = vsel %vm444_vm12, %v14551_v50, %v10551_v17 }
 0x5ea   : > { %10714 = vrot.lane.b32.xlu0 %v10688_v55, %s11598_s16  ;;  %v4848_v48 = vpop.f32.mrf.mxu2  ;;  %10734 = vrot.lane.b32.xlu2 %v10723_v44, %s11597_s28  ;;  %v6045_v50 = vsel %vm3744_vm14, %v6013_v6, %v10556_v7 }
 0x5eb   : > { %v4849_v60 = vadd.f32 %v14514_v49, %v4848_v48  ;;  %v10560_v57 = vpop.permute.xlu1 %10559  ;;  %v10580_v41 = vpop.permute.xlu2 %10579 }
 0x5ec   : > { %v10562_v28 = vunpack.i.h.bf16 %v10560_v57  ;;  %v10561_v47 = vunpack.i.l.bf16 %v10560_v57  ;;  %v10582_v12 = vunpack.i.h.bf16 %v10580_v41  ;;  %v10581_v5 = vunpack.i.l.bf16 %v10580_v41 }
 0x5ed   : > { %v4906_v24 = vmax.f32 %v4849_v60, 0.0 }
 0x5ee   : > { %v6076_v55 = vsel %vm3777_vm15, %v6044_v21, %v10562_v28  ;;  %v6075_v52 = vsel %vm3777_vm15, %v6043_v37, %v10561_v47  ;;  %v6046_v37 = vsel %vm3744_vm14, %v6014_v42, %v10557_v8  ;;  %v6077_v0 = vsel %vm3777_vm15, %v6045_v50, %v10581_v5 }
 0x5ef   : > { %4938 = vst.msk [vmem:[#allocation3 + $0xc9] sm:$0xff] %vm444_vm12, %v4906_v24  ;;  %v6203_v29 = vpack.c.bf16 %v6076_v55, %v6075_v52  ;;  %v6078_v21 = vsel %vm3777_vm15, %v6046_v37, %v10582_v12  ;;  %v14799_v24 = vld [vmem:[#allocation3 + $0xc1] sm:$0xff]  ;;  %v10567_v52 = vunpack.i.h.bf16 %v14734_v1 }
 0x5f0   : > { %v6206_v47 = vpack.c.bf16 %v6078_v21, %v6077_v0  ;;  %v14801_v55 = vld [vmem:[#allocation3 + $0xc0] sm:$0xff] }
 0x5f1   : > { %6455 = vmatmul.bf16.vlgmr.msra.gmra.mxu3 %v6203_v29  ;;  %10729 = vrot.lane.b32.xlu1 %v10728_v59, %s11598_s16  ;;  %v6108_v17 = vsel %vm444_vm12, %v14535_v34, %v10567_v52 }
 0x5f2   : > { %10719 = vrot.lane.b32.xlu0 %v10718_v16, %s11597_s28  ;;  %v4851_v3 = vpop.f32.mrf.mxu2  ;;  %10744 = vrot.lane.b32.xlu2 %v10718_v16, %s11598_s16  ;;  %v10566_v16 = vunpack.i.l.bf16 %v14734_v1 }
 0x5f3   : > { %v4852_v35 = vadd.f32 %v14514_v49, %v4851_v3  ;;  %v10595_v11 = vpop.permute.xlu2 %10594 }
 0x5f4   : > { %v6107_v1 = vsel %vm444_vm12, %v14533_v36, %v10566_v16  ;;  %v10596_v8 = vunpack.i.l.bf16 %v10595_v11 }
 0x5f5   : > { %v4907_v27 = vmax.f32 %v4852_v35, 0.0 }
 0x5f6   : > { %v5223_v58 = vld [vmem:[#allocation3 + $0xc2] sm:$0xff]  ;;  %v5224_v2 = vld [vmem:[#allocation3 + $0xca] sm:$0xff] }
 0x5f7   : > { %4939 = vst.msk [vmem:[#allocation3 + $0xd9] sm:$0xff] %vm444_vm12, %v4907_v27  ;;  %v6223_v20 = vpack.c.bf16 %v5224_v2, %v5223_v58  ;;  %v10763_v30 = vpack.i.bf16 %v5224_v2, %v5223_v58  ;;  %v14794_v57 = vld [vmem:[#allocation3 + $0xc9] sm:$0xff]  ;;  %v10597_v2 = vunpack.i.h.bf16 %v10595_v11 }
 0x5f8   : > { %v14796_v28 = vld [vmem:[#allocation3 + $0xc8] sm:$0xff]  ;;  %v10748_v29 = vpack.i.bf16 %v14794_v57, %v14799_v24 }
 0x5f9   : > { %9196 = vmatmul.msk.bf16.gmra.mxu1 %vm444_vm12, %v6223_v20  ;;  %10739 = vrot.lane.b32.xlu1 %v10728_v59, %s11596_s27  ;;  %v10768_v59 = vpack.i.bf16 %v14796_v28, %v14801_v55 }
 0x5fa   : > { %10764 = vrot.lane.b32.xlu0 %v10763_v30, %s11597_s28  ;;  %v4853_v44 = vpop.f32.mrf.mxu2  ;;  %10754 = vrot.lane.b32.xlu2 %v10763_v30, %s11596_s27 }
 0x5fb   : > { %v4854_v53 = vadd.f32 %v14514_v49, %v4853_v44  ;;  %v14815_v41 = vpop.permute.xlu0 %10584  ;;  %v14842_v16 = vpop.permute.xlu2 %10599 }
 0x5fc   : > { %v14788_v48 = vpop.permute.xlu1 %10569 }
 0x5fd   : > { %v4908_v60 = vmax.f32 %v4854_v53, 0.0 }
 0x5fe   : > { %v14838_v52 = vld [vmem:[#allocation3 + $0xd8] sm:$0xff] }
 0x5ff   : > { %4940 = vst.msk [vmem:[#allocation3 + $0xe1] sm:$0xff] %vm444_vm12, %v4908_v60 }
 0x601   : > { %6460 = vmatmul.bf16.gmra.mxu3 %v6206_v47  ;;  %10749 = vrot.lane.b32.xlu1 %v10748_v29, %s11597_s28 }
 0x602   : > { %10769 = vrot.lane.b32.xlu0 %v10768_v59, %s11596_s27  ;;  %v4856_v3 = vpop.f32.mrf.mxu2  ;;  %10759 = vrot.lane.b32.xlu2 %v10768_v59, %s11598_s16  ;;  %v10572_v59 = vunpack.i.h.bf16 %v14788_v48 }
 0x603   : > { %v4857_v35 = vadd.f32 %v14514_v49, %v4856_v3  ;;  %v14846_v3 = vld [vmem:[#allocation3 + $0xd9] sm:$0xff] }
 0x604   : > { %v10590_v26 = vpop.permute.xlu1 %10589 }
 0x605   : > { %v10592_v27 = vunpack.i.h.bf16 %v10590_v26  ;;  %v10591_v58 = vunpack.i.l.bf16 %v10590_v26  ;;  %v4909_v7 = vmax.f32 %v4857_v35, 0.0 }
 0x606   : > { %v5225_v6 = vld [vmem:[#allocation3 + $0xda] sm:$0xff]  ;;  %v5226_v42 = vld [vmem:[#allocation3 + $0xe2] sm:$0xff] }
 0x607   : > { %v6140_v20 = vsel %vm3744_vm14, %v6108_v17, %v10592_v27  ;;  %v6139_v30 = vsel %vm3744_vm14, %v6107_v1, %v10591_v58  ;;  %4941 = vst.msk [vmem:[#allocation3 + $0xf1] sm:$0xff] %vm444_vm12, %v4909_v7  ;;  %v6226_v44 = vpack.c.bf16 %v5226_v42, %v5225_v6  ;;  %v10793_v53 = vpack.i.bf16 %v5226_v42, %v5225_v6  ;;  %v14833_v60 = vld [vmem:[#allocation3 + $0xe0] sm:$0xff] }
 0x608   : > { %v6172_v34 = vsel %vm3777_vm15, %v6140_v20, %v10597_v2  ;;  %v6171_v12 = vsel %vm3777_vm15, %v6139_v30, %v10596_v8  ;;  %v14835_v47 = vld [vmem:[#allocation3 + $0xe1] sm:$0xff]  ;;  %v10798_v11 = vpack.i.bf16 %v14833_v60, %v14838_v52  ;;  %v10577_v27 = vunpack.i.h.bf16 %v14753_v32 }
 0x609   : > { %v6204_v5 = vpack.c.bf16 %v6172_v34, %v6171_v12  ;;  %9197 = vmatmul.msk.bf16.gmra.mxu1 %vm444_vm12, %v6226_v44  ;;  %10794 = vrot.lane.b32.xlu1 %v10793_v53, %s11597_s28  ;;  %v10778_v35 = vpack.i.bf16 %v14835_v47, %v14846_v3  ;;  %v6016_v58 = vsel %vm444_vm12, %v14581_v51, %v10572_v59  ;;  %v10576_v8 = vunpack.i.l.bf16 %v14753_v32 }
 0x60a   : > { %v4858_v36 = vpop.f32.mrf.mxu2  ;;  %10784 = vrot.lane.b32.xlu0 %v10793_v53, %s11596_s27  ;;  %10774 = vrot.lane.b32.xlu2 %v10748_v29, %s11598_s16  ;;  %v10571_v29 = vunpack.i.l.bf16 %v14788_v48  ;;  %v10586_v59 = vunpack.i.l.bf16 %v14815_v41 }
 0x60b   : > { %v4859_v50 = vadd.f32 %v14514_v49, %v4858_v36  ;;  %6544 = vmatmul.bf16.vlgmr.msra.gmra.mxu0 %v6204_v5  ;;  %v14831_v0 = vpop.permute.xlu0 %10604 }
 0x60c   : > { %v14829_v37 = vpop.permute.xlu1 %10614  ;;  %v6015_v1 = vsel %vm444_vm12, %v14584_v40, %v10571_v29  ;;  %v6048_v40 = vsel %vm3744_vm14, %v6016_v58, %v10577_v27  ;;  %v14875_v29 = vpop.permute.xlu2 %10644 }
 0x60d   : > { %v4910_v21 = vmax.f32 %v4859_v50, 0.0  ;;  %v6047_v51 = vsel %vm3744_vm14, %v6015_v1, %v10576_v8 }
 0x60e   : > { %v14863_v44 = vld [vmem:[#allocation3 + $0xf1] sm:$0xff] }
 0x60f   : > { %4942 = vst.msk [vmem:[#allocation3 + $0xf9] sm:$0xff] %vm444_vm12, %v4910_v21  ;;  %v10587_v21 = vunpack.i.h.bf16 %v14815_v41 }
 0x611   : > { %10799 = vrot.lane.b32.xlu1 %v10798_v11, %s11596_s27  ;;  %v6110_v8 = vsel %vm444_vm12, %v14570_v45, %v10587_v21  ;;  %v10606_v21 = vunpack.i.l.bf16 %v14831_v0 }
 0x612   : > { %v4861_v26 = vpop.f32.mrf.mxu2  ;;  %10789 = vrot.lane.b32.xlu0 %v10798_v11, %s11598_s16  ;;  %10779 = vrot.lane.b32.xlu2 %v10778_v35, %s11597_s28 }
 0x613   : > { %v4862_v17 = vadd.f32 %v14514_v49, %v4861_v26  ;;  %v10610_v2 = vpop.permute.xlu0 %10609 }
 0x614   : > { %v10625_v48 = vpop.permute.xlu1 %10624  ;;  %v10612_v20 = vunpack.i.h.bf16 %v10610_v2  ;;  %v10611_v30 = vunpack.i.l.bf16 %v10610_v2 }
 0x615   : > { %v4911_v7 = vmax.f32 %v4862_v17, 0.0 }
 0x616   : > { %v5227_v6 = vld [vmem:[#allocation3 + $0xf2] sm:$0xff]  ;;  %v5228_v42 = vld [vmem:[#allocation3 + $0xfa] sm:$0xff]  ;;  %v6079_v53 = vsel %vm3777_vm15, %v6047_v51, %v10611_v30  ;;  %v6080_v36 = vsel %vm3777_vm15, %v6048_v40, %v10612_v20  ;;  %v10627_v20 = vunpack.i.h.bf16 %v10625_v48  ;;  %v10626_v30 = vunpack.i.l.bf16 %v10625_v48 }
 0x617   : > { %v14860_v34 = vld [vmem:[#allocation3 + $0xf9] sm:$0xff]  ;;  %4943 = vst.msk [vmem:[#allocation3 + $0x109] sm:$0xff] %vm444_vm12, %v4911_v7  ;;  %v6229_v12 = vpack.c.bf16 %v5228_v42, %v5227_v6  ;;  %v10813_v5 = vpack.i.bf16 %v5228_v42, %v5227_v6  ;;  %v6209_v50 = vpack.c.bf16 %v6080_v36, %v6079_v53  ;;  %v6109_v7 = vsel %vm444_vm12, %v14568_v25, %v10586_v59  ;;  %v14892_v6 = vld [vmem:[#allocation3 + $0xf0] sm:$0xff]  ;;  %v14902_v53 = vpop.permute.xlu2 %10664 }
 0x618   : > { %v14869_v32 = vpack.i.bf16 %v14860_v34, %v14863_v44  ;;  %v14885_v2 = vld [vmem:[#allocation3 + $0xf8] sm:$0xff]  ;;  %v10602_v25 = vunpack.i.h.bf16 %v14842_v16  ;;  %v10601_v48 = vunpack.i.l.bf16 %v14842_v16 }
 0x619   : > { %9198 = vmatmul.msk.bf16.gmra.mxu1 %vm444_vm12, %v6229_v12  ;;  %10814 = vrot.lane.b32.xlu1 %v10813_v5, %s11596_s27  ;;  %v10818_v12 = vpack.i.bf16 %v14885_v2, %v14892_v6 }
 0x61a   : > { %v4863_v11 = vpop.f32.mrf.mxu2  ;;  %10809 = vrot.lane.b32.xlu0 %v14869_v32, %s11597_s28  ;;  %6465 = vmatmul.bf16.gmra.mxu3 %v6209_v50  ;;  %v10607_v50 = vunpack.i.h.bf16 %v14831_v0  ;;  %v6017_v16 = vsel %vm444_vm12, %v14613_v43, %v10601_v48 }
 0x61b   : > { %v4864_v26 = vadd.f32 %v14514_v49, %v4863_v11  ;;  %10804 = vrot.lane.b32.xlu2 %v10778_v35, %s11598_s16  ;;  %v10620_v17 = vpop.permute.xlu0 %10619 }
 0x61c   : > { %v10622_v58 = vunpack.i.h.bf16 %v10620_v17  ;;  %v10621_v1 = vunpack.i.l.bf16 %v10620_v17  ;;  %v14883_v41 = vpop.permute.xlu1 %10634 }
 0x61d   : > { %v4912_v27 = vmax.f32 %v4864_v26, 0.0 }
 0x61e   : > { %v6141_v35 = vsel %vm3744_vm14, %v6109_v7, %v10621_v1  ;;  %v6142_v42 = vsel %vm3744_vm14, %v6110_v8, %v10622_v58 }
 0x61f   : > { %4944 = vst.msk [vmem:[#allocation3 + $0x111] sm:$0xff] %vm444_vm12, %v4912_v27  ;;  %v6173_v51 = vsel %vm3777_vm15, %v6141_v35, %v10626_v30  ;;  %v6174_v45 = vsel %vm3777_vm15, %v6142_v42, %v10627_v20  ;;  %v6018_v27 = vsel %vm444_vm12, %v14606_v14, %v10602_v25  ;;  %v6049_v30 = vsel %vm3744_vm14, %v6017_v16, %v10606_v21  ;;  %v9366_v14 = vld [vmem:[%s16470_s7] sm:$0xff]  ;;  %v10670_v48 = vpop.permute.xlu2 %10669 }
 0x620   : > { %v6207_v40 = vpack.c.bf16 %v6174_v45, %v6173_v51  ;;  %v10616_v51 = vunpack.i.l.bf16 %v14829_v37  ;;  %6837 = vmatpush.bf16.msra.mxu2 %v9366_v14 }
 0x621   : > { %10819 = vrot.lane.b32.xlu1 %v10818_v12, %s11598_s16 }
 0x622   : > { %v4866_v36 = vpop.f32.mrf.mxu2  ;;  %10829 = vrot.lane.b32.xlu0 %v10818_v12, %s11596_s27  ;;  %6549 = vmatmul.bf16.gmra.mxu0 %v6207_v40  ;;  %v10617_v12 = vunpack.i.h.bf16 %v14829_v37  ;;  %v6111_v16 = vsel %vm444_vm12, %v14608_v61, %v10616_v51 }
 0x623   : > { %v4867_v59 = vadd.f32 %v14514_v49, %v4866_v36  ;;  %10824 = vrot.lane.b32.xlu2 %v10813_v5, %s11597_s28  ;;  %v10630_v11 = vpop.permute.xlu0 %10629  ;;  %v6050_v5 = vsel %vm3744_vm14, %v6018_v27, %v10607_v50 }
 0x624   : > { %v10640_v17 = vpop.permute.xlu1 %10639  ;;  %v10632_v40 = vunpack.i.h.bf16 %v10630_v11  ;;  %v10631_v36 = vunpack.i.l.bf16 %v10630_v11 }
 0x625   : > { %v4913_v26 = vmax.f32 %v4867_v59, 0.0  ;;  %v10642_v58 = vunpack.i.h.bf16 %v10640_v17  ;;  %v10641_v1 = vunpack.i.l.bf16 %v10640_v17 }
 0x626   : > { %v5229_v8 = vld [vmem:[#allocation3 + $0x10a] sm:$0xff]  ;;  %v5230_v0 = vld [vmem:[#allocation3 + $0x112] sm:$0xff]  ;;  %v6020_v11 = vsel %vm444_vm12, %v14640_v23, %v10632_v40 }
 0x627   : > { %4945 = vst.msk [vmem:[#allocation3 + $0x121] sm:$0xff] %vm444_vm12, %v4913_v26  ;;  %v6232_v7 = vpack.c.bf16 %v5230_v0, %v5229_v8  ;;  %v10853_v20 = vpack.i.bf16 %v5230_v0, %v5229_v8  ;;  %v6081_v35 = vsel %vm3777_vm15, %v6049_v30, %v10641_v1  ;;  %v6082_v42 = vsel %vm3777_vm15, %v6050_v5, %v10642_v58  ;;  %v14930_v17 = vld [vmem:[#allocation3 + $0x111] sm:$0xff]  ;;  %v14939_v58 = vld [vmem:[#allocation3 + $0x109] sm:$0xff] }
 0x628   : > { %v6212_v43 = vpack.c.bf16 %v6082_v42, %v6081_v35  ;;  %v14941_v1 = vld [vmem:[#allocation3 + $0x110] sm:$0xff]  ;;  %v10838_v61 = vpack.i.bf16 %v14930_v17, %v14939_v58  ;;  %v10636_v30 = vunpack.i.l.bf16 %v14883_v41  ;;  %v14953_v5 = vld [vmem:[#allocation3 + $0x108] sm:$0xff] }
 0x629   : > { %9199 = vmatmul.msk.bf16.gmra.mxu1 %vm444_vm12, %v6232_v7  ;;  %10834 = vrot.lane.b32.xlu1 %v14869_v32, %s11598_s16  ;;  %v6112_v32 = vsel %vm444_vm12, %v14603_v63, %v10617_v12  ;;  %v6019_v63 = vsel %vm444_vm12, %v14647_v56, %v10631_v36  ;;  %v10848_v42 = vpack.i.bf16 %v14941_v1, %v14953_v5  ;;  %v10671_v12 = vunpack.i.l.bf16 %v10670_v48 }
 0x62a   : > { %v4868_v45 = vpop.f32.mrf.mxu2  ;;  %10854 = vrot.lane.b32.xlu0 %v10853_v20, %s11597_s28  ;;  %6470 = vmatmul.bf16.gmra.mxu3 %v6212_v43  ;;  %v6051_v56 = vsel %vm3744_vm14, %v6019_v63, %v10636_v30  ;;  %v10672_v43 = vunpack.i.h.bf16 %v10670_v48 }
 0x62b   : > { %v4869_v25 = vadd.f32 %v14514_v49, %v4868_v45  ;;  %10844 = vrot.lane.b32.xlu2 %v10853_v20, %s11596_s27  ;;  %v10650_v50 = vpop.permute.xlu0 %10649  ;;  %v10637_v20 = vunpack.i.h.bf16 %v14883_v41 }
 0x62c   : > { %v10652_v37 = vunpack.i.h.bf16 %v10650_v50  ;;  %v10651_v59 = vunpack.i.l.bf16 %v10650_v50  ;;  %v10655_v26 = vpop.permute.xlu1 %10654  ;;  %v6083_v50 = vsel %vm3777_vm15, %v6051_v56, %v10671_v12 }
 0x62d   : > { %v4914_v21 = vmax.f32 %v4869_v25, 0.0  ;;  %v10657_v49 = vunpack.i.h.bf16 %v10655_v26  ;;  %v10656_v27 = vunpack.i.l.bf16 %v10655_v26  ;;  %v6052_v14 = vsel %vm3744_vm14, %v6020_v11, %v10637_v20  ;;  %v14980_v11 = vld [vmem:[%s16467_s4] ss:$0 sm:$0xff] }
 0x62e   : > { %v6143_v8 = vsel %vm3744_vm14, %v6111_v16, %v10651_v59  ;;  %v6144_v0 = vsel %vm3744_vm14, %v6112_v32, %v10652_v37  ;;  %v14971_v26 = vld [vmem:[#allocation3 + $0x121] sm:$0xff] }
 0x62f   : > { %4946 = vst.msk [vmem:[#allocation3 + $0x129] sm:$0xff] %vm444_vm12, %v4914_v21  ;;  %v6175_v7 = vsel %vm3777_vm15, %v6143_v8, %v10656_v27  ;;  %v6176_v23 = vsel %vm3777_vm15, %v6144_v0, %v10657_v49  ;;  %v6084_v21 = vsel %vm3777_vm15, %v6052_v14, %v10672_v43  ;;  %v10647_v49 = vunpack.i.h.bf16 %v14875_v29 }
 0x630   : > { %v6210_v35 = vpack.c.bf16 %v6176_v23, %v6175_v7  ;;  %v6215_v16 = vpack.c.bf16 %v6084_v21, %v6083_v50  ;;  %v10646_v27 = vunpack.i.l.bf16 %v14875_v29 }
 0x631   : > { %10839 = vrot.lane.b32.xlu1 %v10838_v61, %s11597_s28  ;;  %v6114_v30 = vsel %vm444_vm12, %v14638_v13, %v10647_v49 }
 0x632   : > { %6554 = vmatmul.bf16.gmra.mxu0 %v6210_v35  ;;  %v6113_v35 = vsel %vm444_vm12, %v14642_v22, %v10646_v27 }
 0x633   : > { %10849 = vrot.lane.b32.xlu2 %v10848_v42, %s11598_s16  ;;  %v14961_v51 = vpop.permute.xlu0 %10674 }
 0x634   : > { %v14963_v41 = vpop.permute.xlu2 %10689  ;;  %v14965_v45 = vpop.permute.xlu1 %10659 }
 0x636   : > { %v5231_v40 = vld [vmem:[#allocation3 + $0x122] sm:$0xff]  ;;  %v5232_v25 = vld [vmem:[#allocation3 + $0x12a] sm:$0xff] }
 0x637   : > { %v14967_v36 = vld [vmem:[#allocation3 + $0x129] sm:$0xff]  ;;  %v6235_v37 = vpack.c.bf16 %v5232_v25, %v5231_v40  ;;  %v10873_v59 = vpack.i.bf16 %v5232_v25, %v5231_v40  ;;  %v14998_v40 = vld [vmem:[#allocation3 + $0x120] sm:$0xff] }
 0x638   : > { %v10868_v32 = vpack.i.bf16 %v14967_v36, %v14971_v26  ;;  %v14994_v14 = vld [vmem:[#allocation3 + $0x128] sm:$0xff] }
 0x639   : > { %v4871_v48 = vpop.f32.mrf.mxu2  ;;  %9200 = vmatmul.msk.bf16.gmra.mxu1 %vm444_vm12, %v6235_v37  ;;  %10859 = vrot.lane.b32.xlu1 %v10848_v42, %s11596_s27  ;;  %v10878_v22 = vpack.i.bf16 %v14994_v14, %v14998_v40 }
 0x63a   : > { %v4872_v8 = vadd.f32 %v14980_v11, %v4871_v48  ;;  %10874 = vrot.lane.b32.xlu0 %v10873_v59, %s11596_s27  ;;  %6475 = vmatmul.bf16.gmra.mxu3 %v6215_v16 }
 0x63b   : > { %10869 = vrot.lane.b32.xlu2 %v10868_v32, %s11597_s28  ;;  %v10680_v63 = vpop.permute.xlu0 %10679 }
 0x63c   : > { %v4915_v0 = vmax.f32 %v4872_v8, 0.0  ;;  %v14987_v7 = vpop.permute.xlu2 %10709  ;;  %v10682_v29 = vunpack.i.h.bf16 %v10680_v63  ;;  %v10681_v23 = vunpack.i.l.bf16 %v10680_v63  ;;  %v10685_v20 = vpop.permute.xlu1 %10684 }
 0x63d   : > { %v10687_v42 = vunpack.i.h.bf16 %v10685_v20  ;;  %v10686_v56 = vunpack.i.l.bf16 %v10685_v20  ;;  %v15020_v20 = vpop.f32.mrf.mxu1 }
 0x63e   : > { %4947 = vst.msk [vmem:[#allocation3 + $0x139] sm:$0xff] %vm444_vm12, %v4915_v0  ;;  %v6145_v43 = vsel %vm3744_vm14, %v6113_v35, %v10681_v23  ;;  %v6146_v12 = vsel %vm3744_vm14, %v6114_v30, %v10682_v29  ;;  %v10662_v30 = vunpack.i.h.bf16 %v14965_v45  ;;  %v10661_v35 = vunpack.i.l.bf16 %v14965_v45 }
 0x63f   : > { %v6177_v25 = vsel %vm3777_vm15, %v6145_v43, %v10686_v56  ;;  %v6178_v50 = vsel %vm3777_vm15, %v6146_v12, %v10687_v42 }
 0x640   : > { %v6213_v21 = vpack.c.bf16 %v6178_v50, %v6177_v25  ;;  %v6022_v45 = vsel %vm444_vm12, %v14667_v15, %v10662_v30  ;;  %v6021_v50 = vsel %vm444_vm12, %v14677_v54, %v10661_v35 }
 0x641   : > { %v4873_v13 = vpop.f32.mrf.mxu2  ;;  %10864 = vrot.lane.b32.xlu1 %v10838_v61, %s11598_s16 }
 0x642   : > { %v4874_v37 = vadd.f32 %v14980_v11, %v4873_v13  ;;  %10879 = vrot.lane.b32.xlu0 %v10878_v22, %s11598_s16  ;;  %6559 = vmatmul.bf16.gmra.mxu0 %v6213_v21  ;;  %v10667_v13 = vunpack.i.h.bf16 %v14902_v53 }
 0x644   : > { %v4916_v48 = vmax.f32 %v4874_v37, 0.0  ;;  %v15007_v16 = vpop.permute.xlu2 %10734 }
 0x645   : > { %v15024_v56 = vld [vmem:[#allocation3 + $0x139] sm:$0xff] }
 0x646   : > { %4948 = vst.msk [vmem:[#allocation3 + $0x141] sm:$0xff] %vm444_vm12, %v4916_v48  ;;  %v15049_v15 = vld [vmem:[#allocation3 + $0x138] sm:$0xff] }
 0x649   : > { %v4876_v49 = vpop.f32.mrf.mxu2  ;;  %10884 = vrot.lane.b32.xlu1 %v10873_v59, %s11597_s28 }
 0x64a   : > { %v4877_v27 = vadd.f32 %v14980_v11, %v4876_v49  ;;  %10889 = vrot.lane.b32.xlu0 %v10878_v22, %s11596_s27  ;;  %v10666_v22 = vunpack.i.l.bf16 %v14902_v53 }
 0x64b   : > { %v15042_v21 = vpop.permute.xlu1 %10704 }
 0x64c   : > { %v4917_v8 = vmax.f32 %v4877_v27, 0.0  ;;  %v15013_v0 = vpop.permute.xlu0 %10694  ;;  %v15015_v63 = vpop.permute.xlu2 %10744  ;;  %v6053_v54 = vsel %vm3744_vm14, %v6021_v50, %v10666_v22  ;;  %v10712_v50 = vunpack.i.h.bf16 %v14987_v7 }
 0x64d   : > { %v5233_v61 = vld [vmem:[#allocation3 + $0x13a] sm:$0xff]  ;;  %v5234_v29 = vld [vmem:[#allocation3 + $0x142] sm:$0xff] }
 0x64e   : > { %4949 = vst.msk [vmem:[#allocation3 + $0x151] sm:$0xff] %vm444_vm12, %v4917_v8  ;;  %v15018_v23 = vld [vmem:[#allocation3 + $0x141] sm:$0xff]  ;;  %v6238_v59 = vpack.c.bf16 %v5234_v29, %v5233_v61  ;;  %v10913_v42 = vpack.i.bf16 %v5234_v29, %v5233_v61  ;;  %v6054_v61 = vsel %vm3744_vm14, %v6022_v45, %v10667_v13  ;;  %v10711_v45 = vunpack.i.l.bf16 %v14987_v7 }
 0x64f   : > { %v15030_v12 = vpack.i.bf16 %v15018_v23, %v15024_v56  ;;  %v15044_v49 = vld [vmem:[#allocation3 + $0x140] sm:$0xff] }
 0x650   : > { %9201 = vmatmul.msk.bf16.gmra.mxu1 %vm444_vm12, %v6238_v59  ;;  %10914 = vrot.lane.b32.xlu2 %v10913_v42, %s11597_s28  ;;  %v10918_v53 = vpack.i.bf16 %v15044_v49, %v15049_v15  ;;  %v15057_v59 = vpop.f32.mrf.mxu1 }
 0x651   : > { %v4878_v43 = vpop.f32.mrf.mxu2  ;;  %10894 = vrot.lane.b32.xlu1 %v10868_v32, %s11598_s16 }
 0x652   : > { %v4879_v25 = vadd.f32 %v14980_v11, %v4878_v43  ;;  %10899 = vrot.lane.b32.xlu0 %v15030_v12, %s11597_s28  ;;  %v10677_v43 = vunpack.i.h.bf16 %v14961_v51 }
 0x654   : > { %v4918_v37 = vmax.f32 %v4879_v25, 0.0  ;;  %v10700_v48 = vpop.permute.xlu0 %10699  ;;  %v15046_v8 = vpop.permute.xlu2 %10754  ;;  %v10676_v25 = vunpack.i.l.bf16 %v14961_v51 }
 0x655   : > { %v10702_v32 = vunpack.i.h.bf16 %v10700_v48  ;;  %v10701_v27 = vunpack.i.l.bf16 %v10700_v48 }
 0x656   : > { %4950 = vst.msk [vmem:[#allocation3 + $0x159] sm:$0xff] %vm444_vm12, %v4918_v37  ;;  %v6115_v51 = vsel %vm444_vm12, %v14673_v19, %v10676_v25  ;;  %v10691_v25 = vunpack.i.l.bf16 %v14963_v41 }
 0x657   : > { %v6085_v29 = vsel %vm3777_vm15, %v6053_v54, %v10701_v27  ;;  %v6086_v30 = vsel %vm3777_vm15, %v6054_v61, %v10702_v32  ;;  %v6116_v27 = vsel %vm444_vm12, %v14665_v4, %v10677_v43  ;;  %v10692_v43 = vunpack.i.h.bf16 %v14963_v41 }
 0x658   : > { %v6218_v35 = vpack.c.bf16 %v6086_v30, %v6085_v29  ;;  %10919 = vrot.lane.b32.xlu2 %v10918_v53, %s11596_s27 }
 0x659   : > { %v4881_v37 = vpop.f32.mrf.mxu2  ;;  %10904 = vrot.lane.b32.xlu1 %v10913_v42, %s11596_s27 }
 0x65a   : > { %v4882_v13 = vadd.f32 %v14980_v11, %v4881_v37  ;;  %6480 = vmatmul.bf16.gmra.mxu3 %v6218_v35  ;;  %v6147_v37 = vsel %vm3744_vm14, %v6115_v51, %v10711_v45  ;;  %v10697_v45 = vunpack.i.h.bf16 %v15013_v0 }
 0x65b   : > { %v15066_v48 = vpop.permute.xlu1 %10724 }
 0x65c   : > { %v4919_v22 = vmax.f32 %v4882_v13, 0.0  ;;  %v10715_v32 = vpop.permute.xlu0 %10714  ;;  %v15073_v7 = vpop.permute.xlu2 %10759  ;;  %v6148_v13 = vsel %vm3744_vm14, %v6116_v27, %v10712_v50  ;;  %v10696_v50 = vunpack.i.l.bf16 %v15013_v0 }
 0x65d   : > { %v10717_v54 = vunpack.i.h.bf16 %v10715_v32  ;;  %v10716_v61 = vunpack.i.l.bf16 %v10715_v32  ;;  %v5235_v29 = vld [vmem:[#allocation3 + $0x152] sm:$0xff]  ;;  %v5236_v30 = vld [vmem:[#allocation3 + $0x15a] sm:$0xff]  ;;  %v15088_v27 = vpop.f32.mrf.mxu1 }
 0x65e   : > { %4951 = vst.msk [vmem:[#allocation3 + $0x169] sm:$0xff] %vm444_vm12, %v4919_v22  ;;  %v6241_v42 = vpack.c.bf16 %v5236_v30, %v5235_v29  ;;  %v10938_v35 = vpack.i.bf16 %v5236_v30, %v5235_v29  ;;  %v6023_v29 = vsel %vm444_vm12, %v14725_v46, %v10691_v25 }
 0x65f   : > { %v6179_v10 = vsel %vm3777_vm15, %v6147_v37, %v10716_v61  ;;  %v6180_v4 = vsel %vm3777_vm15, %v6148_v13, %v10717_v54  ;;  %v6024_v61 = vsel %vm444_vm12, %v14722_v33, %v10692_v43  ;;  %v6055_v37 = vsel %vm3744_vm14, %v6023_v29, %v10696_v50 }
 0x660   : > { %10939 = vrot.lane.b32.xlu0 %v10938_v35, %s11597_s28  ;;  %v6216_v19 = vpack.c.bf16 %v6180_v4, %v6179_v10  ;;  %9202 = vmatmul.msk.bf16.gmra.mxu1 %vm444_vm12, %v6241_v42  ;;  %v15090_v10 = vld [vmem:[#allocation3 + $0x158] sm:$0xff]  ;;  %v15096_v42 = vld [vmem:[#allocation3 + $0x150] sm:$0xff]  ;;  %v6056_v13 = vsel %vm3744_vm14, %v6024_v61, %v10697_v45  ;;  %v10706_v50 = vunpack.i.l.bf16 %v15042_v21 }
 0x661   : > { %10929 = vrot.lane.b32.xlu2 %v10938_v35, %s11596_s27  ;;  %v4883_v22 = vpop.f32.mrf.mxu2  ;;  %10909 = vrot.lane.b32.xlu1 %v10918_v53, %s11598_s16  ;;  %v15098_v35 = vld [vmem:[#allocation3 + $0x159] sm:$0xff]  ;;  %v10943_v53 = vpack.i.bf16 %v15090_v10, %v15096_v42  ;;  %v15105_v4 = vld [vmem:[#allocation3 + $0x151] sm:$0xff] }
 0x662   : > { %v4884_v32 = vadd.f32 %v14980_v11, %v4883_v22  ;;  %6564 = vmatmul.bf16.gmra.mxu0 %v6216_v19  ;;  %16712 = vst [vmem:[#allocation9_spill] sm:$0xff] %v15105_v4  ;;  %v10707_v19 = vunpack.i.h.bf16 %v15042_v21  ;;  %v10923_v25 = vpack.i.bf16 %v15098_v35, %v15105_v4 }
 0x663   : > { %v10730_v41 = vpop.permute.xlu1 %10729 }
 0x664   : > { %v4920_v51 = vmax.f32 %v4884_v32, 0.0  ;;  %v10720_v54 = vpop.permute.xlu0 %10719  ;;  %v10732_v30 = vunpack.i.h.bf16 %v10730_v41  ;;  %v10731_v0 = vunpack.i.l.bf16 %v10730_v41  ;;  %v15110_v43 = vpop.permute.xlu2 %10774  ;;  %v6118_v61 = vsel %vm444_vm12, %v14708_v9, %v10707_v19 }
 0x665   : > { %v10722_v45 = vunpack.i.h.bf16 %v10720_v54  ;;  %v15133_v4 = vld [vmem:[#allocation3 + $0x169] sm:$0xff] }
 0x666   : > { %4952 = vst.msk [vmem:[#allocation3 + $0x171] sm:$0xff] %vm444_vm12, %v4920_v51  ;;  %v6087_v33 = vsel %vm3777_vm15, %v6055_v37, %v10731_v0  ;;  %v6088_v46 = vsel %vm3777_vm15, %v6056_v13, %v10732_v30  ;;  %v10721_v51 = vunpack.i.l.bf16 %v10720_v54  ;;  %v6117_v0 = vsel %vm444_vm12, %v14705_v38, %v10706_v50 }
 0x667   : > { %v6221_v22 = vpack.c.bf16 %v6088_v46, %v6087_v33  ;;  %v10747_v54 = vunpack.i.h.bf16 %v15015_v63  ;;  %v6026_v9 = vsel %vm444_vm12, %v14757_v31, %v10722_v45  ;;  %16714 = vst [vmem:[#allocation13_spill] sm:$0xff] %v15133_v4  ;;  %v10726_v31 = vunpack.i.l.bf16 %v15066_v48 }
 0x668   : > { %10944 = vrot.lane.b32.xlu0 %v10943_v53, %s11596_s27  ;;  %v6025_v38 = vsel %vm444_vm12, %v14764_v39, %v10721_v51 }
 0x669   : > { %10934 = vrot.lane.b32.xlu2 %v10943_v53, %s11598_s16  ;;  %v4886_v32 = vpop.f32.mrf.mxu2  ;;  %10924 = vrot.lane.b32.xlu1 %v10923_v25, %s11597_s28 }
 0x66a   : > { %6485 = vmatmul.bf16.gmra.mxu3 %v6221_v22  ;;  %v4887_v41 = vadd.f32 %v14980_v11, %v4886_v32  ;;  %v15127_v22 = vpop.f32.mrf.mxu1  ;;  %v10746_v32 = vunpack.i.l.bf16 %v15015_v63  ;;  %v10727_v63 = vunpack.i.h.bf16 %v15066_v48  ;;  %v6057_v48 = vsel %vm3744_vm14, %v6025_v38, %v10726_v31 }
 0x66b   : > { %v10740_v29 = vpop.permute.xlu1 %10739  ;;  %v10736_v38 = vunpack.i.l.bf16 %v15007_v16 }
 0x66c   : > { %v15121_v30 = vpop.permute.xlu0 %10764  ;;  %v4921_v21 = vmax.f32 %v4887_v41, 0.0  ;;  %v10742_v37 = vunpack.i.h.bf16 %v10740_v29  ;;  %v10741_v53 = vunpack.i.l.bf16 %v10740_v29  ;;  %v15153_v51 = vpop.permute.xlu2 %10779 }
 0x66d   : > { %v5237_v13 = vld [vmem:[#allocation3 + $0x16a] sm:$0xff]  ;;  %v5238_v33 = vld [vmem:[#allocation3 + $0x172] sm:$0xff] }
 0x66e   : > { %v15125_v46 = vld [vmem:[#allocation3 + $0x171] sm:$0xff]  ;;  %v6244_v19 = vpack.c.bf16 %v5238_v33, %v5237_v13  ;;  %4953 = vst.msk [vmem:[#allocation3 + $0x181] sm:$0xff] %vm444_vm12, %v4921_v21  ;;  %v6149_v41 = vsel %vm3744_vm14, %v6117_v0, %v10741_v53  ;;  %v6150_v29 = vsel %vm3744_vm14, %v6118_v61, %v10742_v37  ;;  %v6058_v21 = vsel %vm3744_vm14, %v6026_v9, %v10727_v63 }
 0x66f   : > { %16713 = vst [vmem:[#allocation14_spill] sm:$0xff] %v15125_v46  ;;  %v15140_v50 = vpack.i.bf16 %v15125_v46, %v15133_v4  ;;  %v6181_v45 = vsel %vm3777_vm15, %v6149_v41, %v10746_v32  ;;  %v6182_v39 = vsel %vm3777_vm15, %v6150_v29, %v10747_v54  ;;  %v10761_v37 = vunpack.i.l.bf16 %v15073_v7 }
 0x670   : > { %10949 = vrot.lane.b32.xlu0 %v15030_v12, %s11598_s16  ;;  %9203 = vmatmul.msk.bf16.gmra.mxu1 %vm444_vm12, %v6244_v19  ;;  %v6219_v61 = vpack.c.bf16 %v6182_v39, %v6181_v45  ;;  %v10762_v12 = vunpack.i.h.bf16 %v15073_v7  ;;  %v10737_v45 = vunpack.i.h.bf16 %v15007_v16  ;;  %v10766_v4 = vunpack.i.l.bf16 %v15121_v30 }
 0x671   : > { %10959 = vrot.lane.b32.xlu2 %v15140_v50, %s11597_s28  ;;  %v4888_v0 = vpop.f32.mrf.mxu2  ;;  %10954 = vrot.lane.b32.xlu1 %v10923_v25, %s11598_s16  ;;  %v6089_v41 = vsel %vm3777_vm15, %v6057_v48, %v10761_v37  ;;  %v10963_v25 = vpack.i.bf16 %v5238_v33, %v5237_v13  ;;  %v6119_v13 = vsel %vm444_vm12, %v14766_v62, %v10736_v38  ;;  %v15174_v33 = vld [vmem:[#allocation3 + $0x170] sm:$0xff]  ;;  %v10777_v48 = vunpack.i.h.bf16 %v15110_v43 }
 0x672   : > { %v4889_v53 = vadd.f32 %v14980_v11, %v4888_v0  ;;  %6569 = vmatmul.bf16.gmra.mxu0 %v6219_v61  ;;  %v6090_v29 = vsel %vm3777_vm15, %v6058_v21, %v10762_v12  ;;  %v15166_v9 = vpop.f32.mrf.mxu1  ;;  %v6120_v31 = vsel %vm444_vm12, %v14759_v18, %v10737_v45  ;;  %v10776_v21 = vunpack.i.l.bf16 %v15110_v43  ;;  %v15186_v18 = vld [vmem:[#allocation3 + $0x168] sm:$0xff] }
 0x673   : > { %v10750_v32 = vpop.permute.xlu1 %10749  ;;  %v6224_v11 = vpack.c.bf16 %v6090_v29, %v6089_v41 }
 0x674   : > { %v10770_v19 = vpop.permute.xlu0 %10769  ;;  %v4922_v54 = vmax.f32 %v4889_v53, 0.0  ;;  %v6456_v12 = vpop.f32.mrf.mxu3  ;;  %v10752_v45 = vunpack.i.h.bf16 %v10750_v32  ;;  %v10751_v38 = vunpack.i.l.bf16 %v10750_v32 }
 0x675   : > { %v10772_v7 = vunpack.i.h.bf16 %v10770_v19  ;;  %v10771_v63 = vunpack.i.l.bf16 %v10770_v19  ;;  %v15178_v0 = vpop.permute.xlu2 %10804  ;;  %v5081_v41 = vld [vmem:[#allocation3 + $0x180] sm:$0xff] }
 0x676   : > { %4954 = vst.msk [vmem:[#allocation3 + $0x189] sm:$0xff] %vm444_vm12, %v4922_v54  ;;  %v10968_v54 = vpack.i.bf16 %v15174_v33, %v15186_v18  ;;  %v6027_v32 = vsel %vm444_vm12, %v14801_v55, %v10751_v38 }
 0x677   : > { %v6151_v16 = vsel %vm3744_vm14, %v6119_v13, %v10771_v63  ;;  %v6152_v39 = vsel %vm3744_vm14, %v6120_v31, %v10772_v7  ;;  %v5209_v31 = vld [vmem:[#allocation3 + $0x199] sm:$0xff]  ;;  %v5210_v13 = vld [vmem:[#allocation3 + $0x1a1] sm:$0xff] }
 0x678   : > { %10964 = vrot.lane.b32.xlu0 %v10963_v25, %s11596_s27  ;;  %v6183_v29 = vsel %vm3777_vm15, %v6151_v16, %v10776_v21  ;;  %v6028_v16 = vsel %vm444_vm12, %v14796_v28, %v10752_v45  ;;  %v10756_v21 = vunpack.i.l.bf16 %v15046_v8 }
 0x679   : > { %10974 = vrot.lane.b32.xlu2 %v10963_v25, %s11597_s28  ;;  %v6184_v25 = vsel %vm3777_vm15, %v6152_v39, %v10777_v48  ;;  %v10757_v48 = vunpack.i.h.bf16 %v15046_v8  ;;  %v15213_v8 = vld [vmem:[%s16469_s6] ss:$0 sm:$0xff] }
 0x67a   : > { %6490 = vmatmul.bf16.gmra.mxu3 %v6224_v11  ;;  %v15194_v63 = vpop.f32.mrf.mxu1  ;;  %v6222_v11 = vpack.c.bf16 %v6184_v25, %v6183_v29  ;;  %v6059_v55 = vsel %vm3744_vm14, %v6027_v32, %v10756_v21  ;;  %v10807_v21 = vunpack.i.h.bf16 %v15178_v0 }
 0x67b   : > { %v15180_v61 = vpop.permute.xlu1 %10794  ;;  %v6060_v38 = vsel %vm3744_vm14, %v6028_v16, %v10757_v48 }
 0x67c   : > { %v15184_v37 = vpop.permute.xlu0 %10784  ;;  %v6458_v28 = vpop.f32.mrf.mxu3 }
 0x67d   : > { %v5239_v62 = vld [vmem:[#allocation3 + $0x182] sm:$0xff]  ;;  %v5240_v53 = vld [vmem:[#allocation3 + $0x18a] sm:$0xff] }
 0x67e   : > { %v5082_v19 = vld [vmem:[#allocation3 + $0x188] sm:$0xff]  ;;  %v6247_v7 = vpack.c.bf16 %v5240_v53, %v5239_v62  ;;  %v10988_v45 = vpack.i.bf16 %v5240_v53, %v5239_v62 }
 0x67f   : > { %v10983_v43 = vpack.i.bf16 %v5082_v19, %v5081_v41  ;;  %v15205_v41 = vpop.permute.xlu2 %10824  ;;  %v15224_v16 = vld [vmem:[#allocation3 + $0x189] sm:$0xff] }
 0x680   : > { %10969 = vrot.lane.b32.xlu0 %v10968_v54, %s11598_s16  ;;  %9204 = vmatmul.msk.bf16.gmra.mxu1 %vm444_vm12, %v6247_v7  ;;  %v11008_v7 = vpack.i.bf16 %v5210_v13, %v5209_v31  ;;  %v6121_v13 = vsel %vm444_vm12, %v14799_v24, %v10766_v4 }
 0x681   : > { %10979 = vrot.lane.b32.xlu2 %v10968_v54, %s11596_s27  ;;  %10984 = vrot.lane.b32.xlu1 %v10983_v43, %s11598_s16  ;;  %v10767_v54 = vunpack.i.h.bf16 %v15121_v30 }
 0x682   : > { %6574 = vmatmul.bf16.gmra.mxu0 %v6222_v11 }
 0x683   : > { %v10800_v39 = vpop.permute.xlu1 %10799  ;;  %v6122_v53 = vsel %vm444_vm12, %v14794_v57, %v10767_v54  ;;  %v15233_v57 = vld [vmem:[#allocation3 + $0x181] sm:$0xff] }
 0x684   : > { %v10790_v19 = vpop.permute.xlu0 %10789  ;;  %v10802_v11 = vunpack.i.h.bf16 %v10800_v39  ;;  %v10801_v46 = vunpack.i.l.bf16 %v10800_v39  ;;  %v11003_v24 = vpack.i.bf16 %v15224_v16, %v15233_v57 }
 0x685   : > { %v10792_v29 = vunpack.i.h.bf16 %v10790_v19  ;;  %v10791_v25 = vunpack.i.l.bf16 %v10790_v19 }
 0x686   : > { %v6153_v32 = vsel %vm3744_vm14, %v6121_v13, %v10801_v46  ;;  %v6154_v39 = vsel %vm3744_vm14, %v6122_v53, %v10802_v11  ;;  %v6459_v46 = vadd.f32 %v15213_v8, %v6458_v28 }
 0x687   : > { %v6091_v19 = vsel %vm3777_vm15, %v6059_v55, %v10791_v25  ;;  %v6092_v31 = vsel %vm3777_vm15, %v6060_v38, %v10792_v29  ;;  %v10806_v29 = vunpack.i.l.bf16 %v15178_v0  ;;  %v10781_v0 = vunpack.i.l.bf16 %v15153_v51  ;;  %v6461_v38 = vpop.f32.mrf.mxu3 }
 0x688   : > { %10999 = vrot.lane.b32.xlu0 %v10983_v43, %s11596_s27  ;;  %v6545_v30 = vpop.f32.mrf.mxu0  ;;  %v6227_v62 = vpack.c.bf16 %v6092_v31, %v6091_v19  ;;  %v6457_v43 = vadd.f32 %v15213_v8, %v6456_v12  ;;  %v6186_v12 = vsel %vm3777_vm15, %v6154_v39, %v10807_v21  ;;  %v10787_v55 = vunpack.i.h.bf16 %v15184_v37 }
 0x689   : > { %10989 = vrot.lane.b32.xlu2 %v10988_v45, %s11597_s28  ;;  %11009 = vrot.lane.b32.xlu1 %v11008_v7, %s11598_s16  ;;  %v6185_v4 = vsel %vm3777_vm15, %v6153_v32, %v10806_v29  ;;  %v15240_v7 = vpop.permute.xlu2 %10844  ;;  %v10782_v45 = vunpack.i.h.bf16 %v15153_v51  ;;  %v10786_v19 = vunpack.i.l.bf16 %v15184_v37  ;;  %v6029_v13 = vsel %vm444_vm12, %v14838_v52, %v10781_v0 }
 0x68a   : > { %6495 = vmatmul.bf16.gmra.mxu3 %v6227_v62  ;;  %v6546_v54 = vadd.f32 %v6545_v30, %v6457_v43  ;;  %v6225_v30 = vpack.c.bf16 %v6186_v12, %v6185_v4  ;;  %v10796_v4 = vunpack.i.l.bf16 %v15180_v61 }
 0x68b   : > { %v15229_v48 = vpop.permute.xlu1 %10814  ;;  %v6030_v51 = vsel %vm444_vm12, %v14833_v60, %v10782_v45  ;;  %v10797_v60 = vunpack.i.h.bf16 %v15180_v61 }
 0x68c   : > { %v10810_v25 = vpop.permute.xlu0 %10809  ;;  %v6635_v31 = vadd.f32 %v15020_v20, %v6546_v54  ;;  %v6062_v37 = vsel %vm3744_vm14, %v6030_v51, %v10787_v55  ;;  %v10816_v51 = vunpack.i.l.bf16 %v15229_v48 }
 0x68d   : > { %v10812_v0 = vunpack.i.h.bf16 %v10810_v25  ;;  %v10811_v55 = vunpack.i.l.bf16 %v10810_v25 }
 0x68e   : > { %v6714_v39 = vmax.f32 %v6635_v31, 0.0  ;;  %v6123_v31 = vsel %vm444_vm12, %v14846_v3, %v10796_v4 }
 0x68f   : > { %v6463_v45 = vpop.f32.mrf.mxu3  ;;  %v6031_v3 = vsel %vm444_vm12, %v14892_v6, %v10811_v55 }
 0x690   : > { %11004 = vrot.lane.b32.xlu0 %v11003_v24, %s11598_s16  ;;  %v6547_v11 = vpop.f32.mrf.mxu0 }
 0x691   : > { %10994 = vrot.lane.b32.xlu2 %v15140_v50, %s11598_s16  ;;  %v6548_v28 = vadd.f32 %v6547_v11, %v6459_v46  ;;  %v6061_v50 = vsel %vm3744_vm14, %v6029_v13, %v10786_v19  ;;  %v10850_v52 = vpop.permute.xlu2 %10849  ;;  %v6124_v19 = vsel %vm444_vm12, %v14835_v47, %v10797_v60  ;;  %v6032_v47 = vsel %vm444_vm12, %v14885_v2, %v10812_v0 }
 0x692   : > { %6579 = vmatmul.bf16.gmra.mxu0 %v6225_v30 }
 0x693   : > { %v6637_v62 = vadd.f32 %v15057_v59, %v6548_v28  ;;  %v10820_v53 = vpop.permute.xlu1 %10819 }
 0x694   : > { %v10822_v43 = vunpack.i.h.bf16 %v10820_v53  ;;  %v10821_v32 = vunpack.i.l.bf16 %v10820_v53  ;;  %v10830_v21 = vpop.permute.xlu0 %10829  ;;  %v10817_v53 = vunpack.i.h.bf16 %v15229_v48  ;;  %v10852_v48 = vunpack.i.h.bf16 %v10850_v52 }
 0x695   : > { %v6715_v20 = vmax.f32 %v6637_v62, 0.0  ;;  %v10832_v12 = vunpack.i.h.bf16 %v10830_v21  ;;  %v10831_v46 = vunpack.i.l.bf16 %v10830_v21  ;;  %v10851_v21 = vunpack.i.l.bf16 %v10850_v52 }
 0x696   : > { %v6093_v29 = vsel %vm3777_vm15, %v6061_v50, %v10821_v32  ;;  %v6094_v59 = vsel %vm3777_vm15, %v6062_v37, %v10822_v43  ;;  %v6462_v50 = vadd.f32 %v15213_v8, %v6461_v38  ;;  %v6464_v38 = vadd.f32 %v15213_v8, %v6463_v45 }
 0x697   : > { %v6746_v54 = vpack.c.bf16 %v6715_v20, %v6714_v39  ;;  %v6230_v24 = vpack.c.bf16 %v6094_v59, %v6093_v29  ;;  %v6156_v61 = vsel %vm3744_vm14, %v6124_v19, %v10832_v12  ;;  %v6155_v62 = vsel %vm3744_vm14, %v6123_v31, %v10831_v46 }
 0x698   : > { %v6063_v39 = vsel %vm3744_vm14, %v6031_v3, %v10816_v51  ;;  %v6064_v20 = vsel %vm3744_vm14, %v6032_v47, %v10817_v53  ;;  %v10826_v45 = vunpack.i.l.bf16 %v15205_v41  ;;  %v10847_v3 = vunpack.i.h.bf16 %v15240_v7 }
 0x699   : > { %9214 = vmatmul.msk.bf16.vlgmr.msra.gmra.mxu2 %vm444_vm12, %v6746_v54  ;;  %v15279_v29 = vpop.permute.xlu2 %10869  ;;  %v6095_v6 = vsel %vm3777_vm15, %v6063_v39, %v10851_v21 }
 0x69a   : > { %6500 = vmatmul.bf16.gmra.mxu3 %v6230_v24  ;;  %v6096_v24 = vsel %vm3777_vm15, %v6064_v20, %v10852_v48 }
 0x69b   : > { %v10835_v11 = vpop.permute.xlu1 %10834  ;;  %v6233_v46 = vpack.c.bf16 %v6096_v24, %v6095_v6 }
 0x69c   : > { %v10837_v28 = vunpack.i.h.bf16 %v10835_v11  ;;  %v10836_v30 = vunpack.i.l.bf16 %v10835_v11  ;;  %v15281_v54 = vpop.permute.xlu0 %10854 }
 0x69d   : > { %v6466_v37 = vpop.f32.mrf.mxu3 }
 0x69e   : > { %v6187_v13 = vsel %vm3777_vm15, %v6155_v62, %v10836_v30  ;;  %v6188_v25 = vsel %vm3777_vm15, %v6156_v61, %v10837_v28  ;;  %v10827_v30 = vunpack.i.h.bf16 %v15205_v41  ;;  %v6467_v47 = vadd.f32 %v15213_v8, %v6466_v37 }
 0x69f   : > { %v6550_v43 = vpop.f32.mrf.mxu0  ;;  %v6228_v32 = vpack.c.bf16 %v6188_v25, %v6187_v13  ;;  %v6125_v25 = vsel %vm444_vm12, %v14863_v44, %v10826_v45  ;;  %v10846_v41 = vunpack.i.l.bf16 %v15240_v7 }
 0x6a0   : > { %v6551_v2 = vadd.f32 %v6550_v43, %v6462_v50  ;;  %v6126_v13 = vsel %vm444_vm12, %v14860_v34, %v10827_v30 }
 0x6a2   : > { %6584 = vmatmul.bf16.gmra.mxu0 %v6228_v32  ;;  %v6640_v4 = vadd.f32 %v15088_v27, %v6551_v2 }
 0x6a3   : > { %v10840_v59 = vpop.permute.xlu1 %10839 }
 0x6a4   : > { %v6716_v11 = vmax.f32 %v6640_v4, 0.0  ;;  %v10842_v62 = vunpack.i.h.bf16 %v10840_v59  ;;  %v10841_v27 = vunpack.i.l.bf16 %v10840_v59 }
 0x6a5   : > { %v6468_v19 = vpop.f32.mrf.mxu3 }
 0x6a6   : > { %v6034_v43 = vsel %vm444_vm12, %v14941_v1, %v10842_v62  ;;  %v6033_v32 = vsel %vm444_vm12, %v14953_v5, %v10841_v27  ;;  %v6469_v39 = vadd.f32 %v15213_v8, %v6468_v19  ;;  %v6649_v19 = vpop.f32.mrf.mxu1 }
 0x6a7   : > { %v6552_v60 = vpop.f32.mrf.mxu0  ;;  %v6065_v1 = vsel %vm3744_vm14, %v6033_v32, %v10846_v41  ;;  %v6066_v5 = vsel %vm3744_vm14, %v6034_v43, %v10847_v3 }
 0x6a8   : > { %v6553_v12 = vadd.f32 %v6552_v60, %v6464_v38 }
 0x6aa   : > { %v6642_v52 = vadd.f32 %v15127_v22, %v6553_v12  ;;  %6505 = vmatmul.bf16.gmra.mxu3 %v6233_v46  ;;  %v15288_v0 = vpop.permute.xlu2 %10914 }
 0x6ab   : > { %v10860_v55 = vpop.permute.xlu1 %10859 }
 0x6ac   : > { %v6717_v31 = vmax.f32 %v6642_v52, 0.0  ;;  %v15290_v28 = vpop.permute.xlu0 %10874  ;;  %v10862_v22 = vunpack.i.h.bf16 %v10860_v55  ;;  %v10861_v51 = vunpack.i.l.bf16 %v10860_v55 }
 0x6ad   : > { %v6471_v6 = vpop.f32.mrf.mxu3 }
 0x6ae   : > { %v6747_v61 = vpack.c.bf16 %v6717_v31, %v6716_v11  ;;  %v6157_v44 = vsel %vm3744_vm14, %v6125_v25, %v10861_v51  ;;  %v6158_v37 = vsel %vm3744_vm14, %v6126_v13, %v10862_v22  ;;  %v6651_v3 = vpop.f32.mrf.mxu1 }
 0x6af   : > { %v6555_v53 = vpop.f32.mrf.mxu0 }
 0x6b0   : > { %9215 = vmatmul.msk.bf16.gmra.mxu2 %vm444_vm12, %v6747_v61  ;;  %v6556_v20 = vadd.f32 %v6555_v53, %v6467_v47  ;;  %v10857_v53 = vunpack.i.h.bf16 %v15281_v54 }
 0x6b2   : > { %v15309_v59 = vpop.permute.xlu2 %10919  ;;  %v6645_v52 = vadd.f32 %v15166_v9, %v6556_v20  ;;  %v10856_v9 = vunpack.i.l.bf16 %v15281_v54  ;;  %v6128_v41 = vsel %vm444_vm12, %v14930_v17, %v10857_v53 }
 0x6b3   : > { %v10865_v50 = vpop.permute.xlu1 %10864 }
 0x6b4   : > { %v10867_v34 = vunpack.i.h.bf16 %v10865_v50  ;;  %v10866_v48 = vunpack.i.l.bf16 %v10865_v50  ;;  %v10880_v21 = vpop.permute.xlu0 %10879  ;;  %v6718_v45 = vmax.f32 %v6645_v52, 0.0  ;;  %v6127_v32 = vsel %vm444_vm12, %v14939_v58, %v10856_v9 }
 0x6b5   : > { %v10882_v7 = vunpack.i.h.bf16 %v10880_v21  ;;  %v10881_v2 = vunpack.i.l.bf16 %v10880_v21  ;;  %v6473_v13 = vpop.f32.mrf.mxu3  ;;  %v10871_v52 = vunpack.i.l.bf16 %v15279_v29 }
 0x6b6   : > { %v6189_v24 = vsel %vm3777_vm15, %v6157_v44, %v10866_v48  ;;  %v6190_v38 = vsel %vm3777_vm15, %v6158_v37, %v10867_v34  ;;  %v6474_v48 = vadd.f32 %v15213_v8, %v6473_v13 }
 0x6b7   : > { %v6557_v60 = vpop.f32.mrf.mxu0  ;;  %v6097_v4 = vsel %vm3777_vm15, %v6065_v1, %v10881_v2  ;;  %v6098_v12 = vsel %vm3777_vm15, %v6066_v5, %v10882_v7  ;;  %v6231_v46 = vpack.c.bf16 %v6190_v38, %v6189_v24  ;;  %v15338_v24 = vpop.f32.mrf.mxu1 }
 0x6b8   : > { %v6558_v55 = vadd.f32 %v6557_v60, %v6469_v39  ;;  %v6236_v11 = vpack.c.bf16 %v6098_v12, %v6097_v4 }
 0x6b9   : > { %6589 = vmatmul.bf16.gmra.mxu0 %v6231_v46  ;;  %v10872_v46 = vunpack.i.h.bf16 %v15279_v29 }
 0x6ba   : > { %v6647_v31 = vadd.f32 %v15194_v63, %v6558_v55  ;;  %6510 = vmatmul.bf16.gmra.mxu3 %v6236_v11  ;;  %v6472_v63 = vadd.f32 %v15213_v8, %v6471_v6  ;;  %v10877_v55 = vunpack.i.h.bf16 %v15290_v28  ;;  %v10876_v11 = vunpack.i.l.bf16 %v15290_v28  ;;  %v9375_v28 = vld [vmem:[%s16472_s9 + $0x38] sm:$0xff] }
 0x6bb   : > { %v15319_v30 = vpop.permute.xlu1 %10884  ;;  %v15322_v22 = vpop.permute.xlu2 %10929  ;;  %8571 = vmatpush.bf16.msrb.mxu3 %v9375_v28 }
 0x6bc   : > { %v6719_v61 = vmax.f32 %v6647_v31, 0.0  ;;  %v10890_v27 = vpop.permute.xlu0 %10889 }
 0x6bd   : > { %v10892_v25 = vunpack.i.h.bf16 %v10890_v27  ;;  %v10891_v47 = vunpack.i.l.bf16 %v10890_v27  ;;  %v6476_v1 = vpop.f32.mrf.mxu3 }
 0x6be   : > { %v6748_v62 = vpack.c.bf16 %v6719_v61, %v6718_v45  ;;  %v6036_v61 = vsel %vm444_vm12, %v14994_v14, %v10872_v46 }
 0x6bf   : > { %v6560_v51 = vpop.f32.mrf.mxu0  ;;  %v6159_v54 = vsel %vm3744_vm14, %v6127_v32, %v10891_v47  ;;  %v6160_v34 = vsel %vm3744_vm14, %v6128_v41, %v10892_v25  ;;  %v6068_v13 = vsel %vm3744_vm14, %v6036_v61, %v10877_v55 }
 0x6c0   : > { %9216 = vmatmul.msk.bf16.gmra.mxu2 %vm444_vm12, %v6748_v62  ;;  %v6561_v50 = vadd.f32 %v6560_v51, %v6472_v63  ;;  %v6035_v62 = vsel %vm444_vm12, %v14998_v40, %v10871_v52  ;;  %v6656_v51 = vpop.f32.mrf.mxu1  ;;  %v10887_v40 = vunpack.i.h.bf16 %v15319_v30 }
 0x6c1   : > { %v6067_v9 = vsel %vm3744_vm14, %v6035_v62, %v10876_v11 }
 0x6c2   : > { %v6650_v17 = vadd.f32 %v6649_v19, %v6561_v50 }
 0x6c3   : > { %v10895_v43 = vpop.permute.xlu1 %10894  ;;  %v15336_v6 = vpop.permute.xlu2 %10934 }
 0x6c4   : > { %v10897_v39 = vunpack.i.h.bf16 %v10895_v43  ;;  %v10896_v20 = vunpack.i.l.bf16 %v10895_v43  ;;  %v10900_v58 = vpop.permute.xlu0 %10899  ;;  %v6720_v60 = vmax.f32 %v6650_v17, 0.0 }
 0x6c5   : > { %v6478_v27 = vpop.f32.mrf.mxu3  ;;  %v10902_v41 = vunpack.i.h.bf16 %v10900_v58  ;;  %v10901_v43 = vunpack.i.l.bf16 %v10900_v58  ;;  %v6477_v58 = vadd.f32 %v15213_v8, %v6476_v1 }
 0x6c6   : > { %v6191_v21 = vsel %vm3777_vm15, %v6159_v54, %v10896_v20  ;;  %v6192_v44 = vsel %vm3777_vm15, %v6160_v34, %v10897_v39  ;;  %v6479_v61 = vadd.f32 %v15213_v8, %v6478_v27  ;;  %v10916_v27 = vunpack.i.l.bf16 %v15288_v0 }
 0x6c7   : > { %v6562_v37 = vpop.f32.mrf.mxu0  ;;  %v6234_v7 = vpack.c.bf16 %v6192_v44, %v6191_v21  ;;  %v9383_v21 = vld [vmem:[%s16472_s9 + $0x78] sm:$0xff]  ;;  %v6130_v44 = vsel %vm444_vm12, %v14967_v36, %v10887_v40  ;;  %v6037_v17 = vsel %vm444_vm12, %v15049_v15, %v10901_v43  ;;  %v10937_v36 = vunpack.i.h.bf16 %v15336_v6 }
 0x6c8   : > { %v6563_v2 = vadd.f32 %v6562_v37, %v6474_v48  ;;  %v15368_v34 = vpop.f32.mrf.mxu1  ;;  %v10922_v48 = vunpack.i.h.bf16 %v15309_v59  ;;  %8660 = vmatpush.bf16.msrb.mxu0 %v9383_v21 }
 0x6c9   : > { %6594 = vmatmul.bf16.gmra.mxu0 %v6234_v7  ;;  %v6038_v7 = vsel %vm444_vm12, %v15044_v49, %v10902_v41  ;;  %v10917_v41 = vunpack.i.h.bf16 %v15288_v0 }
 0x6ca   : > { %v6652_v5 = vadd.f32 %v6651_v3, %v6563_v2  ;;  %v10886_v3 = vunpack.i.l.bf16 %v15319_v30  ;;  %v9385_v30 = vld [vmem:[%s16472_s9 + $0x88] sm:$0xff]  ;;  %v10921_v2 = vunpack.i.l.bf16 %v15309_v59  ;;  %v6162_v59 = vsel %vm3744_vm14, %v6130_v44, %v10922_v48 }
 0x6cb   : > { %v10905_v38 = vpop.permute.xlu1 %10904  ;;  %v15347_v31 = vpop.permute.xlu2 %10959  ;;  %8755 = vmatpush.bf16.msrb.mxu1 %v9385_v30  ;;  %v6132_v30 = vsel %vm444_vm12, %v15018_v23, %v10917_v41  ;;  %v6131_v44 = vsel %vm444_vm12, %v15024_v56, %v10916_v27 }
 0x6cc   : > { %v6721_v4 = vmax.f32 %v6652_v5, 0.0  ;;  %v10907_v50 = vunpack.i.h.bf16 %v10905_v38  ;;  %v10906_v39 = vunpack.i.l.bf16 %v10905_v38  ;;  %v6129_v37 = vsel %vm444_vm12, %v14971_v26, %v10886_v3 }
 0x6cd   : > { %v10936_v26 = vunpack.i.l.bf16 %v15336_v6  ;;  %v6161_v15 = vsel %vm3744_vm14, %v6129_v37, %v10921_v2 }
 0x6ce   : > { %v6749_v12 = vpack.c.bf16 %v6721_v4, %v6720_v60  ;;  %v6069_v5 = vsel %vm3744_vm14, %v6037_v17, %v10906_v39  ;;  %v6070_v38 = vsel %vm3744_vm14, %v6038_v7, %v10907_v50  ;;  %v10932_v7 = vunpack.i.h.bf16 %v15322_v22 }
 0x6cf   : > { %v6101_v11 = vsel %vm3777_vm15, %v6069_v5, %v10936_v26  ;;  %v10931_v17 = vunpack.i.l.bf16 %v15322_v22 }
 0x6d0   : > { %9217 = vmatmul.msk.bf16.gmra.mxu2 %vm444_vm12, %v6749_v12  ;;  %v6661_v28 = vpop.f32.mrf.mxu1 }
 0x6d2   : > { %v15345_v19 = vpop.permute.xlu0 %10939 }
 0x6d3   : > { %v10910_v45 = vpop.permute.xlu1 %10909  ;;  %v15366_v20 = vpop.permute.xlu2 %10974 }
 0x6d4   : > { %v10912_v53 = vunpack.i.h.bf16 %v10910_v45  ;;  %v10911_v29 = vunpack.i.l.bf16 %v10910_v45  ;;  %v6102_v45 = vsel %vm3777_vm15, %v6070_v38, %v10937_v36 }
 0x6d6   : > { %v6099_v25 = vsel %vm3777_vm15, %v6067_v9, %v10911_v29  ;;  %v6100_v47 = vsel %vm3777_vm15, %v6068_v13, %v10912_v53  ;;  %v6242_v13 = vpack.c.bf16 %v6102_v45, %v6101_v11 }
 0x6d7   : > { %v6239_v14 = vpack.c.bf16 %v6100_v47, %v6099_v25 }
 0x6d9   : > { %6515 = vmatmul.bf16.gmra.mxu3 %v6239_v14 }
 0x6da   : > { %v15360_v63 = vpop.permute.xlu0 %10944 }
 0x6db   : > { %v10925_v60 = vpop.permute.xlu1 %10924  ;;  %v15398_v53 = vpop.permute.xlu2 %10979  ;;  %v10947_v39 = vunpack.i.h.bf16 %v15360_v63 }
 0x6dc   : > { %v10927_v43 = vunpack.i.h.bf16 %v10925_v60  ;;  %v10926_v50 = vunpack.i.l.bf16 %v10925_v60 }
 0x6dd   : > { %v15364_v32 = vpop.f32.mrf.mxu3 }
 0x6de   : > { %v6040_v0 = vsel %vm444_vm12, %v15090_v10, %v10927_v43  ;;  %v6039_v37 = vsel %vm444_vm12, %v15096_v42, %v10926_v50  ;;  %v6482_v42 = vadd.f32 %v15213_v8, %v15364_v32 }
 0x6df   : > { %v6565_v54 = vpop.f32.mrf.mxu0  ;;  %v6071_v22 = vsel %vm3744_vm14, %v6039_v37, %v10931_v17  ;;  %v6072_v36 = vsel %vm3744_vm14, %v6040_v0, %v10932_v7 }
 0x6e0   : > { %v6566_v46 = vadd.f32 %v6565_v54, %v6477_v58  ;;  %v6164_v58 = vsel %vm3744_vm14, %v6132_v30, %v10947_v39  ;;  %v16715_v39 = vld [vmem:[#allocation9_spill] sm:$0xff] }
 0x6e2   : > { %v10950_v4 = vpop.permute.xlu0 %10949  ;;  %v6655_v29 = vadd.f32 %v15338_v24, %v6566_v46  ;;  %v10946_v24 = vunpack.i.l.bf16 %v15360_v63 }
 0x6e3   : > { %v10952_v49 = vunpack.i.h.bf16 %v10950_v4  ;;  %v10951_v12 = vunpack.i.l.bf16 %v10950_v4  ;;  %v10955_v40 = vpop.permute.xlu1 %10954  ;;  %v15422_v5 = vpop.permute.xlu2 %10989 }
 0x6e4   : > { %v6722_v14 = vmax.f32 %v6655_v29, 0.0  ;;  %v10956_v21 = vunpack.i.l.bf16 %v10955_v40  ;;  %v6163_v2 = vsel %vm3744_vm14, %v6131_v44, %v10946_v24  ;;  %v15426_v4 = vpop.f32.mrf.mxu1  ;;  %v10941_v29 = vunpack.i.l.bf16 %v15345_v19 }
 0x6e5   : > { %v6483_v1 = vpop.f32.mrf.mxu3  ;;  %v6193_v52 = vsel %vm3777_vm15, %v6161_v15, %v10951_v12  ;;  %v6194_v55 = vsel %vm3777_vm15, %v6162_v59, %v10952_v49  ;;  %v9374_v15 = vld [vmem:[%s16472_s9 + $0x30] sm:$0xff] }
 0x6e6   : > { %v6237_v62 = vpack.c.bf16 %v6194_v55, %v6193_v52  ;;  %v6195_v60 = vsel %vm3777_vm15, %v6163_v2, %v10956_v21  ;;  %v6484_v59 = vadd.f32 %v15213_v8, %v6483_v1  ;;  %8572 = vmatpush.bf16.msrb.mxu3 %v9374_v15  ;;  %v10981_v1 = vunpack.i.l.bf16 %v15398_v53 }
 0x6e7   : > { %v6567_v6 = vpop.f32.mrf.mxu0  ;;  %v6133_v24 = vsel %vm444_vm12, %v16715_v39, %v10941_v29  ;;  %v10977_v15 = vunpack.i.h.bf16 %v15366_v20  ;;  %v16717_v29 = vld [vmem:[#allocation13_spill] sm:$0xff] }
 0x6e8   : > { %v6568_v9 = vadd.f32 %v6567_v6, %v6479_v61  ;;  %6599 = vmatmul.bf16.gmra.mxu0 %v6237_v62  ;;  %v10942_v6 = vunpack.i.h.bf16 %v15345_v19  ;;  %v9382_v19 = vld [vmem:[%s16472_s9 + $0x70] sm:$0xff]  ;;  %v6165_v30 = vsel %vm3744_vm14, %v6133_v24, %v10981_v1 }
 0x6e9   : > { %6520 = vmatmul.bf16.gmra.mxu3 %v6242_v13  ;;  %v10982_v13 = vunpack.i.h.bf16 %v15398_v53  ;;  %8661 = vmatpush.bf16.msrb.mxu0 %v9382_v19 }
 0x6ea   : > { %v6657_v25 = vadd.f32 %v6656_v51, %v6568_v9  ;;  %v15401_v47 = vpop.permute.xlu0 %10964  ;;  %v10957_v51 = vunpack.i.h.bf16 %v10955_v40  ;;  %v6134_v53 = vsel %vm444_vm12, %v15098_v35, %v10942_v6 }
 0x6eb   : > { %v10995_v61 = vpop.permute.xlu2 %10994  ;;  %v10966_v43 = vunpack.i.l.bf16 %v15401_v47  ;;  %v6166_v21 = vsel %vm3744_vm14, %v6134_v53, %v10982_v13 }
 0x6ec   : > { %v6723_v3 = vmax.f32 %v6657_v25, 0.0  ;;  %v6196_v10 = vsel %vm3777_vm15, %v6164_v58, %v10957_v51  ;;  %v6666_v9 = vpop.f32.mrf.mxu1  ;;  %v10997_v41 = vunpack.i.h.bf16 %v10995_v61  ;;  %v10996_v27 = vunpack.i.l.bf16 %v10995_v61 }
 0x6ed   : > { %v15407_v48 = vpop.f32.mrf.mxu3  ;;  %v6240_v46 = vpack.c.bf16 %v6196_v10, %v6195_v60 }
 0x6ee   : > { %v6750_v54 = vpack.c.bf16 %v6723_v3, %v6722_v14  ;;  %v10962_v3 = vunpack.i.h.bf16 %v15347_v31  ;;  %v6197_v37 = vsel %vm3777_vm15, %v6165_v30, %v10996_v27  ;;  %v6487_v2 = vadd.f32 %v15213_v8, %v15407_v48  ;;  %v7144_v27 = vld [vmem:[#allocation3 + $0xa] sm:$0xff] }
 0x6ef   : > { %v6570_v63 = vpop.f32.mrf.mxu0 }
 0x6f0   : > { %9218 = vmatmul.msk.bf16.gmra.mxu2 %vm444_vm12, %v6750_v54  ;;  %v6571_v12 = vadd.f32 %v6570_v63, %v6482_v42  ;;  %v6042_v0 = vsel %vm444_vm12, %v15174_v33, %v10962_v3  ;;  %v6198_v63 = vsel %vm3777_vm15, %v6166_v21, %v10997_v41  ;;  %v5241_v42 = vld [vmem:[#allocation3 + $0x19a] sm:$0xff]  ;;  %v7143_v41 = vld [vmem:[#allocation3 + $0x2] sm:$0xff]  ;;  %v10991_v21 = vunpack.i.l.bf16 %v15422_v5 }
 0x6f1   : > { %v6243_v33 = vpack.c.bf16 %v6198_v63, %v6197_v37  ;;  %v11018_v19 = vpack.i.bf16 %v7144_v27, %v7143_v41 }
 0x6f2   : > { %v10970_v23 = vpop.permute.xlu0 %10969  ;;  %v6660_v11 = vadd.f32 %v15368_v34, %v6571_v12  ;;  %v10961_v34 = vunpack.i.l.bf16 %v15347_v31 }
 0x6f3   : > { %v10972_v38 = vunpack.i.h.bf16 %v10970_v23  ;;  %v10971_v56 = vunpack.i.l.bf16 %v10970_v23  ;;  %v10985_v14 = vpop.permute.xlu1 %10984  ;;  %11019 = vrot.lane.b32.xlu0 %v11018_v19, %s11596_s27 }
 0x6f4   : > { %v6724_v25 = vmax.f32 %v6660_v11, 0.0  ;;  %v10987_v54 = vunpack.i.h.bf16 %v10985_v14  ;;  %v10986_v51 = vunpack.i.l.bf16 %v10985_v14  ;;  %v6041_v35 = vsel %vm444_vm12, %v15186_v18, %v10961_v34  ;;  %v9373_v34 = vld [vmem:[%s16472_s9 + $0x28] sm:$0xff] }
 0x6f5   : > { %v6103_v26 = vsel %vm3777_vm15, %v6071_v22, %v10971_v56  ;;  %v6104_v49 = vsel %vm3777_vm15, %v6072_v36, %v10972_v38  ;;  %v6488_v52 = vpop.f32.mrf.mxu3  ;;  %v6073_v7 = vsel %vm3744_vm14, %v6041_v35, %v10966_v43  ;;  %v6669_v56 = vpop.f32.mrf.mxu1  ;;  %v5242_v22 = vld [vmem:[#allocation3 + $0x1a2] sm:$0xff]  ;;  %8573 = vmatpush.bf16.msrb.mxu3 %v9373_v34  ;;  %v9384_v34 = vld [vmem:[%s16472_s9 + $0x80] sm:$0xff] }
 0x6f6   : > { %v6245_v55 = vpack.c.bf16 %v6104_v49, %v6103_v26  ;;  %v6105_v58 = vsel %vm3777_vm15, %v6073_v7, %v10986_v51  ;;  %v6489_v18 = vadd.f32 %v15213_v8, %v6488_v52  ;;  %v6250_v49 = vpack.c.bf16 %v5242_v22, %v5241_v42  ;;  %v15492_v51 = vld [vmem:[%s16471_s8] ss:$0 sm:$0xff]  ;;  %8756 = vmatpush.bf16.msrb.mxu1 %v9384_v34 }
 0x6f7   : > { %v6572_v32 = vpop.f32.mrf.mxu0 }
 0x6f8   : > { %6604 = vmatmul.bf16.gmra.mxu0 %v6240_v46  ;;  %v6573_v45 = vadd.f32 %v6572_v32, %v6484_v59  ;;  %9205 = vmatmul.msk.bf16.gmra.mxu1 %vm444_vm12, %v6250_v49  ;;  %v10976_v59 = vunpack.i.l.bf16 %v15366_v20 }
 0x6f9   : > { %6525 = vmatmul.bf16.gmra.mxu3 %v6245_v55 }
 0x6fa   : > { %v6662_v62 = vadd.f32 %v6661_v28, %v6573_v45  ;;  %v10967_v28 = vunpack.i.h.bf16 %v15401_v47  ;;  %v11000_v44 = vpop.permute.xlu0 %10999  ;;  %v6135_v13 = vsel %vm444_vm12, %v16717_v29, %v10976_v59  ;;  %v7111_v29 = vld [vmem:[#allocation3 + $0x1] sm:$0xff] }
 0x6fb   : > { %v11002_v52 = vunpack.i.h.bf16 %v11000_v44  ;;  %v11001_v55 = vunpack.i.l.bf16 %v11000_v44  ;;  %v11010_v44 = vpop.permute.xlu1 %11009 }
 0x6fc   : > { %v6725_v40 = vmax.f32 %v6662_v62, 0.0  ;;  %v6074_v17 = vsel %vm3744_vm14, %v6042_v0, %v10967_v28 }
 0x6fd   : > { %v6491_v47 = vpop.f32.mrf.mxu3  ;;  %v6106_v23 = vsel %vm3777_vm15, %v6074_v17, %v10987_v54  ;;  %v6671_v1 = vpop.f32.mrf.mxu1  ;;  %v6137_v17 = vsel %vm444_vm12, %v15233_v57, %v10991_v21 }
 0x6fe   : > { %v6751_v50 = vpack.c.bf16 %v6725_v40, %v6724_v25  ;;  %v6248_v60 = vpack.c.bf16 %v6106_v23, %v6105_v58  ;;  %v6167_v25 = vsel %vm3744_vm14, %v6135_v13, %v11001_v55  ;;  %v6492_v3 = vadd.f32 %v15213_v8, %v6491_v47  ;;  %v16718_v23 = vld [vmem:[#allocation10_spill] sm:$0xff]  ;;  %v7112_v13 = vld [vmem:[#allocation3 + $0x9] sm:$0xff] }
 0x6ff   : > { %v6575_v31 = vpop.f32.mrf.mxu0  ;;  %v11011_v58 = vunpack.i.l.bf16 %v11010_v44 }
 0x700   : > { %9219 = vmatmul.msk.bf16.gmra.mxu2 %vm444_vm12, %v6751_v50  ;;  %v6576_v38 = vadd.f32 %v6575_v31, %v6487_v2  ;;  %v10992_v31 = vunpack.i.h.bf16 %v15422_v5  ;;  %v11012_v2 = vunpack.i.h.bf16 %v11010_v44  ;;  %v10546_v5 = vunpack.i.l.bf16 %v16718_v23 }
 0x702   : > { %v6665_v36 = vadd.f32 %v15426_v4, %v6576_v38  ;;  %v11005_v48 = vpop.permute.xlu0 %11004  ;;  %v16716_v4 = vld [vmem:[#allocation14_spill] sm:$0xff]  ;;  %v6138_v7 = vsel %vm444_vm12, %v15224_v16, %v10992_v31  ;;  %v10547_v38 = vunpack.i.h.bf16 %v16718_v23  ;;  %v6169_v16 = vsel %vm3744_vm14, %v6137_v17, %v10546_v5  ;;  %v11544_v17 = vld [vmem:[#allocation4 + $0x18] sm:$0xff] }
 0x703   : > { %v11007_v45 = vunpack.i.h.bf16 %v11005_v48  ;;  %v11006_v61 = vunpack.i.l.bf16 %v11005_v48  ;;  %v6136_v6 = vsel %vm444_vm12, %v16716_v4, %v10977_v15  ;;  %v6201_v57 = vsel %vm3777_vm15, %v6169_v16, %v11011_v58 }
 0x704   : > { %v6726_v32 = vmax.f32 %v6665_v36, 0.0  ;;  %v6168_v14 = vsel %vm3744_vm14, %v6136_v6, %v11002_v52  ;;  %v6170_v42 = vsel %vm3744_vm14, %v6138_v7, %v10547_v38  ;;  %v9381_v36 = vld [vmem:[%s16472_s9 + $0x68] sm:$0xff] }
 0x705   : > { %v6493_v12 = vpop.f32.mrf.mxu3  ;;  %v6199_v20 = vsel %vm3777_vm15, %v6167_v25, %v11006_v61  ;;  %v6200_v40 = vsel %vm3777_vm15, %v6168_v14, %v11007_v45  ;;  %v6674_v30 = vpop.f32.mrf.mxu1  ;;  %v6202_v22 = vsel %vm3777_vm15, %v6170_v42, %v11012_v2  ;;  %8662 = vmatpush.bf16.msrb.mxu0 %v9381_v36  ;;  %v11542_v52 = vld [vmem:[#allocation4 + $0x8] sm:$0xff]  ;;  %v11013_v25 = vpack.i.bf16 %v7112_v13, %v7111_v29 }
 0x706   : > { %v6246_v50 = vpack.c.bf16 %v6200_v40, %v6199_v20  ;;  %v6494_v53 = vadd.f32 %v15213_v8, %v6493_v12  ;;  %v6249_v15 = vpack.c.bf16 %v6202_v22, %v6201_v57 }
 0x707   : > { %v6577_v10 = vpop.f32.mrf.mxu0  ;;  %11014 = vrot.lane.b32.xlu2 %v11013_v25, %s11597_s28 }
 0x708   : > { %6609 = vmatmul.bf16.gmra.mxu0 %v6243_v33  ;;  %v6578_v26 = vadd.f32 %v6577_v10, %v6489_v18  ;;  %v11541_v18 = vld [vmem:[#allocation4] sm:$0xff] }
 0x709   : > { %6530 = vmatmul.bf16.gmra.mxu3 %v6248_v60 }
 0x70a   : > { %v6667_v46 = vadd.f32 %v6666_v9, %v6578_v26 }
 0x70c   : > { %v6727_v11 = vmax.f32 %v6667_v46, 0.0 }
 0x70d   : > { %v6496_v28 = vpop.f32.mrf.mxu3  ;;  %v6676_v48 = vpop.f32.mrf.mxu1 }
 0x70e   : > { %v6752_v62 = vpack.c.bf16 %v6727_v11, %v6726_v32  ;;  %v6497_v26 = vadd.f32 %v15213_v8, %v6496_v28 }
 0x70f   : > { %v6580_v9 = vpop.f32.mrf.mxu0 }
 0x710   : > { %9220 = vmatmul.msk.bf16.gmra.mxu2 %vm444_vm12, %v6752_v62  ;;  %v6581_v43 = vadd.f32 %v6580_v9, %v6492_v3 }
 0x712   : > { %v6670_v24 = vadd.f32 %v6669_v56, %v6581_v43  ;;  %v11543_v43 = vld [vmem:[#allocation4 + $0x10] sm:$0xff] }
 0x714   : > { %v6728_v35 = vmax.f32 %v6670_v24, 0.0 }
 0x715   : > { %v6498_v33 = vpop.f32.mrf.mxu3  ;;  %v6679_v14 = vpop.f32.mrf.mxu1 }
 0x716   : > { %v6499_v59 = vadd.f32 %v15213_v8, %v6498_v33 }
 0x717   : > { %v6582_v39 = vpop.f32.mrf.mxu0 }
 0x718   : > { %6614 = vmatmul.bf16.gmra.mxu0 %v6246_v50  ;;  %v6583_v54 = vadd.f32 %v6582_v39, %v6494_v53 }
 0x71a   : > { %v6672_v47 = vadd.f32 %v6671_v1, %v6583_v54 }
 0x71c   : > { %v6839_v0 = vpop.f32.mrf.mxu2  ;;  %v6729_v37 = vmax.f32 %v6672_v47, 0.0 }
 0x71d   : > { %v6840_v63 = vadd.f32 %v15492_v51, %v6839_v0  ;;  %v6501_v61 = vpop.f32.mrf.mxu3  ;;  %v6681_v53 = vpop.f32.mrf.mxu1 }
 0x71e   : > { %v6753_v56 = vpack.c.bf16 %v6729_v37, %v6728_v35  ;;  %v6502_v39 = vadd.f32 %v15213_v8, %v6501_v61  ;;  %v9372_v35 = vld [vmem:[%s16472_s9 + $0x20] sm:$0xff] }
 0x71f   : > { %v6919_v60 = vadd.f32 %v11541_v18, %v6840_v63  ;;  %v6585_v10 = vpop.f32.mrf.mxu0  ;;  %8574 = vmatpush.bf16.msrb.mxu3 %v9372_v35 }
 0x720   : > { %9221 = vmatmul.msk.bf16.gmra.mxu2 %vm444_vm12, %v6753_v56  ;;  %v6586_v12 = vadd.f32 %v6585_v10, %v6497_v26  ;;  %v9380_v10 = vld [vmem:[%s16472_s9 + $0x60] sm:$0xff] }
 0x721   : > { %6951 = vst.msk [vmem:[#allocation4] sm:$0xff] %vm444_vm12, %v6919_v60  ;;  %8663 = vmatpush.bf16.msrb.mxu0 %v9380_v10 }
 0x722   : > { %v6675_v62 = vadd.f32 %v6674_v30, %v6586_v12 }
 0x724   : > { %v6841_v49 = vpop.f32.mrf.mxu2  ;;  %v6730_v9 = vmax.f32 %v6675_v62, 0.0  ;;  %v15561_v62 = vld [vmem:[%s16469_s6] ss:$0 sm:$0xff] }
 0x725   : > { %v6842_v46 = vadd.f32 %v15492_v51, %v6841_v49  ;;  %v6503_v41 = vpop.f32.mrf.mxu3  ;;  %v6684_v16 = vpop.f32.mrf.mxu1 }
 0x726   : > { %v6504_v63 = vadd.f32 %v15213_v8, %v6503_v41 }
 0x727   : > { %v6920_v55 = vadd.f32 %v11542_v52, %v6842_v46  ;;  %v6587_v11 = vpop.f32.mrf.mxu0 }
 0x728   : > { %6619 = vmatmul.bf16.gmra.mxu0 %v6249_v15  ;;  %v6983_v32 = vld [vmem:[#allocation4] sm:$0xff]  ;;  %v6588_v4 = vadd.f32 %v6587_v11, %v6499_v59 }
 0x729   : > { %v7015_v45 = vmax.f32 %v6983_v32, 0.0  ;;  %6952 = vst.msk [vmem:[#allocation4 + $0x8] sm:$0xff] %vm444_vm12, %v6920_v55 }
 0x72a   : > { %v6677_v6 = vadd.f32 %v6676_v48, %v6588_v4  ;;  %v11545_v48 = vld [vmem:[#allocation4 + $0x20] sm:$0xff] }
 0x72b   : > { %7047 = vst.msk [vmem:[#allocation3 + $0x19] sm:$0xff] %vm444_vm12, %v7015_v45 }
 0x72c   : > { %v6731_v1 = vmax.f32 %v6677_v6, 0.0  ;;  %v11547_v6 = vld [vmem:[#allocation4 + $0x28] sm:$0xff] }
 0x72d   : > { %v6506_v7 = vpop.f32.mrf.mxu3  ;;  %v6686_v61 = vpop.f32.mrf.mxu1 }
 0x72e   : > { %v6754_v20 = vpack.c.bf16 %v6731_v1, %v6730_v9  ;;  %v6507_v55 = vadd.f32 %v15213_v8, %v6506_v7 }
 0x730   : > { %v6984_v40 = vld [vmem:[#allocation4 + $0x8] sm:$0xff]  ;;  %9222 = vmatmul.msk.bf16.gmra.mxu2 %vm444_vm12, %v6754_v20 }
 0x731   : > { %v7016_v3 = vmax.f32 %v6984_v40, 0.0 }
 0x732   : > { %v15526_v24 = vld [vmem:[#allocation3 + $0x19] sm:$0xff] }
 0x733   : > { %7048 = vst.msk [vmem:[#allocation3 + $0x21] sm:$0xff] %vm444_vm12, %v7016_v3  ;;  %v6844_v27 = vpop.f32.mrf.mxu2  ;;  %v15543_v60 = vld [vmem:[#allocation3 + $0x18] sm:$0xff] }
 0x734   : > { %v6845_v28 = vadd.f32 %v15492_v51, %v6844_v27 }
 0x735   : > { %v6508_v15 = vpop.f32.mrf.mxu3 }
 0x736   : > { %v6921_v50 = vadd.f32 %v11543_v43, %v6845_v28  ;;  %v6590_v19 = vpop.f32.mrf.mxu0  ;;  %v6509_v4 = vadd.f32 %v15561_v62, %v6508_v15 }
 0x737   : > { %v6591_v30 = vadd.f32 %v6590_v19, %v6502_v39  ;;  %v9371_v39 = vld [vmem:[%s16472_s9 + $0x18] sm:$0xff] }
 0x738   : > { %6953 = vst.msk [vmem:[#allocation4 + $0x10] sm:$0xff] %vm444_vm12, %v6921_v50  ;;  %8575 = vmatpush.bf16.msrb.mxu3 %v9371_v39 }
 0x739   : > { %v6680_v38 = vadd.f32 %v6679_v14, %v6591_v30 }
 0x73a   : > { %v7145_v54 = vld [vmem:[#allocation3 + $0x1a] sm:$0xff]  ;;  %v7146_v31 = vld [vmem:[#allocation3 + $0x22] sm:$0xff] }
 0x73b   : > { %v15528_v21 = vld [vmem:[#allocation3 + $0x21] sm:$0xff]  ;;  %v6846_v44 = vpop.f32.mrf.mxu2  ;;  %v11028_v47 = vpack.i.bf16 %v7146_v31, %v7145_v54  ;;  %v6732_v42 = vmax.f32 %v6680_v38, 0.0  ;;  %v6689_v31 = vpop.f32.mrf.mxu1 }
 0x73c   : > { %v11023_v0 = vpack.i.bf16 %v15528_v21, %v15526_v24  ;;  %v6847_v37 = vadd.f32 %v15492_v51, %v6846_v44  ;;  %v15540_v56 = vld [vmem:[#allocation3 + $0x20] sm:$0xff] }
 0x73d   : > { %11029 = vrot.lane.b32.xlu1 %v11028_v47, %s11596_s27  ;;  %v11033_v36 = vpack.i.bf16 %v15540_v56, %v15543_v60  ;;  %v6511_v20 = vpop.f32.mrf.mxu3  ;;  %v11548_v44 = vld [vmem:[#allocation4 + $0x30] sm:$0xff] }
 0x73e   : > { %11024 = vrot.lane.b32.xlu0 %v11023_v0, %s11597_s28  ;;  %v6922_v2 = vadd.f32 %v11544_v17, %v6847_v37  ;;  %v6592_v58 = vpop.f32.mrf.mxu0 }
 0x73f   : > { %v6985_v23 = vld [vmem:[#allocation4 + $0x10] sm:$0xff]  ;;  %v6593_v5 = vadd.f32 %v6592_v58, %v6504_v63 }
 0x740   : > { %v7017_v33 = vmax.f32 %v6985_v23, 0.0  ;;  %6954 = vst.msk [vmem:[#allocation4 + $0x18] sm:$0xff] %vm444_vm12, %v6922_v2  ;;  %v11549_v23 = vld [vmem:[#allocation4 + $0x38] sm:$0xff] }
 0x741   : > { %v6682_v18 = vadd.f32 %v6681_v53, %v6593_v5 }
 0x742   : > { %7049 = vst.msk [vmem:[#allocation3 + $0x31] sm:$0xff] %vm444_vm12, %v7017_v33 }
 0x743   : > { %v6733_v57 = vmax.f32 %v6682_v18, 0.0  ;;  %v6849_v22 = vpop.f32.mrf.mxu2  ;;  %v6691_v5 = vpop.f32.mrf.mxu1 }
 0x744   : > { %v6850_v26 = vadd.f32 %v15492_v51, %v6849_v22 }
 0x745   : > { %v6755_v49 = vpack.c.bf16 %v6733_v57, %v6732_v42  ;;  %11039 = vrot.lane.b32.xlu1 %v11028_v47, %s11597_s28  ;;  %v6513_v7 = vpop.f32.mrf.mxu3 }
 0x746   : > { %11034 = vrot.lane.b32.xlu0 %v11033_v36, %s11598_s16  ;;  %v6923_v12 = vadd.f32 %v11545_v48, %v6850_v26  ;;  %v6595_v46 = vpop.f32.mrf.mxu0 }
 0x747   : > { %v6986_v59 = vld [vmem:[#allocation4 + $0x18] sm:$0xff]  ;;  %9223 = vmatmul.msk.bf16.gmra.mxu2 %vm444_vm12, %v6755_v49  ;;  %v6596_v32 = vadd.f32 %v6595_v46, %v6507_v55  ;;  %v6512_v46 = vadd.f32 %v15561_v62, %v6511_v20 }
 0x748   : > { %v7018_v52 = vmax.f32 %v6986_v59, 0.0  ;;  %6955 = vst.msk [vmem:[#allocation4 + $0x20] sm:$0xff] %vm444_vm12, %v6923_v12  ;;  %v9379_v49 = vld [vmem:[%s16472_s9 + $0x58] sm:$0xff] }
 0x749   : > { %v6685_v1 = vadd.f32 %v6684_v16, %v6596_v32  ;;  %v15565_v14 = vld [vmem:[#allocation3 + $0x31] sm:$0xff]  ;;  %8664 = vmatpush.bf16.msrb.mxu0 %v9379_v49 }
 0x74a   : > { %7050 = vst.msk [vmem:[#allocation3 + $0x39] sm:$0xff] %vm444_vm12, %v7018_v52  ;;  %v15585_v63 = vld [vmem:[#allocation3 + $0x30] sm:$0xff] }
 0x74b   : > { %v6851_v11 = vpop.f32.mrf.mxu2  ;;  %v6734_v50 = vmax.f32 %v6685_v1, 0.0  ;;  %v6694_v55 = vpop.f32.mrf.mxu1 }
 0x74c   : > { %v6852_v45 = vadd.f32 %v15492_v51, %v6851_v11 }
 0x74e   : > { %v6924_v29 = vadd.f32 %v11547_v6, %v6852_v45  ;;  %v6597_v13 = vpop.f32.mrf.mxu0 }
 0x74f   : > { %v6987_v9 = vld [vmem:[#allocation4 + $0x20] sm:$0xff]  ;;  %v6598_v8 = vadd.f32 %v6597_v13, %v6509_v4 }
 0x750   : > { %v7019_v25 = vmax.f32 %v6987_v9, 0.0  ;;  %6956 = vst.msk [vmem:[#allocation4 + $0x28] sm:$0xff] %vm444_vm12, %v6924_v29 }
 0x751   : > { %v6687_v40 = vadd.f32 %v6686_v61, %v6598_v8  ;;  %v7335_v3 = vld [vmem:[#allocation3 + $0x32] sm:$0xff]  ;;  %v7336_v34 = vld [vmem:[#allocation3 + $0x3a] sm:$0xff]  ;;  %v6514_v61 = vadd.f32 %v15561_v62, %v6513_v7 }
 0x752   : > { %v15567_v41 = vld [vmem:[#allocation3 + $0x39] sm:$0xff]  ;;  %7051 = vst.msk [vmem:[#allocation3 + $0x49] sm:$0xff] %vm444_vm12, %v7019_v25  ;;  %v8329_v27 = vpack.c.bf16 %v7336_v34, %v7335_v3  ;;  %v11048_v43 = vpack.i.bf16 %v7336_v34, %v7335_v3 }
 0x753   : > { %v11058_v28 = vpack.i.bf16 %v15567_v41, %v15565_v14  ;;  %v6735_v19 = vmax.f32 %v6687_v40, 0.0  ;;  %v6854_v53 = vpop.f32.mrf.mxu2  ;;  %v15582_v37 = vld [vmem:[#allocation3 + $0x38] sm:$0xff] }
 0x754   : > { %v6855_v54 = vadd.f32 %v15492_v51, %v6854_v53  ;;  %9302 = vmatmul.msk.bf16.vlgmr.msrb.gmra.mxu1 %vm444_vm12, %v8329_v27  ;;  %11049 = vrot.lane.b32.xlu2 %v11048_v43, %s11596_s27  ;;  %v11063_v2 = vpack.i.bf16 %v15582_v37, %v15585_v63  ;;  %v6696_v27 = vpop.f32.mrf.mxu1 }
 0x755   : > { %11059 = vrot.lane.b32.xlu0 %v11058_v28, %s11598_s16  ;;  %v6756_v30 = vpack.c.bf16 %v6735_v19, %v6734_v50  ;;  %11044 = vrot.lane.b32.xlu1 %v11058_v28, %s11597_s28  ;;  %v11550_v19 = vld [vmem:[#allocation4 + $0x40] sm:$0xff] }
 0x756   : > { %v6925_v47 = vadd.f32 %v11548_v44, %v6855_v54 }
 0x757   : > { %v6988_v0 = vld [vmem:[#allocation4 + $0x28] sm:$0xff]  ;;  %9224 = vmatmul.msk.bf16.gmra.mxu2 %vm444_vm12, %v6756_v30 }
 0x758   : > { %v7020_v35 = vmax.f32 %v6988_v0, 0.0  ;;  %6957 = vst.msk [vmem:[#allocation4 + $0x30] sm:$0xff] %vm444_vm12, %v6925_v47 }
 0x759   : > { %v15593_v10 = vld [vmem:[#allocation3 + $0x49] sm:$0xff] }
 0x75a   : > { %7052 = vst.msk [vmem:[#allocation3 + $0x51] sm:$0xff] %vm444_vm12, %v7020_v35  ;;  %v15610_v11 = vld [vmem:[#allocation3 + $0x48] sm:$0xff] }
 0x75b   : > { %v6856_v17 = vpop.f32.mrf.mxu2 }
 0x75c   : > { %v6857_v58 = vadd.f32 %v15492_v51, %v6856_v17  ;;  %11054 = vrot.lane.b32.xlu2 %v11063_v2, %s11596_s27  ;;  %v6516_v48 = vpop.f32.mrf.mxu3 }
 0x75d   : > { %11064 = vrot.lane.b32.xlu1 %v11063_v2, %s11598_s16  ;;  %v6517_v39 = vadd.f32 %v15561_v62, %v6516_v48 }
 0x75e   : > { %v6926_v38 = vadd.f32 %v11549_v23, %v6857_v58  ;;  %v9370_v23 = vld [vmem:[%s16472_s9 + $0x10] sm:$0xff] }
 0x75f   : > { %v6989_v33 = vld [vmem:[#allocation4 + $0x30] sm:$0xff]  ;;  %8576 = vmatpush.bf16.msrb.mxu3 %v9370_v23 }
 0x760   : > { %v7021_v18 = vmax.f32 %v6989_v33, 0.0  ;;  %6958 = vst.msk [vmem:[#allocation4 + $0x38] sm:$0xff] %vm444_vm12, %v6926_v38 }
 0x761   : > { %v7337_v16 = vld [vmem:[#allocation3 + $0x4a] sm:$0xff]  ;;  %v7338_v42 = vld [vmem:[#allocation3 + $0x52] sm:$0xff] }
 0x762   : > { %v15595_v57 = vld [vmem:[#allocation3 + $0x51] sm:$0xff]  ;;  %7053 = vst.msk [vmem:[#allocation3 + $0x61] sm:$0xff] %vm444_vm12, %v7021_v18  ;;  %v8332_v22 = vpack.c.bf16 %v7338_v42, %v7337_v16  ;;  %v11078_v26 = vpack.i.bf16 %v7338_v42, %v7337_v16 }
 0x763   : > { %v11088_v36 = vpack.i.bf16 %v15595_v57, %v15593_v10  ;;  %v15608_v59 = vld [vmem:[#allocation3 + $0x50] sm:$0xff]  ;;  %v11551_v18 = vld [vmem:[#allocation4 + $0x48] sm:$0xff] }
 0x764   : > { %9303 = vmatmul.msk.bf16.gmra.mxu1 %vm444_vm12, %v8332_v22  ;;  %11079 = vrot.lane.b32.xlu0 %v11078_v26, %s11596_s27  ;;  %v11083_v45 = vpack.i.bf16 %v15608_v59, %v15610_v11  ;;  %v6518_v29 = vpop.f32.mrf.mxu3 }
 0x765   : > { %v6600_v12 = vpop.f32.mrf.mxu0  ;;  %11069 = vrot.lane.b32.xlu2 %v11048_v43, %s11597_s28  ;;  %11089 = vrot.lane.b32.xlu1 %v11088_v36, %s11598_s16  ;;  %v6519_v17 = vadd.f32 %v15561_v62, %v6518_v29 }
 0x766   : > { %v6601_v32 = vadd.f32 %v6600_v12, %v6512_v46 }
 0x767   : > { %v6990_v15 = vld [vmem:[#allocation4 + $0x38] sm:$0xff] }
 0x768   : > { %v7022_v52 = vmax.f32 %v6990_v15, 0.0  ;;  %v6690_v6 = vadd.f32 %v6689_v31, %v6601_v32  ;;  %v9378_v15 = vld [vmem:[%s16472_s9 + $0x50] sm:$0xff] }
 0x769   : > { %v15630_v47 = vld [vmem:[#allocation3 + $0x61] sm:$0xff]  ;;  %8665 = vmatpush.bf16.msrb.mxu0 %v9378_v15 }
 0x76a   : > { %7054 = vst.msk [vmem:[#allocation3 + $0x69] sm:$0xff] %vm444_vm12, %v7022_v52  ;;  %v6736_v1 = vmax.f32 %v6690_v6, 0.0  ;;  %v15634_v7 = vld [vmem:[#allocation3 + $0x60] sm:$0xff] }
 0x76b   : > { %v11552_v6 = vld [vmem:[#allocation4 + $0x50] sm:$0xff] }
 0x76c   : > { %11084 = vrot.lane.b32.xlu0 %v11083_v45, %s11596_s27  ;;  %v6521_v54 = vpop.f32.mrf.mxu3 }
 0x76d   : > { %v6602_v4 = vpop.f32.mrf.mxu0  ;;  %11074 = vrot.lane.b32.xlu2 %v11088_v36, %s11597_s28 }
 0x76e   : > { %v6603_v13 = vadd.f32 %v6602_v4, %v6514_v61 }
 0x770   : > { %v6692_v9 = vadd.f32 %v6691_v5, %v6603_v13  ;;  %v6699_v5 = vpop.f32.mrf.mxu1  ;;  %v6522_v13 = vadd.f32 %v15561_v62, %v6521_v54 }
 0x771   : > { %v7339_v25 = vld [vmem:[#allocation3 + $0x62] sm:$0xff]  ;;  %v7340_v20 = vld [vmem:[#allocation3 + $0x6a] sm:$0xff] }
 0x772   : > { %v6737_v8 = vmax.f32 %v6692_v9, 0.0  ;;  %v8335_v3 = vpack.c.bf16 %v7340_v20, %v7339_v25  ;;  %v11108_v34 = vpack.i.bf16 %v7340_v20, %v7339_v25  ;;  %v15626_v31 = vld [vmem:[#allocation3 + $0x69] sm:$0xff] }
 0x773   : > { %v6859_v40 = vpop.f32.mrf.mxu2  ;;  %v15628_v30 = vld [vmem:[#allocation3 + $0x68] sm:$0xff]  ;;  %v11118_v35 = vpack.i.bf16 %v15626_v31, %v15630_v47 }
 0x774   : > { %v6757_v28 = vpack.c.bf16 %v6737_v8, %v6736_v1  ;;  %v6860_v43 = vadd.f32 %v15492_v51, %v6859_v40  ;;  %11099 = vrot.lane.b32.xlu0 %v11078_v26, %s11597_s28  ;;  %9304 = vmatmul.msk.bf16.gmra.mxu1 %vm444_vm12, %v8335_v3  ;;  %v11113_v58 = vpack.i.bf16 %v15628_v30, %v15634_v7  ;;  %v6523_v48 = vpop.f32.mrf.mxu3 }
 0x775   : > { %v6605_v50 = vpop.f32.mrf.mxu0  ;;  %11094 = vrot.lane.b32.xlu2 %v11083_v45, %s11598_s16  ;;  %11109 = vrot.lane.b32.xlu1 %v11108_v34, %s11596_s27  ;;  %v6524_v8 = vadd.f32 %v15561_v62, %v6523_v48 }
 0x776   : > { %v6927_v53 = vadd.f32 %v11550_v19, %v6860_v43  ;;  %9225 = vmatmul.msk.bf16.gmra.mxu2 %vm444_vm12, %v6757_v28  ;;  %v6606_v44 = vadd.f32 %v6605_v50, %v6517_v39 }
 0x778   : > { %6959 = vst.msk [vmem:[#allocation4 + $0x40] sm:$0xff] %vm444_vm12, %v6927_v53  ;;  %v6695_v33 = vadd.f32 %v6694_v55, %v6606_v44  ;;  %v6701_v61 = vpop.f32.mrf.mxu1 }
 0x77a   : > { %v6738_v49 = vmax.f32 %v6695_v33, 0.0 }
 0x77b   : > { %v6861_v0 = vpop.f32.mrf.mxu2 }
 0x77c   : > { %v6862_v2 = vadd.f32 %v15492_v51, %v6861_v0  ;;  %11104 = vrot.lane.b32.xlu0 %v11118_v35, %s11597_s28  ;;  %v6526_v1 = vpop.f32.mrf.mxu3 }
 0x77d   : > { %v6607_v38 = vpop.f32.mrf.mxu0  ;;  %11119 = vrot.lane.b32.xlu2 %v11118_v35, %s11598_s16  ;;  %11114 = vrot.lane.b32.xlu1 %v11113_v58, %s11596_s27 }
 0x77e   : > { %v6928_v16 = vadd.f32 %v11551_v18, %v6862_v2  ;;  %v6608_v42 = vadd.f32 %v6607_v38, %v6519_v17 }
 0x77f   : > { %v6991_v22 = vld [vmem:[#allocation4 + $0x40] sm:$0xff] }
 0x780   : > { %v7023_v36 = vmax.f32 %v6991_v22, 0.0  ;;  %6960 = vst.msk [vmem:[#allocation4 + $0x48] sm:$0xff] %vm444_vm12, %v6928_v16  ;;  %v6697_v26 = vadd.f32 %v6696_v27, %v6608_v42  ;;  %v11553_v27 = vld [vmem:[#allocation4 + $0x58] sm:$0xff]  ;;  %v6704_v54 = vpop.f32.mrf.mxu1  ;;  %v9369_v22 = vld [vmem:[%s16472_s9 + $0x8] sm:$0xff] }
 0x781   : > { %8577 = vmatpush.bf16.msrb.mxu3 %v9369_v22 }
 0x782   : > { %7055 = vst.msk [vmem:[#allocation3 + $0x79] sm:$0xff] %vm444_vm12, %v7023_v36  ;;  %v6739_v12 = vmax.f32 %v6697_v26, 0.0  ;;  %v11554_v36 = vld [vmem:[#allocation4 + $0x60] sm:$0xff] }
 0x783   : > { %v6864_v52 = vpop.f32.mrf.mxu2 }
 0x784   : > { %v6758_v46 = vpack.c.bf16 %v6739_v12, %v6738_v49  ;;  %11124 = vrot.lane.b32.xlu0 %v11113_v58, %s11598_s16  ;;  %v6865_v55 = vadd.f32 %v15492_v51, %v6864_v52  ;;  %v6528_v33 = vpop.f32.mrf.mxu3  ;;  %v6527_v49 = vadd.f32 %v15561_v62, %v6526_v1  ;;  %v11555_v1 = vld [vmem:[#allocation4 + $0x68] sm:$0xff] }
 0x785   : > { %v6610_v32 = vpop.f32.mrf.mxu0  ;;  %11129 = vrot.lane.b32.xlu1 %v11108_v34, %s11597_s28 }
 0x786   : > { %9226 = vmatmul.msk.bf16.gmra.mxu2 %vm444_vm12, %v6758_v46  ;;  %v6929_v29 = vadd.f32 %v11552_v6, %v6865_v55  ;;  %v6611_v9 = vadd.f32 %v6610_v32, %v6522_v13  ;;  %v9368_v55 = vld [vmem:[%s16472_s9] sm:$0xff] }
 0x787   : > { %v6992_v45 = vld [vmem:[#allocation4 + $0x48] sm:$0xff]  ;;  %8578 = vmatpush.bf16.msrb.mxu3 %v9368_v55 }
 0x788   : > { %v7024_v4 = vmax.f32 %v6992_v45, 0.0  ;;  %6961 = vst.msk [vmem:[#allocation4 + $0x50] sm:$0xff] %vm444_vm12, %v6929_v29  ;;  %v6700_v3 = vadd.f32 %v6699_v5, %v6611_v9  ;;  %v6706_v32 = vpop.f32.mrf.mxu1  ;;  %v6529_v45 = vadd.f32 %v15561_v62, %v6528_v33 }
 0x789   : > { %v15660_v43 = vld [vmem:[#allocation3 + $0x79] sm:$0xff] }
 0x78a   : > { %7056 = vst.msk [vmem:[#allocation3 + $0x81] sm:$0xff] %vm444_vm12, %v7024_v4  ;;  %v6740_v58 = vmax.f32 %v6700_v3, 0.0  ;;  %v15680_v12 = vld [vmem:[#allocation3 + $0x78] sm:$0xff] }
 0x78b   : > { %v6866_v25 = vpop.f32.mrf.mxu2 }
 0x78c   : > { %v6867_v20 = vadd.f32 %v15492_v51, %v6866_v25  ;;  %v6531_v9 = vpop.f32.mrf.mxu3 }
 0x78d   : > { %v6612_v40 = vpop.f32.mrf.mxu0 }
 0x78e   : > { %v6613_v34 = vadd.f32 %v6612_v40, %v6524_v8  ;;  %v6930_v28 = vadd.f32 %v11553_v27, %v6867_v20 }
 0x78f   : > { %v6993_v44 = vld [vmem:[#allocation4 + $0x50] sm:$0xff] }
 0x790   : > { %v6702_v50 = vadd.f32 %v6701_v61, %v6613_v34  ;;  %6962 = vst.msk [vmem:[#allocation4 + $0x58] sm:$0xff] %vm444_vm12, %v6930_v28  ;;  %v7025_v2 = vmax.f32 %v6993_v44, 0.0 }
 0x791   : > { %v7341_v19 = vld [vmem:[#allocation3 + $0x7a] sm:$0xff]  ;;  %v7342_v53 = vld [vmem:[#allocation3 + $0x82] sm:$0xff] }
 0x792   : > { %v15662_v39 = vld [vmem:[#allocation3 + $0x81] sm:$0xff]  ;;  %v8338_v0 = vpack.c.bf16 %v7342_v53, %v7341_v19  ;;  %v11138_v35 = vpack.i.bf16 %v7342_v53, %v7341_v19  ;;  %v6741_v23 = vmax.f32 %v6702_v50, 0.0  ;;  %7057 = vst.msk [vmem:[#allocation3 + $0x91] sm:$0xff] %vm444_vm12, %v7025_v2 }
 0x793   : > { %v11133_v17 = vpack.i.bf16 %v15662_v39, %v15660_v43  ;;  %v6869_v5 = vpop.f32.mrf.mxu2  ;;  %v15674_v42 = vld [vmem:[#allocation3 + $0x80] sm:$0xff] }
 0x794   : > { %9305 = vmatmul.msk.bf16.gmra.mxu1 %vm444_vm12, %v8338_v0  ;;  %11139 = vrot.lane.b32.xlu2 %v11138_v35, %s11596_s27  ;;  %v6759_v38 = vpack.c.bf16 %v6741_v23, %v6740_v58  ;;  %v6870_v18 = vadd.f32 %v15492_v51, %v6869_v5  ;;  %v11143_v15 = vpack.i.bf16 %v15674_v42, %v15680_v12  ;;  %v6709_v0 = vpop.f32.mrf.mxu1  ;;  %v15704_v5 = vpop.permute.xlu0 %11019 }
 0x795   : > { %11134 = vrot.lane.b32.xlu1 %v11133_v17, %s11597_s28  ;;  %11149 = vrot.lane.b32.xlu0 %v11133_v17, %s11598_s16  ;;  %v6615_v16 = vpop.f32.mrf.mxu0  ;;  %v9377_v17 = vld [vmem:[%s16472_s9 + $0x48] sm:$0xff] }
 0x796   : > { %9227 = vmatmul.msk.bf16.gmra.mxu2 %vm444_vm12, %v6759_v38  ;;  %v6931_v26 = vadd.f32 %v11554_v36, %v6870_v18  ;;  %v6616_v52 = vadd.f32 %v6615_v16, %v6527_v49  ;;  %v11015_v18 = vpop.permute.xlu2 %11014  ;;  %8666 = vmatpush.bf16.msrb.mxu0 %v9377_v17  ;;  %v6532_v16 = vadd.f32 %v15561_v62, %v6531_v9  ;;  %v6533_v36 = vpop.f32.mrf.mxu3 }
 0x797   : > { %v6994_v48 = vld [vmem:[#allocation4 + $0x58] sm:$0xff] }
 0x798   : > { %v7026_v46 = vmax.f32 %v6994_v48, 0.0  ;;  %6963 = vst.msk [vmem:[#allocation4 + $0x60] sm:$0xff] %vm444_vm12, %v6931_v26  ;;  %v6705_v29 = vadd.f32 %v6704_v54, %v6616_v52  ;;  %v6534_v52 = vadd.f32 %v15561_v62, %v6533_v36  ;;  %v11016_v62 = vunpack.i.l.bf16 %v11015_v18 }
 0x799   : > { %v7311_v3 = vld [vmem:[#allocation3 + $0x91] sm:$0xff] }
 0x79a   : > { %7058 = vst.msk [vmem:[#allocation3 + $0x99] sm:$0xff] %vm444_vm12, %v7026_v46  ;;  %v6742_v34 = vmax.f32 %v6705_v29, 0.0  ;;  %v9376_v46 = vld [vmem:[%s16472_s9 + $0x40] sm:$0xff] }
 0x79b   : > { %v6871_v61 = vpop.f32.mrf.mxu2  ;;  %8667 = vmatpush.bf16.msrb.mxu0 %v9376_v46 }
 0x79c   : > { %11144 = vrot.lane.b32.xlu2 %v11143_v15, %s11596_s27  ;;  %v6872_v4 = vadd.f32 %v15492_v51, %v6871_v61 }
 0x79d   : > { %11154 = vrot.lane.b32.xlu1 %v11143_v15, %s11598_s16  ;;  %v6617_v6 = vpop.f32.mrf.mxu0  ;;  %v15718_v15 = vld [vmem:[#allocation3 + $0x90] sm:$0xff] }
 0x79e   : > { %v6618_v13 = vadd.f32 %v6617_v6, %v6529_v45  ;;  %v6932_v8 = vadd.f32 %v11555_v1, %v6872_v4  ;;  %v6711_v4 = vpop.f32.mrf.mxu1 }
 0x79f   : > { %v6995_v25 = vld [vmem:[#allocation4 + $0x60] sm:$0xff] }
 0x7a0   : > { %v6707_v20 = vadd.f32 %v6706_v32, %v6618_v13  ;;  %v7027_v40 = vmax.f32 %v6995_v25, 0.0  ;;  %6964 = vst.msk [vmem:[#allocation4 + $0x68] sm:$0xff] %vm444_vm12, %v6932_v8  ;;  %v11557_v13 = vld [vmem:[#allocation4 + $0x78] sm:$0xff]  ;;  %v11017_v25 = vunpack.i.h.bf16 %v11015_v18 }
 0x7a1   : > { %v7343_v28 = vld [vmem:[#allocation3 + $0x92] sm:$0xff]  ;;  %v7344_v50 = vld [vmem:[#allocation3 + $0x9a] sm:$0xff] }
 0x7a2   : > { %v6743_v27 = vmax.f32 %v6707_v20, 0.0  ;;  %v7312_v19 = vld [vmem:[#allocation3 + $0x99] sm:$0xff]  ;;  %7059 = vst.msk [vmem:[#allocation3 + $0xa9] sm:$0xff] %vm444_vm12, %v7027_v40  ;;  %v8341_v53 = vpack.c.bf16 %v7344_v50, %v7343_v28  ;;  %v15696_v44 = vpack.i.bf16 %v7344_v50, %v7343_v28 }
 0x7a3   : > { %v11178_v54 = vpack.i.bf16 %v7312_v19, %v7311_v3  ;;  %v6874_v58 = vpop.f32.mrf.mxu2  ;;  %v15711_v49 = vld [vmem:[#allocation3 + $0x98] sm:$0xff]  ;;  %v7079_v3 = vld [vmem:[#allocation3] sm:$0xff] }
 0x7a4   : > { %11159 = vrot.lane.b32.xlu2 %v11138_v35, %s11597_s28  ;;  %v6760_v2 = vpack.c.bf16 %v6743_v27, %v6742_v34  ;;  %v6875_v23 = vadd.f32 %v15492_v51, %v6874_v58  ;;  %9306 = vmatmul.msk.bf16.gmra.mxu1 %vm444_vm12, %v8341_v53  ;;  %v11556_v35 = vld [vmem:[#allocation4 + $0x70] sm:$0xff]  ;;  %v11173_v32 = vpack.i.bf16 %v15711_v49, %v15718_v15  ;;  %v7080_v34 = vld [vmem:[#allocation3 + $0x8] sm:$0xff] }
 0x7a5   : > { %v6620_v38 = vpop.f32.mrf.mxu0  ;;  %11179 = vrot.lane.b32.xlu1 %v11178_v54, %s11598_s16  ;;  %11169 = vrot.lane.b32.xlu0 %v15696_v44, %s11596_s27  ;;  %v8136_v58 = vsel %vm444_vm12, %v7080_v34, %v11017_v25 }
 0x7a6   : > { %9228 = vmatmul.msk.bf16.gmra.mxu2 %vm444_vm12, %v6760_v2  ;;  %v6933_v33 = vadd.f32 %v11556_v35, %v6875_v23  ;;  %v6621_v48 = vadd.f32 %v6620_v38, %v6532_v16  ;;  %v8135_v23 = vsel %vm444_vm12, %v7079_v3, %v11016_v62  ;;  %v11558_v16 = vld [vmem:[#allocation4 + $0x80] sm:$0xff] }
 0x7a7   : > { %v6996_v22 = vld [vmem:[#allocation4 + $0x68] sm:$0xff] }
 0x7a8   : > { %v7028_v26 = vmax.f32 %v6996_v22, 0.0  ;;  %6965 = vst.msk [vmem:[#allocation4 + $0x70] sm:$0xff] %vm444_vm12, %v6933_v33  ;;  %v6710_v6 = vadd.f32 %v6709_v0, %v6621_v48  ;;  %v11021_v0 = vunpack.i.l.bf16 %v15704_v5 }
 0x7aa   : > { %7060 = vst.msk [vmem:[#allocation3 + $0xb1] sm:$0xff] %vm444_vm12, %v7028_v26  ;;  %v6744_v28 = vmax.f32 %v6710_v6, 0.0  ;;  %v8167_v26 = vsel %vm3744_vm14, %v8135_v23, %v11021_v0 }
 0x7ab   : > { %v6876_v55 = vpop.f32.mrf.mxu2 }
 0x7ac   : > { %11164 = vrot.lane.b32.xlu2 %v11178_v54, %s11597_s28  ;;  %v6877_v45 = vadd.f32 %v15492_v51, %v6876_v55  ;;  %v11022_v54 = vunpack.i.h.bf16 %v15704_v5 }
 0x7ad   : > { %v6622_v61 = vpop.f32.mrf.mxu0  ;;  %11174 = vrot.lane.b32.xlu0 %v11173_v32, %s11596_s27 }
 0x7ae   : > { %v6623_v29 = vadd.f32 %v6622_v61, %v6534_v52  ;;  %v6934_v9 = vadd.f32 %v11557_v13, %v6877_v45  ;;  %v15728_v27 = vpop.permute.xlu2 %11049  ;;  %v8168_v48 = vsel %vm3744_vm14, %v8136_v58, %v11022_v54 }
 0x7af   : > { %v6997_v8 = vld [vmem:[#allocation4 + $0x70] sm:$0xff]  ;;  %v15736_v35 = vpop.permute.xlu1 %11029 }
 0x7b0   : > { %v15725_v1 = vpop.permute.xlu0 %11024  ;;  %v6712_v20 = vadd.f32 %v6711_v4, %v6623_v29  ;;  %v7029_v40 = vmax.f32 %v6997_v8, 0.0  ;;  %6966 = vst.msk [vmem:[#allocation4 + $0x78] sm:$0xff] %vm444_vm12, %v6934_v9  ;;  %v15757_v29 = vld [vmem:[#allocation3 + $0xa8] sm:$0xff] }
 0x7b1   : > { %v7345_v19 = vld [vmem:[#allocation3 + $0xaa] sm:$0xff]  ;;  %v7346_v53 = vld [vmem:[#allocation3 + $0xb2] sm:$0xff] }
 0x7b2   : > { %v6745_v50 = vmax.f32 %v6712_v20, 0.0  ;;  %7061 = vst.msk [vmem:[#allocation3 + $0xc1] sm:$0xff] %vm444_vm12, %v7029_v40  ;;  %v8344_v17 = vpack.c.bf16 %v7346_v53, %v7345_v19  ;;  %v11198_v2 = vpack.i.bf16 %v7346_v53, %v7345_v19  ;;  %v15744_v5 = vld [vmem:[#allocation3 + $0xb1] sm:$0xff] }
 0x7b3   : > { %v6879_v33 = vpop.f32.mrf.mxu2  ;;  %v15750_v45 = vld [vmem:[#allocation3 + $0xb0] sm:$0xff]  ;;  %v11559_v40 = vld [vmem:[#allocation4 + $0x88] sm:$0xff] }
 0x7b4   : > { %11184 = vrot.lane.b32.xlu2 %v11173_v32, %s11598_s16  ;;  %v6761_v38 = vpack.c.bf16 %v6745_v50, %v6744_v28  ;;  %v6880_v18 = vadd.f32 %v15492_v51, %v6879_v33  ;;  %9307 = vmatmul.msk.bf16.gmra.mxu1 %vm444_vm12, %v8344_v17  ;;  %v15748_v32 = vld [vmem:[#allocation3 + $0xa9] sm:$0xff]  ;;  %v11203_v8 = vpack.i.bf16 %v15750_v45, %v15757_v29 }
 0x7b5   : > { %11199 = vrot.lane.b32.xlu1 %v11198_v2, %s11596_s27  ;;  %11189 = vrot.lane.b32.xlu0 %v15696_v44, %s11597_s28  ;;  %v11208_v44 = vpack.i.bf16 %v15744_v5, %v15748_v32 }
 0x7b6   : > { %9229 = vmatmul.msk.bf16.gmra.mxu2 %vm444_vm12, %v6761_v38  ;;  %v6935_v22 = vadd.f32 %v11558_v16, %v6880_v18  ;;  %v11055_v9 = vpop.permute.xlu2 %11054 }
 0x7b7   : > { %v6998_v46 = vld [vmem:[#allocation4 + $0x78] sm:$0xff]  ;;  %v11040_v20 = vpop.permute.xlu1 %11039  ;;  %v11057_v58 = vunpack.i.h.bf16 %v11055_v9  ;;  %v11056_v23 = vunpack.i.l.bf16 %v11055_v9 }
 0x7b8   : > { %v11035_v36 = vpop.permute.xlu0 %11034  ;;  %v7030_v61 = vmax.f32 %v6998_v46, 0.0  ;;  %6967 = vst.msk [vmem:[#allocation4 + $0x80] sm:$0xff] %vm444_vm12, %v6935_v22  ;;  %v11042_v50 = vunpack.i.h.bf16 %v11040_v20  ;;  %v11041_v19 = vunpack.i.l.bf16 %v11040_v20 }
 0x7b9   : > { %v11037_v52 = vunpack.i.h.bf16 %v11035_v36  ;;  %v11036_v55 = vunpack.i.l.bf16 %v11035_v36  ;;  %v15793_v9 = vld [vmem:[#allocation3 + $0xc0] sm:$0xff] }
 0x7ba   : > { %7062 = vst.msk [vmem:[#allocation3 + $0xc9] sm:$0xff] %vm444_vm12, %v7030_v61  ;;  %v8232_v38 = vsel %vm444_vm12, %v15528_v21, %v11042_v50  ;;  %v8231_v33 = vsel %vm444_vm12, %v15526_v24, %v11041_v19 }
 0x7bb   : > { %v8199_v4 = vsel %vm3777_vm15, %v8167_v26, %v11036_v55  ;;  %v8200_v6 = vsel %vm3777_vm15, %v8168_v48, %v11037_v52  ;;  %v6881_v25 = vpop.f32.mrf.mxu2  ;;  %v8264_v21 = vsel %vm3744_vm14, %v8232_v38, %v11057_v58  ;;  %v8263_v24 = vsel %vm3744_vm14, %v8231_v33, %v11056_v23 }
 0x7bc   : > { %v8327_v13 = vpack.c.bf16 %v8200_v6, %v8199_v4  ;;  %11209 = vrot.lane.b32.xlu2 %v11208_v44, %s11598_s16  ;;  %v6882_v62 = vadd.f32 %v15492_v51, %v6881_v25  ;;  %v11026_v4 = vunpack.i.l.bf16 %v15725_v1 }
 0x7bd   : > { %11204 = vrot.lane.b32.xlu1 %v11203_v8, %s11596_s27  ;;  %11194 = vrot.lane.b32.xlu0 %v11208_v44, %s11597_s28  ;;  %v11027_v44 = vunpack.i.h.bf16 %v15725_v1  ;;  %v11031_v1 = vunpack.i.l.bf16 %v15736_v35 }
 0x7be   : > { %8579 = vmatmul.bf16.vlgmr.msrb.gmra.mxu3 %v8327_v13  ;;  %v6936_v3 = vadd.f32 %v11559_v40, %v6882_v62  ;;  %v15799_v62 = vld [vmem:[#allocation3 + $0xc1] sm:$0xff]  ;;  %v11032_v40 = vunpack.i.h.bf16 %v15736_v35  ;;  %v8137_v50 = vsel %vm444_vm12, %v15543_v60, %v11026_v4 }
 0x7bf   : > { %v6999_v34 = vld [vmem:[#allocation4 + $0x80] sm:$0xff]  ;;  %v15774_v18 = vpop.permute.xlu2 %11069 }
 0x7c0   : > { %v7031_v28 = vmax.f32 %v6999_v34, 0.0  ;;  %6968 = vst.msk [vmem:[#allocation4 + $0x88] sm:$0xff] %vm444_vm12, %v6936_v3  ;;  %v11560_v3 = vld [vmem:[#allocation4 + $0x90] sm:$0xff] }
 0x7c1   : > { %v7347_v53 = vld [vmem:[#allocation3 + $0xc2] sm:$0xff]  ;;  %v7348_v54 = vld [vmem:[#allocation3 + $0xca] sm:$0xff] }
 0x7c2   : > { %7063 = vst.msk [vmem:[#allocation3 + $0xd9] sm:$0xff] %vm444_vm12, %v7031_v28  ;;  %v8347_v0 = vpack.c.bf16 %v7348_v54, %v7347_v53  ;;  %v15768_v17 = vpack.i.bf16 %v7348_v54, %v7347_v53  ;;  %v15785_v46 = vld [vmem:[#allocation3 + $0xc8] sm:$0xff]  ;;  %v8138_v28 = vsel %vm444_vm12, %v15540_v56, %v11027_v44 }
 0x7c3   : > { %v11233_v25 = vpack.i.bf16 %v15785_v46, %v15793_v9  ;;  %v8170_v58 = vsel %vm3744_vm14, %v8138_v28, %v11032_v40  ;;  %v11051_v40 = vunpack.i.l.bf16 %v15728_v27 }
 0x7c4   : > { %9308 = vmatmul.msk.bf16.gmra.mxu1 %vm444_vm12, %v8347_v0  ;;  %11229 = vrot.lane.b32.xlu2 %v15768_v17, %s11596_s27  ;;  %v8169_v0 = vsel %vm3744_vm14, %v8137_v50, %v11031_v1 }
 0x7c5   : > { %11219 = vrot.lane.b32.xlu1 %v11198_v2, %s11597_s28  ;;  %11214 = vrot.lane.b32.xlu0 %v11203_v8, %s11598_s16  ;;  %v15789_v2 = vld [vmem:[#allocation3 + $0xc9] sm:$0xff] }
 0x7c6   : > { %v11223_v20 = vpack.i.bf16 %v15789_v2, %v15799_v62 }
 0x7c7   : > { %v11060_v16 = vpop.permute.xlu0 %11059  ;;  %v15781_v26 = vpop.permute.xlu1 %11044  ;;  %v7000_v48 = vld [vmem:[#allocation4 + $0x88] sm:$0xff] }
 0x7c8   : > { %v11062_v22 = vunpack.i.h.bf16 %v11060_v16  ;;  %v11061_v36 = vunpack.i.l.bf16 %v11060_v16  ;;  %v7032_v52 = vmax.f32 %v7000_v48, 0.0  ;;  %v15812_v19 = vpop.permute.xlu2 %11074  ;;  %v11046_v4 = vunpack.i.l.bf16 %v15781_v26 }
 0x7c9   : > { %v7285_v23 = vld [vmem:[#allocation3 + $0xd8] sm:$0xff] }
 0x7ca   : > { %v8295_v55 = vsel %vm3777_vm15, %v8263_v24, %v11061_v36  ;;  %v8296_v61 = vsel %vm3777_vm15, %v8264_v21, %v11062_v22  ;;  %v6884_v13 = vpop.f32.mrf.mxu2  ;;  %7064 = vst.msk [vmem:[#allocation3 + $0xe1] sm:$0xff] %vm444_vm12, %v7032_v52  ;;  %v11561_v52 = vld [vmem:[#allocation4 + $0x98] sm:$0xff]  ;;  %v8139_v1 = vsel %vm444_vm12, %v15585_v63, %v11046_v4 }
 0x7cb   : > { %v8328_v6 = vpack.c.bf16 %v8296_v61, %v8295_v55  ;;  %v6885_v8 = vadd.f32 %v15492_v51, %v6884_v13 }
 0x7cc   : > { %11234 = vrot.lane.b32.xlu2 %v11233_v25, %s11596_s27 }
 0x7cd   : > { %8668 = vmatmul.bf16.vlgmr.msrb.gmra.mxu0 %v8328_v6  ;;  %v6937_v34 = vadd.f32 %v11560_v3, %v6885_v8  ;;  %11224 = vrot.lane.b32.xlu1 %v11223_v20, %s11597_s28  ;;  %v11047_v6 = vunpack.i.h.bf16 %v15781_v26  ;;  %v15844_v3 = vld [vmem:[%s16471_s8] ss:$0 sm:$0xff] }
 0x7ce   : > { %11239 = vrot.lane.b32.xlu0 %v11223_v20, %s11598_s16 }
 0x7cf   : > { %6969 = vst.msk [vmem:[#allocation4 + $0x90] sm:$0xff] %vm444_vm12, %v6937_v34  ;;  %v11065_v53 = vpop.permute.xlu1 %11064  ;;  %v15847_v34 = vld [vmem:[#allocation3 + $0xd9] sm:$0xff]  ;;  %v8140_v28 = vsel %vm444_vm12, %v15582_v37, %v11047_v6 }
 0x7d0   : > { %v11067_v35 = vunpack.i.h.bf16 %v11065_v53  ;;  %v11066_v54 = vunpack.i.l.bf16 %v11065_v53  ;;  %v11095_v13 = vpop.permute.xlu2 %11094 }
 0x7d1   : > { %v7349_v33 = vld [vmem:[#allocation3 + $0xda] sm:$0xff]  ;;  %v7350_v16 = vld [vmem:[#allocation3 + $0xe2] sm:$0xff]  ;;  %v11097_v50 = vunpack.i.h.bf16 %v11095_v13 }
 0x7d2   : > { %v6886_v56 = vpop.f32.mrf.mxu2  ;;  %v8201_v38 = vsel %vm3777_vm15, %v8169_v0, %v11066_v54  ;;  %v8202_v60 = vsel %vm3777_vm15, %v8170_v58, %v11067_v35  ;;  %v7286_v22 = vld [vmem:[#allocation3 + $0xe0] sm:$0xff]  ;;  %v8350_v24 = vpack.c.bf16 %v7350_v16, %v7349_v33  ;;  %v11052_v35 = vunpack.i.h.bf16 %v15728_v27  ;;  %v11563_v54 = vld [vmem:[#allocation4 + $0xa0] sm:$0xff] }
 0x7d3   : > { %v6887_v36 = vadd.f32 %v15492_v51, %v6886_v56  ;;  %v8330_v21 = vpack.c.bf16 %v8202_v60, %v8201_v38  ;;  %v15820_v48 = vpack.i.bf16 %v7286_v22, %v7285_v23  ;;  %v15834_v8 = vld [vmem:[#allocation3 + $0xe1] sm:$0xff]  ;;  %v11273_v58 = vpack.i.bf16 %v7350_v16, %v7349_v33 }
 0x7d4   : > { %9309 = vmatmul.msk.bf16.gmra.mxu1 %vm444_vm12, %v8350_v24  ;;  %11249 = vrot.lane.b32.xlu2 %v15768_v17, %s11597_s28  ;;  %v11072_v17 = vunpack.i.h.bf16 %v15774_v18  ;;  %v11253_v53 = vpack.i.bf16 %v15834_v8, %v15847_v34  ;;  %v8171_v60 = vsel %vm3744_vm14, %v8139_v1, %v11051_v40 }
 0x7d5   : > { %v6938_v55 = vadd.f32 %v11561_v52, %v6887_v36  ;;  %8584 = vmatmul.bf16.gmra.mxu3 %v8330_v21  ;;  %11244 = vrot.lane.b32.xlu1 %v11233_v25, %s11598_s16  ;;  %v11071_v25 = vunpack.i.l.bf16 %v15774_v18  ;;  %v11096_v18 = vunpack.i.l.bf16 %v11095_v13 }
 0x7d6   : > { %v7001_v61 = vld [vmem:[#allocation4 + $0x90] sm:$0xff]  ;;  %v15826_v44 = vpop.permute.xlu0 %11079  ;;  %11259 = vrot.lane.b32.xlu0 %v15820_v48, %s11596_s27  ;;  %v8234_v23 = vsel %vm444_vm12, %v15567_v41, %v11072_v17  ;;  %v8172_v41 = vsel %vm3744_vm14, %v8140_v28, %v11052_v35 }
 0x7d7   : > { %v7033_v51 = vmax.f32 %v7001_v61, 0.0  ;;  %6970 = vst.msk [vmem:[#allocation4 + $0x98] sm:$0xff] %vm444_vm12, %v6938_v55  ;;  %v11090_v63 = vpop.permute.xlu1 %11089  ;;  %v8233_v56 = vsel %vm444_vm12, %v15565_v14, %v11071_v25  ;;  %v8203_v14 = vsel %vm3777_vm15, %v8171_v60, %v11096_v18  ;;  %v8204_v21 = vsel %vm3777_vm15, %v8172_v41, %v11097_v50  ;;  %v11564_v25 = vld [vmem:[#allocation4 + $0xa8] sm:$0xff] }
 0x7d8   : > { %v11092_v16 = vunpack.i.h.bf16 %v11090_v63  ;;  %v11091_v36 = vunpack.i.l.bf16 %v11090_v63  ;;  %v8333_v6 = vpack.c.bf16 %v8204_v21, %v8203_v14  ;;  %v11120_v17 = vpop.permute.xlu2 %11119 }
 0x7d9   : > { %7065 = vst.msk [vmem:[#allocation3 + $0xf1] sm:$0xff] %vm444_vm12, %v7033_v51 }
 0x7da   : > { %v6889_v20 = vpop.f32.mrf.mxu2 }
 0x7db   : > { %v6890_v26 = vadd.f32 %v15844_v3, %v6889_v20 }
 0x7dc   : > { %11254 = vrot.lane.b32.xlu2 %v11253_v53, %s11597_s28 }
 0x7dd   : > { %v6939_v0 = vadd.f32 %v11563_v54, %v6890_v26  ;;  %11264 = vrot.lane.b32.xlu1 %v11253_v53, %s11598_s16 }
 0x7de   : > { %v7002_v38 = vld [vmem:[#allocation4 + $0x98] sm:$0xff]  ;;  %v11085_v37 = vpop.permute.xlu0 %11084  ;;  %11274 = vrot.lane.b32.xlu0 %v11273_v58, %s11597_s28 }
 0x7df   : > { %v7034_v22 = vmax.f32 %v7002_v38, 0.0  ;;  %6971 = vst.msk [vmem:[#allocation4 + $0xa0] sm:$0xff] %vm444_vm12, %v6939_v0  ;;  %v11087_v27 = vunpack.i.h.bf16 %v11085_v37  ;;  %v11086_v33 = vunpack.i.l.bf16 %v11085_v37 }
 0x7e0   : > { %v15878_v50 = vld [vmem:[#allocation3 + $0xf0] sm:$0xff] }
 0x7e1   : > { %7066 = vst.msk [vmem:[#allocation3 + $0xf9] sm:$0xff] %vm444_vm12, %v7034_v22  ;;  %v8266_v24 = vsel %vm3744_vm14, %v8234_v23, %v11087_v27  ;;  %v8265_v52 = vsel %vm3744_vm14, %v8233_v56, %v11086_v33  ;;  %v15885_v54 = vld [vmem:[#allocation3 + $0xf1] sm:$0xff] }
 0x7e2   : > { %v6891_v55 = vpop.f32.mrf.mxu2  ;;  %v8297_v61 = vsel %vm3777_vm15, %v8265_v52, %v11091_v36  ;;  %v8298_v4 = vsel %vm3777_vm15, %v8266_v24, %v11092_v16  ;;  %v11122_v16 = vunpack.i.h.bf16 %v11120_v17  ;;  %v11121_v36 = vunpack.i.l.bf16 %v11120_v17 }
 0x7e3   : > { %v6892_v51 = vadd.f32 %v15844_v3, %v6891_v55  ;;  %v8331_v13 = vpack.c.bf16 %v8298_v4, %v8297_v61  ;;  %v11077_v55 = vunpack.i.h.bf16 %v15812_v19  ;;  %v11076_v61 = vunpack.i.l.bf16 %v15812_v19 }
 0x7e4   : > { %11269 = vrot.lane.b32.xlu2 %v15820_v48, %s11598_s16 }
 0x7e5   : > { %v6940_v20 = vadd.f32 %v11564_v25, %v6892_v51  ;;  %8589 = vmatmul.bf16.gmra.mxu3 %v8333_v6  ;;  %8673 = vmatmul.bf16.gmra.mxu0 %v8331_v13  ;;  %v11082_v6 = vunpack.i.h.bf16 %v15826_v44  ;;  %v8141_v19 = vsel %vm444_vm12, %v15610_v11, %v11076_v61 }
 0x7e6   : > { %v7003_v40 = vld [vmem:[#allocation4 + $0xa0] sm:$0xff]  ;;  %v11100_v1 = vpop.permute.xlu0 %11099  ;;  %11279 = vrot.lane.b32.xlu0 %v11273_v58, %s11596_s27 }
 0x7e7   : > { %v7035_v26 = vmax.f32 %v7003_v40, 0.0  ;;  %6972 = vst.msk [vmem:[#allocation4 + $0xa8] sm:$0xff] %vm444_vm12, %v6940_v20  ;;  %v15876_v28 = vpop.permute.xlu1 %11109  ;;  %v11102_v23 = vunpack.i.h.bf16 %v11100_v1  ;;  %v11101_v56 = vunpack.i.l.bf16 %v11100_v1  ;;  %v8142_v20 = vsel %vm444_vm12, %v15608_v59, %v11077_v55 }
 0x7e8   : > { %v7351_v18 = vld [vmem:[#allocation3 + $0xf2] sm:$0xff]  ;;  %v7352_v53 = vld [vmem:[#allocation3 + $0xfa] sm:$0xff] }
 0x7e9   : > { %v15880_v35 = vld [vmem:[#allocation3 + $0xf8] sm:$0xff]  ;;  %7067 = vst.msk [vmem:[#allocation3 + $0x109] sm:$0xff] %vm444_vm12, %v7035_v26  ;;  %v8353_v63 = vpack.c.bf16 %v7352_v53, %v7351_v18  ;;  %v8236_v14 = vsel %vm444_vm12, %v15595_v57, %v11102_v23  ;;  %v8235_v21 = vsel %vm444_vm12, %v15593_v10, %v11101_v56  ;;  %v11081_v57 = vunpack.i.l.bf16 %v15826_v44 }
 0x7ea   : > { %v11288_v48 = vpack.i.bf16 %v15880_v35, %v15878_v50  ;;  %v15887_v0 = vld [vmem:[#allocation3 + $0xf9] sm:$0xff]  ;;  %v11303_v13 = vpack.i.bf16 %v7352_v53, %v7351_v18  ;;  %v8174_v44 = vsel %vm3744_vm14, %v8142_v20, %v11082_v6 }
 0x7eb   : > { %v11293_v58 = vpack.i.bf16 %v15887_v0, %v15885_v54  ;;  %9310 = vmatmul.msk.bf16.gmra.mxu1 %vm444_vm12, %v8353_v63  ;;  %v8173_v63 = vsel %vm3744_vm14, %v8141_v19, %v11081_v57 }
 0x7ec   : > { %11289 = vrot.lane.b32.xlu1 %v11288_v48, %s11596_s27 }
 0x7ed   : > { %11294 = vrot.lane.b32.xlu2 %v11293_v58, %s11598_s16 }
 0x7ee   : > { %v15893_v38 = vpop.permute.xlu2 %11139  ;;  %v7004_v37 = vld [vmem:[#allocation4 + $0xa8] sm:$0xff]  ;;  %v15896_v60 = vpop.permute.xlu0 %11104  ;;  %11284 = vrot.lane.b32.xlu0 %v11293_v58, %s11597_s28 }
 0x7ef   : > { %v7036_v22 = vmax.f32 %v7004_v37, 0.0  ;;  %v11115_v27 = vpop.permute.xlu1 %11114 }
 0x7f0   : > { %v11117_v33 = vunpack.i.h.bf16 %v11115_v27  ;;  %v11116_v41 = vunpack.i.l.bf16 %v11115_v27  ;;  %v7133_v26 = vld [vmem:[#allocation3 + $0x109] sm:$0xff] }
 0x7f1   : > { %7068 = vst.msk [vmem:[#allocation3 + $0x111] sm:$0xff] %vm444_vm12, %v7036_v22  ;;  %v15920_v37 = vld [vmem:[#allocation3 + $0x108] sm:$0xff] }
 0x7f2   : > { %v8268_v24 = vsel %vm3744_vm14, %v8236_v14, %v11117_v33  ;;  %v8267_v52 = vsel %vm3744_vm14, %v8235_v21, %v11116_v41 }
 0x7f3   : > { %v8299_v4 = vsel %vm3777_vm15, %v8267_v52, %v11121_v36  ;;  %v8300_v51 = vsel %vm3777_vm15, %v8268_v24, %v11122_v16  ;;  %v11565_v16 = vld [vmem:[#allocation4 + $0xb0] sm:$0xff] }
 0x7f4   : > { %11299 = vrot.lane.b32.xlu1 %v11288_v48, %s11598_s16  ;;  %v8334_v10 = vpack.c.bf16 %v8300_v51, %v8299_v4  ;;  %v11566_v4 = vld [vmem:[#allocation4 + $0xb8] sm:$0xff] }
 0x7f5   : > { %11304 = vrot.lane.b32.xlu2 %v11303_v13, %s11597_s28 }
 0x7f6   : > { %v11145_v17 = vpop.permute.xlu2 %11144  ;;  %8678 = vmatmul.bf16.gmra.mxu0 %v8334_v10  ;;  %v11125_v25 = vpop.permute.xlu0 %11124 }
 0x7f7   : > { %v11127_v40 = vunpack.i.h.bf16 %v11125_v25  ;;  %v11126_v1 = vunpack.i.l.bf16 %v11125_v25  ;;  %v11130_v14 = vpop.permute.xlu1 %11129  ;;  %v11147_v10 = vunpack.i.h.bf16 %v11145_v17  ;;  %v11146_v25 = vunpack.i.l.bf16 %v11145_v17 }
 0x7f8   : > { %v7353_v18 = vld [vmem:[#allocation3 + $0x10a] sm:$0xff]  ;;  %v7354_v53 = vld [vmem:[#allocation3 + $0x112] sm:$0xff]  ;;  %v11132_v24 = vunpack.i.h.bf16 %v11130_v14  ;;  %v11131_v52 = vunpack.i.l.bf16 %v11130_v14  ;;  %v11106_v17 = vunpack.i.l.bf16 %v15896_v60 }
 0x7f9   : > { %v7134_v48 = vld [vmem:[#allocation3 + $0x111] sm:$0xff]  ;;  %v6894_v58 = vpop.f32.mrf.mxu2  ;;  %v8356_v23 = vpack.c.bf16 %v7354_v53, %v7353_v18  ;;  %v8205_v11 = vsel %vm3777_vm15, %v8173_v63, %v11126_v1  ;;  %v8206_v59 = vsel %vm3777_vm15, %v8174_v44, %v11127_v40  ;;  %v11107_v63 = vunpack.i.h.bf16 %v15896_v60 }
 0x7fa   : > { %v11313_v56 = vpack.i.bf16 %v7134_v48, %v7133_v26  ;;  %v15922_v22 = vld [vmem:[#allocation3 + $0x110] sm:$0xff]  ;;  %v6895_v27 = vadd.f32 %v15844_v3, %v6894_v58  ;;  %v8336_v41 = vpack.c.bf16 %v8206_v59, %v8205_v11  ;;  %v8238_v6 = vsel %vm444_vm12, %v15626_v31, %v11132_v24 }
 0x7fb   : > { %v11318_v33 = vpack.i.bf16 %v15922_v22, %v15920_v37  ;;  %9311 = vmatmul.msk.bf16.gmra.mxu1 %vm444_vm12, %v8356_v23  ;;  %v8237_v57 = vsel %vm444_vm12, %v15630_v47, %v11131_v52  ;;  %v8270_v47 = vsel %vm3744_vm14, %v8238_v6, %v11147_v10  ;;  %v11333_v58 = vpack.i.bf16 %v7354_v53, %v7353_v18 }
 0x7fc   : > { %11314 = vrot.lane.b32.xlu1 %v11313_v56, %s11597_s28  ;;  %v6941_v36 = vadd.f32 %v11565_v16, %v6895_v27  ;;  %8594 = vmatmul.bf16.gmra.mxu3 %v8336_v41  ;;  %v8269_v31 = vsel %vm3744_vm14, %v8237_v57, %v11146_v25  ;;  %v11567_v27 = vld [vmem:[#allocation4 + $0xc0] sm:$0xff]  ;;  %v8143_v41 = vsel %vm444_vm12, %v15634_v7, %v11106_v17  ;;  %v11112_v18 = vunpack.i.h.bf16 %v15876_v28  ;;  %v11568_v57 = vld [vmem:[#allocation4 + $0xc8] sm:$0xff] }
 0x7fd   : > { %11319 = vrot.lane.b32.xlu0 %v11318_v33, %s11596_s27  ;;  %11309 = vrot.lane.b32.xlu2 %v11303_v13, %s11596_s27  ;;  %v8144_v60 = vsel %vm444_vm12, %v15628_v30, %v11107_v63  ;;  %v11111_v53 = vunpack.i.l.bf16 %v15876_v28 }
 0x7fe   : > { %6973 = vst.msk [vmem:[#allocation4 + $0xb0] sm:$0xff] %vm444_vm12, %v6941_v36  ;;  %v15934_v21 = vpop.permute.xlu2 %11159  ;;  %v8176_v7 = vsel %vm3744_vm14, %v8144_v60, %v11112_v18 }
 0x801   : > { %v6896_v55 = vpop.f32.mrf.mxu2 }
 0x802   : > { %v6897_v61 = vadd.f32 %v15844_v3, %v6896_v55  ;;  %v8175_v55 = vsel %vm3744_vm14, %v8143_v41, %v11111_v53  ;;  %v11162_v41 = vunpack.i.h.bf16 %v15934_v21  ;;  %v11161_v53 = vunpack.i.l.bf16 %v15934_v21 }
 0x804   : > { %11324 = vrot.lane.b32.xlu1 %v11313_v56, %s11598_s16  ;;  %v6942_v51 = vadd.f32 %v11566_v4, %v6897_v61  ;;  %v8240_v21 = vsel %vm444_vm12, %v15662_v39, %v11162_v41 }
 0x805   : > { %11329 = vrot.lane.b32.xlu0 %v11318_v33, %s11598_s16  ;;  %v7005_v13 = vld [vmem:[#allocation4 + $0xb0] sm:$0xff] }
 0x806   : > { %v7037_v19 = vmax.f32 %v7005_v13, 0.0  ;;  %6974 = vst.msk [vmem:[#allocation4 + $0xb8] sm:$0xff] %vm444_vm12, %v6942_v51  ;;  %v15948_v44 = vpop.permute.xlu2 %11164 }
 0x807   : > { %v15944_v20 = vpop.permute.xlu1 %11134  ;;  %v11150_v40 = vpop.permute.xlu0 %11149 }
 0x808   : > { %v11152_v1 = vunpack.i.h.bf16 %v11150_v40  ;;  %v11151_v26 = vunpack.i.l.bf16 %v11150_v40  ;;  %7069 = vst.msk [vmem:[#allocation3 + $0x121] sm:$0xff] %vm444_vm12, %v7037_v19  ;;  %v11137_v40 = vunpack.i.h.bf16 %v15944_v20 }
 0x809   : > { %v6899_v48 = vpop.f32.mrf.mxu2 }
 0x80a   : > { %v8301_v23 = vsel %vm3777_vm15, %v8269_v31, %v11151_v26  ;;  %v8302_v56 = vsel %vm3777_vm15, %v8270_v47, %v11152_v1  ;;  %v6900_v11 = vadd.f32 %v15844_v3, %v6899_v48  ;;  %v11136_v1 = vunpack.i.l.bf16 %v15944_v20 }
 0x80b   : > { %v8337_v59 = vpack.c.bf16 %v8302_v56, %v8301_v23  ;;  %v8146_v20 = vsel %vm444_vm12, %v15674_v42, %v11137_v40 }
 0x80c   : > { %11334 = vrot.lane.b32.xlu1 %v11333_v58, %s11597_s28  ;;  %v6943_v33 = vadd.f32 %v11567_v27, %v6900_v11  ;;  %v8145_v56 = vsel %vm444_vm12, %v15680_v12, %v11136_v1  ;;  %v11142_v27 = vunpack.i.h.bf16 %v15893_v38 }
 0x80d   : > { %8683 = vmatmul.bf16.gmra.mxu0 %v8337_v59  ;;  %v7006_v16 = vld [vmem:[#allocation4 + $0xb8] sm:$0xff] }
 0x80e   : > { %v7038_v36 = vmax.f32 %v7006_v16, 0.0  ;;  %6975 = vst.msk [vmem:[#allocation4 + $0xc0] sm:$0xff] %vm444_vm12, %v6943_v33  ;;  %v11185_v51 = vpop.permute.xlu2 %11184  ;;  %v11141_v33 = vunpack.i.l.bf16 %v15893_v38  ;;  %v11569_v16 = vld [vmem:[#allocation4 + $0xd0] sm:$0xff] }
 0x80f   : > { %v11155_v14 = vpop.permute.xlu1 %11154  ;;  %v15972_v19 = vld [vmem:[#allocation3 + $0x121] sm:$0xff]  ;;  %v11187_v11 = vunpack.i.h.bf16 %v11185_v51  ;;  %v11186_v59 = vunpack.i.l.bf16 %v11185_v51 }
 0x810   : > { %v11157_v24 = vunpack.i.h.bf16 %v11155_v14  ;;  %v11156_v52 = vunpack.i.l.bf16 %v11155_v14  ;;  %7070 = vst.msk [vmem:[#allocation3 + $0x129] sm:$0xff] %vm444_vm12, %v7038_v36  ;;  %v8177_v14 = vsel %vm3744_vm14, %v8145_v56, %v11141_v33  ;;  %v16002_v38 = vld [vmem:[#allocation3 + $0x120] sm:$0xff] }
 0x811   : > { %v6901_v61 = vpop.f32.mrf.mxu2 }
 0x812   : > { %v8207_v30 = vsel %vm3777_vm15, %v8175_v55, %v11156_v52  ;;  %v8208_v4 = vsel %vm3777_vm15, %v8176_v7, %v11157_v24  ;;  %v6902_v28 = vadd.f32 %v15844_v3, %v6901_v61  ;;  %v8178_v24 = vsel %vm3744_vm14, %v8146_v20, %v11142_v27 }
 0x813   : > { %v8339_v6 = vpack.c.bf16 %v8208_v4, %v8207_v30  ;;  %v8209_v55 = vsel %vm3777_vm15, %v8177_v14, %v11186_v59  ;;  %v8210_v7 = vsel %vm3777_vm15, %v8178_v24, %v11187_v11  ;;  %v8239_v4 = vsel %vm444_vm12, %v15660_v43, %v11161_v53  ;;  %v11571_v14 = vld [vmem:[#allocation4 + $0xe0] sm:$0xff] }
 0x814   : > { %11339 = vrot.lane.b32.xlu1 %v11333_v58, %s11596_s27  ;;  %v6944_v13 = vadd.f32 %v11568_v57, %v6902_v28  ;;  %v8342_v39 = vpack.c.bf16 %v8210_v7, %v8209_v55 }
 0x815   : > { %8599 = vmatmul.bf16.gmra.mxu3 %v8339_v6  ;;  %v7007_v10 = vld [vmem:[#allocation4 + $0xc0] sm:$0xff] }
 0x816   : > { %v7039_v25 = vmax.f32 %v7007_v10, 0.0  ;;  %6976 = vst.msk [vmem:[#allocation4 + $0xc8] sm:$0xff] %vm444_vm12, %v6944_v13  ;;  %v15994_v60 = vpop.permute.xlu2 %11209 }
 0x817   : > { %v7355_v26 = vld [vmem:[#allocation3 + $0x122] sm:$0xff]  ;;  %v7356_v63 = vld [vmem:[#allocation3 + $0x12a] sm:$0xff]  ;;  %v15979_v47 = vpop.permute.xlu0 %11169  ;;  %v11180_v52 = vpop.permute.xlu1 %11179 }
 0x818   : > { %v15976_v31 = vld [vmem:[#allocation3 + $0x129] sm:$0xff]  ;;  %7071 = vst.msk [vmem:[#allocation3 + $0x139] sm:$0xff] %vm444_vm12, %v7039_v25  ;;  %v8359_v17 = vpack.c.bf16 %v7356_v63, %v7355_v26  ;;  %v11363_v57 = vpack.i.bf16 %v7356_v63, %v7355_v26  ;;  %v11182_v13 = vunpack.i.h.bf16 %v11180_v52  ;;  %v11181_v10 = vunpack.i.l.bf16 %v11180_v52 }
 0x819   : > { %v11343_v48 = vpack.i.bf16 %v15976_v31, %v15972_v19  ;;  %v6904_v58 = vpop.f32.mrf.mxu2  ;;  %v15997_v36 = vld [vmem:[#allocation3 + $0x128] sm:$0xff] }
 0x81a   : > { %v6905_v23 = vadd.f32 %v15844_v3, %v6904_v58  ;;  %9312 = vmatmul.msk.bf16.gmra.mxu1 %vm444_vm12, %v8359_v17  ;;  %v11348_v30 = vpack.i.bf16 %v15997_v36, %v16002_v38  ;;  %v11570_v17 = vld [vmem:[#allocation4 + $0xd8] sm:$0xff] }
 0x81b   : > { %11344 = vrot.lane.b32.xlu2 %v11343_v48, %s11597_s28  ;;  %11354 = vrot.lane.b32.xlu0 %v11343_v48, %s11598_s16 }
 0x81c   : > { %v6945_v18 = vadd.f32 %v11569_v16, %v6905_v23  ;;  %v16034_v16 = vpop.f32.mrf.mxu1 }
 0x81d   : > { %v7008_v42 = vld [vmem:[#allocation4 + $0xc8] sm:$0xff] }
 0x81e   : > { %v7040_v12 = vmax.f32 %v7008_v42, 0.0  ;;  %6977 = vst.msk [vmem:[#allocation4 + $0xd0] sm:$0xff] %vm444_vm12, %v6945_v18  ;;  %v16020_v20 = vpop.permute.xlu2 %11229 }
 0x81f   : > { %v11175_v61 = vpop.permute.xlu0 %11174  ;;  %v16032_v41 = vld [vmem:[#allocation3 + $0x138] sm:$0xff] }
 0x820   : > { %7072 = vst.msk [vmem:[#allocation3 + $0x141] sm:$0xff] %vm444_vm12, %v7040_v12  ;;  %v11177_v51 = vunpack.i.h.bf16 %v11175_v61  ;;  %v11176_v28 = vunpack.i.l.bf16 %v11175_v61 }
 0x821   : > { %v6906_v6 = vpop.f32.mrf.mxu2 }
 0x822   : > { %v6907_v25 = vadd.f32 %v15844_v3, %v6906_v6  ;;  %v8272_v40 = vsel %vm3744_vm14, %v8240_v21, %v11177_v51  ;;  %v8271_v1 = vsel %vm3744_vm14, %v8239_v4, %v11176_v28  ;;  %v16048_v51 = vld [vmem:[#allocation3 + $0x139] sm:$0xff]  ;;  %v7217_v28 = vld [vmem:[#allocation3 + $0x91] sm:$0xff] }
 0x823   : > { %11349 = vrot.lane.b32.xlu2 %v11348_v30, %s11596_s27  ;;  %11364 = vrot.lane.b32.xlu0 %v11363_v57, %s11597_s28  ;;  %v8303_v43 = vsel %vm3777_vm15, %v8271_v1, %v11181_v10  ;;  %v8304_v26 = vsel %vm3777_vm15, %v8272_v40, %v11182_v13  ;;  %v7218_v6 = vld [vmem:[#allocation3 + $0x99] sm:$0xff] }
 0x824   : > { %v6946_v48 = vadd.f32 %v11570_v17, %v6907_v25  ;;  %v8340_v58 = vpack.c.bf16 %v8304_v26, %v8303_v43 }
 0x825   : > { %8604 = vmatmul.bf16.gmra.mxu3 %v8342_v39  ;;  %v7009_v63 = vld [vmem:[#allocation4 + $0xd0] sm:$0xff]  ;;  %v11212_v39 = vunpack.i.h.bf16 %v15994_v60 }
 0x826   : > { %v7041_v23 = vmax.f32 %v7009_v63, 0.0  ;;  %6978 = vst.msk [vmem:[#allocation4 + $0xd8] sm:$0xff] %vm444_vm12, %v6946_v48  ;;  %8688 = vmatmul.bf16.gmra.mxu0 %v8340_v58  ;;  %v11211_v48 = vunpack.i.l.bf16 %v15994_v60  ;;  %v16065_v58 = vpop.f32.mrf.mxu1 }
 0x827   : > { %v16023_v56 = vpop.permute.xlu1 %11199  ;;  %v16025_v11 = vld [vmem:[#allocation3 + $0x13a] sm:$0xff]  ;;  %v16027_v59 = vld [vmem:[#allocation3 + $0x142] sm:$0xff]  ;;  %v11190_v33 = vpop.permute.xlu0 %11189 }
 0x828   : > { %v16029_v27 = vld [vmem:[#allocation3 + $0x140] sm:$0xff]  ;;  %7073 = vst.msk [vmem:[#allocation3 + $0x151] sm:$0xff] %vm444_vm12, %v7041_v23  ;;  %v8362_v53 = vpack.c.bf16 %v16027_v59, %v16025_v11  ;;  %v11192_v55 = vunpack.i.h.bf16 %v11190_v33  ;;  %v11191_v7 = vunpack.i.l.bf16 %v11190_v33  ;;  %v11572_v23 = vld [vmem:[#allocation4 + $0xe8] sm:$0xff] }
 0x829   : > { %v6909_v18 = vpop.f32.mrf.mxu2  ;;  %v11378_v42 = vpack.i.bf16 %v16029_v27, %v16032_v41  ;;  %v16045_v21 = vld [vmem:[#allocation3 + $0x141] sm:$0xff] }
 0x82a   : > { %v6910_v12 = vadd.f32 %v15844_v3, %v6909_v18  ;;  %9313 = vmatmul.msk.bf16.gmra.mxu1 %vm444_vm12, %v8362_v53  ;;  %v11383_v25 = vpack.i.bf16 %v16045_v21, %v16048_v51  ;;  %v8242_v40 = vsel %vm444_vm12, %v7218_v6, %v11192_v55  ;;  %v8241_v1 = vsel %vm444_vm12, %v7217_v28, %v11191_v7 }
 0x82b   : > { %11359 = vrot.lane.b32.xlu2 %v11348_v30, %s11598_s16  ;;  %11379 = vrot.lane.b32.xlu1 %v11378_v42, %s11596_s27  ;;  %v16051_v30 = vpop.permute.xlu2 %11234  ;;  %v11167_v53 = vunpack.i.h.bf16 %v15948_v44  ;;  %v11171_v7 = vunpack.i.l.bf16 %v15979_v47 }
 0x82c   : > { %v6947_v24 = vadd.f32 %v11571_v14, %v6910_v12  ;;  %11369 = vrot.lane.b32.xlu0 %v11363_v57, %s11596_s27  ;;  %v11166_v12 = vunpack.i.l.bf16 %v15948_v44 }
 0x82d   : > { %v7010_v52 = vld [vmem:[#allocation4 + $0xd8] sm:$0xff] }
 0x82e   : > { %v7042_v61 = vmax.f32 %v7010_v52, 0.0  ;;  %6979 = vst.msk [vmem:[#allocation4 + $0xe0] sm:$0xff] %vm444_vm12, %v6947_v24 }
 0x82f   : > { %v11205_v4 = vpop.permute.xlu1 %11204  ;;  %v16053_v57 = vpop.permute.xlu0 %11194  ;;  %v16074_v55 = vld [vmem:[#allocation3 + $0x151] sm:$0xff] }
 0x830   : > { %7074 = vst.msk [vmem:[#allocation3 + $0x159] sm:$0xff] %vm444_vm12, %v7042_v61  ;;  %v11207_v13 = vunpack.i.h.bf16 %v11205_v4  ;;  %v11206_v10 = vunpack.i.l.bf16 %v11205_v4 }
 0x831   : > { %v6911_v17 = vpop.f32.mrf.mxu2 }
 0x832   : > { %v8273_v43 = vsel %vm3744_vm14, %v8241_v1, %v11206_v10  ;;  %v8274_v26 = vsel %vm3744_vm14, %v8242_v40, %v11207_v13  ;;  %v6912_v63 = vadd.f32 %v15844_v3, %v6911_v17  ;;  %v11393_v13 = vpack.i.bf16 %v16027_v59, %v16025_v11  ;;  %v16097_v17 = vld [vmem:[#allocation3 + $0x150] sm:$0xff] }
 0x833   : > { %11384 = vrot.lane.b32.xlu2 %v11383_v25, %s11598_s16  ;;  %11389 = vrot.lane.b32.xlu1 %v11378_v42, %s11598_s16  ;;  %v8305_v18 = vsel %vm3777_vm15, %v8273_v43, %v11211_v48  ;;  %v8306_v60 = vsel %vm3777_vm15, %v8274_v26, %v11212_v39  ;;  %v11172_v42 = vunpack.i.h.bf16 %v15979_v47  ;;  %v8147_v39 = vsel %vm444_vm12, %v15718_v15, %v11166_v12  ;;  %v16099_v48 = vpop.permute.xlu2 %11249  ;;  %v16112_v12 = vpop.f32.mrf.mxu1 }
 0x834   : > { %v6948_v33 = vadd.f32 %v11572_v23, %v6912_v63  ;;  %11374 = vrot.lane.b32.xlu0 %v11383_v25, %s11597_s28  ;;  %v8343_v24 = vpack.c.bf16 %v8306_v60, %v8305_v18  ;;  %v8148_v25 = vsel %vm444_vm12, %v15711_v49, %v11167_v53  ;;  %v8179_v63 = vsel %vm3744_vm14, %v8147_v39, %v11171_v7 }
 0x835   : > { %v7011_v14 = vld [vmem:[#allocation4 + $0xe0] sm:$0xff]  ;;  %v8180_v49 = vsel %vm3744_vm14, %v8148_v25, %v11172_v42  ;;  %v11236_v25 = vunpack.i.l.bf16 %v16051_v30 }
 0x836   : > { %v7043_v52 = vmax.f32 %v7011_v14, 0.0  ;;  %6980 = vst.msk [vmem:[#allocation4 + $0xe8] sm:$0xff] %vm444_vm12, %v6948_v33  ;;  %8693 = vmatmul.bf16.gmra.mxu0 %v8343_v24  ;;  %v11573_v33 = vld [vmem:[#allocation4 + $0xf0] sm:$0xff] }
 0x837   : > { %v16078_v61 = vld [vmem:[#allocation3 + $0x152] sm:$0xff]  ;;  %v16080_v4 = vld [vmem:[#allocation3 + $0x15a] sm:$0xff]  ;;  %v11220_v44 = vpop.permute.xlu1 %11219  ;;  %v11215_v40 = vpop.permute.xlu0 %11214 }
 0x838   : > { %v16082_v28 = vld [vmem:[#allocation3 + $0x159] sm:$0xff]  ;;  %7075 = vst.msk [vmem:[#allocation3 + $0x169] sm:$0xff] %vm444_vm12, %v7043_v52  ;;  %v8365_v6 = vpack.c.bf16 %v16080_v4, %v16078_v61  ;;  %v11217_v43 = vunpack.i.h.bf16 %v11215_v40  ;;  %v11216_v26 = vunpack.i.l.bf16 %v11215_v40  ;;  %v11222_v15 = vunpack.i.h.bf16 %v11220_v44 }
 0x839   : > { %v11398_v10 = vpack.i.bf16 %v16082_v28, %v16074_v55  ;;  %v16091_v47 = vld [vmem:[#allocation3 + $0x158] sm:$0xff]  ;;  %v6914_v1 = vpop.f32.mrf.mxu2  ;;  %v11221_v23 = vunpack.i.l.bf16 %v11220_v44  ;;  %v11197_v40 = vunpack.i.h.bf16 %v16053_v57 }
 0x83a   : > { %v6915_v11 = vadd.f32 %v15844_v3, %v6914_v1  ;;  %v11403_v59 = vpack.i.bf16 %v16091_v47, %v16097_v17  ;;  %9314 = vmatmul.msk.bf16.gmra.mxu1 %vm444_vm12, %v8365_v6  ;;  %v8211_v60 = vsel %vm3777_vm15, %v8179_v63, %v11216_v26  ;;  %v8212_v53 = vsel %vm3777_vm15, %v8180_v49, %v11217_v43 }
 0x83b   : > { %11394 = vrot.lane.b32.xlu2 %v11393_v13, %s11597_s28  ;;  %11399 = vrot.lane.b32.xlu1 %v11398_v10, %s11597_s28  ;;  %v8345_v24 = vpack.c.bf16 %v8212_v53, %v8211_v60  ;;  %v8244_v42 = vsel %vm444_vm12, %v15744_v5, %v11222_v15  ;;  %v8243_v7 = vsel %vm444_vm12, %v15748_v32, %v11221_v23  ;;  %v11237_v6 = vunpack.i.h.bf16 %v16051_v30  ;;  %v16130_v63 = vpop.permute.xlu2 %11254 }
 0x83c   : > { %v6949_v18 = vadd.f32 %v11573_v33, %v6915_v11  ;;  %11404 = vrot.lane.b32.xlu0 %v11403_v59, %s11596_s27  ;;  %v11196_v11 = vunpack.i.l.bf16 %v16053_v57  ;;  %v8275_v32 = vsel %vm3744_vm14, %v8243_v7, %v11236_v25  ;;  %v11574_v57 = vld [vmem:[#allocation4 + $0xf8] sm:$0xff]  ;;  %v11202_v7 = vunpack.i.h.bf16 %v16023_v56 }
 0x83d   : > { %v7012_v14 = vld [vmem:[#allocation4 + $0xe8] sm:$0xff]  ;;  %8609 = vmatmul.bf16.gmra.mxu3 %v8345_v24  ;;  %v8276_v49 = vsel %vm3744_vm14, %v8244_v42, %v11237_v6  ;;  %v11201_v6 = vunpack.i.l.bf16 %v16023_v56 }
 0x83e   : > { %v7044_v52 = vmax.f32 %v7012_v14, 0.0  ;;  %6981 = vst.msk [vmem:[#allocation4 + $0xf0] sm:$0xff] %vm444_vm12, %v6949_v18  ;;  %v16143_v14 = vpop.f32.mrf.mxu1 }
 0x83f   : > { %v16120_v44 = vpop.permute.xlu1 %11224  ;;  %v16141_v53 = vld [vmem:[#allocation3 + $0x169] sm:$0xff] }
 0x840   : > { %7076 = vst.msk [vmem:[#allocation3 + $0x171] sm:$0xff] %vm444_vm12, %v7044_v52  ;;  %v11240_v39 = vpop.permute.xlu0 %11239 }
 0x841   : > { %v11242_v1 = vunpack.i.h.bf16 %v11240_v39  ;;  %v11241_v43 = vunpack.i.l.bf16 %v11240_v39  ;;  %v6916_v26 = vpop.f32.mrf.mxu2  ;;  %v8580_v15 = vpop.f32.mrf.mxu3 }
 0x842   : > { %v6917_v5 = vadd.f32 %v15844_v3, %v6916_v26  ;;  %v16139_v3 = vld [vmem:[%s16473_s10] ss:$0 sm:$0xff] }
 0x843   : > { %11414 = vrot.lane.b32.xlu2 %v11393_v13, %s11596_s27  ;;  %11409 = vrot.lane.b32.xlu1 %v11398_v10, %s11598_s16  ;;  %v8307_v30 = vsel %vm3777_vm15, %v8275_v32, %v11241_v43  ;;  %v8308_v23 = vsel %vm3777_vm15, %v8276_v49, %v11242_v1  ;;  %v8150_v10 = vsel %vm444_vm12, %v15750_v45, %v11197_v40 }
 0x844   : > { %11419 = vrot.lane.b32.xlu0 %v11403_v59, %s11598_s16  ;;  %v6950_v33 = vadd.f32 %v11574_v57, %v6917_v5  ;;  %v8346_v18 = vpack.c.bf16 %v8308_v23, %v8307_v30  ;;  %v8149_v59 = vsel %vm444_vm12, %v15757_v29, %v11196_v11  ;;  %v8581_v29 = vadd.f32 %v16139_v3, %v8580_v15  ;;  %v11270_v57 = vpop.permute.xlu2 %11269 }
 0x845   : > { %v7013_v13 = vld [vmem:[#allocation4 + $0xf0] sm:$0xff]  ;;  %v11423_v11 = vpack.i.bf16 %v16080_v4, %v16078_v61  ;;  %v8181_v56 = vsel %vm3744_vm14, %v8149_v59, %v11201_v6  ;;  %v8182_v5 = vsel %vm3744_vm14, %v8150_v10, %v11202_v7  ;;  %v11251_v4 = vunpack.i.l.bf16 %v16099_v48  ;;  %v16182_v7 = vld [vmem:[#allocation3 + $0x168] sm:$0xff] }
 0x846   : > { %v7045_v60 = vmax.f32 %v7013_v13, 0.0  ;;  %6982 = vst.msk [vmem:[#allocation4 + $0xf8] sm:$0xff] %vm444_vm12, %v6950_v33  ;;  %8698 = vmatmul.bf16.gmra.mxu0 %v8346_v18  ;;  %v11252_v13 = vunpack.i.h.bf16 %v16099_v48  ;;  %v11227_v6 = vunpack.i.h.bf16 %v16120_v44  ;;  %v16188_v48 = vpop.f32.mrf.mxu1 }
 0x847   : > { %v7361_v24 = vld [vmem:[#allocation3 + $0x16a] sm:$0xff]  ;;  %v7362_v52 = vld [vmem:[#allocation3 + $0x172] sm:$0xff]  ;;  %v11245_v25 = vpop.permute.xlu1 %11244 }
 0x848   : > { %v16150_v42 = vld [vmem:[#allocation3 + $0x171] sm:$0xff]  ;;  %7077 = vst.msk [vmem:[#allocation3 + $0x181] sm:$0xff] %vm444_vm12, %v7045_v60  ;;  %v8368_v39 = vpack.c.bf16 %v7362_v52, %v7361_v24  ;;  %v11247_v40 = vunpack.i.h.bf16 %v11245_v25  ;;  %v11246_v1 = vunpack.i.l.bf16 %v11245_v25  ;;  %v11260_v43 = vpop.permute.xlu0 %11259  ;;  %v11226_v25 = vunpack.i.l.bf16 %v16120_v44 }
 0x849   : > { %v11428_v45 = vpack.i.bf16 %v16150_v42, %v16141_v53  ;;  %v16177_v23 = vld [vmem:[#allocation3 + $0x170] sm:$0xff]  ;;  %v11261_v18 = vunpack.i.l.bf16 %v11260_v43  ;;  %v8582_v60 = vpop.f32.mrf.mxu3  ;;  %v11262_v59 = vunpack.i.h.bf16 %v11260_v43  ;;  %v8246_v43 = vsel %vm444_vm12, %v15789_v2, %v11252_v13 }
 0x84a   : > { %v8669_v26 = vpop.f32.mrf.mxu0  ;;  %9315 = vmatmul.msk.bf16.gmra.mxu1 %vm444_vm12, %v8368_v39  ;;  %v8213_v49 = vsel %vm3777_vm15, %v8181_v56, %v11246_v1  ;;  %v8214_v15 = vsel %vm3777_vm15, %v8182_v5, %v11247_v40  ;;  %v11433_v39 = vpack.i.bf16 %v16177_v23, %v16182_v7  ;;  %v11453_v5 = vpack.i.bf16 %v7362_v52, %v7361_v24 }
 0x84b   : > { %11429 = vrot.lane.b32.xlu2 %v11428_v45, %s11597_s28  ;;  %v8670_v32 = vadd.f32 %v8669_v26, %v8581_v29  ;;  %11424 = vrot.lane.b32.xlu1 %v11423_v11, %s11597_s28  ;;  %v8348_v61 = vpack.c.bf16 %v8214_v15, %v8213_v49  ;;  %v8583_v29 = vadd.f32 %v16139_v3, %v8582_v60  ;;  %v11231_v24 = vunpack.i.l.bf16 %v16020_v20 }
 0x84c   : > { %11439 = vrot.lane.b32.xlu0 %v11428_v45, %s11598_s16  ;;  %v8245_v45 = vsel %vm444_vm12, %v15799_v62, %v11251_v4  ;;  %v8152_v15 = vsel %vm444_vm12, %v15785_v46, %v11227_v6  ;;  %v11232_v4 = vunpack.i.h.bf16 %v16020_v20  ;;  %v11272_v13 = vunpack.i.h.bf16 %v11270_v57 }
 0x84d   : > { %v8759_v30 = vadd.f32 %v16034_v16, %v8670_v32  ;;  %v7014_v33 = vld [vmem:[#allocation4 + $0xf8] sm:$0xff]  ;;  %8614 = vmatmul.bf16.gmra.mxu3 %v8348_v61  ;;  %v8277_v44 = vsel %vm3744_vm14, %v8245_v45, %v11261_v18  ;;  %v8278_v32 = vsel %vm3744_vm14, %v8246_v43, %v11262_v59  ;;  %v8151_v61 = vsel %vm444_vm12, %v15793_v9, %v11226_v25 }
 0x84e   : > { %v7046_v10 = vmax.f32 %v7014_v33, 0.0  ;;  %v8183_v46 = vsel %vm3744_vm14, %v8151_v61, %v11231_v24  ;;  %v8184_v9 = vsel %vm3744_vm14, %v8152_v15, %v11232_v4  ;;  %v11295_v33 = vpop.permute.xlu2 %11294  ;;  %v16223_v45 = vpop.f32.mrf.mxu1 }
 0x84f   : > { %8838 = vst.msk [vmem:[%s16171_s13] sm:$0xff] %vm1910_vm2, %v8759_v30  ;;  %v11265_v16 = vpop.permute.xlu1 %11264  ;;  %v11296_v15 = vunpack.i.l.bf16 %v11295_v33 }
 0x850   : > { %7078 = vst.msk [vmem:[#allocation3 + $0x189] sm:$0xff] %vm444_vm12, %v7046_v10  ;;  %v11267_v40 = vunpack.i.h.bf16 %v11265_v16  ;;  %v11266_v1 = vunpack.i.l.bf16 %v11265_v16  ;;  %v11275_v26 = vpop.permute.xlu0 %11274  ;;  %v8216_v16 = vsel %vm3777_vm15, %v8184_v9, %v11272_v13  ;;  %v11257_v9 = vunpack.i.h.bf16 %v16130_v63 }
 0x852   : > { %v8671_v56 = vpop.f32.mrf.mxu0  ;;  %v8309_v49 = vsel %vm3777_vm15, %v8277_v44, %v11266_v1  ;;  %v8310_v2 = vsel %vm3777_vm15, %v8278_v32, %v11267_v40 }
 0x853   : > { %11434 = vrot.lane.b32.xlu2 %v11433_v39, %s11596_s27  ;;  %v8672_v62 = vadd.f32 %v8671_v56, %v8583_v29  ;;  %11444 = vrot.lane.b32.xlu1 %v11423_v11, %s11596_s27  ;;  %v8349_v30 = vpack.c.bf16 %v8310_v2, %v8309_v49  ;;  %v11271_v11 = vunpack.i.l.bf16 %v11270_v57  ;;  %v11277_v57 = vunpack.i.h.bf16 %v11275_v26  ;;  %v7302_v56 = vld [vmem:[#allocation3 + $0x1a0] sm:$0xff] }
 0x854   : > { %11454 = vrot.lane.b32.xlu0 %v11453_v5, %s11597_s28  ;;  %v11276_v29 = vunpack.i.l.bf16 %v11275_v26  ;;  %v11297_v49 = vunpack.i.h.bf16 %v11295_v33  ;;  %v16234_v2 = vld [vmem:[#allocation3 + $0x181] sm:$0xff] }
 0x855   : > { %v8761_v52 = vadd.f32 %v16065_v58, %v8672_v62  ;;  %v7299_v58 = vld [vmem:[#allocation3 + $0x180] sm:$0xff]  ;;  %v8215_v25 = vsel %vm3777_vm15, %v8183_v46, %v11271_v11  ;;  %v8248_v26 = vsel %vm444_vm12, %v15834_v8, %v11277_v57 }
 0x856   : > { %8703 = vmatmul.bf16.gmra.mxu0 %v8349_v30  ;;  %v8351_v1 = vpack.c.bf16 %v8216_v16, %v8215_v25  ;;  %v8247_v61 = vsel %vm444_vm12, %v15847_v34, %v11276_v29  ;;  %v11256_v34 = vunpack.i.l.bf16 %v16130_v63  ;;  %v11305_v13 = vpop.permute.xlu2 %11304  ;;  %v7333_v57 = vld [vmem:[#allocation3 + $0x199] sm:$0xff]  ;;  %v7334_v29 = vld [vmem:[#allocation3 + $0x1a1] sm:$0xff] }
 0x857   : > { %8839 = vst.msk [vmem:[%s16171_s13 + $0x8] sm:$0xff] %vm1910_vm2, %v8761_v52  ;;  %v16214_v18 = vld [vmem:[#allocation3 + $0x182] sm:$0xff]  ;;  %v16216_v60 = vld [vmem:[#allocation3 + $0x18a] sm:$0xff] }
 0x858   : > { %v7300_v10 = vld [vmem:[#allocation3 + $0x188] sm:$0xff]  ;;  %v8585_v59 = vpop.f32.mrf.mxu3  ;;  %v8371_v20 = vpack.c.bf16 %v16216_v60, %v16214_v18  ;;  %v11280_v40 = vpop.permute.xlu0 %11279  ;;  %v11575_v63 = vld [vmem:[#allocation3 + $0xe0] sm:$0xff] }
 0x859   : > { %v11458_v6 = vpack.i.bf16 %v7300_v10, %v7299_v58  ;;  %v16228_v44 = vld [vmem:[#allocation3 + $0x189] sm:$0xff]  ;;  %v8586_v30 = vadd.f32 %v16139_v3, %v8585_v59  ;;  %v11282_v33 = vunpack.i.h.bf16 %v11280_v40  ;;  %v11281_v10 = vunpack.i.l.bf16 %v11280_v40 }
 0x85a   : > { %9316 = vmatmul.msk.bf16.gmra.mxu1 %vm444_vm12, %v8371_v20  ;;  %v11463_v24 = vpack.i.bf16 %v16228_v44, %v16234_v2 }
 0x85b   : > { %11449 = vrot.lane.b32.xlu2 %v11433_v39, %s11598_s16  ;;  %11459 = vrot.lane.b32.xlu1 %v11458_v6, %s11596_s27  ;;  %v7301_v39 = vld [vmem:[#allocation3 + $0x198] sm:$0xff] }
 0x85c   : > { %11469 = vrot.lane.b32.xlu0 %v11453_v5, %s11596_s27  ;;  %v11483_v52 = vpack.i.bf16 %v7302_v56, %v7301_v39 }
 0x85d   : > { %8619 = vmatmul.bf16.gmra.mxu3 %v8351_v1  ;;  %v8154_v1 = vsel %vm444_vm12, %v11575_v63, %v11257_v9  ;;  %v11306_v9 = vunpack.i.l.bf16 %v11305_v13 }
 0x85e   : > { %v11290_v43 = vpop.permute.xlu1 %11289 }
 0x85f   : > { %v11292_v32 = vunpack.i.h.bf16 %v11290_v43  ;;  %v11291_v62 = vunpack.i.l.bf16 %v11290_v43  ;;  %v11576_v43 = vld [vmem:[#allocation3 + $0xd8] sm:$0xff] }
 0x860   : > { %v8587_v20 = vpop.f32.mrf.mxu3  ;;  %v8153_v39 = vsel %vm444_vm12, %v11576_v43, %v11256_v34  ;;  %v11285_v40 = vpop.permute.xlu0 %11284 }
 0x861   : > { %v8279_v5 = vsel %vm3744_vm14, %v8247_v61, %v11291_v62  ;;  %v8280_v4 = vsel %vm3744_vm14, %v8248_v26, %v11292_v32  ;;  %v8186_v62 = vsel %vm3744_vm14, %v8154_v1, %v11282_v33  ;;  %v8588_v61 = vadd.f32 %v16139_v3, %v8587_v20 }
 0x862   : > { %v8311_v46 = vsel %vm3777_vm15, %v8279_v5, %v11296_v15  ;;  %v8312_v8 = vsel %vm3777_vm15, %v8280_v4, %v11297_v49  ;;  %v8674_v11 = vpop.f32.mrf.mxu0  ;;  %v11488_v49 = vpack.i.bf16 %v7334_v29, %v7333_v57  ;;  %v11287_v34 = vunpack.i.h.bf16 %v11285_v40 }
 0x863   : > { %11464 = vrot.lane.b32.xlu2 %v11463_v24, %s11598_s16  ;;  %v8675_v58 = vadd.f32 %v8674_v11, %v8586_v30  ;;  %v8352_v25 = vpack.c.bf16 %v8312_v8, %v8311_v46  ;;  %11474 = vrot.lane.b32.xlu1 %v11458_v6, %s11598_s16  ;;  %v8185_v6 = vsel %vm3744_vm14, %v8153_v39, %v11281_v10  ;;  %v11286_v11 = vunpack.i.l.bf16 %v11285_v40 }
 0x864   : > { %11484 = vrot.lane.b32.xlu0 %v11483_v52, %s11596_s27  ;;  %v11310_v52 = vpop.permute.xlu2 %11309 }
 0x865   : > { %v8764_v59 = vadd.f32 %v16112_v12, %v8675_v58  ;;  %v11478_v12 = vpack.i.bf16 %v16216_v60, %v16214_v18  ;;  %v11307_v60 = vunpack.i.h.bf16 %v11305_v13  ;;  %v11312_v57 = vunpack.i.h.bf16 %v11310_v52 }
 0x866   : > { %v11300_v16 = vpop.permute.xlu1 %11299  ;;  %8708 = vmatmul.bf16.gmra.mxu0 %v8352_v25  ;;  %v8156_v13 = vsel %vm444_vm12, %v15880_v35, %v11287_v34  ;;  %v8155_v29 = vsel %vm444_vm12, %v15878_v50, %v11286_v11  ;;  %v11311_v1 = vunpack.i.l.bf16 %v11310_v52 }
 0x867   : > { %v11302_v56 = vunpack.i.h.bf16 %v11300_v16  ;;  %v11301_v32 = vunpack.i.l.bf16 %v11300_v16  ;;  %8840 = vst.msk [vmem:[%s16171_s13 + $0x10] sm:$0xff] %vm1910_vm2, %v8764_v59  ;;  %v8250_v25 = vsel %vm444_vm12, %v15887_v0, %v11307_v60 }
 0x868   : > { %v8590_v30 = vpop.f32.mrf.mxu3 }
 0x869   : > { %v8217_v15 = vsel %vm3777_vm15, %v8185_v6, %v11301_v32  ;;  %v8218_v26 = vsel %vm3777_vm15, %v8186_v62, %v11302_v56  ;;  %v8591_v33 = vadd.f32 %v16139_v3, %v8590_v30 }
 0x86a   : > { %v8676_v5 = vpop.f32.mrf.mxu0  ;;  %v8354_v24 = vpack.c.bf16 %v8218_v26, %v8217_v15 }
 0x86b   : > { %11479 = vrot.lane.b32.xlu2 %v11478_v12, %s11597_s28  ;;  %v8677_v4 = vadd.f32 %v8676_v5, %v8588_v61  ;;  %11489 = vrot.lane.b32.xlu1 %v11488_v49, %s11598_s16  ;;  %v8187_v12 = vsel %vm3744_vm14, %v8155_v29, %v11311_v1 }
 0x86d   : > { %v8766_v46 = vadd.f32 %v16143_v14, %v8677_v4  ;;  %8624 = vmatmul.bf16.gmra.mxu3 %v8354_v24  ;;  %v8249_v14 = vsel %vm444_vm12, %v15885_v54, %v11306_v9 }
 0x86e   : > { %v11315_v8 = vpop.permute.xlu1 %11314 }
 0x86f   : > { %v11320_v18 = vpop.permute.xlu0 %11319  ;;  %8841 = vst.msk [vmem:[%s16171_s13 + $0x18] sm:$0xff] %vm1910_vm2, %v8766_v46  ;;  %v8773_v46 = vpop.f32.mrf.mxu1  ;;  %v11317_v60 = vunpack.i.h.bf16 %v11315_v8  ;;  %v11316_v9 = vunpack.i.l.bf16 %v11315_v8 }
 0x870   : > { %v11322_v10 = vunpack.i.h.bf16 %v11320_v18  ;;  %v11321_v20 = vunpack.i.l.bf16 %v11320_v18  ;;  %v8592_v62 = vpop.f32.mrf.mxu3 }
 0x871   : > { %v8593_v61 = vadd.f32 %v16139_v3, %v8592_v62 }
 0x872   : > { %v8282_v56 = vsel %vm3744_vm14, %v8250_v25, %v11322_v10  ;;  %v8281_v32 = vsel %vm3744_vm14, %v8249_v14, %v11321_v20  ;;  %v8158_v10 = vsel %vm444_vm12, %v15922_v22, %v11317_v60  ;;  %v8157_v25 = vsel %vm444_vm12, %v15920_v37, %v11316_v9  ;;  %v7228_v37 = vld [vmem:[#allocation3 + $0x111] sm:$0xff] }
 0x873   : > { %v8679_v58 = vpop.f32.mrf.mxu0 }
 0x874   : > { %v8680_v59 = vadd.f32 %v8679_v58, %v8591_v33 }
 0x875   : > { %v16268_v16 = vpop.permute.xlu2 %11344 }
 0x876   : > { %v11325_v63 = vpop.permute.xlu1 %11324  ;;  %v8769_v43 = vadd.f32 %v16188_v48, %v8680_v59  ;;  %v8188_v48 = vsel %vm3744_vm14, %v8156_v13, %v11312_v57 }
 0x877   : > { %v11327_v39 = vunpack.i.h.bf16 %v11325_v63  ;;  %v11326_v0 = vunpack.i.l.bf16 %v11325_v63  ;;  %v11330_v40 = vpop.permute.xlu0 %11329 }
 0x878   : > { %v11332_v54 = vunpack.i.h.bf16 %v11330_v40  ;;  %v11331_v6 = vunpack.i.l.bf16 %v11330_v40  ;;  %8842 = vst.msk [vmem:[%s16171_s13 + $0x20] sm:$0xff] %vm1910_vm2, %v8769_v43 }
 0x879   : > { %v8313_v35 = vsel %vm3777_vm15, %v8281_v32, %v11326_v0  ;;  %v8314_v50 = vsel %vm3777_vm15, %v8282_v56, %v11327_v39  ;;  %v7227_v0 = vld [vmem:[#allocation3 + $0x109] sm:$0xff] }
 0x87a   : > { %v8355_v49 = vpack.c.bf16 %v8314_v50, %v8313_v35  ;;  %v8219_v15 = vsel %vm3777_vm15, %v8187_v12, %v11331_v6  ;;  %v8220_v26 = vsel %vm3777_vm15, %v8188_v48, %v11332_v54 }
 0x87b   : > { %v8681_v5 = vpop.f32.mrf.mxu0  ;;  %v8357_v4 = vpack.c.bf16 %v8220_v26, %v8219_v15 }
 0x87c   : > { %8713 = vmatmul.bf16.gmra.mxu0 %v8355_v49  ;;  %v8682_v24 = vadd.f32 %v8681_v5, %v8593_v61 }
 0x87d   : > { %v11350_v52 = vpop.permute.xlu2 %11349  ;;  %8629 = vmatmul.bf16.gmra.mxu3 %v8357_v4 }
 0x87e   : > { %v11335_v30 = vpop.permute.xlu1 %11334  ;;  %v8771_v18 = vadd.f32 %v16223_v45, %v8682_v24  ;;  %v8775_v45 = vpop.f32.mrf.mxu1  ;;  %v11352_v54 = vunpack.i.h.bf16 %v11350_v52  ;;  %v11351_v6 = vunpack.i.l.bf16 %v11350_v52 }
 0x87f   : > { %v8595_v34 = vpop.f32.mrf.mxu3  ;;  %v11337_v59 = vunpack.i.h.bf16 %v11335_v30  ;;  %v11336_v13 = vunpack.i.l.bf16 %v11335_v30 }
 0x880   : > { %8843 = vst.msk [vmem:[%s16171_s13 + $0x28] sm:$0xff] %vm1910_vm2, %v8771_v18  ;;  %v8596_v29 = vadd.f32 %v16139_v3, %v8595_v34 }
 0x881   : > { %v8252_v56 = vsel %vm444_vm12, %v7228_v37, %v11337_v59  ;;  %v8251_v32 = vsel %vm444_vm12, %v7227_v0, %v11336_v13 }
 0x882   : > { %v8283_v49 = vsel %vm3744_vm14, %v8251_v32, %v11351_v6  ;;  %v8284_v15 = vsel %vm3744_vm14, %v8252_v56, %v11352_v54 }
 0x885   : > { %v11360_v11 = vpop.permute.xlu2 %11359 }
 0x886   : > { %v11340_v33 = vpop.permute.xlu1 %11339  ;;  %v11362_v14 = vunpack.i.h.bf16 %v11360_v11  ;;  %v11361_v57 = vunpack.i.l.bf16 %v11360_v11  ;;  %v8778_v52 = vpop.f32.mrf.mxu1 }
 0x887   : > { %v11342_v20 = vunpack.i.h.bf16 %v11340_v33  ;;  %v11341_v58 = vunpack.i.l.bf16 %v11340_v33  ;;  %v8597_v35 = vpop.f32.mrf.mxu3 }
 0x888   : > { %v8598_v26 = vadd.f32 %v16139_v3, %v8597_v35 }
 0x889   : > { %v8189_v8 = vsel %vm3744_vm14, %v8157_v25, %v11341_v58  ;;  %v8190_v63 = vsel %vm3744_vm14, %v8158_v10, %v11342_v20 }
 0x88a   : > { %v8684_v1 = vpop.f32.mrf.mxu0  ;;  %v8221_v22 = vsel %vm3777_vm15, %v8189_v8, %v11361_v57  ;;  %v8222_v43 = vsel %vm3777_vm15, %v8190_v63, %v11362_v14 }
 0x88b   : > { %v8685_v39 = vadd.f32 %v8684_v1, %v8596_v29  ;;  %v8360_v40 = vpack.c.bf16 %v8222_v43, %v8221_v22  ;;  %v11347_v22 = vunpack.i.h.bf16 %v16268_v16  ;;  %v11346_v43 = vunpack.i.l.bf16 %v16268_v16 }
 0x88d   : > { %v8774_v62 = vadd.f32 %v8773_v46, %v8685_v39  ;;  %v11355_v50 = vpop.permute.xlu0 %11354  ;;  %8634 = vmatmul.bf16.gmra.mxu3 %v8360_v40  ;;  %v11385_v46 = vpop.permute.xlu2 %11384  ;;  %v8159_v54 = vsel %vm444_vm12, %v16002_v38, %v11346_v43 }
 0x88e   : > { %v11357_v12 = vunpack.i.h.bf16 %v11355_v50  ;;  %v11356_v48 = vunpack.i.l.bf16 %v11355_v50  ;;  %v8780_v33 = vpop.f32.mrf.mxu1  ;;  %v11387_v14 = vunpack.i.h.bf16 %v11385_v46  ;;  %v11386_v57 = vunpack.i.l.bf16 %v11385_v46 }
 0x88f   : > { %8844 = vst.msk [vmem:[%s16171_s13 + $0x30] sm:$0xff] %vm1910_vm2, %v8774_v62  ;;  %v8160_v62 = vsel %vm444_vm12, %v15997_v36, %v11347_v22 }
 0x890   : > { %v8315_v61 = vsel %vm3777_vm15, %v8283_v49, %v11356_v48  ;;  %v8316_v5 = vsel %vm3777_vm15, %v8284_v15, %v11357_v12 }
 0x891   : > { %v8358_v24 = vpack.c.bf16 %v8316_v5, %v8315_v61 }
 0x892   : > { %v8686_v4 = vpop.f32.mrf.mxu0 }
 0x893   : > { %v8687_v30 = vadd.f32 %v8686_v4, %v8598_v26  ;;  %8718 = vmatmul.bf16.gmra.mxu0 %v8358_v24 }
 0x895   : > { %v8776_v18 = vadd.f32 %v8775_v45, %v8687_v30  ;;  %v11365_v60 = vpop.permute.xlu0 %11364  ;;  %v11395_v10 = vpop.permute.xlu2 %11394 }
 0x896   : > { %v11367_v34 = vunpack.i.h.bf16 %v11365_v60  ;;  %v11366_v11 = vunpack.i.l.bf16 %v11365_v60  ;;  %v8783_v50 = vpop.f32.mrf.mxu1 }
 0x897   : > { %8845 = vst.msk [vmem:[%s16171_s13 + $0x38] sm:$0xff] %vm1910_vm2, %v8776_v18 }
 0x898   : > { %v8600_v9 = vpop.f32.mrf.mxu3  ;;  %v8254_v13 = vsel %vm444_vm12, %v15976_v31, %v11367_v34  ;;  %v8253_v45 = vsel %vm444_vm12, %v15972_v19, %v11366_v11  ;;  %v11396_v11 = vunpack.i.l.bf16 %v11395_v10 }
 0x899   : > { %v8601_v0 = vadd.f32 %v16139_v3, %v8600_v9 }
 0x89d   : > { %v11380_v20 = vpop.permute.xlu1 %11379  ;;  %v11415_v12 = vpop.permute.xlu2 %11414 }
 0x89e   : > { %v11382_v58 = vunpack.i.h.bf16 %v11380_v20  ;;  %v11381_v25 = vunpack.i.l.bf16 %v11380_v20  ;;  %v11370_v59 = vpop.permute.xlu0 %11369  ;;  %v8785_v60 = vpop.f32.mrf.mxu1 }
 0x89f   : > { %v11372_v37 = vunpack.i.h.bf16 %v11370_v59  ;;  %v11371_v31 = vunpack.i.l.bf16 %v11370_v59 }
 0x8a0   : > { %v8285_v29 = vsel %vm3744_vm14, %v8253_v45, %v11381_v25  ;;  %v8286_v8 = vsel %vm3744_vm14, %v8254_v13, %v11382_v58  ;;  %v8602_v40 = vpop.f32.mrf.mxu3  ;;  %v8255_v45 = vsel %vm444_vm12, %v16048_v51, %v11396_v11 }
 0x8a1   : > { %v8317_v63 = vsel %vm3777_vm15, %v8285_v29, %v11386_v57  ;;  %v8318_v1 = vsel %vm3777_vm15, %v8286_v8, %v11387_v14  ;;  %v8192_v48 = vsel %vm3744_vm14, %v8160_v62, %v11372_v37  ;;  %v8191_v49 = vsel %vm3744_vm14, %v8159_v54, %v11371_v31 }
 0x8a2   : > { %v8361_v39 = vpack.c.bf16 %v8318_v1, %v8317_v63  ;;  %v8603_v38 = vadd.f32 %v16139_v3, %v8602_v40  ;;  %v11417_v29 = vunpack.i.h.bf16 %v11415_v12  ;;  %v11416_v8 = vunpack.i.l.bf16 %v11415_v12 }
 0x8a3   : > { %v8689_v56 = vpop.f32.mrf.mxu0 }
 0x8a4   : > { %8723 = vmatmul.bf16.gmra.mxu0 %v8361_v39  ;;  %v8690_v19 = vadd.f32 %v8689_v56, %v8601_v0 }
 0x8a5   : > { %v11390_v32 = vpop.permute.xlu1 %11389  ;;  %v16335_v9 = vpop.permute.xlu2 %11429 }
 0x8a6   : > { %v11392_v6 = vunpack.i.h.bf16 %v11390_v32  ;;  %v11391_v35 = vunpack.i.l.bf16 %v11390_v32  ;;  %v11375_v16 = vpop.permute.xlu0 %11374  ;;  %v8779_v15 = vadd.f32 %v8778_v52, %v8690_v19  ;;  %v11397_v52 = vunpack.i.h.bf16 %v11395_v10  ;;  %v8788_v54 = vpop.f32.mrf.mxu1 }
 0x8a7   : > { %v11377_v34 = vunpack.i.h.bf16 %v11375_v16  ;;  %v11376_v20 = vunpack.i.l.bf16 %v11375_v16 }
 0x8a8   : > { %v8223_v26 = vsel %vm3777_vm15, %v8191_v49, %v11391_v35  ;;  %v8224_v61 = vsel %vm3777_vm15, %v8192_v48, %v11392_v6  ;;  %8846 = vst.msk [vmem:[%s16171_s13 + $0x40] sm:$0xff] %vm1910_vm2, %v8779_v15  ;;  %v8605_v4 = vpop.f32.mrf.mxu3  ;;  %v8256_v57 = vsel %vm444_vm12, %v16045_v21, %v11397_v52 }
 0x8a9   : > { %v8363_v36 = vpack.c.bf16 %v8224_v61, %v8223_v26  ;;  %v8606_v58 = vadd.f32 %v16139_v3, %v8605_v4  ;;  %v8161_v10 = vsel %vm444_vm12, %v16032_v41, %v11376_v20  ;;  %v7365_v20 = vld [vmem:[#allocation3 + $0x19a] sm:$0xff] }
 0x8aa   : > { %v8193_v51 = vsel %vm3744_vm14, %v8161_v10, %v11416_v8 }
 0x8ab   : > { %8639 = vmatmul.bf16.gmra.mxu3 %v8363_v36  ;;  %v8691_v5 = vpop.f32.mrf.mxu0 }
 0x8ac   : > { %v8692_v24 = vadd.f32 %v8691_v5, %v8603_v38 }
 0x8ad   : > { %v16333_v30 = vpop.permute.xlu1 %11399  ;;  %v11435_v6 = vpop.permute.xlu2 %11434 }
 0x8ae   : > { %v11405_v46 = vpop.permute.xlu0 %11404  ;;  %v8781_v18 = vadd.f32 %v8780_v33, %v8692_v24  ;;  %v8162_v33 = vsel %vm444_vm12, %v16029_v27, %v11377_v34  ;;  %v11437_v5 = vunpack.i.h.bf16 %v11435_v6  ;;  %v11436_v4 = vunpack.i.l.bf16 %v11435_v6 }
 0x8af   : > { %v11407_v25 = vunpack.i.h.bf16 %v11405_v46  ;;  %v11406_v59 = vunpack.i.l.bf16 %v11405_v46  ;;  %v8194_v40 = vsel %vm3744_vm14, %v8162_v33, %v11417_v29  ;;  %v11401_v52 = vunpack.i.l.bf16 %v16333_v30 }
 0x8b0   : > { %8847 = vst.msk [vmem:[%s16171_s13 + $0x48] sm:$0xff] %vm1910_vm2, %v8781_v18  ;;  %v8607_v37 = vpop.f32.mrf.mxu3  ;;  %v11402_v18 = vunpack.i.h.bf16 %v16333_v30 }
 0x8b1   : > { %v8288_v21 = vsel %vm3744_vm14, %v8256_v57, %v11407_v25  ;;  %v8287_v27 = vsel %vm3744_vm14, %v8255_v45, %v11406_v59  ;;  %v8608_v35 = vadd.f32 %v16139_v3, %v8607_v37 }
 0x8b2   : > { %v8164_v10 = vsel %vm444_vm12, %v16091_v47, %v11402_v18 }
 0x8b3   : > { %v8694_v14 = vpop.f32.mrf.mxu0 }
 0x8b4   : > { %v8695_v13 = vadd.f32 %v8694_v14, %v8606_v58  ;;  %v7366_v58 = vld [vmem:[#allocation3 + $0x1a2] sm:$0xff] }
 0x8b5   : > { %v11410_v63 = vpop.permute.xlu1 %11409  ;;  %v11450_v25 = vpop.permute.xlu2 %11449  ;;  %v8374_v57 = vpack.c.bf16 %v7366_v58, %v7365_v20 }
 0x8b6   : > { %v11420_v1 = vpop.permute.xlu0 %11419  ;;  %v8784_v22 = vadd.f32 %v8783_v50, %v8695_v13  ;;  %v11412_v43 = vunpack.i.h.bf16 %v11410_v63  ;;  %v11411_v39 = vunpack.i.l.bf16 %v11410_v63  ;;  %v11452_v63 = vunpack.i.h.bf16 %v11450_v25 }
 0x8b7   : > { %v11422_v0 = vunpack.i.h.bf16 %v11420_v1  ;;  %v11421_v31 = vunpack.i.l.bf16 %v11420_v1  ;;  %9317 = vmatmul.msk.bf16.gmra.mxu1 %vm444_vm12, %v8374_v57 }
 0x8b8   : > { %8848 = vst.msk [vmem:[%s16171_s13 + $0x50] sm:$0xff] %vm1910_vm2, %v8784_v22  ;;  %v8319_v56 = vsel %vm3777_vm15, %v8287_v27, %v11411_v39  ;;  %v8320_v19 = vsel %vm3777_vm15, %v8288_v21, %v11412_v43  ;;  %v8163_v22 = vsel %vm444_vm12, %v16097_v17, %v11401_v52  ;;  %v11451_v43 = vunpack.i.l.bf16 %v11450_v25 }
 0x8b9   : > { %v8226_v41 = vsel %vm3777_vm15, %v8194_v40, %v11422_v0  ;;  %v8225_v32 = vsel %vm3777_vm15, %v8193_v51, %v11421_v31  ;;  %v8364_v62 = vpack.c.bf16 %v8320_v19, %v8319_v56 }
 0x8ba   : > { %v8366_v16 = vpack.c.bf16 %v8226_v41, %v8225_v32 }
 0x8bb   : > { %8728 = vmatmul.bf16.gmra.mxu0 %v8364_v62  ;;  %v8696_v50 = vpop.f32.mrf.mxu0 }
 0x8bc   : > { %8644 = vmatmul.bf16.gmra.mxu3 %v8366_v16  ;;  %v8697_v12 = vadd.f32 %v8696_v50, %v8608_v35  ;;  %v11432_v50 = vunpack.i.h.bf16 %v16335_v9 }
 0x8bd   : > { %v11425_v48 = vpop.permute.xlu1 %11424  ;;  %v11465_v35 = vpop.permute.xlu2 %11464 }
 0x8be   : > { %v11440_v49 = vpop.permute.xlu0 %11439  ;;  %v8786_v15 = vadd.f32 %v8785_v60, %v8697_v12  ;;  %v11427_v26 = vunpack.i.h.bf16 %v11425_v48  ;;  %v11426_v61 = vunpack.i.l.bf16 %v11425_v48  ;;  %v11431_v12 = vunpack.i.l.bf16 %v16335_v9 }
 0x8bf   : > { %v11442_v59 = vunpack.i.h.bf16 %v11440_v49 }
 0x8c0   : > { %8849 = vst.msk [vmem:[%s16171_s13 + $0x58] sm:$0xff] %vm1910_vm2, %v8786_v15  ;;  %v8258_v36 = vsel %vm444_vm12, %v16082_v28, %v11427_v26  ;;  %v8257_v38 = vsel %vm444_vm12, %v16074_v55, %v11426_v61  ;;  %v8610_v24 = vpop.f32.mrf.mxu3  ;;  %v8790_v28 = vpop.f32.mrf.mxu1  ;;  %v11441_v55 = vunpack.i.l.bf16 %v11440_v49  ;;  %v8165_v18 = vsel %vm444_vm12, %v16182_v7, %v11431_v12 }
 0x8c1   : > { %v8611_v46 = vadd.f32 %v16139_v3, %v8610_v24  ;;  %v8289_v34 = vsel %vm3744_vm14, %v8257_v38, %v11436_v4  ;;  %v8290_v11 = vsel %vm3744_vm14, %v8258_v36, %v11437_v5  ;;  %v11466_v36 = vunpack.i.l.bf16 %v11465_v35 }
 0x8c2   : > { %v8321_v30 = vsel %vm3777_vm15, %v8289_v34, %v11441_v55  ;;  %v8322_v8 = vsel %vm3777_vm15, %v8290_v11, %v11442_v59 }
 0x8c3   : > { %v8699_v60 = vpop.f32.mrf.mxu0  ;;  %v8367_v27 = vpack.c.bf16 %v8322_v8, %v8321_v30 }
 0x8c4   : > { %v8700_v14 = vadd.f32 %v8699_v60, %v8611_v46  ;;  %v11467_v46 = vunpack.i.h.bf16 %v11465_v35 }
 0x8c5   : > { %v11445_v33 = vpop.permute.xlu1 %11444 }
 0x8c6   : > { %v8789_v13 = vadd.f32 %v8788_v54, %v8700_v14  ;;  %v11447_v45 = vunpack.i.h.bf16 %v11445_v33  ;;  %v11455_v29 = vpop.permute.xlu0 %11454  ;;  %v11446_v1 = vunpack.i.l.bf16 %v11445_v33 }
 0x8c7   : > { %v11456_v41 = vunpack.i.l.bf16 %v11455_v29  ;;  %v11457_v32 = vunpack.i.h.bf16 %v11455_v29 }
 0x8c8   : > { %8850 = vst.msk [vmem:[%s16171_s13 + $0x60] sm:$0xff] %vm1910_vm2, %v8789_v13  ;;  %v8196_v39 = vsel %vm3744_vm14, %v8164_v10, %v11447_v45  ;;  %v8195_v0 = vsel %vm3744_vm14, %v8163_v22, %v11446_v1  ;;  %v8612_v21 = vpop.f32.mrf.mxu3  ;;  %v8793_v19 = vpop.f32.mrf.mxu1 }
 0x8c9   : > { %v8228_v37 = vsel %vm3777_vm15, %v8196_v39, %v11452_v63  ;;  %v8613_v31 = vadd.f32 %v16139_v3, %v8612_v21  ;;  %v8227_v47 = vsel %vm3777_vm15, %v8195_v0, %v11451_v43  ;;  %v8259_v48 = vsel %vm444_vm12, %v16141_v53, %v11456_v41  ;;  %v11480_v45 = vpop.permute.xlu2 %11479 }
 0x8ca   : > { %v8369_v40 = vpack.c.bf16 %v8228_v37, %v8227_v47  ;;  %v8260_v15 = vsel %vm444_vm12, %v16150_v42, %v11457_v32  ;;  %v8166_v53 = vsel %vm444_vm12, %v16177_v23, %v11432_v50  ;;  %v11482_v63 = vunpack.i.h.bf16 %v11480_v45 }
 0x8cb   : > { %8733 = vmatmul.bf16.gmra.mxu0 %v8367_v27  ;;  %v8701_v51 = vpop.f32.mrf.mxu0  ;;  %v11481_v1 = vunpack.i.l.bf16 %v11480_v45 }
 0x8cc   : > { %v8702_v17 = vadd.f32 %v8701_v51, %v8613_v31  ;;  %8649 = vmatmul.bf16.gmra.mxu3 %v8369_v40  ;;  %v8262_v31 = vsel %vm444_vm12, %v16228_v44, %v11482_v63 }
 0x8cd   : > { %v11460_v56 = vpop.permute.xlu1 %11459  ;;  %v8261_v47 = vsel %vm444_vm12, %v16234_v2, %v11481_v1 }
 0x8ce   : > { %v8791_v62 = vadd.f32 %v8790_v28, %v8702_v17  ;;  %v11461_v54 = vunpack.i.l.bf16 %v11460_v56  ;;  %v11462_v6 = vunpack.i.h.bf16 %v11460_v56  ;;  %v11470_v16 = vpop.permute.xlu0 %11469 }
 0x8cf   : > { %v11472_v5 = vunpack.i.h.bf16 %v11470_v16  ;;  %v11471_v4 = vunpack.i.l.bf16 %v11470_v16 }
 0x8d0   : > { %8851 = vst.msk [vmem:[%s16171_s13 + $0x68] sm:$0xff] %vm1910_vm2, %v8791_v62  ;;  %v8615_v49 = vpop.f32.mrf.mxu3  ;;  %v8291_v26 = vsel %vm3744_vm14, %v8259_v48, %v11461_v54  ;;  %v8292_v38 = vsel %vm3744_vm14, %v8260_v15, %v11462_v6  ;;  %v8795_v25 = vpop.f32.mrf.mxu1 }
 0x8d1   : > { %v8616_v61 = vadd.f32 %v16139_v3, %v8615_v49  ;;  %v8323_v52 = vsel %vm3777_vm15, %v8291_v26, %v11466_v36  ;;  %v8324_v20 = vsel %vm3777_vm15, %v8292_v38, %v11467_v46  ;;  %v8198_v58 = vsel %vm3744_vm14, %v8166_v53, %v11472_v5 }
 0x8d2   : > { %v8197_v28 = vsel %vm3744_vm14, %v8165_v18, %v11471_v4  ;;  %v8370_v55 = vpack.c.bf16 %v8324_v20, %v8323_v52 }
 0x8d3   : > { %v8704_v24 = vpop.f32.mrf.mxu0 }
 0x8d4   : > { %v8705_v9 = vadd.f32 %v8704_v24, %v8616_v61 }
 0x8d5   : > { %v11475_v42 = vpop.permute.xlu1 %11474 }
 0x8d6   : > { %v8794_v60 = vadd.f32 %v8793_v19, %v8705_v9  ;;  %v11477_v34 = vunpack.i.h.bf16 %v11475_v42  ;;  %v11476_v11 = vunpack.i.l.bf16 %v11475_v42  ;;  %v11485_v29 = vpop.permute.xlu0 %11484 }
 0x8d7   : > { %v11487_v22 = vunpack.i.h.bf16 %v11485_v29  ;;  %v11486_v43 = vunpack.i.l.bf16 %v11485_v29 }
 0x8d8   : > { %8852 = vst.msk [vmem:[%s16171_s13 + $0x70] sm:$0xff] %vm1910_vm2, %v8794_v60  ;;  %v8229_v23 = vsel %vm3777_vm15, %v8197_v28, %v11476_v11  ;;  %v8230_v59 = vsel %vm3777_vm15, %v8198_v58, %v11477_v34  ;;  %v8617_v7 = vpop.f32.mrf.mxu3  ;;  %v8798_v10 = vpop.f32.mrf.mxu1 }
 0x8d9   : > { %v8372_v14 = vpack.c.bf16 %v8230_v59, %v8229_v23  ;;  %v8618_v57 = vadd.f32 %v16139_v3, %v8617_v7  ;;  %v8294_v51 = vsel %vm3744_vm14, %v8262_v31, %v11487_v22  ;;  %v8293_v17 = vsel %vm3744_vm14, %v8261_v47, %v11486_v43 }
 0x8db   : > { %8738 = vmatmul.bf16.gmra.mxu0 %v8370_v55  ;;  %v8706_v33 = vpop.f32.mrf.mxu0 }
 0x8dc   : > { %v8707_v13 = vadd.f32 %v8706_v33, %v8618_v57  ;;  %8654 = vmatmul.bf16.gmra.mxu3 %v8372_v14  ;;  %v11577_v33 = vld [vmem:[%s16473_s10] ss:$0 sm:$0xff] }
 0x8dd   : > { %v11490_v8 = vpop.permute.xlu1 %11489 }
 0x8de   : > { %v8796_v30 = vadd.f32 %v8795_v25, %v8707_v13  ;;  %v11492_v0 = vunpack.i.h.bf16 %v11490_v8  ;;  %v11491_v21 = vunpack.i.l.bf16 %v11490_v8 }
 0x8e0   : > { %8853 = vst.msk [vmem:[%s16171_s13 + $0x78] sm:$0xff] %vm1910_vm2, %v8796_v30  ;;  %v8620_v39 = vpop.f32.mrf.mxu3  ;;  %v8325_v56 = vsel %vm3777_vm15, %v8293_v17, %v11491_v21  ;;  %v8326_v19 = vsel %vm3777_vm15, %v8294_v51, %v11492_v0  ;;  %v8800_v44 = vpop.f32.mrf.mxu1 }
 0x8e1   : > { %v8621_v27 = vadd.f32 %v16139_v3, %v8620_v39  ;;  %v8373_v62 = vpack.c.bf16 %v8326_v19, %v8325_v56 }
 0x8e3   : > { %v8709_v37 = vpop.f32.mrf.mxu0 }
 0x8e4   : > { %v8710_v40 = vadd.f32 %v8709_v37, %v8621_v27 }
 0x8e6   : > { %v8799_v41 = vadd.f32 %v8798_v10, %v8710_v40 }
 0x8e8   : > { %8854 = vst.msk [vmem:[%s16171_s13 + $0x80] sm:$0xff] %vm1910_vm2, %v8799_v41  ;;  %v8622_v32 = vpop.f32.mrf.mxu3  ;;  %v8803_v50 = vpop.f32.mrf.mxu1 }
 0x8e9   : > { %v8623_v54 = vadd.f32 %v16139_v3, %v8622_v32 }
 0x8eb   : > { %8743 = vmatmul.bf16.gmra.mxu0 %v8373_v62  ;;  %v8711_v2 = vpop.f32.mrf.mxu0 }
 0x8ec   : > { %v8712_v6 = vadd.f32 %v8711_v2, %v8623_v54 }
 0x8ee   : > { %v8801_v35 = vadd.f32 %v8800_v44, %v8712_v6 }
 0x8f0   : > { %8855 = vst.msk [vmem:[%s16171_s13 + $0x88] sm:$0xff] %vm1910_vm2, %v8801_v35  ;;  %v8625_v16 = vpop.f32.mrf.mxu3  ;;  %v8805_v61 = vpop.f32.mrf.mxu1 }
 0x8f1   : > { %v8626_v12 = vadd.f32 %v16139_v3, %v8625_v16 }
 0x8f8   : > { %v8627_v26 = vpop.f32.mrf.mxu3  ;;  %v8808_v24 = vpop.f32.mrf.mxu1 }
 0x8f9   : > { %v8714_v48 = vpop.f32.mrf.mxu0  ;;  %v8628_v36 = vadd.f32 %v16139_v3, %v8627_v26 }
 0x8fa   : > { %v8715_v49 = vadd.f32 %v8714_v48, %v8626_v12 }
 0x8fc   : > { %v8804_v15 = vadd.f32 %v8803_v50, %v8715_v49 }
 0x8fe   : > { %8856 = vst.msk [vmem:[%s16171_s13 + $0x90] sm:$0xff] %vm1910_vm2, %v8804_v15 }
 0x900   : > { %v8630_v46 = vpop.f32.mrf.mxu3  ;;  %v8810_v18 = vpop.f32.mrf.mxu1 }
 0x901   : > { %v8716_v38 = vpop.f32.mrf.mxu0  ;;  %v8631_v9 = vadd.f32 %v16139_v3, %v8630_v46 }
 0x902   : > { %v8717_v5 = vadd.f32 %v8716_v38, %v8628_v36 }
 0x904   : > { %v8806_v4 = vadd.f32 %v8805_v61, %v8717_v5 }
 0x906   : > { %8857 = vst.msk [vmem:[%s16171_s13 + $0x98] sm:$0xff] %vm1910_vm2, %v8806_v4 }
 0x908   : > { %v8632_v42 = vpop.f32.mrf.mxu3  ;;  %v8813_v58 = vpop.f32.mrf.mxu1 }
 0x909   : > { %v8633_v34 = vadd.f32 %v16139_v3, %v8632_v42 }
 0x910   : > { %v8719_v53 = vpop.f32.mrf.mxu0  ;;  %v8635_v28 = vpop.f32.mrf.mxu3 }
 0x911   : > { %v8720_v52 = vadd.f32 %v8719_v53, %v8631_v9  ;;  %v8636_v23 = vadd.f32 %v16139_v3, %v8635_v28  ;;  %v8815_v14 = vpop.f32.mrf.mxu1 }
 0x913   : > { %v8809_v60 = vadd.f32 %v8808_v24, %v8720_v52 }
 0x915   : > { %8858 = vst.msk [vmem:[%s16171_s13 + $0xa0] sm:$0xff] %vm1910_vm2, %v8809_v60 }
 0x918   : > { %v8721_v11 = vpop.f32.mrf.mxu0  ;;  %v8637_v57 = vpop.f32.mrf.mxu3 }
 0x919   : > { %v8722_v20 = vadd.f32 %v8721_v11, %v8633_v34  ;;  %v8638_v13 = vadd.f32 %v11577_v33, %v8637_v57  ;;  %v8818_v8 = vpop.f32.mrf.mxu1 }
 0x91b   : > { %v8811_v25 = vadd.f32 %v8810_v18, %v8722_v20 }
 0x91d   : > { %8859 = vst.msk [vmem:[%s16171_s13 + $0xa8] sm:$0xff] %vm1910_vm2, %v8811_v25 }
 0x921   : > { %v8724_v59 = vpop.f32.mrf.mxu0  ;;  %v8820_v1 = vpop.f32.mrf.mxu1 }
 0x922   : > { %v8725_v7 = vadd.f32 %v8724_v59, %v8636_v23 }
 0x924   : > { %v8814_v55 = vadd.f32 %v8813_v58, %v8725_v7 }
 0x926   : > { %8860 = vst.msk [vmem:[%s16171_s13 + $0xb0] sm:$0xff] %vm1910_vm2, %v8814_v55 }
 0x929   : > { %v8726_v45 = vpop.f32.mrf.mxu0  ;;  %v8823_v31 = vpop.f32.mrf.mxu1 }
 0x92a   : > { %v8727_v29 = vadd.f32 %v8726_v45, %v8638_v13 }
 0x92c   : > { %v8816_v30 = vadd.f32 %v8815_v14, %v8727_v29 }
 0x92e   : > { %8861 = vst.msk [vmem:[%s16171_s13 + $0xb8] sm:$0xff] %vm1910_vm2, %v8816_v30  ;;  %v8640_v3 = vpop.f32.mrf.mxu3 }
 0x92f   : > { %v8641_v63 = vadd.f32 %v11577_v33, %v8640_v3 }
 0x931   : > { %v8825_v19 = vpop.f32.mrf.mxu1 }
 0x936   : > { %v8642_v10 = vpop.f32.mrf.mxu3 }
 0x937   : > { %v8643_v0 = vadd.f32 %v11577_v33, %v8642_v10 }
 0x938   : > { %v8729_v22 = vpop.f32.mrf.mxu0 }
 0x939   : > { %v8730_v43 = vadd.f32 %v8729_v22, %v8641_v63  ;;  %v8828_v6 = vpop.f32.mrf.mxu1 }
 0x93b   : > { %v8819_v39 = vadd.f32 %v8818_v8, %v8730_v43 }
 0x93d   : > { %8862 = vst.msk [vmem:[%s16171_s13 + $0xc0] sm:$0xff] %vm1910_vm2, %v8819_v39 }
 0x93f   : > { %v8645_v21 = vpop.f32.mrf.mxu3 }
 0x940   : > { %v8731_v27 = vpop.f32.mrf.mxu0  ;;  %v8646_v40 = vadd.f32 %v11577_v33, %v8645_v21 }
 0x941   : > { %v8732_v37 = vadd.f32 %v8731_v27, %v8643_v0  ;;  %v8830_v15 = vpop.f32.mrf.mxu1 }
 0x943   : > { %v8821_v47 = vadd.f32 %v8820_v1, %v8732_v37 }
 0x945   : > { %8863 = vst.msk [vmem:[%s16171_s13 + $0xc8] sm:$0xff] %vm1910_vm2, %v8821_v47 }
 0x947   : > { %v8647_v51 = vpop.f32.mrf.mxu3 }
 0x948   : > { %v8734_v17 = vpop.f32.mrf.mxu0  ;;  %v8648_v32 = vadd.f32 %v11577_v33, %v8647_v51 }
 0x949   : > { %v8735_v41 = vadd.f32 %v8734_v17, %v8646_v40  ;;  %v8833_v4 = vpop.f32.mrf.mxu1 }
 0x94b   : > { %v8824_v56 = vadd.f32 %v8823_v31, %v8735_v41 }
 0x94d   : > { %8864 = vst.msk [vmem:[%s16171_s13 + $0xd0] sm:$0xff] %vm1910_vm2, %v8824_v56 }
 0x94f   : > { %v8650_v62 = vpop.f32.mrf.mxu3 }
 0x950   : > { %v8736_v44 = vpop.f32.mrf.mxu0  ;;  %v8651_v35 = vadd.f32 %v11577_v33, %v8650_v62 }
 0x951   : > { %v8737_v54 = vadd.f32 %v8736_v44, %v8648_v32  ;;  %v8835_v60 = vpop.f32.mrf.mxu1 }
 0x953   : > { %v8826_v2 = vadd.f32 %v8825_v19, %v8737_v54 }
 0x955   : > { %8865 = vst.msk [vmem:[%s16171_s13 + $0xd8] sm:$0xff] %vm1910_vm2, %v8826_v2 }
 0x957   : > { %v8652_v16 = vpop.f32.mrf.mxu3 }
 0x958   : > { %v8739_v50 = vpop.f32.mrf.mxu0  ;;  %v8653_v49 = vadd.f32 %v11577_v33, %v8652_v16 }
 0x959   : > { %v8740_v12 = vadd.f32 %v8739_v50, %v8651_v35 }
 0x95b   : > { %v8829_v48 = vadd.f32 %v8828_v6, %v8740_v12 }
 0x95d   : > { %8866 = vst.msk [vmem:[%s16171_s13 + $0xe0] sm:$0xff] %vm1910_vm2, %v8829_v48 }
 0x95f   : > { %v8655_v36 = vpop.f32.mrf.mxu3 }
 0x960   : > { %v8741_v26 = vpop.f32.mrf.mxu0  ;;  %v8656_v5 = vadd.f32 %v11577_v33, %v8655_v36 }
 0x961   : > { %v8742_v61 = vadd.f32 %v8741_v26, %v8653_v49 }
 0x963   : > { %v8831_v38 = vadd.f32 %v8830_v15, %v8742_v61 }
 0x965   : > { %8867 = vst.msk [vmem:[%s16171_s13 + $0xe8] sm:$0xff] %vm1910_vm2, %v8831_v38 }
 0x967   : > { %v8657_v53 = vpop.f32.mrf.mxu3 }
 0x968   : > { %v8744_v24 = vpop.f32.mrf.mxu0  ;;  %v8658_v18 = vadd.f32 %v11577_v33, %v8657_v53 }
 0x969   : > { %v8745_v46 = vadd.f32 %v8744_v24, %v8656_v5 }
 0x96b   : > { %v8834_v9 = vadd.f32 %v8833_v4, %v8745_v46 }
 0x96d   : > { %8868 = vst.msk [vmem:[%s16171_s13 + $0xf0] sm:$0xff] %vm1910_vm2, %v8834_v9 }
 0x970   : > { %v8746_v42 = vpop.f32.mrf.mxu0 }
 0x971   : > { %v8747_v52 = vadd.f32 %v8746_v42, %v8658_v18 }
 0x973   : > { %v8836_v34 = vadd.f32 %v8835_v60, %v8747_v52 }
 0x975   : > { %8869 = vst.msk [vmem:[%s16171_s13 + $0xf8] sm:$0xff] %vm1910_vm2, %v8836_v34 }
 0x976 PF: > { %s21_s17 = sadd.s32 1, %s11584_s17  }
 0x977   : > { %p18_p4 = scmp.ge.s32.totalorder %s21_s17, 4  }
 0x979   :  { %20 = sbr.rel (!%p18_p4) target bundleno = 1 (0x1), region = 98 }

</bundles_post_ra>
